<compile_context>
chip_gen: v5e
topology: v5e:2x2
jax: 0.10.0
libtpu: 0.0.40
codegen_flags: <defaults>
</compile_context>

<pallas_src>
import jax
import jax.numpy as jnp
from jax import lax
from jax.experimental import pallas as pl
from jax.experimental.pallas import tpu as pltpu

VMEM = pl.BlockSpec(memory_space=pltpu.MemorySpace.VMEM)
SMEM = pl.BlockSpec(memory_space=pltpu.MemorySpace.SMEM)

HIDDEN_PAD = 1024   # fc1 hidden 1000 -> 1024 (lane multiple)
OUT_PAD = 128       # fc2 logits 10   -> 128  (lane-dense output store)


def _sigmoid(x):
    return 1.0 / (1.0 + jnp.exp(-x))


def _bmm(a, b):
    """Batched matmul (n,i,j) x (n,j,k) -> (n,i,k) via canonical dot_general."""
    return lax.dot_general(a, b, (((2,), (1,)), ((0,), (0,))),
                           preferred_element_type=jnp.float32)


def _sel(rows, cols, d):
    """0/1 selector S[k,i] = 1 iff k == 2*i + d - 1.

    Right-multiplying by S picks input row/col (2*i + d - 1) for output i; out-of-range
    indices give an all-zero column, which implements the padded border of the stride-2
    window (valid: zero padding for conv2, and post-ReLU zero == -inf padding for maxpool).
    """
    k = lax.broadcasted_iota(jnp.int32, (rows, cols), 0)
    i = lax.broadcasted_iota(jnp.int32, (rows, cols), 1)
    return (k == 2 * i + d - 1).astype(jnp.float32)


def _sel_t(rows, cols, d):
    """Transposed selector: S_T[i,k] = 1 iff k == 2*i + d - 1 (for left-selection)."""
    i = lax.broadcasted_iota(jnp.int32, (rows, cols), 0)
    k = lax.broadcasted_iota(jnp.int32, (rows, cols), 1)
    return (k == 2 * i + d - 1).astype(jnp.float32)


def net_kernel(x_ref, cw1_ref, cb1_ref, cw2_ref, cb2_ref,
               w1_ref, b1_ref, w2_ref, b2_ref, out_ref):
    n = x_ref.shape[0]

    # ---- conv1: Conv2d(1, 2, 3, stride=1) + ReLU -> two (n, 26, 26) maps ----
    c1 = []
    for co in range(2):
        acc = jnp.zeros((n, 26, 26), jnp.float32)
        for ki in range(3):
            for kj in range(3):
                acc = acc + x_ref[:, ki:ki + 26, kj:kj + 26] * cw1_ref[co, 3 * ki + kj]
        c1.append(jnp.maximum(acc + cb1_ref[co], 0.0))

    # ---- MaxPool2d(2, 2, padding=1) -> two (n, 14, 14) maps ----
    # view[dr,dc][i,j] = c1[2i+dr-1, 2j+dc-1] (zero at the padded border), taken with
    # exact 0/1 selection matmuls; zero padding == -inf padding because c1 is post-ReLU.
    mcol = [jnp.broadcast_to(_sel(26, 14, d), (n, 26, 14)) for d in range(2)]
    mrow = [jnp.broadcast_to(_sel_t(14, 26, d), (n, 14, 26)) for d in range(2)]
    pooled = []
    for c in range(2):
        cols = [_bmm(c1[c], mcol[d]) for d in range(2)]                # (n, 26, 14)
        v = [_bmm(mrow[dr], cols[dc]) for dr in range(2) for dc in range(2)]
        pooled.append(jnp.maximum(jnp.maximum(v[0], v[1]),
                                  jnp.maximum(v[2], v[3])))            # (n, 14, 14)

    # ---- conv2: Conv2d(2, 5, 2, stride=2, padding=1) + sigmoid -> five (n, 8, 8) maps ----
    tcol = [jnp.broadcast_to(_sel(14, 8, d), (n, 14, 8)) for d in range(2)]
    trow = [jnp.broadcast_to(_sel_t(8, 14, d), (n, 8, 14)) for d in range(2)]
    taps = []                              # order c*4 + kh*2 + kw == conv2_w flatten order
    for c in range(2):
        cols = [_bmm(pooled[c], tcol[b]) for b in range(2)]            # (n, 14, 8)
        for a in range(2):
            for b in range(2):
                taps.append(_bmm(trow[a], cols[b]))                    # (n, 8, 8)
    c2 = []
    for o in range(5):
        acc = jnp.zeros((n, 8, 8), jnp.float32)
        for t in range(8):
            acc = acc + taps[t] * cw2_ref[o, t]
        c2.append(_sigmoid(acc + cb2_ref[o]))

    # ---- fc1 (320 -> 1024 padded) + sigmoid ----
    # torch.flatten order is (channel, row, col); w1_ref is pre-packed host-side as
    # (5, 8, 8, 1024) bf16, so the contraction is 40 small lane-dense MXU matmuls with
    # f32 accumulation.  Padded hidden lanes see sigmoid(0)=0.5 but multiply zero rows
    # of the padded fc2 weight, so they do not affect the logits.
    h = jnp.zeros((n, HIDDEN_PAD), jnp.float32)
    for o in range(5):
        for u in range(8):
            lhs = c2[o][:, u, :].astype(jnp.bfloat16)                  # (n, 8)
            h = h + jnp.dot(lhs, w1_ref[o, u, :, :],
                            preferred_element_type=jnp.float32)
    h = _sigmoid(h + b1_ref[...])

    # ---- fc2 (1024 -> 128 padded; real logits in lanes 0..9) ----
    out_ref[...] = (jnp.dot(h.astype(jnp.bfloat16), w2_ref[...],
                            preferred_element_type=jnp.float32) + b2_ref[...])


def net_forward(x, pp):
    """x: (N, 1, 28, 28) f32, pp: prepare_params(...) -> (N, 10) f32 logits."""
    n = x.shape[0]
    x3 = x.reshape(n, 28, 28)
    bn = min(n, 256)                       # batch tile: one "parallel" grid step per tile
    grid = (pl.cdiv(n, bn),)
    out = pl.pallas_call(
        net_kernel,
        out_shape=jax.ShapeDtypeStruct((n, OUT_PAD), jnp.float32),
        grid=grid,
        in_specs=[
            pl.BlockSpec((bn, 28, 28), lambda i: (i, 0, 0)),   # input images (blocked on N)
            SMEM, SMEM, SMEM, SMEM,                            # conv weights / biases (scalars)
            VMEM, VMEM, VMEM, VMEM,                            # fc weights / biases (resident)
        ],
        out_specs=pl.BlockSpec((bn, OUT_PAD), lambda i: (i, 0)),
        compiler_params=pltpu.CompilerParams(
            dimension_semantics=("parallel",),
            vmem_limit_bytes=32 * 1024 * 1024),
    )(x3, pp["conv1_w"], pp["conv1_b"], pp["conv2_w"], pp["conv2_b"],
      pp["fc1_w"], pp["fc1_b"], pp["fc2_w"], pp["fc2_b"])
    return out[:, :10]


def init_params(key):
    """Deterministic PyTorch-default-style init (uniform +/- 1/sqrt(fan_in)), f32.

    fc weights are stored already transposed to (in_features, out_features), i.e.
    torch `weight.T`, so `x @ w + b` matches nn.Linear."""
    ks = jax.random.split(key, 8)

    def u(k, shape, fan_in):
        bound = 1.0 / float(fan_in) ** 0.5
        return jax.random.uniform(k, shape, jnp.float32, -bound, bound)

    return {
        "conv1_w": u(ks[0], (2, 1, 3, 3), 1 * 3 * 3),
        "conv1_b": u(ks[1], (2,), 1 * 3 * 3),
        "conv2_w": u(ks[2], (5, 2, 2, 2), 2 * 2 * 2),
        "conv2_b": u(ks[3], (5,), 2 * 2 * 2),
        "fc1_w": u(ks[4], (320, 1000), 320),
        "fc1_b": u(ks[5], (1000,), 320),
        "fc2_w": u(ks[6], (1000, 10), 1000),
        "fc2_b": u(ks[7], (10,), 1000),
    }


def prepare_params(p):
    """One-time host-side repack: flatten conv kernels for SMEM, pad MLP dims to lane
    multiples (1000->1024, 10->128) and cast the MXU (fc) weights to bf16."""
    w1 = jnp.pad(p["fc1_w"], ((0, 0), (0, HIDDEN_PAD - 1000)))
    w1 = w1.reshape(5, 8, 8, HIDDEN_PAD).astype(jnp.bfloat16)   # (cout, h, w, hidden)
    w2 = jnp.pad(p["fc2_w"], ((0, HIDDEN_PAD - 1000),
                              (0, OUT_PAD - 10))).astype(jnp.bfloat16)
    return {
        "conv1_w": p["conv1_w"].reshape(2, 9),                  # (cout, cin*kh*kw)
        "conv1_b": p["conv1_b"],
        "conv2_w": p["conv2_w"].reshape(5, 8),                  # (cout, cin*kh*kw)
        "conv2_b": p["conv2_b"],
        "fc1_w": w1,
        "fc1_b": jnp.pad(p["fc1_b"], (0, HIDDEN_PAD - 1000)).reshape(1, HIDDEN_PAD),
        "fc2_w": w2,
        "fc2_b": jnp.pad(p["fc2_b"], (0, OUT_PAD - 10)).reshape(1, OUT_PAD),
    }


if __name__ == "__main__":
    key = jax.random.PRNGKey(0)
    k_x, k_p = jax.random.split(key)
    # fc1 expects 320 = 5*8*8 features, which forces a 28x28 single-channel input.
    x = jax.random.normal(k_x, (2, 1, 28, 28), dtype=jnp.float32)
    params = prepare_params(init_params(k_p))

    out = jax.jit(net_forward)(x, params)
    out = jax.block_until_ready(out)
    assert out.shape == (2, 10) and out.dtype == jnp.float32
    print("KERNEL_OK")
</pallas_src>

<mosaic_0001>
module attributes {stable_mosaic.version = 11 : i64} {
  func.func @net_kernel(%arg0: i32, %arg1: memref<2x28x28xf32, #tpu.memory_space<vmem>>, %arg2: memref<2x9xf32, #tpu.memory_space<smem>>, %arg3: memref<2xf32, #tpu.memory_space<smem>>, %arg4: memref<5x8xf32, #tpu.memory_space<smem>>, %arg5: memref<5xf32, #tpu.memory_space<smem>>, %arg6: memref<5x8x8x1024xbf16, #tpu.memory_space<vmem>>, %arg7: memref<1x1024xf32, #tpu.memory_space<vmem>>, %arg8: memref<1024x128xbf16, #tpu.memory_space<vmem>>, %arg9: memref<1x128xf32, #tpu.memory_space<vmem>>, %arg10: memref<2x128xf32, #tpu.memory_space<vmem>>) attributes {dimension_semantics = [#tpu.dimension_semantics<parallel>], iteration_bounds = array<i64: 1>, scalar_prefetch = 0 : i64, scratch_operands = 0 : i64, tpu.core_type = #tpu.core_type<tc>, window_params = [{transform_indices = @transform_0, window_bounds = array<i64: 2, 28, 28>}, {transform_indices = @transform_1, window_bounds = array<i64: 2, 9>}, {transform_indices = @transform_2, window_bounds = array<i64: 2>}, {transform_indices = @transform_3, window_bounds = array<i64: 5, 8>}, {transform_indices = @transform_4, window_bounds = array<i64: 5>}, {pipeline_mode = #tpu.pipeline_mode<synchronous>, transform_indices = @transform_5, window_bounds = array<i64: 5, 8, 8, 1024>}, {pipeline_mode = #tpu.pipeline_mode<synchronous>, transform_indices = @transform_6, window_bounds = array<i64: 1, 1024>}, {pipeline_mode = #tpu.pipeline_mode<synchronous>, transform_indices = @transform_7, window_bounds = array<i64: 1024, 128>}, {pipeline_mode = #tpu.pipeline_mode<synchronous>, transform_indices = @transform_8, window_bounds = array<i64: 1, 128>}, {transform_indices = @transform_9, window_bounds = array<i64: 2, 128>}]} {
    %cst = arith.constant 0.000000e+00 : f32
    %0 = vector.broadcast %cst : f32 to vector<2x26x26xf32>
    %c0 = arith.constant 0 : index
    %c0_0 = arith.constant 0 : index
    %c0_1 = arith.constant 0 : index
    %1 = vector.load %arg1[%c0, %c0_0, %c0_1] : memref<2x28x28xf32, #tpu.memory_space<vmem>>, vector<2x26x26xf32>
    %c0_2 = arith.constant 0 : index
    %c0_3 = arith.constant 0 : index
    %2 = memref.load %arg2[%c0_2, %c0_3] : memref<2x9xf32, #tpu.memory_space<smem>>
    %3 = vector.broadcast %2 : f32 to vector<2x26x26xf32>
    %4 = arith.mulf %1, %3 : vector<2x26x26xf32>
    %5 = arith.addf %0, %4 : vector<2x26x26xf32>
    %c0_4 = arith.constant 0 : index
    %c0_5 = arith.constant 0 : index
    %c1 = arith.constant 1 : index
    %6 = vector.load %arg1[%c0_4, %c0_5, %c1] : memref<2x28x28xf32, #tpu.memory_space<vmem>>, vector<2x26x26xf32>
    %c0_6 = arith.constant 0 : index
    %c1_7 = arith.constant 1 : index
    %7 = memref.load %arg2[%c0_6, %c1_7] : memref<2x9xf32, #tpu.memory_space<smem>>
    %8 = vector.broadcast %7 : f32 to vector<2x26x26xf32>
    %9 = arith.mulf %6, %8 : vector<2x26x26xf32>
    %10 = arith.addf %5, %9 : vector<2x26x26xf32>
    %c0_8 = arith.constant 0 : index
    %c0_9 = arith.constant 0 : index
    %c2 = arith.constant 2 : index
    %11 = vector.load %arg1[%c0_8, %c0_9, %c2] : memref<2x28x28xf32, #tpu.memory_space<vmem>>, vector<2x26x26xf32>
    %c0_10 = arith.constant 0 : index
    %c2_11 = arith.constant 2 : index
    %12 = memref.load %arg2[%c0_10, %c2_11] : memref<2x9xf32, #tpu.memory_space<smem>>
    %13 = vector.broadcast %12 : f32 to vector<2x26x26xf32>
    %14 = arith.mulf %11, %13 : vector<2x26x26xf32>
    %15 = arith.addf %10, %14 : vector<2x26x26xf32>
    %c0_12 = arith.constant 0 : index
    %c1_13 = arith.constant 1 : index
    %c0_14 = arith.constant 0 : index
    %16 = vector.load %arg1[%c0_12, %c1_13, %c0_14] : memref<2x28x28xf32, #tpu.memory_space<vmem>>, vector<2x26x26xf32>
    %c0_15 = arith.constant 0 : index
    %c3 = arith.constant 3 : index
    %17 = memref.load %arg2[%c0_15, %c3] : memref<2x9xf32, #tpu.memory_space<smem>>
    %18 = vector.broadcast %17 : f32 to vector<2x26x26xf32>
    %19 = arith.mulf %16, %18 : vector<2x26x26xf32>
    %20 = arith.addf %15, %19 : vector<2x26x26xf32>
    %c0_16 = arith.constant 0 : index
    %c1_17 = arith.constant 1 : index
    %c1_18 = arith.constant 1 : index
    %21 = vector.load %arg1[%c0_16, %c1_17, %c1_18] : memref<2x28x28xf32, #tpu.memory_space<vmem>>, vector<2x26x26xf32>
    %c0_19 = arith.constant 0 : index
    %c4 = arith.constant 4 : index
    %22 = memref.load %arg2[%c0_19, %c4] : memref<2x9xf32, #tpu.memory_space<smem>>
    %23 = vector.broadcast %22 : f32 to vector<2x26x26xf32>
    %24 = arith.mulf %21, %23 : vector<2x26x26xf32>
    %25 = arith.addf %20, %24 : vector<2x26x26xf32>
    %c0_20 = arith.constant 0 : index
    %c1_21 = arith.constant 1 : index
    %c2_22 = arith.constant 2 : index
    %26 = vector.load %arg1[%c0_20, %c1_21, %c2_22] : memref<2x28x28xf32, #tpu.memory_space<vmem>>, vector<2x26x26xf32>
    %c0_23 = arith.constant 0 : index
    %c5 = arith.constant 5 : index
    %27 = memref.load %arg2[%c0_23, %c5] : memref<2x9xf32, #tpu.memory_space<smem>>
    %28 = vector.broadcast %27 : f32 to vector<2x26x26xf32>
    %29 = arith.mulf %26, %28 : vector<2x26x26xf32>
    %30 = arith.addf %25, %29 : vector<2x26x26xf32>
    %c0_24 = arith.constant 0 : index
    %c2_25 = arith.constant 2 : index
    %c0_26 = arith.constant 0 : index
    %31 = vector.load %arg1[%c0_24, %c2_25, %c0_26] : memref<2x28x28xf32, #tpu.memory_space<vmem>>, vector<2x26x26xf32>
    %c0_27 = arith.constant 0 : index
    %c6 = arith.constant 6 : index
    %32 = memref.load %arg2[%c0_27, %c6] : memref<2x9xf32, #tpu.memory_space<smem>>
    %33 = vector.broadcast %32 : f32 to vector<2x26x26xf32>
    %34 = arith.mulf %31, %33 : vector<2x26x26xf32>
    %35 = arith.addf %30, %34 : vector<2x26x26xf32>
    %c0_28 = arith.constant 0 : index
    %c2_29 = arith.constant 2 : index
    %c1_30 = arith.constant 1 : index
    %36 = vector.load %arg1[%c0_28, %c2_29, %c1_30] : memref<2x28x28xf32, #tpu.memory_space<vmem>>, vector<2x26x26xf32>
    %c0_31 = arith.constant 0 : index
    %c7 = arith.constant 7 : index
    %37 = memref.load %arg2[%c0_31, %c7] : memref<2x9xf32, #tpu.memory_space<smem>>
    %38 = vector.broadcast %37 : f32 to vector<2x26x26xf32>
    %39 = arith.mulf %36, %38 : vector<2x26x26xf32>
    %40 = arith.addf %35, %39 : vector<2x26x26xf32>
    %c0_32 = arith.constant 0 : index
    %c2_33 = arith.constant 2 : index
    %c2_34 = arith.constant 2 : index
    %41 = vector.load %arg1[%c0_32, %c2_33, %c2_34] : memref<2x28x28xf32, #tpu.memory_space<vmem>>, vector<2x26x26xf32>
    %c0_35 = arith.constant 0 : index
    %c8 = arith.constant 8 : index
    %42 = memref.load %arg2[%c0_35, %c8] : memref<2x9xf32, #tpu.memory_space<smem>>
    %43 = vector.broadcast %42 : f32 to vector<2x26x26xf32>
    %44 = arith.mulf %41, %43 : vector<2x26x26xf32>
    %45 = arith.addf %40, %44 : vector<2x26x26xf32>
    %c0_36 = arith.constant 0 : index
    %46 = memref.load %arg3[%c0_36] : memref<2xf32, #tpu.memory_space<smem>>
    %47 = vector.broadcast %46 : f32 to vector<2x26x26xf32>
    %48 = arith.addf %45, %47 : vector<2x26x26xf32>
    %cst_37 = arith.constant 0.000000e+00 : f32
    %49 = vector.broadcast %cst_37 : f32 to vector<2x26x26xf32>
    %50 = arith.maximumf %48, %49 : vector<2x26x26xf32>
    %cst_38 = arith.constant 0.000000e+00 : f32
    %51 = vector.broadcast %cst_38 : f32 to vector<2x26x26xf32>
    %c0_39 = arith.constant 0 : index
    %c0_40 = arith.constant 0 : index
    %c0_41 = arith.constant 0 : index
    %52 = vector.load %arg1[%c0_39, %c0_40, %c0_41] : memref<2x28x28xf32, #tpu.memory_space<vmem>>, vector<2x26x26xf32>
    %c1_42 = arith.constant 1 : index
    %c0_43 = arith.constant 0 : index
    %53 = memref.load %arg2[%c1_42, %c0_43] : memref<2x9xf32, #tpu.memory_space<smem>>
    %54 = vector.broadcast %53 : f32 to vector<2x26x26xf32>
    %55 = arith.mulf %52, %54 : vector<2x26x26xf32>
    %56 = arith.addf %51, %55 : vector<2x26x26xf32>
    %c0_44 = arith.constant 0 : index
    %c0_45 = arith.constant 0 : index
    %c1_46 = arith.constant 1 : index
    %57 = vector.load %arg1[%c0_44, %c0_45, %c1_46] : memref<2x28x28xf32, #tpu.memory_space<vmem>>, vector<2x26x26xf32>
    %c1_47 = arith.constant 1 : index
    %c1_48 = arith.constant 1 : index
    %58 = memref.load %arg2[%c1_47, %c1_48] : memref<2x9xf32, #tpu.memory_space<smem>>
    %59 = vector.broadcast %58 : f32 to vector<2x26x26xf32>
    %60 = arith.mulf %57, %59 : vector<2x26x26xf32>
    %61 = arith.addf %56, %60 : vector<2x26x26xf32>
    %c0_49 = arith.constant 0 : index
    %c0_50 = arith.constant 0 : index
    %c2_51 = arith.constant 2 : index
    %62 = vector.load %arg1[%c0_49, %c0_50, %c2_51] : memref<2x28x28xf32, #tpu.memory_space<vmem>>, vector<2x26x26xf32>
    %c1_52 = arith.constant 1 : index
    %c2_53 = arith.constant 2 : index
    %63 = memref.load %arg2[%c1_52, %c2_53] : memref<2x9xf32, #tpu.memory_space<smem>>
    %64 = vector.broadcast %63 : f32 to vector<2x26x26xf32>
    %65 = arith.mulf %62, %64 : vector<2x26x26xf32>
    %66 = arith.addf %61, %65 : vector<2x26x26xf32>
    %c0_54 = arith.constant 0 : index
    %c1_55 = arith.constant 1 : index
    %c0_56 = arith.constant 0 : index
    %67 = vector.load %arg1[%c0_54, %c1_55, %c0_56] : memref<2x28x28xf32, #tpu.memory_space<vmem>>, vector<2x26x26xf32>
    %c1_57 = arith.constant 1 : index
    %c3_58 = arith.constant 3 : index
    %68 = memref.load %arg2[%c1_57, %c3_58] : memref<2x9xf32, #tpu.memory_space<smem>>
    %69 = vector.broadcast %68 : f32 to vector<2x26x26xf32>
    %70 = arith.mulf %67, %69 : vector<2x26x26xf32>
    %71 = arith.addf %66, %70 : vector<2x26x26xf32>
    %c0_59 = arith.constant 0 : index
    %c1_60 = arith.constant 1 : index
    %c1_61 = arith.constant 1 : index
    %72 = vector.load %arg1[%c0_59, %c1_60, %c1_61] : memref<2x28x28xf32, #tpu.memory_space<vmem>>, vector<2x26x26xf32>
    %c1_62 = arith.constant 1 : index
    %c4_63 = arith.constant 4 : index
    %73 = memref.load %arg2[%c1_62, %c4_63] : memref<2x9xf32, #tpu.memory_space<smem>>
    %74 = vector.broadcast %73 : f32 to vector<2x26x26xf32>
    %75 = arith.mulf %72, %74 : vector<2x26x26xf32>
    %76 = arith.addf %71, %75 : vector<2x26x26xf32>
    %c0_64 = arith.constant 0 : index
    %c1_65 = arith.constant 1 : index
    %c2_66 = arith.constant 2 : index
    %77 = vector.load %arg1[%c0_64, %c1_65, %c2_66] : memref<2x28x28xf32, #tpu.memory_space<vmem>>, vector<2x26x26xf32>
    %c1_67 = arith.constant 1 : index
    %c5_68 = arith.constant 5 : index
    %78 = memref.load %arg2[%c1_67, %c5_68] : memref<2x9xf32, #tpu.memory_space<smem>>
    %79 = vector.broadcast %78 : f32 to vector<2x26x26xf32>
    %80 = arith.mulf %77, %79 : vector<2x26x26xf32>
    %81 = arith.addf %76, %80 : vector<2x26x26xf32>
    %c0_69 = arith.constant 0 : index
    %c2_70 = arith.constant 2 : index
    %c0_71 = arith.constant 0 : index
    %82 = vector.load %arg1[%c0_69, %c2_70, %c0_71] : memref<2x28x28xf32, #tpu.memory_space<vmem>>, vector<2x26x26xf32>
    %c1_72 = arith.constant 1 : index
    %c6_73 = arith.constant 6 : index
    %83 = memref.load %arg2[%c1_72, %c6_73] : memref<2x9xf32, #tpu.memory_space<smem>>
    %84 = vector.broadcast %83 : f32 to vector<2x26x26xf32>
    %85 = arith.mulf %82, %84 : vector<2x26x26xf32>
    %86 = arith.addf %81, %85 : vector<2x26x26xf32>
    %c0_74 = arith.constant 0 : index
    %c2_75 = arith.constant 2 : index
    %c1_76 = arith.constant 1 : index
    %87 = vector.load %arg1[%c0_74, %c2_75, %c1_76] : memref<2x28x28xf32, #tpu.memory_space<vmem>>, vector<2x26x26xf32>
    %c1_77 = arith.constant 1 : index
    %c7_78 = arith.constant 7 : index
    %88 = memref.load %arg2[%c1_77, %c7_78] : memref<2x9xf32, #tpu.memory_space<smem>>
    %89 = vector.broadcast %88 : f32 to vector<2x26x26xf32>
    %90 = arith.mulf %87, %89 : vector<2x26x26xf32>
    %91 = arith.addf %86, %90 : vector<2x26x26xf32>
    %c0_79 = arith.constant 0 : index
    %c2_80 = arith.constant 2 : index
    %c2_81 = arith.constant 2 : index
    %92 = vector.load %arg1[%c0_79, %c2_80, %c2_81] : memref<2x28x28xf32, #tpu.memory_space<vmem>>, vector<2x26x26xf32>
    %c1_82 = arith.constant 1 : index
    %c8_83 = arith.constant 8 : index
    %93 = memref.load %arg2[%c1_82, %c8_83] : memref<2x9xf32, #tpu.memory_space<smem>>
    %94 = vector.broadcast %93 : f32 to vector<2x26x26xf32>
    %95 = arith.mulf %92, %94 : vector<2x26x26xf32>
    %96 = arith.addf %91, %95 : vector<2x26x26xf32>
    %c1_84 = arith.constant 1 : index
    %97 = memref.load %arg3[%c1_84] : memref<2xf32, #tpu.memory_space<smem>>
    %98 = vector.broadcast %97 : f32 to vector<2x26x26xf32>
    %99 = arith.addf %96, %98 : vector<2x26x26xf32>
    %cst_85 = arith.constant 0.000000e+00 : f32
    %100 = vector.broadcast %cst_85 : f32 to vector<2x26x26xf32>
    %101 = arith.maximumf %99, %100 : vector<2x26x26xf32>
    %102 = tpu.iota {dimensions = array<i32: 0>} : vector<26x14xi32>
    %103 = tpu.iota {dimensions = array<i32: 1>} : vector<26x14xi32>
    %c2_i32 = arith.constant 2 : i32
    %104 = vector.broadcast %c2_i32 : i32 to vector<26x14xi32>
    %105 = arith.muli %104, %103 : vector<26x14xi32>
    %c0_i32 = arith.constant 0 : i32
    %106 = vector.broadcast %c0_i32 : i32 to vector<26x14xi32>
    %107 = arith.addi %105, %106 : vector<26x14xi32>
    %c1_i32 = arith.constant 1 : i32
    %108 = vector.broadcast %c1_i32 : i32 to vector<26x14xi32>
    %109 = arith.subi %107, %108 : vector<26x14xi32>
    %110 = arith.cmpi eq, %102, %109 : vector<26x14xi32>
    %111 = arith.extui %110 : vector<26x14xi1> to vector<26x14xi32>
    %112 = arith.sitofp %111 : vector<26x14xi32> to vector<26x14xf32>
    %113 = vector.shape_cast %112 : vector<26x14xf32> to vector<1x26x14xf32>
    %114 = vector.broadcast %113 : vector<1x26x14xf32> to vector<2x26x14xf32>
    %115 = tpu.iota {dimensions = array<i32: 0>} : vector<26x14xi32>
    %116 = tpu.iota {dimensions = array<i32: 1>} : vector<26x14xi32>
    %c2_i32_86 = arith.constant 2 : i32
    %117 = vector.broadcast %c2_i32_86 : i32 to vector<26x14xi32>
    %118 = arith.muli %117, %116 : vector<26x14xi32>
    %c1_i32_87 = arith.constant 1 : i32
    %119 = vector.broadcast %c1_i32_87 : i32 to vector<26x14xi32>
    %120 = arith.addi %118, %119 : vector<26x14xi32>
    %c1_i32_88 = arith.constant 1 : i32
    %121 = vector.broadcast %c1_i32_88 : i32 to vector<26x14xi32>
    %122 = arith.subi %120, %121 : vector<26x14xi32>
    %123 = arith.cmpi eq, %115, %122 : vector<26x14xi32>
    %124 = arith.extui %123 : vector<26x14xi1> to vector<26x14xi32>
    %125 = arith.sitofp %124 : vector<26x14xi32> to vector<26x14xf32>
    %126 = vector.shape_cast %125 : vector<26x14xf32> to vector<1x26x14xf32>
    %127 = vector.broadcast %126 : vector<1x26x14xf32> to vector<2x26x14xf32>
    %128 = tpu.iota {dimensions = array<i32: 0>} : vector<14x26xi32>
    %129 = tpu.iota {dimensions = array<i32: 1>} : vector<14x26xi32>
    %c2_i32_89 = arith.constant 2 : i32
    %130 = vector.broadcast %c2_i32_89 : i32 to vector<14x26xi32>
    %131 = arith.muli %130, %128 : vector<14x26xi32>
    %c0_i32_90 = arith.constant 0 : i32
    %132 = vector.broadcast %c0_i32_90 : i32 to vector<14x26xi32>
    %133 = arith.addi %131, %132 : vector<14x26xi32>
    %c1_i32_91 = arith.constant 1 : i32
    %134 = vector.broadcast %c1_i32_91 : i32 to vector<14x26xi32>
    %135 = arith.subi %133, %134 : vector<14x26xi32>
    %136 = arith.cmpi eq, %129, %135 : vector<14x26xi32>
    %137 = arith.extui %136 : vector<14x26xi1> to vector<14x26xi32>
    %138 = arith.sitofp %137 : vector<14x26xi32> to vector<14x26xf32>
    %139 = vector.shape_cast %138 : vector<14x26xf32> to vector<1x14x26xf32>
    %140 = vector.broadcast %139 : vector<1x14x26xf32> to vector<2x14x26xf32>
    %141 = tpu.iota {dimensions = array<i32: 0>} : vector<14x26xi32>
    %142 = tpu.iota {dimensions = array<i32: 1>} : vector<14x26xi32>
    %c2_i32_92 = arith.constant 2 : i32
    %143 = vector.broadcast %c2_i32_92 : i32 to vector<14x26xi32>
    %144 = arith.muli %143, %141 : vector<14x26xi32>
    %c1_i32_93 = arith.constant 1 : i32
    %145 = vector.broadcast %c1_i32_93 : i32 to vector<14x26xi32>
    %146 = arith.addi %144, %145 : vector<14x26xi32>
    %c1_i32_94 = arith.constant 1 : i32
    %147 = vector.broadcast %c1_i32_94 : i32 to vector<14x26xi32>
    %148 = arith.subi %146, %147 : vector<14x26xi32>
    %149 = arith.cmpi eq, %142, %148 : vector<14x26xi32>
    %150 = arith.extui %149 : vector<14x26xi1> to vector<14x26xi32>
    %151 = arith.sitofp %150 : vector<14x26xi32> to vector<14x26xf32>
    %152 = vector.shape_cast %151 : vector<14x26xf32> to vector<1x14x26xf32>
    %153 = vector.broadcast %152 : vector<1x14x26xf32> to vector<2x14x26xf32>
    %cst_95 = arith.constant dense<0.000000e+00> : vector<2x26x14xf32>
    %154 = tpu.matmul %50, %114, %cst_95 {dimension_numbers = #tpu.dot_dimension_numbers<[2], [1], [1], [2], [0, 0, 0, 1, 1, 2], [0], [0]>} : vector<2x26x26xf32>, vector<2x26x14xf32>, vector<2x26x14xf32> -> vector<2x26x14xf32>
    %cst_96 = arith.constant dense<0.000000e+00> : vector<2x26x14xf32>
    %155 = tpu.matmul %50, %127, %cst_96 {dimension_numbers = #tpu.dot_dimension_numbers<[2], [1], [1], [2], [0, 0, 0, 1, 1, 2], [0], [0]>} : vector<2x26x26xf32>, vector<2x26x14xf32>, vector<2x26x14xf32> -> vector<2x26x14xf32>
    %cst_97 = arith.constant dense<0.000000e+00> : vector<2x14x14xf32>
    %156 = tpu.matmul %140, %154, %cst_97 {dimension_numbers = #tpu.dot_dimension_numbers<[2], [1], [1], [2], [0, 0, 0, 1, 1, 2], [0], [0]>} : vector<2x14x26xf32>, vector<2x26x14xf32>, vector<2x14x14xf32> -> vector<2x14x14xf32>
    %cst_98 = arith.constant dense<0.000000e+00> : vector<2x14x14xf32>
    %157 = tpu.matmul %140, %155, %cst_98 {dimension_numbers = #tpu.dot_dimension_numbers<[2], [1], [1], [2], [0, 0, 0, 1, 1, 2], [0], [0]>} : vector<2x14x26xf32>, vector<2x26x14xf32>, vector<2x14x14xf32> -> vector<2x14x14xf32>
    %cst_99 = arith.constant dense<0.000000e+00> : vector<2x14x14xf32>
    %158 = tpu.matmul %153, %154, %cst_99 {dimension_numbers = #tpu.dot_dimension_numbers<[2], [1], [1], [2], [0, 0, 0, 1, 1, 2], [0], [0]>} : vector<2x14x26xf32>, vector<2x26x14xf32>, vector<2x14x14xf32> -> vector<2x14x14xf32>
    %cst_100 = arith.constant dense<0.000000e+00> : vector<2x14x14xf32>
    %159 = tpu.matmul %153, %155, %cst_100 {dimension_numbers = #tpu.dot_dimension_numbers<[2], [1], [1], [2], [0, 0, 0, 1, 1, 2], [0], [0]>} : vector<2x14x26xf32>, vector<2x26x14xf32>, vector<2x14x14xf32> -> vector<2x14x14xf32>
    %160 = arith.maximumf %156, %157 : vector<2x14x14xf32>
    %161 = arith.maximumf %158, %159 : vector<2x14x14xf32>
    %162 = arith.maximumf %160, %161 : vector<2x14x14xf32>
    %cst_101 = arith.constant dense<0.000000e+00> : vector<2x26x14xf32>
    %163 = tpu.matmul %101, %114, %cst_101 {dimension_numbers = #tpu.dot_dimension_numbers<[2], [1], [1], [2], [0, 0, 0, 1, 1, 2], [0], [0]>} : vector<2x26x26xf32>, vector<2x26x14xf32>, vector<2x26x14xf32> -> vector<2x26x14xf32>
    %cst_102 = arith.constant dense<0.000000e+00> : vector<2x26x14xf32>
    %164 = tpu.matmul %101, %127, %cst_102 {dimension_numbers = #tpu.dot_dimension_numbers<[2], [1], [1], [2], [0, 0, 0, 1, 1, 2], [0], [0]>} : vector<2x26x26xf32>, vector<2x26x14xf32>, vector<2x26x14xf32> -> vector<2x26x14xf32>
    %cst_103 = arith.constant dense<0.000000e+00> : vector<2x14x14xf32>
    %165 = tpu.matmul %140, %163, %cst_103 {dimension_numbers = #tpu.dot_dimension_numbers<[2], [1], [1], [2], [0, 0, 0, 1, 1, 2], [0], [0]>} : vector<2x14x26xf32>, vector<2x26x14xf32>, vector<2x14x14xf32> -> vector<2x14x14xf32>
    %cst_104 = arith.constant dense<0.000000e+00> : vector<2x14x14xf32>
    %166 = tpu.matmul %140, %164, %cst_104 {dimension_numbers = #tpu.dot_dimension_numbers<[2], [1], [1], [2], [0, 0, 0, 1, 1, 2], [0], [0]>} : vector<2x14x26xf32>, vector<2x26x14xf32>, vector<2x14x14xf32> -> vector<2x14x14xf32>
    %cst_105 = arith.constant dense<0.000000e+00> : vector<2x14x14xf32>
    %167 = tpu.matmul %153, %163, %cst_105 {dimension_numbers = #tpu.dot_dimension_numbers<[2], [1], [1], [2], [0, 0, 0, 1, 1, 2], [0], [0]>} : vector<2x14x26xf32>, vector<2x26x14xf32>, vector<2x14x14xf32> -> vector<2x14x14xf32>
    %cst_106 = arith.constant dense<0.000000e+00> : vector<2x14x14xf32>
    %168 = tpu.matmul %153, %164, %cst_106 {dimension_numbers = #tpu.dot_dimension_numbers<[2], [1], [1], [2], [0, 0, 0, 1, 1, 2], [0], [0]>} : vector<2x14x26xf32>, vector<2x26x14xf32>, vector<2x14x14xf32> -> vector<2x14x14xf32>
    %169 = arith.maximumf %165, %166 : vector<2x14x14xf32>
    %170 = arith.maximumf %167, %168 : vector<2x14x14xf32>
    %171 = arith.maximumf %169, %170 : vector<2x14x14xf32>
    %172 = tpu.iota {dimensions = array<i32: 0>} : vector<14x8xi32>
    %173 = tpu.iota {dimensions = array<i32: 1>} : vector<14x8xi32>
    %c2_i32_107 = arith.constant 2 : i32
    %174 = vector.broadcast %c2_i32_107 : i32 to vector<14x8xi32>
    %175 = arith.muli %174, %173 : vector<14x8xi32>
    %c0_i32_108 = arith.constant 0 : i32
    %176 = vector.broadcast %c0_i32_108 : i32 to vector<14x8xi32>
    %177 = arith.addi %175, %176 : vector<14x8xi32>
    %c1_i32_109 = arith.constant 1 : i32
    %178 = vector.broadcast %c1_i32_109 : i32 to vector<14x8xi32>
    %179 = arith.subi %177, %178 : vector<14x8xi32>
    %180 = arith.cmpi eq, %172, %179 : vector<14x8xi32>
    %181 = arith.extui %180 : vector<14x8xi1> to vector<14x8xi32>
    %182 = arith.sitofp %181 : vector<14x8xi32> to vector<14x8xf32>
    %183 = vector.shape_cast %182 : vector<14x8xf32> to vector<1x14x8xf32>
    %184 = vector.broadcast %183 : vector<1x14x8xf32> to vector<2x14x8xf32>
    %185 = tpu.iota {dimensions = array<i32: 0>} : vector<14x8xi32>
    %186 = tpu.iota {dimensions = array<i32: 1>} : vector<14x8xi32>
    %c2_i32_110 = arith.constant 2 : i32
    %187 = vector.broadcast %c2_i32_110 : i32 to vector<14x8xi32>
    %188 = arith.muli %187, %186 : vector<14x8xi32>
    %c1_i32_111 = arith.constant 1 : i32
    %189 = vector.broadcast %c1_i32_111 : i32 to vector<14x8xi32>
    %190 = arith.addi %188, %189 : vector<14x8xi32>
    %c1_i32_112 = arith.constant 1 : i32
    %191 = vector.broadcast %c1_i32_112 : i32 to vector<14x8xi32>
    %192 = arith.subi %190, %191 : vector<14x8xi32>
    %193 = arith.cmpi eq, %185, %192 : vector<14x8xi32>
    %194 = arith.extui %193 : vector<14x8xi1> to vector<14x8xi32>
    %195 = arith.sitofp %194 : vector<14x8xi32> to vector<14x8xf32>
    %196 = vector.shape_cast %195 : vector<14x8xf32> to vector<1x14x8xf32>
    %197 = vector.broadcast %196 : vector<1x14x8xf32> to vector<2x14x8xf32>
    %198 = tpu.iota {dimensions = array<i32: 0>} : vector<8x14xi32>
    %199 = tpu.iota {dimensions = array<i32: 1>} : vector<8x14xi32>
    %c2_i32_113 = arith.constant 2 : i32
    %200 = vector.broadcast %c2_i32_113 : i32 to vector<8x14xi32>
    %201 = arith.muli %200, %198 : vector<8x14xi32>
    %c0_i32_114 = arith.constant 0 : i32
    %202 = vector.broadcast %c0_i32_114 : i32 to vector<8x14xi32>
    %203 = arith.addi %201, %202 : vector<8x14xi32>
    %c1_i32_115 = arith.constant 1 : i32
    %204 = vector.broadcast %c1_i32_115 : i32 to vector<8x14xi32>
    %205 = arith.subi %203, %204 : vector<8x14xi32>
    %206 = arith.cmpi eq, %199, %205 : vector<8x14xi32>
    %207 = arith.extui %206 : vector<8x14xi1> to vector<8x14xi32>
    %208 = arith.sitofp %207 : vector<8x14xi32> to vector<8x14xf32>
    %209 = vector.shape_cast %208 : vector<8x14xf32> to vector<1x8x14xf32>
    %210 = vector.broadcast %209 : vector<1x8x14xf32> to vector<2x8x14xf32>
    %211 = tpu.iota {dimensions = array<i32: 0>} : vector<8x14xi32>
    %212 = tpu.iota {dimensions = array<i32: 1>} : vector<8x14xi32>
    %c2_i32_116 = arith.constant 2 : i32
    %213 = vector.broadcast %c2_i32_116 : i32 to vector<8x14xi32>
    %214 = arith.muli %213, %211 : vector<8x14xi32>
    %c1_i32_117 = arith.constant 1 : i32
    %215 = vector.broadcast %c1_i32_117 : i32 to vector<8x14xi32>
    %216 = arith.addi %214, %215 : vector<8x14xi32>
    %c1_i32_118 = arith.constant 1 : i32
    %217 = vector.broadcast %c1_i32_118 : i32 to vector<8x14xi32>
    %218 = arith.subi %216, %217 : vector<8x14xi32>
    %219 = arith.cmpi eq, %212, %218 : vector<8x14xi32>
    %220 = arith.extui %219 : vector<8x14xi1> to vector<8x14xi32>
    %221 = arith.sitofp %220 : vector<8x14xi32> to vector<8x14xf32>
    %222 = vector.shape_cast %221 : vector<8x14xf32> to vector<1x8x14xf32>
    %223 = vector.broadcast %222 : vector<1x8x14xf32> to vector<2x8x14xf32>
    %cst_119 = arith.constant dense<0.000000e+00> : vector<2x14x8xf32>
    %224 = tpu.matmul %162, %184, %cst_119 {dimension_numbers = #tpu.dot_dimension_numbers<[2], [1], [1], [2], [0, 0, 0, 1, 1, 2], [0], [0]>} : vector<2x14x14xf32>, vector<2x14x8xf32>, vector<2x14x8xf32> -> vector<2x14x8xf32>
    %cst_120 = arith.constant dense<0.000000e+00> : vector<2x14x8xf32>
    %225 = tpu.matmul %162, %197, %cst_120 {dimension_numbers = #tpu.dot_dimension_numbers<[2], [1], [1], [2], [0, 0, 0, 1, 1, 2], [0], [0]>} : vector<2x14x14xf32>, vector<2x14x8xf32>, vector<2x14x8xf32> -> vector<2x14x8xf32>
    %cst_121 = arith.constant dense<0.000000e+00> : vector<2x8x8xf32>
    %226 = tpu.matmul %210, %224, %cst_121 {dimension_numbers = #tpu.dot_dimension_numbers<[2], [1], [1], [2], [0, 0, 0, 1, 1, 2], [0], [0]>} : vector<2x8x14xf32>, vector<2x14x8xf32>, vector<2x8x8xf32> -> vector<2x8x8xf32>
    %cst_122 = arith.constant dense<0.000000e+00> : vector<2x8x8xf32>
    %227 = tpu.matmul %210, %225, %cst_122 {dimension_numbers = #tpu.dot_dimension_numbers<[2], [1], [1], [2], [0, 0, 0, 1, 1, 2], [0], [0]>} : vector<2x8x14xf32>, vector<2x14x8xf32>, vector<2x8x8xf32> -> vector<2x8x8xf32>
    %cst_123 = arith.constant dense<0.000000e+00> : vector<2x8x8xf32>
    %228 = tpu.matmul %223, %224, %cst_123 {dimension_numbers = #tpu.dot_dimension_numbers<[2], [1], [1], [2], [0, 0, 0, 1, 1, 2], [0], [0]>} : vector<2x8x14xf32>, vector<2x14x8xf32>, vector<2x8x8xf32> -> vector<2x8x8xf32>
    %cst_124 = arith.constant dense<0.000000e+00> : vector<2x8x8xf32>
    %229 = tpu.matmul %223, %225, %cst_124 {dimension_numbers = #tpu.dot_dimension_numbers<[2], [1], [1], [2], [0, 0, 0, 1, 1, 2], [0], [0]>} : vector<2x8x14xf32>, vector<2x14x8xf32>, vector<2x8x8xf32> -> vector<2x8x8xf32>
    %cst_125 = arith.constant dense<0.000000e+00> : vector<2x14x8xf32>
    %230 = tpu.matmul %171, %184, %cst_125 {dimension_numbers = #tpu.dot_dimension_numbers<[2], [1], [1], [2], [0, 0, 0, 1, 1, 2], [0], [0]>} : vector<2x14x14xf32>, vector<2x14x8xf32>, vector<2x14x8xf32> -> vector<2x14x8xf32>
    %cst_126 = arith.constant dense<0.000000e+00> : vector<2x14x8xf32>
    %231 = tpu.matmul %171, %197, %cst_126 {dimension_numbers = #tpu.dot_dimension_numbers<[2], [1], [1], [2], [0, 0, 0, 1, 1, 2], [0], [0]>} : vector<2x14x14xf32>, vector<2x14x8xf32>, vector<2x14x8xf32> -> vector<2x14x8xf32>
    %cst_127 = arith.constant dense<0.000000e+00> : vector<2x8x8xf32>
    %232 = tpu.matmul %210, %230, %cst_127 {dimension_numbers = #tpu.dot_dimension_numbers<[2], [1], [1], [2], [0, 0, 0, 1, 1, 2], [0], [0]>} : vector<2x8x14xf32>, vector<2x14x8xf32>, vector<2x8x8xf32> -> vector<2x8x8xf32>
    %cst_128 = arith.constant dense<0.000000e+00> : vector<2x8x8xf32>
    %233 = tpu.matmul %210, %231, %cst_128 {dimension_numbers = #tpu.dot_dimension_numbers<[2], [1], [1], [2], [0, 0, 0, 1, 1, 2], [0], [0]>} : vector<2x8x14xf32>, vector<2x14x8xf32>, vector<2x8x8xf32> -> vector<2x8x8xf32>
    %cst_129 = arith.constant dense<0.000000e+00> : vector<2x8x8xf32>
    %234 = tpu.matmul %223, %230, %cst_129 {dimension_numbers = #tpu.dot_dimension_numbers<[2], [1], [1], [2], [0, 0, 0, 1, 1, 2], [0], [0]>} : vector<2x8x14xf32>, vector<2x14x8xf32>, vector<2x8x8xf32> -> vector<2x8x8xf32>
    %cst_130 = arith.constant dense<0.000000e+00> : vector<2x8x8xf32>
    %235 = tpu.matmul %223, %231, %cst_130 {dimension_numbers = #tpu.dot_dimension_numbers<[2], [1], [1], [2], [0, 0, 0, 1, 1, 2], [0], [0]>} : vector<2x8x14xf32>, vector<2x14x8xf32>, vector<2x8x8xf32> -> vector<2x8x8xf32>
    %cst_131 = arith.constant 0.000000e+00 : f32
    %236 = vector.broadcast %cst_131 : f32 to vector<2x8x8xf32>
    %c0_132 = arith.constant 0 : index
    %c0_133 = arith.constant 0 : index
    %237 = memref.load %arg4[%c0_132, %c0_133] : memref<5x8xf32, #tpu.memory_space<smem>>
    %238 = vector.broadcast %237 : f32 to vector<2x8x8xf32>
    %239 = arith.mulf %226, %238 : vector<2x8x8xf32>
    %240 = arith.addf %236, %239 : vector<2x8x8xf32>
    %c0_134 = arith.constant 0 : index
    %c1_135 = arith.constant 1 : index
    %241 = memref.load %arg4[%c0_134, %c1_135] : memref<5x8xf32, #tpu.memory_space<smem>>
    %242 = vector.broadcast %241 : f32 to vector<2x8x8xf32>
    %243 = arith.mulf %227, %242 : vector<2x8x8xf32>
    %244 = arith.addf %240, %243 : vector<2x8x8xf32>
    %c0_136 = arith.constant 0 : index
    %c2_137 = arith.constant 2 : index
    %245 = memref.load %arg4[%c0_136, %c2_137] : memref<5x8xf32, #tpu.memory_space<smem>>
    %246 = vector.broadcast %245 : f32 to vector<2x8x8xf32>
    %247 = arith.mulf %228, %246 : vector<2x8x8xf32>
    %248 = arith.addf %244, %247 : vector<2x8x8xf32>
    %c0_138 = arith.constant 0 : index
    %c3_139 = arith.constant 3 : index
    %249 = memref.load %arg4[%c0_138, %c3_139] : memref<5x8xf32, #tpu.memory_space<smem>>
    %250 = vector.broadcast %249 : f32 to vector<2x8x8xf32>
    %251 = arith.mulf %229, %250 : vector<2x8x8xf32>
    %252 = arith.addf %248, %251 : vector<2x8x8xf32>
    %c0_140 = arith.constant 0 : index
    %c4_141 = arith.constant 4 : index
    %253 = memref.load %arg4[%c0_140, %c4_141] : memref<5x8xf32, #tpu.memory_space<smem>>
    %254 = vector.broadcast %253 : f32 to vector<2x8x8xf32>
    %255 = arith.mulf %232, %254 : vector<2x8x8xf32>
    %256 = arith.addf %252, %255 : vector<2x8x8xf32>
    %c0_142 = arith.constant 0 : index
    %c5_143 = arith.constant 5 : index
    %257 = memref.load %arg4[%c0_142, %c5_143] : memref<5x8xf32, #tpu.memory_space<smem>>
    %258 = vector.broadcast %257 : f32 to vector<2x8x8xf32>
    %259 = arith.mulf %233, %258 : vector<2x8x8xf32>
    %260 = arith.addf %256, %259 : vector<2x8x8xf32>
    %c0_144 = arith.constant 0 : index
    %c6_145 = arith.constant 6 : index
    %261 = memref.load %arg4[%c0_144, %c6_145] : memref<5x8xf32, #tpu.memory_space<smem>>
    %262 = vector.broadcast %261 : f32 to vector<2x8x8xf32>
    %263 = arith.mulf %234, %262 : vector<2x8x8xf32>
    %264 = arith.addf %260, %263 : vector<2x8x8xf32>
    %c0_146 = arith.constant 0 : index
    %c7_147 = arith.constant 7 : index
    %265 = memref.load %arg4[%c0_146, %c7_147] : memref<5x8xf32, #tpu.memory_space<smem>>
    %266 = vector.broadcast %265 : f32 to vector<2x8x8xf32>
    %267 = arith.mulf %235, %266 : vector<2x8x8xf32>
    %268 = arith.addf %264, %267 : vector<2x8x8xf32>
    %c0_148 = arith.constant 0 : index
    %269 = memref.load %arg5[%c0_148] : memref<5xf32, #tpu.memory_space<smem>>
    %270 = vector.broadcast %269 : f32 to vector<2x8x8xf32>
    %271 = arith.addf %268, %270 : vector<2x8x8xf32>
    %cst_149 = arith.constant 0.000000e+00 : f32
    %272 = vector.broadcast %cst_149 : f32 to vector<2x8x8xf32>
    %273 = arith.subf %272, %271 : vector<2x8x8xf32>
    %274 = math.exp %273 : vector<2x8x8xf32>
    %cst_150 = arith.constant 1.000000e+00 : f32
    %275 = vector.broadcast %cst_150 : f32 to vector<2x8x8xf32>
    %276 = arith.addf %275, %274 : vector<2x8x8xf32>
    %cst_151 = arith.constant 1.000000e+00 : f32
    %277 = vector.broadcast %cst_151 : f32 to vector<2x8x8xf32>
    %278 = arith.divf %277, %276 : vector<2x8x8xf32>
    %cst_152 = arith.constant 0.000000e+00 : f32
    %279 = vector.broadcast %cst_152 : f32 to vector<2x8x8xf32>
    %c1_153 = arith.constant 1 : index
    %c0_154 = arith.constant 0 : index
    %280 = memref.load %arg4[%c1_153, %c0_154] : memref<5x8xf32, #tpu.memory_space<smem>>
    %281 = vector.broadcast %280 : f32 to vector<2x8x8xf32>
    %282 = arith.mulf %226, %281 : vector<2x8x8xf32>
    %283 = arith.addf %279, %282 : vector<2x8x8xf32>
    %c1_155 = arith.constant 1 : index
    %c1_156 = arith.constant 1 : index
    %284 = memref.load %arg4[%c1_155, %c1_156] : memref<5x8xf32, #tpu.memory_space<smem>>
    %285 = vector.broadcast %284 : f32 to vector<2x8x8xf32>
    %286 = arith.mulf %227, %285 : vector<2x8x8xf32>
    %287 = arith.addf %283, %286 : vector<2x8x8xf32>
    %c1_157 = arith.constant 1 : index
    %c2_158 = arith.constant 2 : index
    %288 = memref.load %arg4[%c1_157, %c2_158] : memref<5x8xf32, #tpu.memory_space<smem>>
    %289 = vector.broadcast %288 : f32 to vector<2x8x8xf32>
    %290 = arith.mulf %228, %289 : vector<2x8x8xf32>
    %291 = arith.addf %287, %290 : vector<2x8x8xf32>
    %c1_159 = arith.constant 1 : index
    %c3_160 = arith.constant 3 : index
    %292 = memref.load %arg4[%c1_159, %c3_160] : memref<5x8xf32, #tpu.memory_space<smem>>
    %293 = vector.broadcast %292 : f32 to vector<2x8x8xf32>
    %294 = arith.mulf %229, %293 : vector<2x8x8xf32>
    %295 = arith.addf %291, %294 : vector<2x8x8xf32>
    %c1_161 = arith.constant 1 : index
    %c4_162 = arith.constant 4 : index
    %296 = memref.load %arg4[%c1_161, %c4_162] : memref<5x8xf32, #tpu.memory_space<smem>>
    %297 = vector.broadcast %296 : f32 to vector<2x8x8xf32>
    %298 = arith.mulf %232, %297 : vector<2x8x8xf32>
    %299 = arith.addf %295, %298 : vector<2x8x8xf32>
    %c1_163 = arith.constant 1 : index
    %c5_164 = arith.constant 5 : index
    %300 = memref.load %arg4[%c1_163, %c5_164] : memref<5x8xf32, #tpu.memory_space<smem>>
    %301 = vector.broadcast %300 : f32 to vector<2x8x8xf32>
    %302 = arith.mulf %233, %301 : vector<2x8x8xf32>
    %303 = arith.addf %299, %302 : vector<2x8x8xf32>
    %c1_165 = arith.constant 1 : index
    %c6_166 = arith.constant 6 : index
    %304 = memref.load %arg4[%c1_165, %c6_166] : memref<5x8xf32, #tpu.memory_space<smem>>
    %305 = vector.broadcast %304 : f32 to vector<2x8x8xf32>
    %306 = arith.mulf %234, %305 : vector<2x8x8xf32>
    %307 = arith.addf %303, %306 : vector<2x8x8xf32>
    %c1_167 = arith.constant 1 : index
    %c7_168 = arith.constant 7 : index
    %308 = memref.load %arg4[%c1_167, %c7_168] : memref<5x8xf32, #tpu.memory_space<smem>>
    %309 = vector.broadcast %308 : f32 to vector<2x8x8xf32>
    %310 = arith.mulf %235, %309 : vector<2x8x8xf32>
    %311 = arith.addf %307, %310 : vector<2x8x8xf32>
    %c1_169 = arith.constant 1 : index
    %312 = memref.load %arg5[%c1_169] : memref<5xf32, #tpu.memory_space<smem>>
    %313 = vector.broadcast %312 : f32 to vector<2x8x8xf32>
    %314 = arith.addf %311, %313 : vector<2x8x8xf32>
    %cst_170 = arith.constant 0.000000e+00 : f32
    %315 = vector.broadcast %cst_170 : f32 to vector<2x8x8xf32>
    %316 = arith.subf %315, %314 : vector<2x8x8xf32>
    %317 = math.exp %316 : vector<2x8x8xf32>
    %cst_171 = arith.constant 1.000000e+00 : f32
    %318 = vector.broadcast %cst_171 : f32 to vector<2x8x8xf32>
    %319 = arith.addf %318, %317 : vector<2x8x8xf32>
    %cst_172 = arith.constant 1.000000e+00 : f32
    %320 = vector.broadcast %cst_172 : f32 to vector<2x8x8xf32>
    %321 = arith.divf %320, %319 : vector<2x8x8xf32>
    %cst_173 = arith.constant 0.000000e+00 : f32
    %322 = vector.broadcast %cst_173 : f32 to vector<2x8x8xf32>
    %c2_174 = arith.constant 2 : index
    %c0_175 = arith.constant 0 : index
    %323 = memref.load %arg4[%c2_174, %c0_175] : memref<5x8xf32, #tpu.memory_space<smem>>
    %324 = vector.broadcast %323 : f32 to vector<2x8x8xf32>
    %325 = arith.mulf %226, %324 : vector<2x8x8xf32>
    %326 = arith.addf %322, %325 : vector<2x8x8xf32>
    %c2_176 = arith.constant 2 : index
    %c1_177 = arith.constant 1 : index
    %327 = memref.load %arg4[%c2_176, %c1_177] : memref<5x8xf32, #tpu.memory_space<smem>>
    %328 = vector.broadcast %327 : f32 to vector<2x8x8xf32>
    %329 = arith.mulf %227, %328 : vector<2x8x8xf32>
    %330 = arith.addf %326, %329 : vector<2x8x8xf32>
    %c2_178 = arith.constant 2 : index
    %c2_179 = arith.constant 2 : index
    %331 = memref.load %arg4[%c2_178, %c2_179] : memref<5x8xf32, #tpu.memory_space<smem>>
    %332 = vector.broadcast %331 : f32 to vector<2x8x8xf32>
    %333 = arith.mulf %228, %332 : vector<2x8x8xf32>
    %334 = arith.addf %330, %333 : vector<2x8x8xf32>
    %c2_180 = arith.constant 2 : index
    %c3_181 = arith.constant 3 : index
    %335 = memref.load %arg4[%c2_180, %c3_181] : memref<5x8xf32, #tpu.memory_space<smem>>
    %336 = vector.broadcast %335 : f32 to vector<2x8x8xf32>
    %337 = arith.mulf %229, %336 : vector<2x8x8xf32>
    %338 = arith.addf %334, %337 : vector<2x8x8xf32>
    %c2_182 = arith.constant 2 : index
    %c4_183 = arith.constant 4 : index
    %339 = memref.load %arg4[%c2_182, %c4_183] : memref<5x8xf32, #tpu.memory_space<smem>>
    %340 = vector.broadcast %339 : f32 to vector<2x8x8xf32>
    %341 = arith.mulf %232, %340 : vector<2x8x8xf32>
    %342 = arith.addf %338, %341 : vector<2x8x8xf32>
    %c2_184 = arith.constant 2 : index
    %c5_185 = arith.constant 5 : index
    %343 = memref.load %arg4[%c2_184, %c5_185] : memref<5x8xf32, #tpu.memory_space<smem>>
    %344 = vector.broadcast %343 : f32 to vector<2x8x8xf32>
    %345 = arith.mulf %233, %344 : vector<2x8x8xf32>
    %346 = arith.addf %342, %345 : vector<2x8x8xf32>
    %c2_186 = arith.constant 2 : index
    %c6_187 = arith.constant 6 : index
    %347 = memref.load %arg4[%c2_186, %c6_187] : memref<5x8xf32, #tpu.memory_space<smem>>
    %348 = vector.broadcast %347 : f32 to vector<2x8x8xf32>
    %349 = arith.mulf %234, %348 : vector<2x8x8xf32>
    %350 = arith.addf %346, %349 : vector<2x8x8xf32>
    %c2_188 = arith.constant 2 : index
    %c7_189 = arith.constant 7 : index
    %351 = memref.load %arg4[%c2_188, %c7_189] : memref<5x8xf32, #tpu.memory_space<smem>>
    %352 = vector.broadcast %351 : f32 to vector<2x8x8xf32>
    %353 = arith.mulf %235, %352 : vector<2x8x8xf32>
    %354 = arith.addf %350, %353 : vector<2x8x8xf32>
    %c2_190 = arith.constant 2 : index
    %355 = memref.load %arg5[%c2_190] : memref<5xf32, #tpu.memory_space<smem>>
    %356 = vector.broadcast %355 : f32 to vector<2x8x8xf32>
    %357 = arith.addf %354, %356 : vector<2x8x8xf32>
    %cst_191 = arith.constant 0.000000e+00 : f32
    %358 = vector.broadcast %cst_191 : f32 to vector<2x8x8xf32>
    %359 = arith.subf %358, %357 : vector<2x8x8xf32>
    %360 = math.exp %359 : vector<2x8x8xf32>
    %cst_192 = arith.constant 1.000000e+00 : f32
    %361 = vector.broadcast %cst_192 : f32 to vector<2x8x8xf32>
    %362 = arith.addf %361, %360 : vector<2x8x8xf32>
    %cst_193 = arith.constant 1.000000e+00 : f32
    %363 = vector.broadcast %cst_193 : f32 to vector<2x8x8xf32>
    %364 = arith.divf %363, %362 : vector<2x8x8xf32>
    %cst_194 = arith.constant 0.000000e+00 : f32
    %365 = vector.broadcast %cst_194 : f32 to vector<2x8x8xf32>
    %c3_195 = arith.constant 3 : index
    %c0_196 = arith.constant 0 : index
    %366 = memref.load %arg4[%c3_195, %c0_196] : memref<5x8xf32, #tpu.memory_space<smem>>
    %367 = vector.broadcast %366 : f32 to vector<2x8x8xf32>
    %368 = arith.mulf %226, %367 : vector<2x8x8xf32>
    %369 = arith.addf %365, %368 : vector<2x8x8xf32>
    %c3_197 = arith.constant 3 : index
    %c1_198 = arith.constant 1 : index
    %370 = memref.load %arg4[%c3_197, %c1_198] : memref<5x8xf32, #tpu.memory_space<smem>>
    %371 = vector.broadcast %370 : f32 to vector<2x8x8xf32>
    %372 = arith.mulf %227, %371 : vector<2x8x8xf32>
    %373 = arith.addf %369, %372 : vector<2x8x8xf32>
    %c3_199 = arith.constant 3 : index
    %c2_200 = arith.constant 2 : index
    %374 = memref.load %arg4[%c3_199, %c2_200] : memref<5x8xf32, #tpu.memory_space<smem>>
    %375 = vector.broadcast %374 : f32 to vector<2x8x8xf32>
    %376 = arith.mulf %228, %375 : vector<2x8x8xf32>
    %377 = arith.addf %373, %376 : vector<2x8x8xf32>
    %c3_201 = arith.constant 3 : index
    %c3_202 = arith.constant 3 : index
    %378 = memref.load %arg4[%c3_201, %c3_202] : memref<5x8xf32, #tpu.memory_space<smem>>
    %379 = vector.broadcast %378 : f32 to vector<2x8x8xf32>
    %380 = arith.mulf %229, %379 : vector<2x8x8xf32>
    %381 = arith.addf %377, %380 : vector<2x8x8xf32>
    %c3_203 = arith.constant 3 : index
    %c4_204 = arith.constant 4 : index
    %382 = memref.load %arg4[%c3_203, %c4_204] : memref<5x8xf32, #tpu.memory_space<smem>>
    %383 = vector.broadcast %382 : f32 to vector<2x8x8xf32>
    %384 = arith.mulf %232, %383 : vector<2x8x8xf32>
    %385 = arith.addf %381, %384 : vector<2x8x8xf32>
    %c3_205 = arith.constant 3 : index
    %c5_206 = arith.constant 5 : index
    %386 = memref.load %arg4[%c3_205, %c5_206] : memref<5x8xf32, #tpu.memory_space<smem>>
    %387 = vector.broadcast %386 : f32 to vector<2x8x8xf32>
    %388 = arith.mulf %233, %387 : vector<2x8x8xf32>
    %389 = arith.addf %385, %388 : vector<2x8x8xf32>
    %c3_207 = arith.constant 3 : index
    %c6_208 = arith.constant 6 : index
    %390 = memref.load %arg4[%c3_207, %c6_208] : memref<5x8xf32, #tpu.memory_space<smem>>
    %391 = vector.broadcast %390 : f32 to vector<2x8x8xf32>
    %392 = arith.mulf %234, %391 : vector<2x8x8xf32>
    %393 = arith.addf %389, %392 : vector<2x8x8xf32>
    %c3_209 = arith.constant 3 : index
    %c7_210 = arith.constant 7 : index
    %394 = memref.load %arg4[%c3_209, %c7_210] : memref<5x8xf32, #tpu.memory_space<smem>>
    %395 = vector.broadcast %394 : f32 to vector<2x8x8xf32>
    %396 = arith.mulf %235, %395 : vector<2x8x8xf32>
    %397 = arith.addf %393, %396 : vector<2x8x8xf32>
    %c3_211 = arith.constant 3 : index
    %398 = memref.load %arg5[%c3_211] : memref<5xf32, #tpu.memory_space<smem>>
    %399 = vector.broadcast %398 : f32 to vector<2x8x8xf32>
    %400 = arith.addf %397, %399 : vector<2x8x8xf32>
    %cst_212 = arith.constant 0.000000e+00 : f32
    %401 = vector.broadcast %cst_212 : f32 to vector<2x8x8xf32>
    %402 = arith.subf %401, %400 : vector<2x8x8xf32>
    %403 = math.exp %402 : vector<2x8x8xf32>
    %cst_213 = arith.constant 1.000000e+00 : f32
    %404 = vector.broadcast %cst_213 : f32 to vector<2x8x8xf32>
    %405 = arith.addf %404, %403 : vector<2x8x8xf32>
    %cst_214 = arith.constant 1.000000e+00 : f32
    %406 = vector.broadcast %cst_214 : f32 to vector<2x8x8xf32>
    %407 = arith.divf %406, %405 : vector<2x8x8xf32>
    %cst_215 = arith.constant 0.000000e+00 : f32
    %408 = vector.broadcast %cst_215 : f32 to vector<2x8x8xf32>
    %c4_216 = arith.constant 4 : index
    %c0_217 = arith.constant 0 : index
    %409 = memref.load %arg4[%c4_216, %c0_217] : memref<5x8xf32, #tpu.memory_space<smem>>
    %410 = vector.broadcast %409 : f32 to vector<2x8x8xf32>
    %411 = arith.mulf %226, %410 : vector<2x8x8xf32>
    %412 = arith.addf %408, %411 : vector<2x8x8xf32>
    %c4_218 = arith.constant 4 : index
    %c1_219 = arith.constant 1 : index
    %413 = memref.load %arg4[%c4_218, %c1_219] : memref<5x8xf32, #tpu.memory_space<smem>>
    %414 = vector.broadcast %413 : f32 to vector<2x8x8xf32>
    %415 = arith.mulf %227, %414 : vector<2x8x8xf32>
    %416 = arith.addf %412, %415 : vector<2x8x8xf32>
    %c4_220 = arith.constant 4 : index
    %c2_221 = arith.constant 2 : index
    %417 = memref.load %arg4[%c4_220, %c2_221] : memref<5x8xf32, #tpu.memory_space<smem>>
    %418 = vector.broadcast %417 : f32 to vector<2x8x8xf32>
    %419 = arith.mulf %228, %418 : vector<2x8x8xf32>
    %420 = arith.addf %416, %419 : vector<2x8x8xf32>
    %c4_222 = arith.constant 4 : index
    %c3_223 = arith.constant 3 : index
    %421 = memref.load %arg4[%c4_222, %c3_223] : memref<5x8xf32, #tpu.memory_space<smem>>
    %422 = vector.broadcast %421 : f32 to vector<2x8x8xf32>
    %423 = arith.mulf %229, %422 : vector<2x8x8xf32>
    %424 = arith.addf %420, %423 : vector<2x8x8xf32>
    %c4_224 = arith.constant 4 : index
    %c4_225 = arith.constant 4 : index
    %425 = memref.load %arg4[%c4_224, %c4_225] : memref<5x8xf32, #tpu.memory_space<smem>>
    %426 = vector.broadcast %425 : f32 to vector<2x8x8xf32>
    %427 = arith.mulf %232, %426 : vector<2x8x8xf32>
    %428 = arith.addf %424, %427 : vector<2x8x8xf32>
    %c4_226 = arith.constant 4 : index
    %c5_227 = arith.constant 5 : index
    %429 = memref.load %arg4[%c4_226, %c5_227] : memref<5x8xf32, #tpu.memory_space<smem>>
    %430 = vector.broadcast %429 : f32 to vector<2x8x8xf32>
    %431 = arith.mulf %233, %430 : vector<2x8x8xf32>
    %432 = arith.addf %428, %431 : vector<2x8x8xf32>
    %c4_228 = arith.constant 4 : index
    %c6_229 = arith.constant 6 : index
    %433 = memref.load %arg4[%c4_228, %c6_229] : memref<5x8xf32, #tpu.memory_space<smem>>
    %434 = vector.broadcast %433 : f32 to vector<2x8x8xf32>
    %435 = arith.mulf %234, %434 : vector<2x8x8xf32>
    %436 = arith.addf %432, %435 : vector<2x8x8xf32>
    %c4_230 = arith.constant 4 : index
    %c7_231 = arith.constant 7 : index
    %437 = memref.load %arg4[%c4_230, %c7_231] : memref<5x8xf32, #tpu.memory_space<smem>>
    %438 = vector.broadcast %437 : f32 to vector<2x8x8xf32>
    %439 = arith.mulf %235, %438 : vector<2x8x8xf32>
    %440 = arith.addf %436, %439 : vector<2x8x8xf32>
    %c4_232 = arith.constant 4 : index
    %441 = memref.load %arg5[%c4_232] : memref<5xf32, #tpu.memory_space<smem>>
    %442 = vector.broadcast %441 : f32 to vector<2x8x8xf32>
    %443 = arith.addf %440, %442 : vector<2x8x8xf32>
    %cst_233 = arith.constant 0.000000e+00 : f32
    %444 = vector.broadcast %cst_233 : f32 to vector<2x8x8xf32>
    %445 = arith.subf %444, %443 : vector<2x8x8xf32>
    %446 = math.exp %445 : vector<2x8x8xf32>
    %cst_234 = arith.constant 1.000000e+00 : f32
    %447 = vector.broadcast %cst_234 : f32 to vector<2x8x8xf32>
    %448 = arith.addf %447, %446 : vector<2x8x8xf32>
    %cst_235 = arith.constant 1.000000e+00 : f32
    %449 = vector.broadcast %cst_235 : f32 to vector<2x8x8xf32>
    %450 = arith.divf %449, %448 : vector<2x8x8xf32>
    %cst_236 = arith.constant 0.000000e+00 : f32
    %451 = vector.broadcast %cst_236 : f32 to vector<2x1024xf32>
    %452 = vector.extract_strided_slice %278 {offsets = [0, 0, 0], sizes = [2, 1, 8], strides = [1, 1, 1]} : vector<2x8x8xf32> to vector<2x1x8xf32>
    %453 = vector.shape_cast %452 : vector<2x1x8xf32> to vector<2x8xf32>
    %454 = arith.truncf %453 : vector<2x8xf32> to vector<2x8xbf16>
    %c0_237 = arith.constant 0 : index
    %c0_238 = arith.constant 0 : index
    %c0_239 = arith.constant 0 : index
    %c0_240 = arith.constant 0 : index
    %455 = vector.load %arg6[%c0_237, %c0_238, %c0_239, %c0_240] : memref<5x8x8x1024xbf16, #tpu.memory_space<vmem>>, vector<1x1x8x1024xbf16>
    %456 = vector.shape_cast %455 : vector<1x1x8x1024xbf16> to vector<8x1024xbf16>
    %cst_241 = arith.constant dense<0.000000e+00> : vector<2x1024xf32>
    %457 = tpu.matmul %454, %456, %cst_241 {dimension_numbers = #tpu.dot_dimension_numbers<[1], [0], [0], [1], [0, 0, 1, 1], [], []>} : vector<2x8xbf16>, vector<8x1024xbf16>, vector<2x1024xf32> -> vector<2x1024xf32>
    %458 = arith.addf %451, %457 : vector<2x1024xf32>
    %459 = vector.extract_strided_slice %278 {offsets = [0, 1, 0], sizes = [2, 1, 8], strides = [1, 1, 1]} : vector<2x8x8xf32> to vector<2x1x8xf32>
    %460 = vector.shape_cast %459 : vector<2x1x8xf32> to vector<2x8xf32>
    %461 = arith.truncf %460 : vector<2x8xf32> to vector<2x8xbf16>
    %c0_242 = arith.constant 0 : index
    %c1_243 = arith.constant 1 : index
    %c0_244 = arith.constant 0 : index
    %c0_245 = arith.constant 0 : index
    %462 = vector.load %arg6[%c0_242, %c1_243, %c0_244, %c0_245] : memref<5x8x8x1024xbf16, #tpu.memory_space<vmem>>, vector<1x1x8x1024xbf16>
    %463 = vector.shape_cast %462 : vector<1x1x8x1024xbf16> to vector<8x1024xbf16>
    %cst_246 = arith.constant dense<0.000000e+00> : vector<2x1024xf32>
    %464 = tpu.matmul %461, %463, %cst_246 {dimension_numbers = #tpu.dot_dimension_numbers<[1], [0], [0], [1], [0, 0, 1, 1], [], []>} : vector<2x8xbf16>, vector<8x1024xbf16>, vector<2x1024xf32> -> vector<2x1024xf32>
    %465 = arith.addf %458, %464 : vector<2x1024xf32>
    %466 = vector.extract_strided_slice %278 {offsets = [0, 2, 0], sizes = [2, 1, 8], strides = [1, 1, 1]} : vector<2x8x8xf32> to vector<2x1x8xf32>
    %467 = vector.shape_cast %466 : vector<2x1x8xf32> to vector<2x8xf32>
    %468 = arith.truncf %467 : vector<2x8xf32> to vector<2x8xbf16>
    %c0_247 = arith.constant 0 : index
    %c2_248 = arith.constant 2 : index
    %c0_249 = arith.constant 0 : index
    %c0_250 = arith.constant 0 : index
    %469 = vector.load %arg6[%c0_247, %c2_248, %c0_249, %c0_250] : memref<5x8x8x1024xbf16, #tpu.memory_space<vmem>>, vector<1x1x8x1024xbf16>
    %470 = vector.shape_cast %469 : vector<1x1x8x1024xbf16> to vector<8x1024xbf16>
    %cst_251 = arith.constant dense<0.000000e+00> : vector<2x1024xf32>
    %471 = tpu.matmul %468, %470, %cst_251 {dimension_numbers = #tpu.dot_dimension_numbers<[1], [0], [0], [1], [0, 0, 1, 1], [], []>} : vector<2x8xbf16>, vector<8x1024xbf16>, vector<2x1024xf32> -> vector<2x1024xf32>
    %472 = arith.addf %465, %471 : vector<2x1024xf32>
    %473 = vector.extract_strided_slice %278 {offsets = [0, 3, 0], sizes = [2, 1, 8], strides = [1, 1, 1]} : vector<2x8x8xf32> to vector<2x1x8xf32>
    %474 = vector.shape_cast %473 : vector<2x1x8xf32> to vector<2x8xf32>
    %475 = arith.truncf %474 : vector<2x8xf32> to vector<2x8xbf16>
    %c0_252 = arith.constant 0 : index
    %c3_253 = arith.constant 3 : index
    %c0_254 = arith.constant 0 : index
    %c0_255 = arith.constant 0 : index
    %476 = vector.load %arg6[%c0_252, %c3_253, %c0_254, %c0_255] : memref<5x8x8x1024xbf16, #tpu.memory_space<vmem>>, vector<1x1x8x1024xbf16>
    %477 = vector.shape_cast %476 : vector<1x1x8x1024xbf16> to vector<8x1024xbf16>
    %cst_256 = arith.constant dense<0.000000e+00> : vector<2x1024xf32>
    %478 = tpu.matmul %475, %477, %cst_256 {dimension_numbers = #tpu.dot_dimension_numbers<[1], [0], [0], [1], [0, 0, 1, 1], [], []>} : vector<2x8xbf16>, vector<8x1024xbf16>, vector<2x1024xf32> -> vector<2x1024xf32>
    %479 = arith.addf %472, %478 : vector<2x1024xf32>
    %480 = vector.extract_strided_slice %278 {offsets = [0, 4, 0], sizes = [2, 1, 8], strides = [1, 1, 1]} : vector<2x8x8xf32> to vector<2x1x8xf32>
    %481 = vector.shape_cast %480 : vector<2x1x8xf32> to vector<2x8xf32>
    %482 = arith.truncf %481 : vector<2x8xf32> to vector<2x8xbf16>
    %c0_257 = arith.constant 0 : index
    %c4_258 = arith.constant 4 : index
    %c0_259 = arith.constant 0 : index
    %c0_260 = arith.constant 0 : index
    %483 = vector.load %arg6[%c0_257, %c4_258, %c0_259, %c0_260] : memref<5x8x8x1024xbf16, #tpu.memory_space<vmem>>, vector<1x1x8x1024xbf16>
    %484 = vector.shape_cast %483 : vector<1x1x8x1024xbf16> to vector<8x1024xbf16>
    %cst_261 = arith.constant dense<0.000000e+00> : vector<2x1024xf32>
    %485 = tpu.matmul %482, %484, %cst_261 {dimension_numbers = #tpu.dot_dimension_numbers<[1], [0], [0], [1], [0, 0, 1, 1], [], []>} : vector<2x8xbf16>, vector<8x1024xbf16>, vector<2x1024xf32> -> vector<2x1024xf32>
    %486 = arith.addf %479, %485 : vector<2x1024xf32>
    %487 = vector.extract_strided_slice %278 {offsets = [0, 5, 0], sizes = [2, 1, 8], strides = [1, 1, 1]} : vector<2x8x8xf32> to vector<2x1x8xf32>
    %488 = vector.shape_cast %487 : vector<2x1x8xf32> to vector<2x8xf32>
    %489 = arith.truncf %488 : vector<2x8xf32> to vector<2x8xbf16>
    %c0_262 = arith.constant 0 : index
    %c5_263 = arith.constant 5 : index
    %c0_264 = arith.constant 0 : index
    %c0_265 = arith.constant 0 : index
    %490 = vector.load %arg6[%c0_262, %c5_263, %c0_264, %c0_265] : memref<5x8x8x1024xbf16, #tpu.memory_space<vmem>>, vector<1x1x8x1024xbf16>
    %491 = vector.shape_cast %490 : vector<1x1x8x1024xbf16> to vector<8x1024xbf16>
    %cst_266 = arith.constant dense<0.000000e+00> : vector<2x1024xf32>
    %492 = tpu.matmul %489, %491, %cst_266 {dimension_numbers = #tpu.dot_dimension_numbers<[1], [0], [0], [1], [0, 0, 1, 1], [], []>} : vector<2x8xbf16>, vector<8x1024xbf16>, vector<2x1024xf32> -> vector<2x1024xf32>
    %493 = arith.addf %486, %492 : vector<2x1024xf32>
    %494 = vector.extract_strided_slice %278 {offsets = [0, 6, 0], sizes = [2, 1, 8], strides = [1, 1, 1]} : vector<2x8x8xf32> to vector<2x1x8xf32>
    %495 = vector.shape_cast %494 : vector<2x1x8xf32> to vector<2x8xf32>
    %496 = arith.truncf %495 : vector<2x8xf32> to vector<2x8xbf16>
    %c0_267 = arith.constant 0 : index
    %c6_268 = arith.constant 6 : index
    %c0_269 = arith.constant 0 : index
    %c0_270 = arith.constant 0 : index
    %497 = vector.load %arg6[%c0_267, %c6_268, %c0_269, %c0_270] : memref<5x8x8x1024xbf16, #tpu.memory_space<vmem>>, vector<1x1x8x1024xbf16>
    %498 = vector.shape_cast %497 : vector<1x1x8x1024xbf16> to vector<8x1024xbf16>
    %cst_271 = arith.constant dense<0.000000e+00> : vector<2x1024xf32>
    %499 = tpu.matmul %496, %498, %cst_271 {dimension_numbers = #tpu.dot_dimension_numbers<[1], [0], [0], [1], [0, 0, 1, 1], [], []>} : vector<2x8xbf16>, vector<8x1024xbf16>, vector<2x1024xf32> -> vector<2x1024xf32>
    %500 = arith.addf %493, %499 : vector<2x1024xf32>
    %501 = vector.extract_strided_slice %278 {offsets = [0, 7, 0], sizes = [2, 1, 8], strides = [1, 1, 1]} : vector<2x8x8xf32> to vector<2x1x8xf32>
    %502 = vector.shape_cast %501 : vector<2x1x8xf32> to vector<2x8xf32>
    %503 = arith.truncf %502 : vector<2x8xf32> to vector<2x8xbf16>
    %c0_272 = arith.constant 0 : index
    %c7_273 = arith.constant 7 : index
    %c0_274 = arith.constant 0 : index
    %c0_275 = arith.constant 0 : index
    %504 = vector.load %arg6[%c0_272, %c7_273, %c0_274, %c0_275] : memref<5x8x8x1024xbf16, #tpu.memory_space<vmem>>, vector<1x1x8x1024xbf16>
    %505 = vector.shape_cast %504 : vector<1x1x8x1024xbf16> to vector<8x1024xbf16>
    %cst_276 = arith.constant dense<0.000000e+00> : vector<2x1024xf32>
    %506 = tpu.matmul %503, %505, %cst_276 {dimension_numbers = #tpu.dot_dimension_numbers<[1], [0], [0], [1], [0, 0, 1, 1], [], []>} : vector<2x8xbf16>, vector<8x1024xbf16>, vector<2x1024xf32> -> vector<2x1024xf32>
    %507 = arith.addf %500, %506 : vector<2x1024xf32>
    %508 = vector.extract_strided_slice %321 {offsets = [0, 0, 0], sizes = [2, 1, 8], strides = [1, 1, 1]} : vector<2x8x8xf32> to vector<2x1x8xf32>
    %509 = vector.shape_cast %508 : vector<2x1x8xf32> to vector<2x8xf32>
    %510 = arith.truncf %509 : vector<2x8xf32> to vector<2x8xbf16>
    %c1_277 = arith.constant 1 : index
    %c0_278 = arith.constant 0 : index
    %c0_279 = arith.constant 0 : index
    %c0_280 = arith.constant 0 : index
    %511 = vector.load %arg6[%c1_277, %c0_278, %c0_279, %c0_280] : memref<5x8x8x1024xbf16, #tpu.memory_space<vmem>>, vector<1x1x8x1024xbf16>
    %512 = vector.shape_cast %511 : vector<1x1x8x1024xbf16> to vector<8x1024xbf16>
    %cst_281 = arith.constant dense<0.000000e+00> : vector<2x1024xf32>
    %513 = tpu.matmul %510, %512, %cst_281 {dimension_numbers = #tpu.dot_dimension_numbers<[1], [0], [0], [1], [0, 0, 1, 1], [], []>} : vector<2x8xbf16>, vector<8x1024xbf16>, vector<2x1024xf32> -> vector<2x1024xf32>
    %514 = arith.addf %507, %513 : vector<2x1024xf32>
    %515 = vector.extract_strided_slice %321 {offsets = [0, 1, 0], sizes = [2, 1, 8], strides = [1, 1, 1]} : vector<2x8x8xf32> to vector<2x1x8xf32>
    %516 = vector.shape_cast %515 : vector<2x1x8xf32> to vector<2x8xf32>
    %517 = arith.truncf %516 : vector<2x8xf32> to vector<2x8xbf16>
    %c1_282 = arith.constant 1 : index
    %c1_283 = arith.constant 1 : index
    %c0_284 = arith.constant 0 : index
    %c0_285 = arith.constant 0 : index
    %518 = vector.load %arg6[%c1_282, %c1_283, %c0_284, %c0_285] : memref<5x8x8x1024xbf16, #tpu.memory_space<vmem>>, vector<1x1x8x1024xbf16>
    %519 = vector.shape_cast %518 : vector<1x1x8x1024xbf16> to vector<8x1024xbf16>
    %cst_286 = arith.constant dense<0.000000e+00> : vector<2x1024xf32>
    %520 = tpu.matmul %517, %519, %cst_286 {dimension_numbers = #tpu.dot_dimension_numbers<[1], [0], [0], [1], [0, 0, 1, 1], [], []>} : vector<2x8xbf16>, vector<8x1024xbf16>, vector<2x1024xf32> -> vector<2x1024xf32>
    %521 = arith.addf %514, %520 : vector<2x1024xf32>
    %522 = vector.extract_strided_slice %321 {offsets = [0, 2, 0], sizes = [2, 1, 8], strides = [1, 1, 1]} : vector<2x8x8xf32> to vector<2x1x8xf32>
    %523 = vector.shape_cast %522 : vector<2x1x8xf32> to vector<2x8xf32>
    %524 = arith.truncf %523 : vector<2x8xf32> to vector<2x8xbf16>
    %c1_287 = arith.constant 1 : index
    %c2_288 = arith.constant 2 : index
    %c0_289 = arith.constant 0 : index
    %c0_290 = arith.constant 0 : index
    %525 = vector.load %arg6[%c1_287, %c2_288, %c0_289, %c0_290] : memref<5x8x8x1024xbf16, #tpu.memory_space<vmem>>, vector<1x1x8x1024xbf16>
    %526 = vector.shape_cast %525 : vector<1x1x8x1024xbf16> to vector<8x1024xbf16>
    %cst_291 = arith.constant dense<0.000000e+00> : vector<2x1024xf32>
    %527 = tpu.matmul %524, %526, %cst_291 {dimension_numbers = #tpu.dot_dimension_numbers<[1], [0], [0], [1], [0, 0, 1, 1], [], []>} : vector<2x8xbf16>, vector<8x1024xbf16>, vector<2x1024xf32> -> vector<2x1024xf32>
    %528 = arith.addf %521, %527 : vector<2x1024xf32>
    %529 = vector.extract_strided_slice %321 {offsets = [0, 3, 0], sizes = [2, 1, 8], strides = [1, 1, 1]} : vector<2x8x8xf32> to vector<2x1x8xf32>
    %530 = vector.shape_cast %529 : vector<2x1x8xf32> to vector<2x8xf32>
    %531 = arith.truncf %530 : vector<2x8xf32> to vector<2x8xbf16>
    %c1_292 = arith.constant 1 : index
    %c3_293 = arith.constant 3 : index
    %c0_294 = arith.constant 0 : index
    %c0_295 = arith.constant 0 : index
    %532 = vector.load %arg6[%c1_292, %c3_293, %c0_294, %c0_295] : memref<5x8x8x1024xbf16, #tpu.memory_space<vmem>>, vector<1x1x8x1024xbf16>
    %533 = vector.shape_cast %532 : vector<1x1x8x1024xbf16> to vector<8x1024xbf16>
    %cst_296 = arith.constant dense<0.000000e+00> : vector<2x1024xf32>
    %534 = tpu.matmul %531, %533, %cst_296 {dimension_numbers = #tpu.dot_dimension_numbers<[1], [0], [0], [1], [0, 0, 1, 1], [], []>} : vector<2x8xbf16>, vector<8x1024xbf16>, vector<2x1024xf32> -> vector<2x1024xf32>
    %535 = arith.addf %528, %534 : vector<2x1024xf32>
    %536 = vector.extract_strided_slice %321 {offsets = [0, 4, 0], sizes = [2, 1, 8], strides = [1, 1, 1]} : vector<2x8x8xf32> to vector<2x1x8xf32>
    %537 = vector.shape_cast %536 : vector<2x1x8xf32> to vector<2x8xf32>
    %538 = arith.truncf %537 : vector<2x8xf32> to vector<2x8xbf16>
    %c1_297 = arith.constant 1 : index
    %c4_298 = arith.constant 4 : index
    %c0_299 = arith.constant 0 : index
    %c0_300 = arith.constant 0 : index
    %539 = vector.load %arg6[%c1_297, %c4_298, %c0_299, %c0_300] : memref<5x8x8x1024xbf16, #tpu.memory_space<vmem>>, vector<1x1x8x1024xbf16>
    %540 = vector.shape_cast %539 : vector<1x1x8x1024xbf16> to vector<8x1024xbf16>
    %cst_301 = arith.constant dense<0.000000e+00> : vector<2x1024xf32>
    %541 = tpu.matmul %538, %540, %cst_301 {dimension_numbers = #tpu.dot_dimension_numbers<[1], [0], [0], [1], [0, 0, 1, 1], [], []>} : vector<2x8xbf16>, vector<8x1024xbf16>, vector<2x1024xf32> -> vector<2x1024xf32>
    %542 = arith.addf %535, %541 : vector<2x1024xf32>
    %543 = vector.extract_strided_slice %321 {offsets = [0, 5, 0], sizes = [2, 1, 8], strides = [1, 1, 1]} : vector<2x8x8xf32> to vector<2x1x8xf32>
    %544 = vector.shape_cast %543 : vector<2x1x8xf32> to vector<2x8xf32>
    %545 = arith.truncf %544 : vector<2x8xf32> to vector<2x8xbf16>
    %c1_302 = arith.constant 1 : index
    %c5_303 = arith.constant 5 : index
    %c0_304 = arith.constant 0 : index
    %c0_305 = arith.constant 0 : index
    %546 = vector.load %arg6[%c1_302, %c5_303, %c0_304, %c0_305] : memref<5x8x8x1024xbf16, #tpu.memory_space<vmem>>, vector<1x1x8x1024xbf16>
    %547 = vector.shape_cast %546 : vector<1x1x8x1024xbf16> to vector<8x1024xbf16>
    %cst_306 = arith.constant dense<0.000000e+00> : vector<2x1024xf32>
    %548 = tpu.matmul %545, %547, %cst_306 {dimension_numbers = #tpu.dot_dimension_numbers<[1], [0], [0], [1], [0, 0, 1, 1], [], []>} : vector<2x8xbf16>, vector<8x1024xbf16>, vector<2x1024xf32> -> vector<2x1024xf32>
    %549 = arith.addf %542, %548 : vector<2x1024xf32>
    %550 = vector.extract_strided_slice %321 {offsets = [0, 6, 0], sizes = [2, 1, 8], strides = [1, 1, 1]} : vector<2x8x8xf32> to vector<2x1x8xf32>
    %551 = vector.shape_cast %550 : vector<2x1x8xf32> to vector<2x8xf32>
    %552 = arith.truncf %551 : vector<2x8xf32> to vector<2x8xbf16>
    %c1_307 = arith.constant 1 : index
    %c6_308 = arith.constant 6 : index
    %c0_309 = arith.constant 0 : index
    %c0_310 = arith.constant 0 : index
    %553 = vector.load %arg6[%c1_307, %c6_308, %c0_309, %c0_310] : memref<5x8x8x1024xbf16, #tpu.memory_space<vmem>>, vector<1x1x8x1024xbf16>
    %554 = vector.shape_cast %553 : vector<1x1x8x1024xbf16> to vector<8x1024xbf16>
    %cst_311 = arith.constant dense<0.000000e+00> : vector<2x1024xf32>
    %555 = tpu.matmul %552, %554, %cst_311 {dimension_numbers = #tpu.dot_dimension_numbers<[1], [0], [0], [1], [0, 0, 1, 1], [], []>} : vector<2x8xbf16>, vector<8x1024xbf16>, vector<2x1024xf32> -> vector<2x1024xf32>
    %556 = arith.addf %549, %555 : vector<2x1024xf32>
    %557 = vector.extract_strided_slice %321 {offsets = [0, 7, 0], sizes = [2, 1, 8], strides = [1, 1, 1]} : vector<2x8x8xf32> to vector<2x1x8xf32>
    %558 = vector.shape_cast %557 : vector<2x1x8xf32> to vector<2x8xf32>
    %559 = arith.truncf %558 : vector<2x8xf32> to vector<2x8xbf16>
    %c1_312 = arith.constant 1 : index
    %c7_313 = arith.constant 7 : index
    %c0_314 = arith.constant 0 : index
    %c0_315 = arith.constant 0 : index
    %560 = vector.load %arg6[%c1_312, %c7_313, %c0_314, %c0_315] : memref<5x8x8x1024xbf16, #tpu.memory_space<vmem>>, vector<1x1x8x1024xbf16>
    %561 = vector.shape_cast %560 : vector<1x1x8x1024xbf16> to vector<8x1024xbf16>
    %cst_316 = arith.constant dense<0.000000e+00> : vector<2x1024xf32>
    %562 = tpu.matmul %559, %561, %cst_316 {dimension_numbers = #tpu.dot_dimension_numbers<[1], [0], [0], [1], [0, 0, 1, 1], [], []>} : vector<2x8xbf16>, vector<8x1024xbf16>, vector<2x1024xf32> -> vector<2x1024xf32>
    %563 = arith.addf %556, %562 : vector<2x1024xf32>
    %564 = vector.extract_strided_slice %364 {offsets = [0, 0, 0], sizes = [2, 1, 8], strides = [1, 1, 1]} : vector<2x8x8xf32> to vector<2x1x8xf32>
    %565 = vector.shape_cast %564 : vector<2x1x8xf32> to vector<2x8xf32>
    %566 = arith.truncf %565 : vector<2x8xf32> to vector<2x8xbf16>
    %c2_317 = arith.constant 2 : index
    %c0_318 = arith.constant 0 : index
    %c0_319 = arith.constant 0 : index
    %c0_320 = arith.constant 0 : index
    %567 = vector.load %arg6[%c2_317, %c0_318, %c0_319, %c0_320] : memref<5x8x8x1024xbf16, #tpu.memory_space<vmem>>, vector<1x1x8x1024xbf16>
    %568 = vector.shape_cast %567 : vector<1x1x8x1024xbf16> to vector<8x1024xbf16>
    %cst_321 = arith.constant dense<0.000000e+00> : vector<2x1024xf32>
    %569 = tpu.matmul %566, %568, %cst_321 {dimension_numbers = #tpu.dot_dimension_numbers<[1], [0], [0], [1], [0, 0, 1, 1], [], []>} : vector<2x8xbf16>, vector<8x1024xbf16>, vector<2x1024xf32> -> vector<2x1024xf32>
    %570 = arith.addf %563, %569 : vector<2x1024xf32>
    %571 = vector.extract_strided_slice %364 {offsets = [0, 1, 0], sizes = [2, 1, 8], strides = [1, 1, 1]} : vector<2x8x8xf32> to vector<2x1x8xf32>
    %572 = vector.shape_cast %571 : vector<2x1x8xf32> to vector<2x8xf32>
    %573 = arith.truncf %572 : vector<2x8xf32> to vector<2x8xbf16>
    %c2_322 = arith.constant 2 : index
    %c1_323 = arith.constant 1 : index
    %c0_324 = arith.constant 0 : index
    %c0_325 = arith.constant 0 : index
    %574 = vector.load %arg6[%c2_322, %c1_323, %c0_324, %c0_325] : memref<5x8x8x1024xbf16, #tpu.memory_space<vmem>>, vector<1x1x8x1024xbf16>
    %575 = vector.shape_cast %574 : vector<1x1x8x1024xbf16> to vector<8x1024xbf16>
    %cst_326 = arith.constant dense<0.000000e+00> : vector<2x1024xf32>
    %576 = tpu.matmul %573, %575, %cst_326 {dimension_numbers = #tpu.dot_dimension_numbers<[1], [0], [0], [1], [0, 0, 1, 1], [], []>} : vector<2x8xbf16>, vector<8x1024xbf16>, vector<2x1024xf32> -> vector<2x1024xf32>
    %577 = arith.addf %570, %576 : vector<2x1024xf32>
    %578 = vector.extract_strided_slice %364 {offsets = [0, 2, 0], sizes = [2, 1, 8], strides = [1, 1, 1]} : vector<2x8x8xf32> to vector<2x1x8xf32>
    %579 = vector.shape_cast %578 : vector<2x1x8xf32> to vector<2x8xf32>
    %580 = arith.truncf %579 : vector<2x8xf32> to vector<2x8xbf16>
    %c2_327 = arith.constant 2 : index
    %c2_328 = arith.constant 2 : index
    %c0_329 = arith.constant 0 : index
    %c0_330 = arith.constant 0 : index
    %581 = vector.load %arg6[%c2_327, %c2_328, %c0_329, %c0_330] : memref<5x8x8x1024xbf16, #tpu.memory_space<vmem>>, vector<1x1x8x1024xbf16>
    %582 = vector.shape_cast %581 : vector<1x1x8x1024xbf16> to vector<8x1024xbf16>
    %cst_331 = arith.constant dense<0.000000e+00> : vector<2x1024xf32>
    %583 = tpu.matmul %580, %582, %cst_331 {dimension_numbers = #tpu.dot_dimension_numbers<[1], [0], [0], [1], [0, 0, 1, 1], [], []>} : vector<2x8xbf16>, vector<8x1024xbf16>, vector<2x1024xf32> -> vector<2x1024xf32>
    %584 = arith.addf %577, %583 : vector<2x1024xf32>
    %585 = vector.extract_strided_slice %364 {offsets = [0, 3, 0], sizes = [2, 1, 8], strides = [1, 1, 1]} : vector<2x8x8xf32> to vector<2x1x8xf32>
    %586 = vector.shape_cast %585 : vector<2x1x8xf32> to vector<2x8xf32>
    %587 = arith.truncf %586 : vector<2x8xf32> to vector<2x8xbf16>
    %c2_332 = arith.constant 2 : index
    %c3_333 = arith.constant 3 : index
    %c0_334 = arith.constant 0 : index
    %c0_335 = arith.constant 0 : index
    %588 = vector.load %arg6[%c2_332, %c3_333, %c0_334, %c0_335] : memref<5x8x8x1024xbf16, #tpu.memory_space<vmem>>, vector<1x1x8x1024xbf16>
    %589 = vector.shape_cast %588 : vector<1x1x8x1024xbf16> to vector<8x1024xbf16>
    %cst_336 = arith.constant dense<0.000000e+00> : vector<2x1024xf32>
    %590 = tpu.matmul %587, %589, %cst_336 {dimension_numbers = #tpu.dot_dimension_numbers<[1], [0], [0], [1], [0, 0, 1, 1], [], []>} : vector<2x8xbf16>, vector<8x1024xbf16>, vector<2x1024xf32> -> vector<2x1024xf32>
    %591 = arith.addf %584, %590 : vector<2x1024xf32>
    %592 = vector.extract_strided_slice %364 {offsets = [0, 4, 0], sizes = [2, 1, 8], strides = [1, 1, 1]} : vector<2x8x8xf32> to vector<2x1x8xf32>
    %593 = vector.shape_cast %592 : vector<2x1x8xf32> to vector<2x8xf32>
    %594 = arith.truncf %593 : vector<2x8xf32> to vector<2x8xbf16>
    %c2_337 = arith.constant 2 : index
    %c4_338 = arith.constant 4 : index
    %c0_339 = arith.constant 0 : index
    %c0_340 = arith.constant 0 : index
    %595 = vector.load %arg6[%c2_337, %c4_338, %c0_339, %c0_340] : memref<5x8x8x1024xbf16, #tpu.memory_space<vmem>>, vector<1x1x8x1024xbf16>
    %596 = vector.shape_cast %595 : vector<1x1x8x1024xbf16> to vector<8x1024xbf16>
    %cst_341 = arith.constant dense<0.000000e+00> : vector<2x1024xf32>
    %597 = tpu.matmul %594, %596, %cst_341 {dimension_numbers = #tpu.dot_dimension_numbers<[1], [0], [0], [1], [0, 0, 1, 1], [], []>} : vector<2x8xbf16>, vector<8x1024xbf16>, vector<2x1024xf32> -> vector<2x1024xf32>
    %598 = arith.addf %591, %597 : vector<2x1024xf32>
    %599 = vector.extract_strided_slice %364 {offsets = [0, 5, 0], sizes = [2, 1, 8], strides = [1, 1, 1]} : vector<2x8x8xf32> to vector<2x1x8xf32>
    %600 = vector.shape_cast %599 : vector<2x1x8xf32> to vector<2x8xf32>
    %601 = arith.truncf %600 : vector<2x8xf32> to vector<2x8xbf16>
    %c2_342 = arith.constant 2 : index
    %c5_343 = arith.constant 5 : index
    %c0_344 = arith.constant 0 : index
    %c0_345 = arith.constant 0 : index
    %602 = vector.load %arg6[%c2_342, %c5_343, %c0_344, %c0_345] : memref<5x8x8x1024xbf16, #tpu.memory_space<vmem>>, vector<1x1x8x1024xbf16>
    %603 = vector.shape_cast %602 : vector<1x1x8x1024xbf16> to vector<8x1024xbf16>
    %cst_346 = arith.constant dense<0.000000e+00> : vector<2x1024xf32>
    %604 = tpu.matmul %601, %603, %cst_346 {dimension_numbers = #tpu.dot_dimension_numbers<[1], [0], [0], [1], [0, 0, 1, 1], [], []>} : vector<2x8xbf16>, vector<8x1024xbf16>, vector<2x1024xf32> -> vector<2x1024xf32>
    %605 = arith.addf %598, %604 : vector<2x1024xf32>
    %606 = vector.extract_strided_slice %364 {offsets = [0, 6, 0], sizes = [2, 1, 8], strides = [1, 1, 1]} : vector<2x8x8xf32> to vector<2x1x8xf32>
    %607 = vector.shape_cast %606 : vector<2x1x8xf32> to vector<2x8xf32>
    %608 = arith.truncf %607 : vector<2x8xf32> to vector<2x8xbf16>
    %c2_347 = arith.constant 2 : index
    %c6_348 = arith.constant 6 : index
    %c0_349 = arith.constant 0 : index
    %c0_350 = arith.constant 0 : index
    %609 = vector.load %arg6[%c2_347, %c6_348, %c0_349, %c0_350] : memref<5x8x8x1024xbf16, #tpu.memory_space<vmem>>, vector<1x1x8x1024xbf16>
    %610 = vector.shape_cast %609 : vector<1x1x8x1024xbf16> to vector<8x1024xbf16>
    %cst_351 = arith.constant dense<0.000000e+00> : vector<2x1024xf32>
    %611 = tpu.matmul %608, %610, %cst_351 {dimension_numbers = #tpu.dot_dimension_numbers<[1], [0], [0], [1], [0, 0, 1, 1], [], []>} : vector<2x8xbf16>, vector<8x1024xbf16>, vector<2x1024xf32> -> vector<2x1024xf32>
    %612 = arith.addf %605, %611 : vector<2x1024xf32>
    %613 = vector.extract_strided_slice %364 {offsets = [0, 7, 0], sizes = [2, 1, 8], strides = [1, 1, 1]} : vector<2x8x8xf32> to vector<2x1x8xf32>
    %614 = vector.shape_cast %613 : vector<2x1x8xf32> to vector<2x8xf32>
    %615 = arith.truncf %614 : vector<2x8xf32> to vector<2x8xbf16>
    %c2_352 = arith.constant 2 : index
    %c7_353 = arith.constant 7 : index
    %c0_354 = arith.constant 0 : index
    %c0_355 = arith.constant 0 : index
    %616 = vector.load %arg6[%c2_352, %c7_353, %c0_354, %c0_355] : memref<5x8x8x1024xbf16, #tpu.memory_space<vmem>>, vector<1x1x8x1024xbf16>
    %617 = vector.shape_cast %616 : vector<1x1x8x1024xbf16> to vector<8x1024xbf16>
    %cst_356 = arith.constant dense<0.000000e+00> : vector<2x1024xf32>
    %618 = tpu.matmul %615, %617, %cst_356 {dimension_numbers = #tpu.dot_dimension_numbers<[1], [0], [0], [1], [0, 0, 1, 1], [], []>} : vector<2x8xbf16>, vector<8x1024xbf16>, vector<2x1024xf32> -> vector<2x1024xf32>
    %619 = arith.addf %612, %618 : vector<2x1024xf32>
    %620 = vector.extract_strided_slice %407 {offsets = [0, 0, 0], sizes = [2, 1, 8], strides = [1, 1, 1]} : vector<2x8x8xf32> to vector<2x1x8xf32>
    %621 = vector.shape_cast %620 : vector<2x1x8xf32> to vector<2x8xf32>
    %622 = arith.truncf %621 : vector<2x8xf32> to vector<2x8xbf16>
    %c3_357 = arith.constant 3 : index
    %c0_358 = arith.constant 0 : index
    %c0_359 = arith.constant 0 : index
    %c0_360 = arith.constant 0 : index
    %623 = vector.load %arg6[%c3_357, %c0_358, %c0_359, %c0_360] : memref<5x8x8x1024xbf16, #tpu.memory_space<vmem>>, vector<1x1x8x1024xbf16>
    %624 = vector.shape_cast %623 : vector<1x1x8x1024xbf16> to vector<8x1024xbf16>
    %cst_361 = arith.constant dense<0.000000e+00> : vector<2x1024xf32>
    %625 = tpu.matmul %622, %624, %cst_361 {dimension_numbers = #tpu.dot_dimension_numbers<[1], [0], [0], [1], [0, 0, 1, 1], [], []>} : vector<2x8xbf16>, vector<8x1024xbf16>, vector<2x1024xf32> -> vector<2x1024xf32>
    %626 = arith.addf %619, %625 : vector<2x1024xf32>
    %627 = vector.extract_strided_slice %407 {offsets = [0, 1, 0], sizes = [2, 1, 8], strides = [1, 1, 1]} : vector<2x8x8xf32> to vector<2x1x8xf32>
    %628 = vector.shape_cast %627 : vector<2x1x8xf32> to vector<2x8xf32>
    %629 = arith.truncf %628 : vector<2x8xf32> to vector<2x8xbf16>
    %c3_362 = arith.constant 3 : index
    %c1_363 = arith.constant 1 : index
    %c0_364 = arith.constant 0 : index
    %c0_365 = arith.constant 0 : index
    %630 = vector.load %arg6[%c3_362, %c1_363, %c0_364, %c0_365] : memref<5x8x8x1024xbf16, #tpu.memory_space<vmem>>, vector<1x1x8x1024xbf16>
    %631 = vector.shape_cast %630 : vector<1x1x8x1024xbf16> to vector<8x1024xbf16>
    %cst_366 = arith.constant dense<0.000000e+00> : vector<2x1024xf32>
    %632 = tpu.matmul %629, %631, %cst_366 {dimension_numbers = #tpu.dot_dimension_numbers<[1], [0], [0], [1], [0, 0, 1, 1], [], []>} : vector<2x8xbf16>, vector<8x1024xbf16>, vector<2x1024xf32> -> vector<2x1024xf32>
    %633 = arith.addf %626, %632 : vector<2x1024xf32>
    %634 = vector.extract_strided_slice %407 {offsets = [0, 2, 0], sizes = [2, 1, 8], strides = [1, 1, 1]} : vector<2x8x8xf32> to vector<2x1x8xf32>
    %635 = vector.shape_cast %634 : vector<2x1x8xf32> to vector<2x8xf32>
    %636 = arith.truncf %635 : vector<2x8xf32> to vector<2x8xbf16>
    %c3_367 = arith.constant 3 : index
    %c2_368 = arith.constant 2 : index
    %c0_369 = arith.constant 0 : index
    %c0_370 = arith.constant 0 : index
    %637 = vector.load %arg6[%c3_367, %c2_368, %c0_369, %c0_370] : memref<5x8x8x1024xbf16, #tpu.memory_space<vmem>>, vector<1x1x8x1024xbf16>
    %638 = vector.shape_cast %637 : vector<1x1x8x1024xbf16> to vector<8x1024xbf16>
    %cst_371 = arith.constant dense<0.000000e+00> : vector<2x1024xf32>
    %639 = tpu.matmul %636, %638, %cst_371 {dimension_numbers = #tpu.dot_dimension_numbers<[1], [0], [0], [1], [0, 0, 1, 1], [], []>} : vector<2x8xbf16>, vector<8x1024xbf16>, vector<2x1024xf32> -> vector<2x1024xf32>
    %640 = arith.addf %633, %639 : vector<2x1024xf32>
    %641 = vector.extract_strided_slice %407 {offsets = [0, 3, 0], sizes = [2, 1, 8], strides = [1, 1, 1]} : vector<2x8x8xf32> to vector<2x1x8xf32>
    %642 = vector.shape_cast %641 : vector<2x1x8xf32> to vector<2x8xf32>
    %643 = arith.truncf %642 : vector<2x8xf32> to vector<2x8xbf16>
    %c3_372 = arith.constant 3 : index
    %c3_373 = arith.constant 3 : index
    %c0_374 = arith.constant 0 : index
    %c0_375 = arith.constant 0 : index
    %644 = vector.load %arg6[%c3_372, %c3_373, %c0_374, %c0_375] : memref<5x8x8x1024xbf16, #tpu.memory_space<vmem>>, vector<1x1x8x1024xbf16>
    %645 = vector.shape_cast %644 : vector<1x1x8x1024xbf16> to vector<8x1024xbf16>
    %cst_376 = arith.constant dense<0.000000e+00> : vector<2x1024xf32>
    %646 = tpu.matmul %643, %645, %cst_376 {dimension_numbers = #tpu.dot_dimension_numbers<[1], [0], [0], [1], [0, 0, 1, 1], [], []>} : vector<2x8xbf16>, vector<8x1024xbf16>, vector<2x1024xf32> -> vector<2x1024xf32>
    %647 = arith.addf %640, %646 : vector<2x1024xf32>
    %648 = vector.extract_strided_slice %407 {offsets = [0, 4, 0], sizes = [2, 1, 8], strides = [1, 1, 1]} : vector<2x8x8xf32> to vector<2x1x8xf32>
    %649 = vector.shape_cast %648 : vector<2x1x8xf32> to vector<2x8xf32>
    %650 = arith.truncf %649 : vector<2x8xf32> to vector<2x8xbf16>
    %c3_377 = arith.constant 3 : index
    %c4_378 = arith.constant 4 : index
    %c0_379 = arith.constant 0 : index
    %c0_380 = arith.constant 0 : index
    %651 = vector.load %arg6[%c3_377, %c4_378, %c0_379, %c0_380] : memref<5x8x8x1024xbf16, #tpu.memory_space<vmem>>, vector<1x1x8x1024xbf16>
    %652 = vector.shape_cast %651 : vector<1x1x8x1024xbf16> to vector<8x1024xbf16>
    %cst_381 = arith.constant dense<0.000000e+00> : vector<2x1024xf32>
    %653 = tpu.matmul %650, %652, %cst_381 {dimension_numbers = #tpu.dot_dimension_numbers<[1], [0], [0], [1], [0, 0, 1, 1], [], []>} : vector<2x8xbf16>, vector<8x1024xbf16>, vector<2x1024xf32> -> vector<2x1024xf32>
    %654 = arith.addf %647, %653 : vector<2x1024xf32>
    %655 = vector.extract_strided_slice %407 {offsets = [0, 5, 0], sizes = [2, 1, 8], strides = [1, 1, 1]} : vector<2x8x8xf32> to vector<2x1x8xf32>
    %656 = vector.shape_cast %655 : vector<2x1x8xf32> to vector<2x8xf32>
    %657 = arith.truncf %656 : vector<2x8xf32> to vector<2x8xbf16>
    %c3_382 = arith.constant 3 : index
    %c5_383 = arith.constant 5 : index
    %c0_384 = arith.constant 0 : index
    %c0_385 = arith.constant 0 : index
    %658 = vector.load %arg6[%c3_382, %c5_383, %c0_384, %c0_385] : memref<5x8x8x1024xbf16, #tpu.memory_space<vmem>>, vector<1x1x8x1024xbf16>
    %659 = vector.shape_cast %658 : vector<1x1x8x1024xbf16> to vector<8x1024xbf16>
    %cst_386 = arith.constant dense<0.000000e+00> : vector<2x1024xf32>
    %660 = tpu.matmul %657, %659, %cst_386 {dimension_numbers = #tpu.dot_dimension_numbers<[1], [0], [0], [1], [0, 0, 1, 1], [], []>} : vector<2x8xbf16>, vector<8x1024xbf16>, vector<2x1024xf32> -> vector<2x1024xf32>
    %661 = arith.addf %654, %660 : vector<2x1024xf32>
    %662 = vector.extract_strided_slice %407 {offsets = [0, 6, 0], sizes = [2, 1, 8], strides = [1, 1, 1]} : vector<2x8x8xf32> to vector<2x1x8xf32>
    %663 = vector.shape_cast %662 : vector<2x1x8xf32> to vector<2x8xf32>
    %664 = arith.truncf %663 : vector<2x8xf32> to vector<2x8xbf16>
    %c3_387 = arith.constant 3 : index
    %c6_388 = arith.constant 6 : index
    %c0_389 = arith.constant 0 : index
    %c0_390 = arith.constant 0 : index
    %665 = vector.load %arg6[%c3_387, %c6_388, %c0_389, %c0_390] : memref<5x8x8x1024xbf16, #tpu.memory_space<vmem>>, vector<1x1x8x1024xbf16>
    %666 = vector.shape_cast %665 : vector<1x1x8x1024xbf16> to vector<8x1024xbf16>
    %cst_391 = arith.constant dense<0.000000e+00> : vector<2x1024xf32>
    %667 = tpu.matmul %664, %666, %cst_391 {dimension_numbers = #tpu.dot_dimension_numbers<[1], [0], [0], [1], [0, 0, 1, 1], [], []>} : vector<2x8xbf16>, vector<8x1024xbf16>, vector<2x1024xf32> -> vector<2x1024xf32>
    %668 = arith.addf %661, %667 : vector<2x1024xf32>
    %669 = vector.extract_strided_slice %407 {offsets = [0, 7, 0], sizes = [2, 1, 8], strides = [1, 1, 1]} : vector<2x8x8xf32> to vector<2x1x8xf32>
    %670 = vector.shape_cast %669 : vector<2x1x8xf32> to vector<2x8xf32>
    %671 = arith.truncf %670 : vector<2x8xf32> to vector<2x8xbf16>
    %c3_392 = arith.constant 3 : index
    %c7_393 = arith.constant 7 : index
    %c0_394 = arith.constant 0 : index
    %c0_395 = arith.constant 0 : index
    %672 = vector.load %arg6[%c3_392, %c7_393, %c0_394, %c0_395] : memref<5x8x8x1024xbf16, #tpu.memory_space<vmem>>, vector<1x1x8x1024xbf16>
    %673 = vector.shape_cast %672 : vector<1x1x8x1024xbf16> to vector<8x1024xbf16>
    %cst_396 = arith.constant dense<0.000000e+00> : vector<2x1024xf32>
    %674 = tpu.matmul %671, %673, %cst_396 {dimension_numbers = #tpu.dot_dimension_numbers<[1], [0], [0], [1], [0, 0, 1, 1], [], []>} : vector<2x8xbf16>, vector<8x1024xbf16>, vector<2x1024xf32> -> vector<2x1024xf32>
    %675 = arith.addf %668, %674 : vector<2x1024xf32>
    %676 = vector.extract_strided_slice %450 {offsets = [0, 0, 0], sizes = [2, 1, 8], strides = [1, 1, 1]} : vector<2x8x8xf32> to vector<2x1x8xf32>
    %677 = vector.shape_cast %676 : vector<2x1x8xf32> to vector<2x8xf32>
    %678 = arith.truncf %677 : vector<2x8xf32> to vector<2x8xbf16>
    %c4_397 = arith.constant 4 : index
    %c0_398 = arith.constant 0 : index
    %c0_399 = arith.constant 0 : index
    %c0_400 = arith.constant 0 : index
    %679 = vector.load %arg6[%c4_397, %c0_398, %c0_399, %c0_400] : memref<5x8x8x1024xbf16, #tpu.memory_space<vmem>>, vector<1x1x8x1024xbf16>
    %680 = vector.shape_cast %679 : vector<1x1x8x1024xbf16> to vector<8x1024xbf16>
    %cst_401 = arith.constant dense<0.000000e+00> : vector<2x1024xf32>
    %681 = tpu.matmul %678, %680, %cst_401 {dimension_numbers = #tpu.dot_dimension_numbers<[1], [0], [0], [1], [0, 0, 1, 1], [], []>} : vector<2x8xbf16>, vector<8x1024xbf16>, vector<2x1024xf32> -> vector<2x1024xf32>
    %682 = arith.addf %675, %681 : vector<2x1024xf32>
    %683 = vector.extract_strided_slice %450 {offsets = [0, 1, 0], sizes = [2, 1, 8], strides = [1, 1, 1]} : vector<2x8x8xf32> to vector<2x1x8xf32>
    %684 = vector.shape_cast %683 : vector<2x1x8xf32> to vector<2x8xf32>
    %685 = arith.truncf %684 : vector<2x8xf32> to vector<2x8xbf16>
    %c4_402 = arith.constant 4 : index
    %c1_403 = arith.constant 1 : index
    %c0_404 = arith.constant 0 : index
    %c0_405 = arith.constant 0 : index
    %686 = vector.load %arg6[%c4_402, %c1_403, %c0_404, %c0_405] : memref<5x8x8x1024xbf16, #tpu.memory_space<vmem>>, vector<1x1x8x1024xbf16>
    %687 = vector.shape_cast %686 : vector<1x1x8x1024xbf16> to vector<8x1024xbf16>
    %cst_406 = arith.constant dense<0.000000e+00> : vector<2x1024xf32>
    %688 = tpu.matmul %685, %687, %cst_406 {dimension_numbers = #tpu.dot_dimension_numbers<[1], [0], [0], [1], [0, 0, 1, 1], [], []>} : vector<2x8xbf16>, vector<8x1024xbf16>, vector<2x1024xf32> -> vector<2x1024xf32>
    %689 = arith.addf %682, %688 : vector<2x1024xf32>
    %690 = vector.extract_strided_slice %450 {offsets = [0, 2, 0], sizes = [2, 1, 8], strides = [1, 1, 1]} : vector<2x8x8xf32> to vector<2x1x8xf32>
    %691 = vector.shape_cast %690 : vector<2x1x8xf32> to vector<2x8xf32>
    %692 = arith.truncf %691 : vector<2x8xf32> to vector<2x8xbf16>
    %c4_407 = arith.constant 4 : index
    %c2_408 = arith.constant 2 : index
    %c0_409 = arith.constant 0 : index
    %c0_410 = arith.constant 0 : index
    %693 = vector.load %arg6[%c4_407, %c2_408, %c0_409, %c0_410] : memref<5x8x8x1024xbf16, #tpu.memory_space<vmem>>, vector<1x1x8x1024xbf16>
    %694 = vector.shape_cast %693 : vector<1x1x8x1024xbf16> to vector<8x1024xbf16>
    %cst_411 = arith.constant dense<0.000000e+00> : vector<2x1024xf32>
    %695 = tpu.matmul %692, %694, %cst_411 {dimension_numbers = #tpu.dot_dimension_numbers<[1], [0], [0], [1], [0, 0, 1, 1], [], []>} : vector<2x8xbf16>, vector<8x1024xbf16>, vector<2x1024xf32> -> vector<2x1024xf32>
    %696 = arith.addf %689, %695 : vector<2x1024xf32>
    %697 = vector.extract_strided_slice %450 {offsets = [0, 3, 0], sizes = [2, 1, 8], strides = [1, 1, 1]} : vector<2x8x8xf32> to vector<2x1x8xf32>
    %698 = vector.shape_cast %697 : vector<2x1x8xf32> to vector<2x8xf32>
    %699 = arith.truncf %698 : vector<2x8xf32> to vector<2x8xbf16>
    %c4_412 = arith.constant 4 : index
    %c3_413 = arith.constant 3 : index
    %c0_414 = arith.constant 0 : index
    %c0_415 = arith.constant 0 : index
    %700 = vector.load %arg6[%c4_412, %c3_413, %c0_414, %c0_415] : memref<5x8x8x1024xbf16, #tpu.memory_space<vmem>>, vector<1x1x8x1024xbf16>
    %701 = vector.shape_cast %700 : vector<1x1x8x1024xbf16> to vector<8x1024xbf16>
    %cst_416 = arith.constant dense<0.000000e+00> : vector<2x1024xf32>
    %702 = tpu.matmul %699, %701, %cst_416 {dimension_numbers = #tpu.dot_dimension_numbers<[1], [0], [0], [1], [0, 0, 1, 1], [], []>} : vector<2x8xbf16>, vector<8x1024xbf16>, vector<2x1024xf32> -> vector<2x1024xf32>
    %703 = arith.addf %696, %702 : vector<2x1024xf32>
    %704 = vector.extract_strided_slice %450 {offsets = [0, 4, 0], sizes = [2, 1, 8], strides = [1, 1, 1]} : vector<2x8x8xf32> to vector<2x1x8xf32>
    %705 = vector.shape_cast %704 : vector<2x1x8xf32> to vector<2x8xf32>
    %706 = arith.truncf %705 : vector<2x8xf32> to vector<2x8xbf16>
    %c4_417 = arith.constant 4 : index
    %c4_418 = arith.constant 4 : index
    %c0_419 = arith.constant 0 : index
    %c0_420 = arith.constant 0 : index
    %707 = vector.load %arg6[%c4_417, %c4_418, %c0_419, %c0_420] : memref<5x8x8x1024xbf16, #tpu.memory_space<vmem>>, vector<1x1x8x1024xbf16>
    %708 = vector.shape_cast %707 : vector<1x1x8x1024xbf16> to vector<8x1024xbf16>
    %cst_421 = arith.constant dense<0.000000e+00> : vector<2x1024xf32>
    %709 = tpu.matmul %706, %708, %cst_421 {dimension_numbers = #tpu.dot_dimension_numbers<[1], [0], [0], [1], [0, 0, 1, 1], [], []>} : vector<2x8xbf16>, vector<8x1024xbf16>, vector<2x1024xf32> -> vector<2x1024xf32>
    %710 = arith.addf %703, %709 : vector<2x1024xf32>
    %711 = vector.extract_strided_slice %450 {offsets = [0, 5, 0], sizes = [2, 1, 8], strides = [1, 1, 1]} : vector<2x8x8xf32> to vector<2x1x8xf32>
    %712 = vector.shape_cast %711 : vector<2x1x8xf32> to vector<2x8xf32>
    %713 = arith.truncf %712 : vector<2x8xf32> to vector<2x8xbf16>
    %c4_422 = arith.constant 4 : index
    %c5_423 = arith.constant 5 : index
    %c0_424 = arith.constant 0 : index
    %c0_425 = arith.constant 0 : index
    %714 = vector.load %arg6[%c4_422, %c5_423, %c0_424, %c0_425] : memref<5x8x8x1024xbf16, #tpu.memory_space<vmem>>, vector<1x1x8x1024xbf16>
    %715 = vector.shape_cast %714 : vector<1x1x8x1024xbf16> to vector<8x1024xbf16>
    %cst_426 = arith.constant dense<0.000000e+00> : vector<2x1024xf32>
    %716 = tpu.matmul %713, %715, %cst_426 {dimension_numbers = #tpu.dot_dimension_numbers<[1], [0], [0], [1], [0, 0, 1, 1], [], []>} : vector<2x8xbf16>, vector<8x1024xbf16>, vector<2x1024xf32> -> vector<2x1024xf32>
    %717 = arith.addf %710, %716 : vector<2x1024xf32>
    %718 = vector.extract_strided_slice %450 {offsets = [0, 6, 0], sizes = [2, 1, 8], strides = [1, 1, 1]} : vector<2x8x8xf32> to vector<2x1x8xf32>
    %719 = vector.shape_cast %718 : vector<2x1x8xf32> to vector<2x8xf32>
    %720 = arith.truncf %719 : vector<2x8xf32> to vector<2x8xbf16>
    %c4_427 = arith.constant 4 : index
    %c6_428 = arith.constant 6 : index
    %c0_429 = arith.constant 0 : index
    %c0_430 = arith.constant 0 : index
    %721 = vector.load %arg6[%c4_427, %c6_428, %c0_429, %c0_430] : memref<5x8x8x1024xbf16, #tpu.memory_space<vmem>>, vector<1x1x8x1024xbf16>
    %722 = vector.shape_cast %721 : vector<1x1x8x1024xbf16> to vector<8x1024xbf16>
    %cst_431 = arith.constant dense<0.000000e+00> : vector<2x1024xf32>
    %723 = tpu.matmul %720, %722, %cst_431 {dimension_numbers = #tpu.dot_dimension_numbers<[1], [0], [0], [1], [0, 0, 1, 1], [], []>} : vector<2x8xbf16>, vector<8x1024xbf16>, vector<2x1024xf32> -> vector<2x1024xf32>
    %724 = arith.addf %717, %723 : vector<2x1024xf32>
    %725 = vector.extract_strided_slice %450 {offsets = [0, 7, 0], sizes = [2, 1, 8], strides = [1, 1, 1]} : vector<2x8x8xf32> to vector<2x1x8xf32>
    %726 = vector.shape_cast %725 : vector<2x1x8xf32> to vector<2x8xf32>
    %727 = arith.truncf %726 : vector<2x8xf32> to vector<2x8xbf16>
    %c4_432 = arith.constant 4 : index
    %c7_433 = arith.constant 7 : index
    %c0_434 = arith.constant 0 : index
    %c0_435 = arith.constant 0 : index
    %728 = vector.load %arg6[%c4_432, %c7_433, %c0_434, %c0_435] : memref<5x8x8x1024xbf16, #tpu.memory_space<vmem>>, vector<1x1x8x1024xbf16>
    %729 = vector.shape_cast %728 : vector<1x1x8x1024xbf16> to vector<8x1024xbf16>
    %cst_436 = arith.constant dense<0.000000e+00> : vector<2x1024xf32>
    %730 = tpu.matmul %727, %729, %cst_436 {dimension_numbers = #tpu.dot_dimension_numbers<[1], [0], [0], [1], [0, 0, 1, 1], [], []>} : vector<2x8xbf16>, vector<8x1024xbf16>, vector<2x1024xf32> -> vector<2x1024xf32>
    %731 = arith.addf %724, %730 : vector<2x1024xf32>
    %c0_437 = arith.constant 0 : index
    %c0_438 = arith.constant 0 : index
    %732 = vector.load %arg7[%c0_437, %c0_438] : memref<1x1024xf32, #tpu.memory_space<vmem>>, vector<1x1024xf32>
    %733 = vector.broadcast %732 : vector<1x1024xf32> to vector<2x1024xf32>
    %734 = arith.addf %731, %733 : vector<2x1024xf32>
    %cst_439 = arith.constant 0.000000e+00 : f32
    %735 = vector.broadcast %cst_439 : f32 to vector<2x1024xf32>
    %736 = arith.subf %735, %734 : vector<2x1024xf32>
    %737 = math.exp %736 : vector<2x1024xf32>
    %cst_440 = arith.constant 1.000000e+00 : f32
    %738 = vector.broadcast %cst_440 : f32 to vector<2x1024xf32>
    %739 = arith.addf %738, %737 : vector<2x1024xf32>
    %cst_441 = arith.constant 1.000000e+00 : f32
    %740 = vector.broadcast %cst_441 : f32 to vector<2x1024xf32>
    %741 = arith.divf %740, %739 : vector<2x1024xf32>
    %742 = arith.truncf %741 : vector<2x1024xf32> to vector<2x1024xbf16>
    %c0_442 = arith.constant 0 : index
    %c0_443 = arith.constant 0 : index
    %743 = vector.load %arg8[%c0_442, %c0_443] : memref<1024x128xbf16, #tpu.memory_space<vmem>>, vector<1024x128xbf16>
    %cst_444 = arith.constant dense<0.000000e+00> : vector<2x128xf32>
    %744 = tpu.matmul %742, %743, %cst_444 {dimension_numbers = #tpu.dot_dimension_numbers<[1], [0], [0], [1], [0, 0, 1, 1], [], []>} : vector<2x1024xbf16>, vector<1024x128xbf16>, vector<2x128xf32> -> vector<2x128xf32>
    %c0_445 = arith.constant 0 : index
    %c0_446 = arith.constant 0 : index
    %745 = vector.load %arg9[%c0_445, %c0_446] : memref<1x128xf32, #tpu.memory_space<vmem>>, vector<1x128xf32>
    %746 = vector.broadcast %745 : vector<1x128xf32> to vector<2x128xf32>
    %747 = arith.addf %744, %746 : vector<2x128xf32>
    %c0_447 = arith.constant 0 : index
    %c0_448 = arith.constant 0 : index
    %748 = vector.load %arg10[%c0_447, %c0_448] : memref<2x128xf32, #tpu.memory_space<vmem>>, vector<2x128xf32>
    tpu.vector_store %arg10[%c0_447, %c0_448], %747 {strides = array<i32>} : memref<2x128xf32, #tpu.memory_space<vmem>>, vector<2x128xf32>,
    return
  }
  func.func @transform_0(%arg0: i32) -> (i32, i32, i32) {
    %c0_i32 = arith.constant 0 : i32
    %c0_i32_0 = arith.constant 0 : i32
    %c0_i32_1 = arith.constant 0 : i32
    return %arg0, %c0_i32, %c0_i32_0 : i32, i32, i32
  }
  func.func @transform_1(%arg0: i32) -> (i32, i32) {
    %c0_i32 = arith.constant 0 : i32
    %c0_i32_0 = arith.constant 0 : i32
    %c0_i32_1 = arith.constant 0 : i32
    return %c0_i32, %c0_i32_0 : i32, i32
  }
  func.func @transform_2(%arg0: i32) -> i32 {
    %c0_i32 = arith.constant 0 : i32
    %c0_i32_0 = arith.constant 0 : i32
    return %c0_i32 : i32
  }
  func.func @transform_3(%arg0: i32) -> (i32, i32) {
    %c0_i32 = arith.constant 0 : i32
    %c0_i32_0 = arith.constant 0 : i32
    %c0_i32_1 = arith.constant 0 : i32
    return %c0_i32, %c0_i32_0 : i32, i32
  }
  func.func @transform_4(%arg0: i32) -> i32 {
    %c0_i32 = arith.constant 0 : i32
    %c0_i32_0 = arith.constant 0 : i32
    return %c0_i32 : i32
  }
  func.func @transform_5(%arg0: i32) -> (i32, i32, i32, i32) {
    %c0_i32 = arith.constant 0 : i32
    %c0_i32_0 = arith.constant 0 : i32
    %c0_i32_1 = arith.constant 0 : i32
    %c0_i32_2 = arith.constant 0 : i32
    %c0_i32_3 = arith.constant 0 : i32
    return %c0_i32, %c0_i32_0, %c0_i32_1, %c0_i32_2 : i32, i32, i32, i32
  }
  func.func @transform_6(%arg0: i32) -> (i32, i32) {
    %c0_i32 = arith.constant 0 : i32
    %c0_i32_0 = arith.constant 0 : i32
    %c0_i32_1 = arith.constant 0 : i32
    return %c0_i32, %c0_i32_0 : i32, i32
  }
  func.func @transform_7(%arg0: i32) -> (i32, i32) {
    %c0_i32 = arith.constant 0 : i32
    %c0_i32_0 = arith.constant 0 : i32
    %c0_i32_1 = arith.constant 0 : i32
    return %c0_i32, %c0_i32_0 : i32, i32
  }
  func.func @transform_8(%arg0: i32) -> (i32, i32) {
    %c0_i32 = arith.constant 0 : i32
    %c0_i32_0 = arith.constant 0 : i32
    %c0_i32_1 = arith.constant 0 : i32
    return %c0_i32, %c0_i32_0 : i32, i32
  }
  func.func @transform_9(%arg0: i32) -> (i32, i32) {
    %c0_i32 = arith.constant 0 : i32
    %c0_i32_0 = arith.constant 0 : i32
    return %arg0, %c0_i32 : i32, i32
  }
}

</mosaic_0001>

<bundles_post_ra>
// kernel: net_forward.1
= control target key start
LH: loop header
LB: loop body
LE: loop exit
PB: predicated region body
PF: predicated region fallthrough
CT: control target
= control target key end

     0   :  { %14 = vsyncpa [#allocation5], 0  ;;  %s15177_s0 = inlined_call_operand.vmem [shape: f32[2,28,28], index: 0, kind: input, shape index: {}]   ;;  %s15178_s1 = inlined_call_operand.vmem [shape: f32[2,9], index: 1, kind: input, shape index: {}]   ;;  %s15179_s2 = inlined_call_operand.vmem [shape: f32[2], index: 2, kind: input, shape index: {}]   ;;  %s15180_s3 = inlined_call_operand.vmem [shape: f32[5,8], index: 3, kind: input, shape index: {}]   ;;  %s15181_s4 = inlined_call_operand.vmem [shape: f32[5], index: 4, kind: input, shape index: {}]   ;;  %s15182_s5 = inlined_call_operand.hbm [shape: bf16[5,8,8,1024], index: 5, kind: input, shape index: {}]   ;;  %s15183_s6 = inlined_call_operand.vmem [shape: f32[1,1024], index: 6, kind: input, shape index: {}]   ;;  %s15184_s7 = inlined_call_operand.hbm [shape: bf16[1024,128], index: 7, kind: input, shape index: {}]   ;;  %s15185_s8 = inlined_call_operand.vmem [shape: f32[1,128], index: 8, kind: input, shape index: {}]   ;;  %s15186_s9 = inlined_call_operand.hbm [shape: f32[2,128], index: 9, kind: output, shape index: {}]  }
   0x1   :  { %15 = vsyncpa [#allocation7], 0 }
   0x2   :  { %16 = vsyncpa [#allocation10], 0 }
   0x3   :  { %17 = vsyncpa [#allocation3], 0 }
   0x4   :  { %18 = vsyncpa [#allocation13], 0  ;;  %s36_s11 = sshll.u32 %s15179_s2, 4  ;;  %s37_s11 = int_to_ptr.vmem [resolvable:$true] %s36_s11 }
   0x5   :  { %19 = vsyncpa [#allocation4], 0  ;;  %s27_s14 = sshll.u32 %s15178_s1, 4  ;;  %s11344_s15 = smov [#allocation6]   ;;  %s28_s14 = int_to_ptr.vmem [resolvable:$true] %s27_s14 }
   0x6   :  { %39 = dma.vmem_to_smem %s37_s11, 16, %s11344_s15, [#allocation7]  }
   0x7   :  { %s11345_s16 = smov [#allocation2]   ;;  %s45_s19 = sshll.u32 %s15180_s3, 4  ;;  %s46_s19 = int_to_ptr.vmem [resolvable:$true] %s45_s19 }
   0x8   :  { %30 = dma.vmem_to_smem %s28_s14, 32, %s11345_s16, [#allocation5]  }
   0x9   :  { %s54_s2 = sshll.u32 %s15181_s4, 4  ;;  %s11346_s22 = smov [#allocation8]   ;;  %s55_s2 = int_to_ptr.vmem [resolvable:$true] %s54_s2 }
   0xa   :  { %48 = dma.vmem_to_smem %s46_s19, 128, %s11346_s22, [#allocation7]  }
   0xb   :  { %s11347_s23 = smov [#allocation9]   ;;  %s62_s25 = sshll.u32 %s15182_s5, 4  ;;  %s63_s25 = int_to_ptr.hbm [resolvable:$true] %s62_s25 }
   0xc   :  { %57 = dma.vmem_to_smem %s55_s2, 16, %s11347_s23, [#allocation10]  }
   0xd   :  { %s11348_s26 = smov [#allocation11]   ;;  %s77_s29 = sshll.u32 %s15184_s7, 4  ;;  %s78_s29 = int_to_ptr.hbm [resolvable:$true] %s77_s29 }
   0xe   :  { %s64_s27 = sshll.u32 %s11348_s26, 4  ;;  %s11349_s30 = smov 512   ;;  %s65_s27 = int_to_ptr.vmem [resolvable:$true] %s64_s27 }
   0xf   :  { %s11350_s10 = smov 32   ;;  %s11351_s4 = smov [#allocation12]  }
  0x10   :  { %70 = dma.hbm_to_vmem [thread:$0]  %s63_s25, 20480, %s65_s27, [#allocation3], %s11349_s30, %s11349_s30, %s11350_s10  }
  0x11   :  { %s79_s11 = sshll.u32 %s11351_s4, 4  ;;  %s11352_s12 = smov 64   ;;  %s80_s11 = int_to_ptr.vmem [resolvable:$true] %s79_s11 }
  0x12   :  { %s11353_s13 = smov 4  }
  0x13   :  { %85 = dma.hbm_to_vmem [thread:$0]  %s78_s29, 8192, %s80_s11, [#allocation13], %s11352_s12, %s11352_s12, %s11353_s13  }
  0x14   :  { %11332 = dma.done.wait [#allocation5], 32  }
  0x15   :  { %11333 = vsyncadd [#allocation5], 4294967264 }
  0x16   :  { %11334 = dma.done.wait [#allocation7], 144  }
  0x17   :  { %11335 = vsyncadd [#allocation7], 4294967152 }
  0x18   :  { %11336 = dma.done.wait [#allocation10], 16  }
  0x19   :  { %11337 = vsyncadd [#allocation10], 4294967280 }
  0x1a   :  { %11338 = dma.done.wait [#allocation3], 20480  }
  0x1b   :  { %11339 = vsyncadd [#allocation3], 4294946816 }
  0x1c   :  { %11340 = dma.done.wait [#allocation13], 8192  }
  0x1d   :  { %11341 = vsyncadd [#allocation13], 4294959104 }
  0x1e   :  { %112 = sfence }
  0x1f   :  { %s10216_s5 = sld [smem:[#allocation2 + $0x2]]  ;;  %v11430_v0 = vld [vmem:[%s15177_s0] sm:$0xff]  ;;  %s11354_s19 = smov 126   ;;  %v11460_v9 = vld [vmem:[%s15177_s0 + $0x8] sm:$0xff]  ;;  %v11529_v29 = vld [vmem:[%s15177_s0 + $0x10] sm:$0xff]  ;;  %vm944_vm0 = vcmask 1041408  }
  0x20   :  { %s10215_s7 = sld [smem:[#allocation2 + $0x1]]  ;;  %v11437_v2 = vld [vmem:[%s15177_s0 + $0x1] sm:$0xff]  ;;  %s11355_s20 = smov 127   ;;  %v11503_v22 = vld [vmem:[%s15177_s0 + $0x9] sm:$0xff]  ;;  %v11573_v42 = vld [vmem:[%s15177_s0 + $0x11] sm:$0xff]  ;;  %vm931_vm9 = vcmask 211968  }
  0x21   :  { %s10218_s14 = sld [smem:[#allocation2 + $0x4]]  ;;  %v11454_v8 = vld [vmem:[%s15177_s0 + $0x20] sm:$0xff]  ;;  %v11481_v15 = vld [vmem:[%s15177_s0 + $0x28] sm:$0xff]  ;;  %v11551_v35 = vld [vmem:[%s15177_s0 + $0x30] sm:$0xff]  ;;  %vm1654_vm14 = vcmask 1045504   ;;  %vm1647_vm15 = vcmask 113664  }
  0x22   :  { %s10219_s22 = sld [smem:[#allocation2 + $0x5]]  ;;  %v11476_v14 = vld [vmem:[%s15177_s0 + $0x21] sm:$0xff]  ;;  %v11537_v31 = vld [vmem:[%s15177_s0 + $0x29] sm:$0xff]  ;;  %v11597_v48 = vld [vmem:[%s15177_s0 + $0x18] sm:$0x3] }
  0x23   :  { %s10221_s28 = sld [smem:[#allocation2 + $0x7]]  ;;  %v11509_v23 = vld [vmem:[%s15177_s0 + $0x2] sm:$0xff]  ;;  %v11579_v43 = vld [vmem:[%s15177_s0 + $0xa] sm:$0xff]  ;;  %v11617_v53 = vld [vmem:[%s15177_s0 + $0x38] sm:$0x3] }
  0x24   :  { %s10222_s4 = sld [smem:[#allocation2 + $0x8]]  ;;  %v11516_v25 = vld [vmem:[%s15177_s0 + $0x22] sm:$0xff]  ;;  %v11584_v44 = vld [vmem:[%s15177_s0 + $0x2a] sm:$0xff]  ;;  %v11639_v60 = vld [vmem:[%s15177_s0 + $0x19] sm:$0x3] }
  0x25   :  { %v11432_v1 = vstv %s10216_s5  ;;  %v11603_v49 = vld [vmem:[%s15177_s0 + $0x31] sm:$0xff]  ;;  %s10224_s16 = sld [smem:[#allocation2 + $0x81]] }
  0x26   :  { %v192_v3 = vmul.f32 %v11432_v1, %v11430_v0  ;;  %v11441_v4 = vstv %s10215_s7  ;;  %v196_v10 = vmul.f32 %v11432_v1, %v11454_v8  ;;  %v193_v20 = vmul.f32 %v11432_v1, %v11460_v9  ;;  %v11644_v61 = vld [vmem:[%s15177_s0 + $0x12] sm:$0xff]  ;;  %s11718_s17 = sld [smem:[#allocation2]] }
  0x27   :  { %v142_v5 = vmul.f32 %v11441_v4, %v11430_v0  ;;  %v11445_v6 = vstv %s10218_s14  ;;  %v146_v11 = vmul.f32 %v11441_v4, %v11454_v8  ;;  %v143_v12 = vmul.f32 %v11441_v4, %v11460_v9  ;;  %v11650_v62 = vld [vmem:[%s15177_s0 + $0x32] sm:$0xff]  ;;  %s11732_s18 = sld [smem:[#allocation2 + $0x84]] }
  0x28   :  { %208 = vrot.lane.b32.xlu1 %v192_v3, %s11354_s19  ;;  %v268_v7 = vmul.f32 %v11445_v6, %v11437_v2  ;;  %v11470_v13 = vstv %s10219_s22  ;;  %v272_v17 = vmul.f32 %v11445_v6, %v11476_v14  ;;  %v147_v18 = vmul.f32 %v11441_v4, %v11481_v15  ;;  %s11739_s21 = sld [smem:[#allocation2 + $0x82]] }
  0x29   :  { %158 = vrot.lane.b32.xlu0 %v142_v5, %s11355_s20  ;;  %v318_v16 = vmul.f32 %v11470_v13, %v11437_v2  ;;  %v322_v19 = vmul.f32 %v11470_v13, %v11476_v14  ;;  %v197_v21 = vmul.f32 %v11432_v1, %v11481_v15  ;;  %v11511_v24 = vstv %s10221_s28  ;;  %v11665_v5 = vld [vmem:[%s15177_s0 + $0x39] sm:$0x3]  ;;  %s10217_s2 = sld [smem:[#allocation2 + $0x3]] }
  0x2a   :  { %284 = vrot.lane.b32.xlu2 %v268_v7, %s11355_s20  ;;  %v269_v26 = vmul.f32 %v11445_v6, %v11503_v22  ;;  %v394_v27 = vmul.f32 %v11511_v24, %v11509_v23  ;;  %v398_v28 = vmul.f32 %v11511_v24, %v11516_v25  ;;  %v11532_v30 = vstv %s10222_s4  ;;  %s10228_s22 = sld [smem:[#allocation2 + $0x85]] }
  0x2b   :  { %v144_v32 = vmul.f32 %v11441_v4, %v11529_v29  ;;  %v444_v33 = vmul.f32 %v11532_v30, %v11509_v23  ;;  %v273_v34 = vmul.f32 %v11445_v6, %v11537_v31  ;;  %v448_v36 = vmul.f32 %v11532_v30, %v11516_v25  ;;  %s10220_s23 = sld [smem:[#allocation2 + $0x6]] }
  0x2c   :  { %v319_v37 = vmul.f32 %v11470_v13, %v11503_v22  ;;  %v148_v38 = vmul.f32 %v11441_v4, %v11551_v35  ;;  %v323_v39 = vmul.f32 %v11470_v13, %v11537_v31  ;;  %v194_v40 = vmul.f32 %v11432_v1, %v11529_v29  ;;  %s10230_s1 = sld [smem:[#allocation2 + $0x87]] }
  0x2d   :  { %v198_v41 = vmul.f32 %v11432_v1, %v11551_v35  ;;  %v270_v45 = vmul.f32 %v11445_v6, %v11573_v42  ;;  %v395_v46 = vmul.f32 %v11511_v24, %v11579_v43  ;;  %v399_v47 = vmul.f32 %v11511_v24, %v11584_v44  ;;  %s492_s24 = sld [smem:[#allocation6]] }
  0x2e   :  { %v145_v50 = vmul.f32 %v11441_v4, %v11597_v48  ;;  %v445_v51 = vmul.f32 %v11532_v30, %v11579_v43  ;;  %v274_v52 = vmul.f32 %v11445_v6, %v11603_v49  ;;  %v449_v54 = vmul.f32 %v11532_v30, %v11584_v44  ;;  %s10231_s25 = sld [smem:[#allocation2 + $0x88]] }
  0x2f   :  { %v320_v55 = vmul.f32 %v11470_v13, %v11573_v42  ;;  %v149_v56 = vmul.f32 %v11441_v4, %v11617_v53  ;;  %v324_v57 = vmul.f32 %v11470_v13, %v11603_v49  ;;  %v195_v58 = vmul.f32 %v11432_v1, %v11597_v48  ;;  %s10223_s26 = sld [smem:[#allocation2 + $0x80]] }
  0x30   :  { %216 = vrot.lane.b32.xlu1 %v196_v10, %s11354_s19  ;;  %v199_v59 = vmul.f32 %v11432_v1, %v11617_v53  ;;  %v271_v63 = vmul.f32 %v11445_v6, %v11639_v60  ;;  %v396_v3 = vmul.f32 %v11511_v24, %v11644_v61  ;;  %v400_v4 = vmul.f32 %v11511_v24, %v11650_v62  ;;  %s10226_s27 = sld [smem:[#allocation2 + $0x83]] }
  0x31   :  { %166 = vrot.lane.b32.xlu0 %v146_v11, %s11355_s20  ;;  %v275_v7 = vmul.f32 %v11445_v6, %v11665_v5  ;;  %v446_v11 = vmul.f32 %v11532_v30, %v11644_v61  ;;  %v450_v6 = vmul.f32 %v11532_v30, %v11650_v62  ;;  %s12277_s5 = sld [smem:[#allocation6 + $0x1]] }
  0x32   :  { %160 = vrot.lane.b32.xlu2 %v143_v12, %s11355_s20  ;;  %v321_v12 = vmul.f32 %v11470_v13, %v11639_v60  ;;  %s12616_s12 = sld [smem:[#allocation8 + $0x80]] }
  0x33   :  { %s12618_s13 = sld [smem:[#allocation8 + $0x100]] }
  0x34   :  { %s12624_s7 = sld [smem:[#allocation8 + $0x200]] }
  0x35   :  { %s12628_s14 = sld [smem:[#allocation8 + $0x1]] }
  0x36   :  { %s12630_s15 = sld [smem:[#allocation8 + $0x81]] }
  0x37   :  { %s12710_s28 = sld [smem:[#allocation8 + $0x204]] }
  0x38   :  { %334 = vrot.lane.b32.xlu1 %v318_v16, %s11354_s19  ;;  %v325_v16 = vmul.f32 %v11470_v13, %v11665_v5  ;;  %v11699_v13 = vld [vmem:[%s15177_s0 + $0x3a] sm:$0x3]  ;;  %s10425_s3 = sld [smem:[#allocation8 + $0x2]] }
  0x39   :  { %292 = vrot.lane.b32.xlu0 %v272_v17, %s11355_s20  ;;  %s10426_s29 = sld [smem:[#allocation8 + $0x3]] }
  0x3a   :  { %168 = vrot.lane.b32.xlu2 %v147_v18, %s11355_s20  ;;  %v11688_v18 = vld [vmem:[%s15177_s0 + $0x1a] sm:$0x3]  ;;  %s10427_s30 = sld [smem:[#allocation8 + $0x4]] }
  0x3b   :  { %s12760_s10 = sld [smem:[#allocation8 + $0x5]] }
  0x3c   :  { %s12762_s4 = sld [smem:[#allocation8 + $0x85]] }
  0x3d   :  { %s12764_s11 = sld [smem:[#allocation8 + $0x105]] }
  0x40   :  { %342 = vrot.lane.b32.xlu1 %v322_v19, %s11354_s19  ;;  %v397_v19 = vmul.f32 %v11511_v24, %v11688_v18 }
  0x41   :  { %210 = vrot.lane.b32.xlu0 %v193_v20, %s11354_s19  ;;  %v882_v20 = vlaneseq }
  0x42   :  { %218 = vrot.lane.b32.xlu2 %v197_v21, %s11354_s19 }
  0x48   :  { %286 = vrot.lane.b32.xlu1 %v269_v26, %s11355_s20 }
  0x49   :  { %410 = vrot.lane.b32.xlu0 %v394_v27, %s11355_s20  ;;  %v11704_v27 = vand.u32 127, %v882_v20 }
  0x4a   :  { %418 = vrot.lane.b32.xlu2 %v398_v28, %s11355_s20  ;;  %v447_v28 = vmul.f32 %v11532_v30, %v11688_v18 }
  0x50   :  { %162 = vrot.lane.b32.xlu1 %v144_v32, %s11355_s20  ;;  %v11708_v32 = vshrl.u32 %v882_v20, 7  ;;  %v11850_v20 = vstv %s10217_s2  ;;  %s10442_s2 = sld [smem:[#allocation8 + $0x102]] }
  0x51   :  { %460 = vrot.lane.b32.xlu0 %v444_v33, %s11354_s19  ;;  %v401_v33 = vmul.f32 %v11511_v24, %v11699_v13  ;;  %v15189_v24 = vmov 0.0  }
  0x52   :  { %294 = vrot.lane.b32.xlu2 %v273_v34, %s11355_s20  ;;  %v11713_v34 = vmul.u32 2, %v11704_v27 }
  0x54   :  { %15201 = vst [vmem:[#allocation21_spill] sm:$0xff] %v11713_v34  ;;  %vm11809_vm8 = vcmp.eq.s32.totalorder %v11708_v32, %v11713_v34 }
  0x58   :  { %468 = vrot.lane.b32.xlu1 %v448_v36, %s11354_s19  ;;  %v451_v36 = vmul.f32 %v11532_v30, %v11699_v13 }
  0x59   :  { %336 = vrot.lane.b32.xlu0 %v319_v37, %s11354_s19  ;;  %v886_v37 = vadd.s32 24, %v11708_v32 }
  0x5a   :  { %170 = vrot.lane.b32.xlu2 %v148_v38, %s11355_s20 }
  0x5b   :  { %vm906_vm1 = vcmp.eq.s32.totalorder %v886_v37, %v11713_v34 }
  0x5c   :  { %v11730_v30 = vsel %vm906_vm1, 1.0, %v15189_v24 }
  0x5d   :  { %15202 = vst [vmem:[#allocation22_spill] sm:$0xff] %v11730_v30  ;;  %10264 = vmatpush.msk.msra.mxu2 %vm944_vm0, %v11730_v30  ;;  %10272 = vmatpush.msk.msra.mxu3 %vm944_vm0, %v11730_v30 }
  0x60   :  { %344 = vrot.lane.b32.xlu1 %v323_v39, %s11354_s19  ;;  %v11723_v39 = vadd.s32 4294967295, %v11713_v34 }
  0x61   :  { %212 = vrot.lane.b32.xlu0 %v194_v40, %s11354_s19 }
  0x62   :  { %220 = vrot.lane.b32.xlu2 %v198_v41, %s11354_s19  ;;  %vm894_vm2 = vcmp.eq.s32.totalorder %v886_v37, %v11723_v39  ;;  %v11736_v41 = vstv %s10224_s16  ;;  %vm11803_vm7 = vcmp.eq.s32.totalorder %v11708_v32, %v11723_v39  ;;  %v250_v37 = vmul.f32 %v11850_v20, %v11437_v2  ;;  %s12632_s16 = sld [smem:[#allocation8 + $0x101]] }
  0x68   :  { %288 = vrot.lane.b32.xlu1 %v270_v45, %s11355_s20  ;;  %v11742_v45 = vsel %vm894_vm2, 1.0, %v15189_v24  ;;  %v11873_v24 = vstv %s10220_s23  ;;  %s10460_s23 = sld [smem:[#allocation8 + $0x202]] }
  0x69   :  { %412 = vrot.lane.b32.xlu0 %v395_v46, %s11355_s20  ;;  %10248 = vmatpush.msk.msra.mxu0 %vm944_vm0, %v11742_v45 }
  0x6a   :  { %420 = vrot.lane.b32.xlu2 %v399_v47, %s11355_s20  ;;  %v11749_v47 = vadd.s32 16, %v11708_v32  ;;  %10256 = vmatpush.msk.msra.mxu1 %vm944_vm0, %v11742_v45 }
  0x6c   :  { %vm893_vm3 = vcmp.eq.s32.totalorder %v11749_v47, %v11723_v39  ;;  %vm905_vm4 = vcmp.eq.s32.totalorder %v11749_v47, %v11713_v34 }
  0x70   :  { %164 = vrot.lane.b32.xlu1 %v145_v50, %s11355_s20  ;;  %v534_v50 = vmul.f32 %v11736_v41, %v11454_v8 }
  0x71   :  { %462 = vrot.lane.b32.xlu0 %v445_v51, %s11354_s19  ;;  %v11756_v51 = vadd.s32 8, %v11708_v32 }
  0x72   :  { %296 = vrot.lane.b32.xlu2 %v274_v52, %s11355_s20  ;;  %v530_v52 = vmul.f32 %v11736_v41, %v11430_v0 }
  0x73   :  { %vm11776_vm5 = vcmp.eq.s32.totalorder %v11756_v51, %v11723_v39  ;;  %vm11782_vm6 = vcmp.eq.s32.totalorder %v11756_v51, %v11713_v34 }
  0x78   :  { %470 = vrot.lane.b32.xlu1 %v449_v54, %s11354_s19  ;;  %v15187_v54 = vmov 1.0  }
  0x79   :  { %338 = vrot.lane.b32.xlu0 %v320_v55, %s11354_s19  ;;  %10249 = vmatpush.msk.msra.mxu0 %vm893_vm3, %v15187_v54 }
  0x7a   :  { %172 = vrot.lane.b32.xlu2 %v149_v56, %s11355_s20  ;;  %10265 = vmatpush.msk.msra.mxu2 %vm905_vm4, %v15187_v54  ;;  %v15205_v56 = vmov 0 }
  0x7b   :  { %v15206_v56 = vsel %vm11782_vm6, 4294967295, %v15205_v56  ;;  %10257 = vmatpush.msk.msra.mxu1 %vm893_vm3, %v15187_v54  ;;  %10273 = vmatpush.msk.msra.mxu3 %vm905_vm4, %v15187_v54 }
  0x7c   :  { %15207 = vst [vmem:[#allocation23_spill] sm:$0xff] %v15206_v56  ;;  %10250 = vmatpush.msk.msra.mxu0 %vm11776_vm5, %v15187_v54  ;;  %10266 = vmatpush.msk.msra.mxu2 %vm11782_vm6, %v15187_v54 }
  0x7d   :  { %10258 = vmatpush.msk.msra.mxu1 %vm11776_vm5, %v15187_v54  ;;  %10274 = vmatpush.msk.msra.mxu3 %vm11782_vm6, %v15187_v54 }
  0x7e   :  { %10251 = vmatpush.msk.msra.mxu0 %vm11803_vm7, %v15187_v54  ;;  %10267 = vmatpush.msk.msra.mxu2 %vm11809_vm8, %v15187_v54 }
  0x7f   :  { %10259 = vmatpush.msk.msra.mxu1 %vm11803_vm7, %v15187_v54  ;;  %10275 = vmatpush.msk.msra.mxu3 %vm11809_vm8, %v15187_v54 }
  0x80   :  { %346 = vrot.lane.b32.xlu1 %v324_v57, %s11354_s19  ;;  %v11787_v57 = vstv %s11718_s17  ;;  %s12634_s17 = sld [smem:[#allocation8 + $0x181]] }
  0x81   :  { %214 = vrot.lane.b32.xlu0 %v195_v58, %s11354_s19  ;;  %v15208_v58 = vmov 0 }
  0x82   :  { %222 = vrot.lane.b32.xlu2 %v199_v59, %s11354_s19  ;;  %v15209_v58 = vsel %vm11803_vm7, 4294967295, %v15208_v58  ;;  %v15211_v59 = vmov 0 }
  0x83   :  { %15210 = vst [vmem:[#allocation24_spill] sm:$0xff] %v15209_v58  ;;  %v15212_v59 = vsel %vm11809_vm8, 4294967295, %v15211_v59 }
  0x84   :  { %v11654_v1 = vpop.permute.xlu2 %284  ;;  %15213 = vst [vmem:[#allocation25_spill] sm:$0xff] %v15212_v59 }
  0x88   :  { %290 = vrot.lane.b32.xlu1 %v271_v63, %s11355_s20 }
  0x89   :  { %414 = vrot.lane.b32.xlu0 %v396_v3, %s11355_s20  ;;  %v11817_v3 = vstv %s11732_s18  ;;  %s12636_s18 = sld [smem:[#allocation8 + $0x201]] }
  0x8a   :  { %422 = vrot.lane.b32.xlu2 %v400_v4, %s11355_s20  ;;  %v124_v4 = vmul.f32 %v11787_v57, %v11430_v0  ;;  %v652_v54 = vmul.f32 %v11817_v3, %v11476_v14 }
  0x8c   :  { %v11670_v10 = vpop.permute.xlu2 %160 }
  0x90   :  { %298 = vrot.lane.b32.xlu1 %v275_v7, %s11355_s20 }
  0x91   :  { %464 = vrot.lane.b32.xlu0 %v446_v11, %s11354_s19  ;;  %v11825_v11 = vstv %s11739_s21  ;;  %s10433_s21 = sld [smem:[#allocation8 + $0x82]] }
  0x92   :  { %340 = vrot.lane.b32.xlu2 %v321_v12, %s11354_s19 }
  0x94   :  { %v11683_v17 = vpop.permute.xlu2 %168 }
  0x98   :  { %348 = vrot.lane.b32.xlu1 %v325_v16, %s11354_s19  ;;  %v648_v16 = vmul.f32 %v11817_v3, %v11437_v2 }
  0x99   :  { %472 = vrot.lane.b32.xlu0 %v450_v6, %s11354_s19  ;;  %v584_v6 = vmul.f32 %v11825_v11, %v11454_v8 }
  0x9a   :  { %v11694_v21 = vpop.permute.xlu1 %208  ;;  %416 = vrot.lane.b32.xlu2 %v397_v19, %s11355_s20 }
  0x9b   :  { %v11702_v26 = vpop.permute.xlu0 %158 }
  0x9c   :  { %v11720_v38 = vpop.permute.xlu2 %218  ;;  %v182_v19 = vadd.f32 %v11702_v26, %v124_v4 }
  0xa0   :  { %466 = vrot.lane.b32.xlu1 %v447_v28, %s11354_s19  ;;  %v128_v28 = vmul.f32 %v11787_v57, %v11454_v8 }
  0xa1   :  { %424 = vrot.lane.b32.xlu0 %v401_v33, %s11355_s20  ;;  %v11856_v33 = vstv %s10228_s22  ;;  %s10451_s22 = sld [smem:[#allocation8 + $0x182]] }
  0xa2   :  { %v11734_v40 = vpop.permute.xlu1 %216  ;;  %474 = vrot.lane.b32.xlu2 %v451_v36, %s11354_s19  ;;  %v232_v36 = vadd.f32 %v11694_v21, %v182_v19  ;;  %v698_v4 = vmul.f32 %v11856_v33, %v11437_v2  ;;  %v254_v19 = vmul.f32 %v11850_v20, %v11476_v14 }
  0xa3   :  { %v167_v46 = vpop.permute.xlu0 %166 }
  0xa4   :  { %v11813_v63 = vpop.permute.xlu2 %418 }
  0xa8   :  { %554 = vrot.lane.b32.xlu1 %v534_v50, %s11355_s20 }
  0xa9   :  { %546 = vrot.lane.b32.xlu0 %v530_v52, %s11355_s20 }
  0xaa   :  { %v335_v7 = vpop.permute.xlu1 %334 }
  0xab   :  { %v293_v12 = vpop.permute.xlu0 %292 }
  0xac   :  { %v11861_v52 = vpop.permute.xlu2 %294 }
  0xb0   :  { %664 = vrot.lane.b32.xlu1 %v648_v16, %s11355_s20  ;;  %v186_v16 = vadd.f32 %v167_v46, %v128_v28 }
  0xb1   :  { %604 = vrot.lane.b32.xlu0 %v584_v6, %s11354_s19  ;;  %v258_v6 = vadd.f32 %v250_v37, %v232_v36  ;;  %v376_v36 = vmul.f32 %v11873_v24, %v11509_v23  ;;  %v580_v37 = vmul.f32 %v11825_v11, %v11430_v0 }
  0xb2   :  { %v343_v50 = vpop.permute.xlu1 %342  ;;  %v236_v21 = vadd.f32 %v11734_v40, %v186_v16  ;;  %v702_v40 = vmul.f32 %v11856_v33, %v11476_v14 }
  0xb3   :  { %v11863_v26 = vpop.permute.xlu0 %210  ;;  %v308_v59 = vadd.f32 %v11654_v1, %v258_v6  ;;  %v581_v1 = vmul.f32 %v11825_v11, %v11460_v9  ;;  %596 = vrot.lane.b32.xlu2 %v580_v37, %s11354_s19 }
  0xb4   :  { %v11885_v16 = vpop.permute.xlu2 %170 }
  0xb5   :  { %v358_v28 = vadd.f32 %v335_v7, %v308_v59  ;;  %v380_v59 = vmul.f32 %v11873_v24, %v11516_v25 }
  0xb7   :  { %v384_v6 = vadd.f32 %v376_v36, %v358_v28 }
  0xb8   :  { %714 = vrot.lane.b32.xlu1 %v698_v4, %s11354_s19  ;;  %v262_v4 = vadd.f32 %v254_v19, %v236_v21  ;;  %v11896_v21 = vstv %s10230_s1  ;;  %v11898_v19 = vstv %s492_s24  ;;  %s12696_s1 = sld [smem:[#allocation8 + $0x83]] }
  0xb9   :  { %672 = vrot.lane.b32.xlu0 %v652_v54, %s11355_s20  ;;  %v766_v36 = vmul.f32 %v11896_v21, %v11509_v23  ;;  %s12698_s24 = sld [smem:[#allocation8 + $0x103]] }
  0xba   :  { %v11877_v56 = vpop.permute.xlu1 %286  ;;  %v312_v54 = vadd.f32 %v293_v12, %v262_v4  ;;  %v649_v12 = vmul.f32 %v11817_v3, %v11503_v22  ;;  %v531_v4 = vmul.f32 %v11736_v41, %v11460_v9 }
  0xbb   :  { %v411_v46 = vpop.permute.xlu0 %410 }
  0xbc   :  { %v362_v7 = vadd.f32 %v343_v50, %v312_v54  ;;  %v434_v34 = vadd.f32 %v411_v46, %v384_v6  ;;  %v11914_v6 = vstv %s10231_s25  ;;  %548 = vrot.lane.b32.xlu2 %v531_v4, %s11355_s20  ;;  %s12700_s25 = sld [smem:[#allocation8 + $0x183]] }
  0xbe   :  { %v388_v28 = vadd.f32 %v380_v59, %v362_v7  ;;  %v532_v59 = vmul.f32 %v11736_v41, %v11529_v29 }
  0xc0   :  { %722 = vrot.lane.b32.xlu1 %v702_v40, %s11354_s19  ;;  %v11905_v40 = vpop.permute.xlu2 %220 }
  0xc1   :  { %598 = vrot.lane.b32.xlu0 %v581_v1, %s11354_s19 }
  0xc2   :  { %v11894_v30 = vpop.permute.xlu1 %162 }
  0xc3   :  { %v461_v58 = vpop.permute.xlu0 %460 }
  0xc4   :  { %v484_v37 = vadd.f32 %v461_v58, %v434_v34  ;;  %v438_v34 = vadd.f32 %v11813_v63, %v388_v28  ;;  %v125_v63 = vmul.f32 %v11787_v57, %v11460_v9 }
  0xc6   :  { %v494_v50 = vadd.f32 %v11898_v19, %v484_v37  ;;  %v816_v37 = vmul.f32 %v11914_v6, %v11509_v23 }
  0xc8   :  { %v502_v46 = vmax.f32 %v494_v50, 0.0  ;;  %666 = vrot.lane.b32.xlu1 %v649_v12, %s11355_s20  ;;  %v129_v12 = vmul.f32 %v11787_v57, %v11481_v15  ;;  %v421_v50 = vpop.permute.xlu2 %420 }
  0xc9   :  { %782 = vrot.lane.b32.xlu0 %v766_v36, %s11355_s20  ;;  %v535_v36 = vmul.f32 %v11736_v41, %v11481_v15 }
  0xca   :  { %10252 = vmatmul.msk.f32.vlgmr.msra.gmra.mxu0 %vm931_vm9, %v502_v46  ;;  %10268 = vmatmul.msk.f32.vlgmr.msra.gmra.mxu2 %vm931_vm9, %v502_v46  ;;  %v469_v58 = vpop.permute.xlu1 %468  ;;  %v183_v46 = vadd.f32 %v11670_v10, %v125_v63  ;;  %v187_v23 = vadd.f32 %v11683_v17, %v129_v12  ;;  %v699_v10 = vmul.f32 %v11856_v33, %v11503_v22 }
  0xcb   :  { %v488_v1 = vadd.f32 %v469_v58, %v438_v34  ;;  %v337_v54 = vpop.permute.xlu0 %336  ;;  %556 = vrot.lane.b32.xlu2 %v535_v36, %s11355_s20  ;;  %v255_v17 = vmul.f32 %v11850_v20, %v11537_v31  ;;  %v585_v63 = vmul.f32 %v11825_v11, %v11481_v15 }
  0xcc   :  { %v233_v58 = vadd.f32 %v11863_v26, %v183_v46 }
  0xcd   :  { %v498_v7 = vadd.f32 %v11898_v19, %v488_v1  ;;  %v251_v1 = vmul.f32 %v11850_v20, %v11503_v22 }
  0xcf   :  { %v506_v28 = vmax.f32 %v498_v7, 0.0  ;;  %v237_v7 = vadd.f32 %v11720_v38, %v187_v23  ;;  %v377_v23 = vmul.f32 %v11873_v24, %v11579_v43 }
  0xd0   :  { %550 = vrot.lane.b32.xlu1 %v532_v59, %s11355_s20  ;;  %v820_v59 = vmul.f32 %v11914_v6, %v11516_v25  ;;  %v11954_v36 = vpop.permute.xlu2 %296 }
  0xd1   :  { %10260 = vmatmul.msk.f32.vlgmr.msra.gmra.mxu1 %vm931_vm9, %v506_v28  ;;  %10276 = vmatmul.msk.f32.vlgmr.msra.gmra.mxu3 %vm931_vm9, %v506_v28  ;;  %v263_v28 = vadd.f32 %v255_v17, %v237_v7 }
  0xd2   :  { %v345_v4 = vpop.permute.xlu1 %344  ;;  %832 = vrot.lane.b32.xlu0 %v816_v37, %s11354_s19  ;;  %v259_v37 = vadd.f32 %v251_v1, %v233_v58  ;;  %v703_v58 = vmul.f32 %v11856_v33, %v11537_v31 }
  0xd3   :  { %v11934_v34 = vpop.permute.xlu0 %212  ;;  %606 = vrot.lane.b32.xlu2 %v585_v63, %s11354_s19  ;;  %v313_v1 = vadd.f32 %v11861_v52, %v263_v28  ;;  %v650_v28 = vmul.f32 %v11817_v3, %v11573_v42 }
  0xd4   :  { %v309_v26 = vadd.f32 %v11877_v56, %v259_v37  ;;  %v582_v56 = vmul.f32 %v11825_v11, %v11529_v29 }
  0xd5   :  { %v363_v7 = vadd.f32 %v345_v4, %v313_v1 }
  0xd6   :  { %v359_v38 = vadd.f32 %v337_v54, %v309_v26  ;;  %v381_v54 = vmul.f32 %v11873_v24, %v11584_v44 }
  0xd8   :  { %840 = vrot.lane.b32.xlu1 %v820_v59, %s11354_s19  ;;  %v385_v59 = vadd.f32 %v377_v23, %v359_v38  ;;  %v11970_v37 = vpop.permute.xlu2 %172  ;;  %v389_v38 = vadd.f32 %v381_v54, %v363_v7  ;;  %v767_v23 = vmul.f32 %v11896_v21, %v11579_v43 }
  0xda   :  { %v11951_v12 = vpop.permute.xlu1 %288  ;;  %716 = vrot.lane.b32.xlu0 %v699_v10, %s11354_s19  ;;  %v770_v10 = vmul.f32 %v11896_v21, %v11516_v25 }
  0xdb   :  { %v413_v46 = vpop.permute.xlu0 %412 }
  0xdc   :  { %v435_v17 = vadd.f32 %v413_v46, %v385_v59  ;;  %790 = vrot.lane.b32.xlu2 %v770_v10, %s11355_s20  ;;  %v653_v46 = vmul.f32 %v11817_v3, %v11537_v31  ;;  %v533_v10 = vmul.f32 %v11736_v41, %v11597_v48  ;;  %v126_v31 = vmul.f32 %v11787_v57, %v11529_v29 }
  0xe0   :  { %724 = vrot.lane.b32.xlu1 %v703_v58, %s11354_s19  ;;  %v439_v58 = vadd.f32 %v421_v50, %v389_v38  ;;  %v223_v54 = vpop.permute.xlu2 %222 }
  0xe2   :  { %v165_v63 = vpop.permute.xlu1 %164  ;;  %600 = vrot.lane.b32.xlu0 %v582_v56, %s11354_s19 }
  0xe3   :  { %v463_v26 = vpop.permute.xlu0 %462 }
  0xe4   :  { %v485_v52 = vadd.f32 %v463_v26, %v435_v17  ;;  %674 = vrot.lane.b32.xlu2 %v653_v46, %s11355_s20  ;;  %v817_v17 = vmul.f32 %v11914_v6, %v11579_v43  ;;  %v130_v26 = vmul.f32 %v11787_v57, %v11551_v35 }
  0xe6   :  { %v495_v25 = vadd.f32 %v11898_v19, %v485_v52  ;;  %v536_v52 = vmul.f32 %v11736_v41, %v11551_v35  ;;  %v188_v43 = vadd.f32 %v11885_v16, %v130_v26  ;;  %v586_v16 = vmul.f32 %v11825_v11, %v11551_v35 }
  0xe7   :  { %v131_v26 = vmul.f32 %v11787_v57, %v11617_v53 }
  0xe8   :  { %v503_v4 = vmax.f32 %v495_v25, 0.0  ;;  %668 = vrot.lane.b32.xlu1 %v650_v28, %s11355_s20  ;;  %v184_v28 = vadd.f32 %v11894_v30, %v126_v31  ;;  %v423_v46 = vpop.permute.xlu2 %422  ;;  %v700_v30 = vmul.f32 %v11856_v33, %v11573_v42 }
  0xea   :  { %10253 = vmatmul.msk.f32.gmra.mxu0 %vm931_vm9, %v503_v4  ;;  %10269 = vmatmul.msk.f32.gmra.mxu2 %vm931_vm9, %v503_v4  ;;  %v471_v56 = vpop.permute.xlu1 %470  ;;  %v234_v25 = vadd.f32 %v11934_v34, %v184_v28  ;;  %v821_v4 = vmul.f32 %v11914_v6, %v11584_v44  ;;  %v127_v34 = vmul.f32 %v11787_v57, %v11597_v48 }
  0xeb   :  { %v489_v1 = vadd.f32 %v471_v56, %v439_v58  ;;  %v339_v59 = vpop.permute.xlu0 %338  ;;  %784 = vrot.lane.b32.xlu0 %v767_v23, %s11355_s20  ;;  %v252_v23 = vmul.f32 %v11850_v20, %v11573_v42  ;;  %v238_v58 = vadd.f32 %v11905_v40, %v188_v43  ;;  %v256_v56 = vmul.f32 %v11850_v20, %v11603_v49 }
  0xec   :  { %558 = vrot.lane.b32.xlu2 %v536_v52, %s11355_s20  ;;  %v185_v35 = vadd.f32 %v165_v63, %v127_v34  ;;  %v583_v28 = vmul.f32 %v11825_v11, %v11597_v48  ;;  %v189_v63 = vadd.f32 %v11970_v37, %v131_v26  ;;  %v382_v57 = vmul.f32 %v11873_v24, %v11650_v62 }
  0xed   :  { %v499_v7 = vadd.f32 %v11898_v19, %v489_v1  ;;  %v260_v1 = vadd.f32 %v252_v23, %v234_v25  ;;  %v264_v42 = vadd.f32 %v256_v56, %v238_v58  ;;  %v651_v48 = vmul.f32 %v11817_v3, %v11639_v60 }
  0xee   :  { %v257_v37 = vmul.f32 %v11850_v20, %v11665_v5  ;;  %v768_v34 = vmul.f32 %v11896_v21, %v11644_v61  ;;  %v655_v26 = vmul.f32 %v11817_v3, %v11665_v5 }
  0xef   :  { %v507_v50 = vmax.f32 %v499_v7, 0.0  ;;  %v314_v43 = vadd.f32 %v11954_v36, %v264_v42 }
  0xf0   :  { %552 = vrot.lane.b32.xlu1 %v533_v10, %s11355_s20  ;;  %v310_v10 = vadd.f32 %v11951_v12, %v260_v1  ;;  %v253_v12 = vmul.f32 %v11850_v20, %v11639_v60  ;;  %v341_v23 = vpop.permute.xlu2 %340  ;;  %v239_v1 = vadd.f32 %v223_v54, %v189_v63 }
  0xf1   :  { %10261 = vmatmul.msk.f32.gmra.mxu1 %vm931_vm9, %v507_v50  ;;  %10277 = vmatmul.msk.f32.gmra.mxu3 %vm931_vm9, %v507_v50  ;;  %v378_v50 = vmul.f32 %v11873_v24, %v11644_v61 }
  0xf2   :  { %v347_v38 = vpop.permute.xlu1 %346  ;;  %v360_v40 = vadd.f32 %v339_v59, %v310_v10  ;;  %v771_v59 = vmul.f32 %v11896_v21, %v11584_v44  ;;  %v654_v10 = vmul.f32 %v11817_v3, %v11603_v49  ;;  %v265_v54 = vadd.f32 %v257_v37, %v239_v1 }
  0xf3   :  { %v215_v29 = vpop.permute.xlu0 %214  ;;  %834 = vrot.lane.b32.xlu0 %v817_v17, %s11354_s19  ;;  %v704_v17 = vmul.f32 %v11856_v33, %v11603_v49 }
  0xf4   :  { %608 = vrot.lane.b32.xlu2 %v586_v16, %s11354_s19  ;;  %v235_v52 = vadd.f32 %v215_v29, %v185_v35  ;;  %v386_v25 = vadd.f32 %v378_v50, %v360_v40  ;;  %v364_v29 = vadd.f32 %v347_v38, %v314_v43  ;;  %v537_v43 = vmul.f32 %v11736_v41, %v11617_v53 }
  0xf5   :  { %v705_v41 = vmul.f32 %v11856_v33, %v11665_v5  ;;  %v12085_v5 = vstv %s10226_s27  ;;  %s12704_s27 = sld [smem:[#allocation8 + $0x84]] }
  0xf6   :  { %v261_v58 = vadd.f32 %v253_v12, %v235_v52  ;;  %v390_v16 = vadd.f32 %v382_v57, %v364_v29 }
  0xf8   :  { %842 = vrot.lane.b32.xlu1 %v821_v4, %s11354_s19  ;;  %v440_v40 = vadd.f32 %v423_v46, %v390_v16  ;;  %v417_v50 = vpop.permute.xlu2 %416  ;;  %v818_v46 = vmul.f32 %v11914_v6, %v11644_v61 }
  0xfa   :  { %v291_v7 = vpop.permute.xlu1 %290 }
  0xfb   :  { %v415_v31 = vpop.permute.xlu0 %414  ;;  %718 = vrot.lane.b32.xlu0 %v700_v30, %s11354_s19  ;;  %v311_v36 = vadd.f32 %v291_v7, %v261_v58  ;;  %v379_v7 = vmul.f32 %v11873_v24, %v11688_v18 }
  0xfc   :  { %v436_v4 = vadd.f32 %v415_v31, %v386_v25  ;;  %792 = vrot.lane.b32.xlu2 %v771_v59, %s11355_s20  ;;  %v383_v59 = vmul.f32 %v11873_v24, %v11699_v13 }
  0xfd   :  { %v361_v42 = vadd.f32 %v341_v23, %v311_v36 }
  0xff   :  { %v387_v52 = vadd.f32 %v379_v7, %v361_v42 }
 0x100   :  { %726 = vrot.lane.b32.xlu1 %v704_v17, %s11354_s19  ;;  %v475_v24 = vpop.permute.xlu2 %474 }
 0x101   :  { %v437_v23 = vadd.f32 %v417_v50, %v387_v52 }
 0x102   :  { %v299_v30 = vpop.permute.xlu1 %298 }
 0x103   :  { %v465_v56 = vpop.permute.xlu0 %464  ;;  %602 = vrot.lane.b32.xlu0 %v583_v28, %s11354_s19  ;;  %v315_v49 = vadd.f32 %v299_v30, %v265_v54  ;;  %v12073_v30 = vstv %s10223_s26  ;;  %s12702_s26 = sld [smem:[#allocation8 + $0x203]] }
 0x104   :  { %v486_v44 = vadd.f32 %v465_v56, %v436_v4  ;;  %676 = vrot.lane.b32.xlu2 %v654_v10, %s11355_s20  ;;  %v512_v1 = vmul.f32 %v12073_v30, %v11430_v0 }
 0x106   :  { %v496_v38 = vadd.f32 %v11898_v19, %v486_v44  ;;  %v822_v44 = vmul.f32 %v11914_v6, %v11650_v62 }
 0x108   :  { %v504_v31 = vmax.f32 %v496_v38, 0.0  ;;  %670 = vrot.lane.b32.xlu1 %v651_v48, %s11355_s20  ;;  %v587_v48 = vmul.f32 %v11825_v11, %v11617_v53  ;;  %v516_v53 = vmul.f32 %v12073_v30, %v11454_v8 }
 0x10a   :  { %10254 = vmatmul.msk.f32.gmra.mxu0 %vm931_vm9, %v504_v31  ;;  %10270 = vmatmul.msk.f32.gmra.mxu2 %vm931_vm9, %v504_v31  ;;  %v349_v20 = vpop.permute.xlu1 %348  ;;  %v772_v31 = vmul.f32 %v11896_v21, %v11650_v62 }
 0x10b   :  { %v473_v17 = vpop.permute.xlu0 %472  ;;  %786 = vrot.lane.b32.xlu0 %v768_v34, %s11355_s20  ;;  %v365_v12 = vadd.f32 %v349_v20, %v315_v49  ;;  %v819_v34 = vmul.f32 %v11914_v6, %v11688_v18 }
 0x10c   :  { %v490_v35 = vadd.f32 %v473_v17, %v440_v40  ;;  %560 = vrot.lane.b32.xlu2 %v537_v43, %s11355_s20  ;;  %v773_v17 = vmul.f32 %v11896_v21, %v11699_v13 }
 0x10d   :  { %v391_v63 = vadd.f32 %v383_v59, %v365_v12  ;;  %v597_v11 = vpop.permute.xlu2 %596  ;;  %v513_v12 = vmul.f32 %v12073_v30, %v11460_v9  ;;  %v517_v59 = vmul.f32 %v12073_v30, %v11481_v15  ;;  %v769_v9 = vmul.f32 %v11896_v21, %v11688_v18 }
 0x10e   :  { %v500_v28 = vadd.f32 %v11898_v19, %v490_v35 }
 0x110   :  { %v508_v25 = vmax.f32 %v500_v28, 0.0  ;;  %678 = vrot.lane.b32.xlu1 %v655_v26, %s11355_s20 }
 0x112   :  { %10262 = vmatmul.msk.f32.gmra.mxu1 %vm931_vm9, %v508_v25  ;;  %10278 = vmatmul.msk.f32.gmra.mxu3 %vm931_vm9, %v508_v25  ;;  %v467_v3 = vpop.permute.xlu1 %466 }
 0x113   :  { %v487_v57 = vadd.f32 %v467_v3, %v437_v23  ;;  %v425_v29 = vpop.permute.xlu0 %424  ;;  %836 = vrot.lane.b32.xlu0 %v818_v46, %s11354_s19 }
 0x114   :  { %v441_v61 = vadd.f32 %v425_v29, %v391_v63  ;;  %610 = vrot.lane.b32.xlu2 %v587_v48, %s11354_s19  ;;  %v631_v63 = vmul.f32 %v12085_v5, %v11503_v22 }
 0x115   :  { %v497_v4 = vadd.f32 %v11898_v19, %v487_v57 }
 0x116   :  { %v491_v58 = vadd.f32 %v475_v24, %v441_v61  ;;  %v549_v50 = vpop.permute.xlu2 %548  ;;  %v823_v61 = vmul.f32 %v11914_v6, %v11699_v13 }
 0x117   :  { %v505_v56 = vmax.f32 %v497_v4, 0.0  ;;  %v571_v46 = vadd.f32 %v549_v50, %v513_v12 }
 0x118   :  { %v501_v36 = vadd.f32 %v11898_v19, %v491_v58  ;;  %728 = vrot.lane.b32.xlu1 %v705_v41, %s11354_s19  ;;  %v630_v19 = vmul.f32 %v12085_v5, %v11437_v2  ;;  %v634_v2 = vmul.f32 %v12085_v5, %v11476_v14  ;;  %v701_v14 = vmul.f32 %v11856_v33, %v11639_v60 }
 0x119   :  { %10255 = vmatmul.msk.f32.gmra.mxu0 %vm931_vm9, %v505_v56  ;;  %10271 = vmatmul.msk.f32.gmra.mxu2 %vm931_vm9, %v505_v56 }
 0x11a   :  { %v509_v16 = vmax.f32 %v501_v36, 0.0  ;;  %v555_v37 = vpop.permute.xlu1 %554 }
 0x11b   :  { %844 = vrot.lane.b32.xlu0 %v822_v44, %s11354_s19  ;;  %v547_v38 = vpop.permute.xlu0 %546  ;;  %v574_v42 = vadd.f32 %v555_v37, %v516_v53 }
 0x11c   :  { %10263 = vmatmul.msk.f32.gmra.mxu1 %vm931_vm9, %v509_v16  ;;  %10279 = vmatmul.msk.f32.gmra.mxu3 %vm931_vm9, %v509_v16  ;;  %v570_v0 = vadd.f32 %v547_v38, %v512_v1 }
 0x11d   :  { %794 = vrot.lane.b32.xlu2 %v772_v31, %s11355_s20 }
 0x11e   :  { %v620_v10 = vadd.f32 %v597_v11, %v570_v0 }
 0x120   :  { %v638_v8 = vadd.f32 %v630_v19, %v620_v10  ;;  %838 = vrot.lane.b32.xlu1 %v819_v34, %s11354_s19 }
 0x122   :  { %v665_v7 = vpop.permute.xlu1 %664 }
 0x123   :  { %v605_v54 = vpop.permute.xlu0 %604  ;;  %v688_v20 = vadd.f32 %v665_v7, %v638_v8  ;;  %796 = vrot.lane.b32.xlu0 %v773_v17, %s11355_s20 }
 0x124   :  { %v624_v40 = vadd.f32 %v605_v54, %v574_v42  ;;  %v915_v42 = vmul.u32 2, %v11708_v32 }
 0x125   :  { %v557_v28 = vpop.permute.xlu2 %556  ;;  %720 = vrot.lane.b32.xlu2 %v701_v14, %s11354_s19 }
 0x126   :  { %v642_v49 = vadd.f32 %v634_v2, %v624_v40  ;;  %v575_v25 = vadd.f32 %v557_v28, %v517_v59  ;;  %vm925_vm12 = vcmp.eq.s32.totalorder %v11704_v27, %v915_v42 }
 0x12a   :  { %v715_v62 = vpop.permute.xlu1 %714 }
 0x12b   :  { %v673_v35 = vpop.permute.xlu0 %672  ;;  %v12106_v26 = vadd.f32 %v715_v62, %v688_v20  ;;  %v10242_v20 = vadd.s32 4294967295, %v915_v42  ;;  %v916_v62 = vmul.u32 2, %v11756_v51 }
 0x12c   :  { %v692_v52 = vadd.f32 %v673_v35, %v642_v49  ;;  %v15214_v35 = vmov 0.0  }
 0x12d   :  { %v607_v29 = vpop.permute.xlu2 %606  ;;  %788 = vrot.lane.b32.xlu2 %v769_v9, %s11355_s20  ;;  %vm919_vm10 = vcmp.eq.s32.totalorder %v11704_v27, %v10242_v20  ;;  %v10243_v14 = vadd.s32 4294967295, %v916_v62  ;;  %v11195_v9 = vld [vmem:[%s15177_s0 + $0x10] sm:$0xff]  ;;  %v11199_v20 = vld [vmem:[%s15177_s0 + $0x22] sm:$0xff]  ;;  %vm926_vm13 = vcmp.eq.s32.totalorder %v11704_v27, %v916_v62  ;;  %v12514_v55 = vsel %vm11782_vm6, 1.0, %v15214_v35  ;;  %s12708_s20 = sld [smem:[#allocation8 + $0x184]] }
 0x12e   :  { %v12121_v15 = vadd.f32 %v607_v29, %v575_v25  ;;  %v514_v29 = vmul.f32 %v11195_v9, %v12073_v30 }
 0x12f   :  { %vm920_vm11 = vcmp.eq.s32.totalorder %v11704_v27, %v10243_v14  ;;  %v11205_v27 = vld [vmem:[%s15177_s0 + $0x2a] sm:$0xff] }
 0x132   :  { %v723_v43 = vpop.permute.xlu1 %722 }
 0x133   :  { %v599_v23 = vpop.permute.xlu0 %598  ;;  %v12115_v3 = vadd.f32 %v723_v43, %v692_v52  ;;  %v12185_v52 = vsel %vm919_vm10, 1.0, %v15214_v35 }
 0x134   :  { %v621_v57 = vadd.f32 %v599_v23, %v571_v46 }
 0x135   :  { %846 = vrot.lane.b32.xlu2 %v823_v61, %s11354_s19  ;;  %s10229_s19 = sld [smem:[#allocation2 + $0x86]]  ;;  %v11197_v61 = vld [vmem:[%s15177_s0 + $0x30] sm:$0xff] }
 0x136   :  { %v639_v24 = vadd.f32 %v631_v63, %v621_v57  ;;  %v12131_v22 = vpop.permute.xlu2 %790  ;;  %v12217_v63 = vsel %vm920_vm11, 1.0, %v15214_v35 }
 0x13a   :  { %v667_v60 = vpop.permute.xlu1 %666 }
 0x13b   :  { %v12124_v33 = vadd.f32 %v667_v60, %v639_v24  ;;  %v12129_v41 = vpop.permute.xlu0 %782  ;;  %v12219_v57 = vstv %s10229_s19  ;;  %v11196_v24 = vld [vmem:[%s15177_s0 + $0x29] sm:$0xff]  ;;  %s12706_s19 = sld [smem:[#allocation8 + $0x104]] }
 0x13c   :  { %v635_v60 = vmul.f32 %v11196_v24, %v12085_v5  ;;  %v753_v51 = vmul.f32 %v11205_v27, %v12219_v57  ;;  %v11211_v27 = vld [vmem:[%s15177_s0 + $0x3a] sm:$0x3] }
 0x13e   :  { %v12137_v21 = vpop.permute.xlu2 %674 }
 0x142   :  { %v12133_v4 = vpop.permute.xlu1 %550 }
 0x144   :  { %v12135_v18 = vpop.permute.xlu0 %832 }
 0x146   :  { %v12143_v44 = vpop.permute.xlu2 %558 }
 0x147   :  { %v12149_v6 = vpop.f32.mrf.mxu0 }
 0x14a   :  { %v12139_v58 = vpop.permute.xlu1 %840 }
 0x14c   :  { %v12141_v56 = vpop.permute.xlu0 %716 }
 0x14d   :  { %v12155_v16 = vpop.f32.mrf.mxu2 }
 0x14e   :  { %v12151_v36 = vpop.f32.mrf.mxu1  ;;  %v12153_v1 = vpop.permute.xlu2 %608 }
 0x152   :  { %v12145_v48 = vpop.permute.xlu1 %724 }
 0x154   :  { %v12147_v13 = vpop.permute.xlu0 %600  ;;  %v12159_v53 = vpop.f32.mrf.mxu3 }
 0x156   :  { %v12163_v19 = vpop.permute.xlu2 %792 }
 0x15a   :  { %v12157_v38 = vpop.permute.xlu1 %668 }
 0x15d   :  { %v12161_v11 = vpop.permute.xlu0 %784 }
 0x15e   :  { %v12176_v2 = vpop.permute.xlu2 %676 }
 0x162   :  { %v12170_v8 = vpop.permute.xlu1 %552 }
 0x165   :  { %v12172_v7 = vpop.permute.xlu0 %834 }
 0x166   :  { %v12197_v46 = vpop.permute.xlu2 %560 }
 0x167   :  { %v968_v37 = vpop.f32.mrf.mxu0 }
 0x16a   :  { %v12189_v28 = vpop.permute.xlu1 %842 }
 0x16d   :  { %v12165_v34 = vpop.f32.mrf.mxu2  ;;  %v12187_v12 = vpop.permute.xlu0 %718 }
 0x16e   :  { %v1009_v0 = vpop.f32.mrf.mxu1 }
 0x172   :  { %v12207_v25 = vpop.permute.xlu1 %726 }
 0x174   :  { %v12167_v31 = vpop.f32.mrf.mxu3 }
 0x175   :  { %v12211_v23 = vpop.permute.xlu0 %602 }
 0x187   :  { %v971_v10 = vpop.f32.mrf.mxu0 }
 0x18d   :  { %v1044_v40 = vpop.f32.mrf.mxu2 }
 0x18f   :  { %v1012_v54 = vpop.f32.mrf.mxu1 }
 0x195   :  { %v12178_v17 = vpop.f32.mrf.mxu3 }
 0x196   :  { %v974_v50 = vpop.f32.mrf.mxu0 }
 0x197   :  { %10280 = vmatpush.msk.msrb.mxu0 %vm944_vm0, %v974_v50 }
 0x199   :  { %v1015_v49 = vpop.f32.mrf.mxu1  ;;  %1101 = vmatpush.msrb.mxu0 %v971_v10 }
 0x19a   :  { %10283 = vmatpush.msk.msrb.mxu1 %vm944_vm0, %v1015_v49 }
 0x19b   :  { %1102 = vmatpush.msrb.mxu0 %v968_v37 }
 0x19c   :  { %1127 = vmatpush.msrb.mxu1 %v1012_v54  ;;  %v1047_v59 = vpop.f32.mrf.mxu2 }
 0x19d   :  { %1103 = vmatpush.msrb.mxu0 %v12149_v6  ;;  %10286 = vmatpush.msk.msrb.mxu2 %vm944_vm0, %v1047_v59 }
 0x19e   :  { %1128 = vmatpush.msrb.mxu1 %v1009_v0  ;;  %10281 = vmatmul.msk.f32.vlgmr.msrb.gmra.mxu0 %vm931_vm9, %v12185_v52 }
 0x19f   :  { %v1076_v43 = vpop.f32.mrf.mxu3  ;;  %10292 = vmatpush.msk.msra.mxu0 %vm944_vm0, %v974_v50  ;;  %1153 = vmatpush.msrb.mxu2 %v1044_v40  ;;  %v752_v50 = vmul.f32 %v11199_v20, %v12219_v57 }
 0x1a0   :  { %1129 = vmatpush.msrb.mxu1 %v12151_v36  ;;  %10289 = vmatpush.msk.msrb.mxu3 %vm944_vm0, %v1076_v43 }
 0x1a1   :  { %10284 = vmatmul.msk.f32.vlgmr.msrb.gmra.mxu1 %vm931_vm9, %v12185_v52  ;;  %1208 = vmatpush.msra.mxu0 %v971_v10  ;;  %v12244_v10 = vpop.permute.xlu2 %610 }
 0x1a2   :  { %10295 = vmatpush.msk.msra.mxu1 %vm944_vm0, %v1015_v49  ;;  %1154 = vmatpush.msrb.mxu2 %v12165_v34  ;;  %v12293_v49 = vpop.permute.xlu0 %786 }
 0x1a3   :  { %1179 = vmatpush.msrb.mxu3 %v12178_v17  ;;  %1209 = vmatpush.msra.mxu0 %v968_v37  ;;  %v518_v37 = vmul.f32 %v11197_v61, %v12073_v30 }
 0x1a4   :  { %1231 = vmatpush.msra.mxu1 %v1012_v54  ;;  %1155 = vmatpush.msrb.mxu2 %v12155_v16  ;;  %v572_v54 = vadd.f32 %v12133_v4, %v514_v29  ;;  %v12267_v4 = vsel %vm925_vm12, 1.0, %v15214_v35 }
 0x1a5   :  { %1180 = vmatpush.msrb.mxu3 %v12167_v31  ;;  %10287 = vmatmul.msk.f32.vlgmr.msrb.gmra.mxu2 %vm931_vm9, %v12185_v52  ;;  %v576_v32 = vadd.f32 %v12143_v44, %v518_v37  ;;  %v12354_v37 = vsel %vm926_vm13, 1.0, %v15214_v35 }
 0x1a6   :  { %1210 = vmatpush.msra.mxu0 %v12149_v6  ;;  %1232 = vmatpush.msra.mxu1 %v1009_v0  ;;  %v11198_v6 = vld [vmem:[%s15177_s0 + $0x2] sm:$0xff]  ;;  %v622_v44 = vadd.f32 %v12147_v13, %v572_v54 }
 0x1a7   :  { %10298 = vmatpush.msk.msra.mxu2 %vm944_vm0, %v1047_v59  ;;  %1181 = vmatpush.msrb.mxu3 %v12159_v53  ;;  %v748_v0 = vmul.f32 %v11198_v6, %v12219_v57  ;;  %v11202_v59 = vld [vmem:[%s15177_s0 + $0x31] sm:$0xff] }
 0x1a8   :  { %10282 = vmatmul.msk.f32.gmra.mxu0 %vm931_vm9, %v12217_v63  ;;  %10290 = vmatmul.msk.f32.vlgmr.msrb.gmra.mxu3 %vm931_vm9, %v12185_v52 }
 0x1a9   :  { %1233 = vmatpush.msra.mxu1 %v12151_v36  ;;  %1254 = vmatpush.msra.mxu2 %v1044_v40  ;;  %v643_v36 = vadd.f32 %v635_v60, %v12121_v15  ;;  %v756_v42 = vadd.f32 %v748_v0, %v12106_v26  ;;  %v12270_v40 = vpop.permute.xlu1 %670  ;;  %v15215_v15 = vmov 1.0   ;;  %v11201_v26 = vld [vmem:[%s15177_s0 + $0x18] sm:$0x3] }
 0x1aa   :  { %10301 = vmatpush.msk.msra.mxu3 %vm944_vm0, %v1076_v43  ;;  %10285 = vmatmul.msk.f32.gmra.mxu1 %vm931_vm9, %v12217_v63  ;;  %v11204_v43 = vld [vmem:[%s15177_s0 + $0xa] sm:$0xff] }
 0x1ab   :  { %1255 = vmatpush.msra.mxu2 %v12165_v34  ;;  %10304 = vmatpush.msk.msrb.mxu0 %vm944_vm0, %v11742_v45  ;;  %v693_v13 = vadd.f32 %v12137_v21, %v643_v36  ;;  %v11203_v21 = vld [vmem:[%s15177_s0 + $0x38] sm:$0x3]  ;;  %v806_v39 = vadd.f32 %v12129_v41, %v756_v42  ;;  %v749_v9 = vmul.f32 %v11204_v43, %v12219_v57 }
 0x1ac   :  { %1277 = vmatpush.msra.mxu3 %v12178_v17  ;;  %10312 = vmatpush.msk.msrb.mxu1 %vm944_vm0, %v11742_v45  ;;  %v11200_v45 = vld [vmem:[%s15177_s0 + $0x11] sm:$0xff]  ;;  %v760_v17 = vadd.f32 %v752_v50, %v12115_v3  ;;  %v636_v3 = vmul.f32 %v11202_v59, %v12085_v5  ;;  %v519_v14 = vmul.f32 %v11203_v21, %v12073_v30  ;;  %v11207_v36 = vld [vmem:[%s15177_s0 + $0x39] sm:$0x3] }
 0x1ad   :  { %1256 = vmatpush.msra.mxu2 %v12155_v16  ;;  %10305 = vmatpush.msk.msrb.mxu0 %vm893_vm3, %v15215_v15  ;;  %v632_v34 = vmul.f32 %v11200_v45, %v12085_v5  ;;  %v515_v16 = vmul.f32 %v11201_v26, %v12073_v30  ;;  %v856_v60 = vadd.f32 %v12135_v18, %v806_v39  ;;  %v11206_v18 = vld [vmem:[%s15177_s0 + $0x19] sm:$0x3] }
 0x1ae   :  { %1278 = vmatpush.msra.mxu3 %v12167_v31  ;;  %10288 = vmatmul.msk.f32.gmra.mxu2 %vm931_vm9, %v12217_v63  ;;  %v626_v31 = vadd.f32 %v12153_v1, %v576_v32  ;;  %v739_v1 = vadd.f32 %v12141_v56, %v12124_v33  ;;  %v15217_v33 = vld [vmem:[#allocation22_spill] sm:$0xff]  ;;  %v810_v41 = vadd.f32 %v12131_v22, %v760_v17  ;;  %v12335_v56 = vpop.permute.xlu2 %794  ;;  %v11209_v17 = vld [vmem:[%s15177_s0 + $0x32] sm:$0xff] }
 0x1af   :  { %10313 = vmatpush.msk.msrb.mxu1 %vm893_vm3, %v15215_v15  ;;  %10306 = vmatpush.msk.msrb.mxu0 %vm11776_vm5, %v15215_v15  ;;  %v573_v29 = vadd.f32 %v12170_v8, %v515_v16  ;;  %v743_v8 = vadd.f32 %v12145_v48, %v693_v13  ;;  %v577_v22 = vadd.f32 %v12197_v46, %v519_v14  ;;  %v12364_v48 = vstv %s12277_s5  ;;  %s12620_s5 = sld [smem:[#allocation8 + $0x180]] }
 0x1b0   :  { %1279 = vmatpush.msra.mxu3 %v12159_v53  ;;  %10293 = vmatmul.msk.f32.vlgmr.msra.gmra.mxu0 %vm931_vm9, %v12267_v4  ;;  %v640_v53 = vadd.f32 %v632_v34, %v622_v44  ;;  %v644_v62 = vadd.f32 %v636_v3, %v626_v31  ;;  %v757_v61 = vadd.f32 %v749_v9, %v739_v1  ;;  %v837_v44 = vpop.permute.xlu0 %836 }
 0x1b1   :  { %10291 = vmatmul.msk.f32.gmra.mxu3 %vm931_vm9, %v12217_v63  ;;  %10307 = vmatpush.msk.msrb.mxu0 %vm11803_vm7, %v15215_v15  ;;  %v623_v6 = vadd.f32 %v12211_v23, %v573_v29  ;;  %v633_v0 = vmul.f32 %v11206_v18, %v12085_v5  ;;  %v860_v54 = vadd.f32 %v12139_v58, %v810_v41  ;;  %v679_v20 = vpop.permute.xlu1 %678  ;;  %v11210_v29 = vld [vmem:[%s15177_s0 + $0x1a] sm:$0x3] }
 0x1b2   :  { %10296 = vmatmul.msk.f32.vlgmr.msra.gmra.mxu1 %vm931_vm9, %v12267_v4  ;;  %10320 = vmatpush.msk.msrb.mxu2 %vm944_vm0, %v15217_v33  ;;  %v690_v46 = vadd.f32 %v12157_v38, %v640_v53  ;;  %v761_v38 = vadd.f32 %v753_v51, %v743_v8  ;;  %v694_v23 = vadd.f32 %v12176_v2, %v644_v62 }
 0x1b3   :  { %10314 = vmatpush.msk.msrb.mxu1 %vm11776_vm5, %v15215_v15  ;;  %10328 = vmatpush.msk.msrb.mxu3 %vm944_vm0, %v15217_v33  ;;  %v627_v50 = vadd.f32 %v12244_v10, %v577_v22  ;;  %v637_v58 = vmul.f32 %v11207_v36, %v12085_v5  ;;  %v866_v32 = vadd.f32 %v12364_v48, %v856_v60  ;;  %v11208_v5 = vld [vmem:[%s15177_s0 + $0x12] sm:$0xff]  ;;  %s12614_s0 = sld [smem:[#allocation8]] }
 0x1b4   :  { %10321 = vmatpush.msk.msrb.mxu2 %vm905_vm4, %v15215_v15  ;;  %v807_v42 = vadd.f32 %v12161_v11, %v757_v61  ;;  %v740_v10 = vadd.f32 %v12187_v12, %v690_v46  ;;  %v750_v45 = vmul.f32 %v11208_v5, %v12219_v57  ;;  %v641_v34 = vadd.f32 %v633_v0, %v623_v6 }
 0x1b5   :  { %10315 = vmatpush.msk.msrb.mxu1 %vm11803_vm7, %v15215_v15  ;;  %10329 = vmatpush.msk.msrb.mxu3 %vm905_vm4, %v15215_v15  ;;  %v870_v11 = vadd.f32 %v12364_v48, %v860_v54  ;;  %v811_v16 = vadd.f32 %v12163_v19, %v761_v38  ;;  %v744_v12 = vadd.f32 %v12207_v25, %v694_v23  ;;  %v874_v59 = vmax.f32 %v866_v32, 0.0 }
 0x1b6   :  { %10299 = vmatmul.msk.f32.vlgmr.msra.gmra.mxu2 %vm931_vm9, %v12267_v4  ;;  %v721_v26 = vpop.permute.xlu2 %720  ;;  %v754_v13 = vmul.f32 %v11209_v17, %v12219_v57  ;;  %v645_v31 = vadd.f32 %v637_v58, %v627_v50  ;;  %v857_v3 = vadd.f32 %v12172_v7, %v807_v42  ;;  %v758_v21 = vadd.f32 %v750_v45, %v740_v10 }
 0x1b7   :  { %10322 = vmatpush.msk.msrb.mxu2 %vm11782_vm6, %v15215_v15  ;;  %10330 = vmatpush.msk.msrb.mxu3 %vm11782_vm6, %v15215_v15  ;;  %v691_v14 = vadd.f32 %v12270_v40, %v641_v34  ;;  %v878_v39 = vmax.f32 %v870_v11, 0.0  ;;  %v861_v19 = vadd.f32 %v12189_v28, %v811_v16  ;;  %v751_v28 = vmul.f32 %v11210_v29, %v12219_v57 }
 0x1b8   :  { %10294 = vmatmul.msk.f32.gmra.mxu0 %vm931_vm9, %v12354_v37  ;;  %v762_v25 = vadd.f32 %v754_v13, %v744_v12  ;;  %v695_v1 = vadd.f32 %v679_v20, %v645_v31  ;;  %v845_v43 = vpop.permute.xlu0 %844  ;;  %v867_v7 = vadd.f32 %v12364_v48, %v857_v3  ;;  %v808_v53 = vadd.f32 %v12293_v49, %v758_v21 }
 0x1b9   :  { %10302 = vmatmul.msk.f32.vlgmr.msra.gmra.mxu3 %vm931_vm9, %v12267_v4  ;;  %10323 = vmatpush.msk.msrb.mxu2 %vm11809_vm8, %v15215_v15  ;;  %v729_v9 = vpop.permute.xlu1 %728  ;;  %v741_v40 = vadd.f32 %v721_v26, %v691_v14  ;;  %v871_v33 = vadd.f32 %v12364_v48, %v861_v19  ;;  %v755_v49 = vmul.f32 %v11211_v27, %v12219_v57 }
 0x1ba   :  { %10297 = vmatmul.msk.f32.gmra.mxu1 %vm931_vm9, %v12354_v37  ;;  %10331 = vmatpush.msk.msrb.mxu3 %vm11809_vm8, %v15215_v15  ;;  %v812_v41 = vadd.f32 %v12335_v56, %v762_v25  ;;  %v745_v8 = vadd.f32 %v729_v9, %v695_v1  ;;  %v875_v62 = vmax.f32 %v867_v7, 0.0  ;;  %v858_v22 = vadd.f32 %v837_v44, %v808_v53 }
 0x1bb   :  { %v759_v24 = vadd.f32 %v751_v28, %v741_v40  ;;  %v879_v60 = vmax.f32 %v871_v33, 0.0 }
 0x1bc   :  { %v862_v61 = vadd.f32 %v845_v43, %v812_v41  ;;  %v763_v46 = vadd.f32 %v755_v49, %v745_v8  ;;  %v868_v56 = vadd.f32 %v12364_v48, %v858_v22 }
 0x1be   :  { %10300 = vmatmul.msk.f32.gmra.mxu2 %vm931_vm9, %v12354_v37  ;;  %v789_v51 = vpop.permute.xlu2 %788  ;;  %v872_v0 = vadd.f32 %v12364_v48, %v862_v61  ;;  %v876_v38 = vmax.f32 %v868_v56, 0.0 }
 0x1bf   :  { %v809_v18 = vadd.f32 %v789_v51, %v759_v24 }
 0x1c0   :  { %10308 = vmatmul.msk.f32.vlgmr.msrb.gmra.mxu0 %vm931_vm9, %v874_v59  ;;  %v797_v6 = vpop.permute.xlu0 %796  ;;  %v880_v50 = vmax.f32 %v872_v0, 0.0 }
 0x1c1   :  { %10303 = vmatmul.msk.f32.gmra.mxu3 %vm931_vm9, %v12354_v37  ;;  %v839_v57 = vpop.permute.xlu1 %838  ;;  %v813_v54 = vadd.f32 %v797_v6, %v763_v46  ;;  %v12485_v46 = vsel %vm11776_vm5, 1.0, %v15214_v35 }
 0x1c2   :  { %10316 = vmatmul.msk.f32.vlgmr.msrb.gmra.mxu1 %vm931_vm9, %v878_v39  ;;  %v859_v23 = vadd.f32 %v839_v57, %v809_v18 }
 0x1c4   :  { %v869_v58 = vadd.f32 %v12364_v48, %v859_v23 }
 0x1c6   :  { %10324 = vmatmul.msk.f32.vlgmr.msrb.gmra.mxu2 %vm931_vm9, %v874_v59  ;;  %v847_v20 = vpop.permute.xlu2 %846  ;;  %v877_v42 = vmax.f32 %v869_v58, 0.0 }
 0x1c7   :  { %v863_v36 = vadd.f32 %v847_v20, %v813_v54 }
 0x1c8   :  { %10309 = vmatmul.msk.f32.gmra.mxu0 %vm931_vm9, %v875_v62 }
 0x1c9   :  { %10332 = vmatmul.msk.f32.vlgmr.msrb.gmra.mxu3 %vm931_vm9, %v878_v39  ;;  %v873_v32 = vadd.f32 %v12364_v48, %v863_v36 }
 0x1ca   :  { %10317 = vmatmul.msk.f32.gmra.mxu1 %vm931_vm9, %v879_v60 }
 0x1cb   :  { %v881_v44 = vmax.f32 %v873_v32, 0.0 }
 0x1ce   :  { %10325 = vmatmul.msk.f32.gmra.mxu2 %vm931_vm9, %v875_v62 }
 0x1d0   :  { %10310 = vmatmul.msk.f32.gmra.mxu0 %vm931_vm9, %v876_v38 }
 0x1d1   :  { %10333 = vmatmul.msk.f32.gmra.mxu3 %vm931_vm9, %v879_v60 }
 0x1d2   :  { %10318 = vmatmul.msk.f32.gmra.mxu1 %vm931_vm9, %v880_v50 }
 0x1d6   :  { %10326 = vmatmul.msk.f32.gmra.mxu2 %vm931_vm9, %v876_v38 }
 0x1d8   :  { %10311 = vmatmul.msk.f32.gmra.mxu0 %vm931_vm9, %v877_v42 }
 0x1d9   :  { %10334 = vmatmul.msk.f32.gmra.mxu3 %vm931_vm9, %v880_v50 }
 0x1da   :  { %10319 = vmatmul.msk.f32.gmra.mxu1 %vm931_vm9, %v881_v44 }
 0x1de   :  { %10327 = vmatmul.msk.f32.gmra.mxu2 %vm931_vm9, %v877_v42 }
 0x1e1   :  { %10335 = vmatmul.msk.f32.gmra.mxu3 %vm931_vm9, %v881_v44 }
 0x21b   :  { %v1105_v10 = vpop.f32.mrf.mxu0 }
 0x21e   :  { %v1131_v5 = vpop.f32.mrf.mxu1 }
 0x225   :  { %v12452_v45 = vpop.f32.mrf.mxu0 }
 0x227   :  { %v12454_v34 = vpop.f32.mrf.mxu1 }
 0x228   :  { %v1157_v48 = vpop.f32.mrf.mxu2 }
 0x229   :  { %v1287_v11 = vmax.f32 %v1105_v10, %v1157_v48 }
 0x22b   :  { %v1183_v26 = vpop.f32.mrf.mxu3 }
 0x22c   :  { %v1289_v16 = vmax.f32 %v1131_v5, %v1183_v26 }
 0x22d   :  { %v1212_v12 = vpop.f32.mrf.mxu0 }
 0x22f   :  { %v1235_v17 = vpop.f32.mrf.mxu1 }
 0x231   :  { %v12456_v13 = vpop.f32.mrf.mxu2 }
 0x234   :  { %v12458_v31 = vpop.f32.mrf.mxu3 }
 0x235   :  { %v12460_v59 = vpop.f32.mrf.mxu0  ;;  %v1290_v6 = vmax.f32 %v12454_v34, %v12458_v31 }
 0x237   :  { %v12462_v3 = vpop.f32.mrf.mxu1 }
 0x239   :  { %v1258_v21 = vpop.f32.mrf.mxu2 }
 0x23a   :  { %v1291_v14 = vmax.f32 %v1212_v12, %v1258_v21 }
 0x23c   :  { %v12464_v39 = vmax.f32 %v1287_v11, %v1291_v14  ;;  %v1281_v19 = vpop.f32.mrf.mxu3 }
 0x23d   :  { %v1293_v25 = vmax.f32 %v1235_v17, %v1281_v19  ;;  %v1328_v1 = vpop.f32.mrf.mxu0 }
 0x23f   :  { %v12466_v43 = vmax.f32 %v1289_v16, %v1293_v25  ;;  %v1369_v9 = vpop.f32.mrf.mxu1 }
 0x241   :  { %v12468_v7 = vpop.f32.mrf.mxu2 }
 0x242   :  { %v1292_v35 = vmax.f32 %v12460_v59, %v12468_v7 }
 0x244   :  { %v12470_v53 = vpop.f32.mrf.mxu3 }
 0x245   :  { %v1331_v40 = vpop.f32.mrf.mxu0  ;;  %v1294_v47 = vmax.f32 %v12462_v3, %v12470_v53 }
 0x247   :  { %v1372_v29 = vpop.f32.mrf.mxu1  ;;  %v1298_v18 = vmax.f32 %v1290_v6, %v1294_v47 }
 0x249   :  { %v1398_v28 = vpop.f32.mrf.mxu2 }
 0x24c   :  { %v1427_v33 = vpop.f32.mrf.mxu3 }
 0x24d   :  { %v1334_v41 = vpop.f32.mrf.mxu0 }
 0x24f   :  { %v1375_v8 = vpop.f32.mrf.mxu1 }
 0x251   :  { %v1401_v27 = vpop.f32.mrf.mxu2 }
 0x254   :  { %v1430_v49 = vpop.f32.mrf.mxu3 }
 0x255   :  { %v1337_v51 = vpop.f32.mrf.mxu0 }
 0x256   :  { %10336 = vmatpush.msk.msra.mxu0 %vm944_vm0, %v1337_v51 }
 0x257   :  { %v1378_v62 = vpop.f32.mrf.mxu1 }
 0x258   :  { %1455 = vmatpush.msra.mxu0 %v1334_v41  ;;  %10339 = vmatpush.msk.msra.mxu1 %vm944_vm0, %v1378_v62 }
 0x259   :  { %v1404_v22 = vpop.f32.mrf.mxu2 }
 0x25a   :  { %1456 = vmatpush.msra.mxu0 %v1331_v40  ;;  %1481 = vmatpush.msra.mxu1 %v1375_v8 }
 0x25c   :  { %v1433_v24 = vpop.f32.mrf.mxu3  ;;  %1457 = vmatpush.msra.mxu0 %v1328_v1  ;;  %1482 = vmatpush.msra.mxu1 %v1372_v29 }
 0x25d   :  { %10337 = vmatmul.msk.f32.vlgmr.msra.gmra.mxu0 %vm931_vm9, %v12185_v52 }
 0x25e   :  { %10348 = vmatpush.msk.msrb.mxu0 %vm944_vm0, %v1337_v51  ;;  %1483 = vmatpush.msra.mxu1 %v1369_v9  ;;  %v2308_v51 = vstv %s12630_s15  ;;  %s12778_s15 = sld [smem:[#allocation8 + $0x206]] }
 0x25f   :  { %10340 = vmatmul.msk.f32.vlgmr.msra.gmra.mxu1 %vm931_vm9, %v12185_v52 }
 0x260   :  { %1556 = vmatpush.msrb.mxu0 %v1334_v41  ;;  %10351 = vmatpush.msk.msrb.mxu1 %vm944_vm0, %v1378_v62  ;;  %v2392_v41 = vstv %s12618_s13  ;;  %v2398_v62 = vstv %s12632_s16  ;;  %s12770_s13 = sld [smem:[#allocation8 + $0x6]] }
 0x261   :  { %v1407_v60 = vpop.f32.mrf.mxu2  ;;  %s12782_s16 = sld [smem:[#allocation8 + $0x7]] }
 0x262   :  { %1557 = vmatpush.msrb.mxu0 %v1331_v40  ;;  %1579 = vmatpush.msrb.mxu1 %v1375_v8  ;;  %v2482_v8 = vstv %s12620_s5  ;;  %s12772_s5 = sld [smem:[#allocation8 + $0x86]] }
 0x263   :  { %10342 = vmatpush.msk.msra.mxu2 %vm944_vm0, %v1407_v60 }
 0x264   :  { %v1436_v61 = vpop.f32.mrf.mxu3  ;;  %1558 = vmatpush.msrb.mxu0 %v1328_v1  ;;  %1580 = vmatpush.msrb.mxu1 %v1372_v29 }
 0x265   :  { %1507 = vmatpush.msra.mxu2 %v1404_v22  ;;  %10345 = vmatpush.msk.msra.mxu3 %vm944_vm0, %v1436_v61 }
 0x266   :  { %10338 = vmatmul.msk.f32.gmra.mxu0 %vm931_vm9, %v12217_v63  ;;  %1581 = vmatpush.msrb.mxu1 %v1369_v9 }
 0x267   :  { %1508 = vmatpush.msra.mxu2 %v1401_v27  ;;  %1533 = vmatpush.msra.mxu3 %v1433_v24 }
 0x268   :  { %10341 = vmatmul.msk.f32.gmra.mxu1 %vm931_vm9, %v12217_v63  ;;  %10360 = vmatpush.msk.msra.mxu0 %vm1654_vm14, %v12485_v46 }
 0x269   :  { %1509 = vmatpush.msra.mxu2 %v1398_v28  ;;  %1534 = vmatpush.msra.mxu3 %v1430_v49 }
 0x26a   :  { %10343 = vmatmul.msk.f32.vlgmr.msra.gmra.mxu2 %vm931_vm9, %v12185_v52  ;;  %10361 = vmatpush.msk.msra.mxu0 %vm11803_vm7, %v15215_v15 }
 0x26b   :  { %10354 = vmatpush.msk.msrb.mxu2 %vm944_vm0, %v1407_v60  ;;  %1535 = vmatpush.msra.mxu3 %v1427_v33 }
 0x26c   :  { %10346 = vmatmul.msk.f32.vlgmr.msra.gmra.mxu3 %vm931_vm9, %v12185_v52  ;;  %10364 = vmatpush.msk.msra.mxu1 %vm1654_vm14, %v12485_v46 }
 0x26d   :  { %1602 = vmatpush.msrb.mxu2 %v1404_v22  ;;  %10357 = vmatpush.msk.msrb.mxu3 %vm944_vm0, %v1436_v61  ;;  %v2488_v22 = vstv %s12634_s17  ;;  %s12784_s17 = sld [smem:[#allocation8 + $0x87]] }
 0x26e   :  { %10349 = vmatmul.msk.f32.vlgmr.msrb.gmra.mxu0 %vm931_vm9, %v12267_v4  ;;  %10365 = vmatpush.msk.msra.mxu1 %vm11803_vm7, %v15215_v15 }
 0x26f   :  { %1603 = vmatpush.msrb.mxu2 %v1401_v27  ;;  %1625 = vmatpush.msrb.mxu3 %v1433_v24  ;;  %v2572_v27 = vstv %s12624_s7  ;;  %v2578_v24 = vstv %s12636_s18  ;;  %s12774_s7 = sld [smem:[#allocation8 + $0x106]] }
 0x270   :  { %10352 = vmatmul.msk.f32.vlgmr.msrb.gmra.mxu1 %vm931_vm9, %v12267_v4  ;;  %s12788_s18 = sld [smem:[#allocation9]] }
 0x271   :  { %1604 = vmatpush.msrb.mxu2 %v1398_v28  ;;  %1626 = vmatpush.msrb.mxu3 %v1430_v49  ;;  %v2212_v28 = vstv %s12614_s0  ;;  %v2218_v49 = vstv %s12628_s14  ;;  %s12766_s0 = sld [smem:[#allocation8 + $0x185]] }
 0x272   :  { %10344 = vmatmul.msk.f32.gmra.mxu2 %vm931_vm9, %v12217_v63  ;;  %s12776_s14 = sld [smem:[#allocation8 + $0x186]] }
 0x273   :  { %1627 = vmatpush.msrb.mxu3 %v1427_v33  ;;  %10368 = vmatpush.msk.msra.mxu2 %vm1654_vm14, %v12514_v55  ;;  %v2302_v33 = vstv %s12616_s12  ;;  %s12768_s12 = sld [smem:[#allocation8 + $0x205]] }
 0x274   :  { %10347 = vmatmul.msk.f32.gmra.mxu3 %vm931_vm9, %v12217_v63  ;;  %v1288_v63 = vmax.f32 %v12452_v45, %v12456_v13 }
 0x275   :  { %10369 = vmatpush.msk.msra.mxu2 %vm11809_vm8, %v15215_v15  ;;  %10372 = vmatpush.msk.msra.mxu3 %vm1654_vm14, %v12514_v55 }
 0x276   :  { %10350 = vmatmul.msk.f32.gmra.mxu0 %vm931_vm9, %v12354_v37  ;;  %v1296_v56 = vmax.f32 %v1288_v63, %v1292_v35 }
 0x277   :  { %10373 = vmatpush.msk.msra.mxu3 %vm11809_vm8, %v15215_v15 }
 0x278   :  { %10353 = vmatmul.msk.f32.gmra.mxu1 %vm931_vm9, %v12354_v37 }
 0x27a   :  { %10355 = vmatmul.msk.f32.vlgmr.msrb.gmra.mxu2 %vm931_vm9, %v12267_v4 }
 0x27c   :  { %10358 = vmatmul.msk.f32.vlgmr.msrb.gmra.mxu3 %vm931_vm9, %v12267_v4 }
 0x27e   :  { %10362 = vmatmul.msk.f32.vlgmr.msra.gmra.mxu0 %vm1647_vm15, %v12464_v39 }
 0x280   :  { %10366 = vmatmul.msk.f32.vlgmr.msra.gmra.mxu1 %vm1647_vm15, %v12466_v43 }
 0x282   :  { %10356 = vmatmul.msk.f32.gmra.mxu2 %vm931_vm9, %v12354_v37 }
 0x284   :  { %10359 = vmatmul.msk.f32.gmra.mxu3 %vm931_vm9, %v12354_v37 }
 0x286   :  { %10363 = vmatmul.msk.f32.gmra.mxu0 %vm1647_vm15, %v1296_v56 }
 0x288   :  { %10367 = vmatmul.msk.f32.gmra.mxu1 %vm1647_vm15, %v1298_v18 }
 0x28a   :  { %10370 = vmatmul.msk.f32.vlgmr.msra.gmra.mxu2 %vm1647_vm15, %v12464_v39 }
 0x28c   :  { %10374 = vmatmul.msk.f32.vlgmr.msra.gmra.mxu3 %vm1647_vm15, %v12466_v43 }
 0x292   :  { %10371 = vmatmul.msk.f32.gmra.mxu2 %vm1647_vm15, %v1296_v56 }
 0x294   :  { %10375 = vmatmul.msk.f32.gmra.mxu3 %vm1647_vm15, %v1298_v18 }
 0x2da   :  { %v1459_v57 = vpop.f32.mrf.mxu0 }
 0x2dc   :  { %v1485_v0 = vpop.f32.mrf.mxu1 }
 0x2e3   :  { %v1462_v54 = vpop.f32.mrf.mxu0 }
 0x2e5   :  { %v1488_v20 = vpop.f32.mrf.mxu1 }
 0x2eb   :  { %v1560_v37 = vpop.f32.mrf.mxu0 }
 0x2ed   :  { %v1511_v38 = vpop.f32.mrf.mxu2  ;;  %v1583_v23 = vpop.f32.mrf.mxu1 }
 0x2ee   :  { %v1635_v13 = vmax.f32 %v1459_v57, %v1511_v38 }
 0x2ef   :  { %v1537_v50 = vpop.f32.mrf.mxu3 }
 0x2f0   :  { %v1637_v59 = vmax.f32 %v1485_v0, %v1537_v50 }
 0x2f3   :  { %v1563_v36 = vpop.f32.mrf.mxu0 }
 0x2f5   :  { %v1514_v58 = vpop.f32.mrf.mxu2  ;;  %v1586_v32 = vpop.f32.mrf.mxu1 }
 0x2f6   :  { %v1636_v19 = vmax.f32 %v1462_v54, %v1514_v58 }
 0x2f7   :  { %v1540_v42 = vpop.f32.mrf.mxu3 }
 0x2f8   :  { %v1638_v1 = vmax.f32 %v1488_v20, %v1540_v42 }
 0x2fb   :  { %v1675_v44 = vpop.f32.mrf.mxu0 }
 0x2fd   :  { %v1606_v10 = vpop.f32.mrf.mxu2  ;;  %v1704_v5 = vpop.f32.mrf.mxu1 }
 0x2fe   :  { %v1639_v17 = vmax.f32 %v1560_v37, %v1606_v10 }
 0x2ff   :  { %v1629_v45 = vpop.f32.mrf.mxu3 }
 0x300   :  { %v1641_v31 = vmax.f32 %v1583_v23, %v1629_v45  ;;  %v1643_v3 = vmax.f32 %v1635_v13, %v1639_v17 }
 0x302   :  { %v1645_v14 = vmax.f32 %v1637_v59, %v1641_v31 }
 0x303   :  { %v1678_v34 = vpop.f32.mrf.mxu0 }
 0x304   :  { %10376 = vmatpush.msk.msrb.mxu0 %vm1654_vm14, %v1678_v34 }
 0x305   :  { %v1609_v48 = vpop.f32.mrf.mxu2  ;;  %v1707_v11 = vpop.f32.mrf.mxu1 }
 0x306   :  { %1779 = vmatpush.msrb.mxu0 %v1675_v44  ;;  %10378 = vmatpush.msk.msrb.mxu1 %vm1654_vm14, %v1707_v11  ;;  %v1640_v30 = vmax.f32 %v1563_v36, %v1609_v48 }
 0x307   :  { %v1632_v26 = vpop.f32.mrf.mxu3  ;;  %10377 = vmatmul.msk.f32.vlgmr.msrb.gmra.mxu0 %vm1647_vm15, %v12185_v52 }
 0x308   :  { %10384 = vmatpush.msk.msra.mxu0 %vm1654_vm14, %v1678_v34  ;;  %1802 = vmatpush.msrb.mxu1 %v1704_v5  ;;  %v1642_v25 = vmax.f32 %v1586_v32, %v1632_v26  ;;  %v1644_v43 = vmax.f32 %v1636_v19, %v1640_v30  ;;  %v2404_v30 = vstv %s10442_s2  ;;  %v2584_v19 = vstv %s10460_s23  ;;  %s12794_s2 = sld [smem:[#allocation8 + $0x187]] }
 0x309   :  { %10379 = vmatmul.msk.f32.vlgmr.msrb.gmra.mxu1 %vm1647_vm15, %v12185_v52  ;;  %s12806_s23 = sld [smem:[#allocation9 + $0x1]] }
 0x30a   :  { %1870 = vmatpush.msra.mxu0 %v1675_v44  ;;  %10386 = vmatpush.msk.msra.mxu1 %vm1654_vm14, %v1707_v11  ;;  %v1646_v9 = vmax.f32 %v1638_v1, %v1642_v25 }
 0x30c   :  { %10392 = vmatpush.msk.msrb.mxu0 %vm1654_vm14, %v12485_v46  ;;  %1890 = vmatpush.msra.mxu1 %v1704_v5 }
 0x30d   :  { %v1730_v16 = vpop.f32.mrf.mxu2 }
 0x30e   :  { %10393 = vmatpush.msk.msrb.mxu0 %vm11803_vm7, %v15215_v15  ;;  %10396 = vmatpush.msk.msrb.mxu1 %vm1654_vm14, %v12485_v46 }
 0x30f   :  { %v1753_v12 = vpop.f32.mrf.mxu3  ;;  %10385 = vmatmul.msk.f32.vlgmr.msra.gmra.mxu0 %vm1647_vm15, %v12267_v4 }
 0x310   :  { %10397 = vmatpush.msk.msrb.mxu1 %vm11803_vm7, %v15215_v15 }
 0x311   :  { %10387 = vmatmul.msk.f32.vlgmr.msra.gmra.mxu1 %vm1647_vm15, %v12267_v4 }
 0x315   :  { %v1733_v21 = vpop.f32.mrf.mxu2 }
 0x316   :  { %10380 = vmatpush.msk.msrb.mxu2 %vm1654_vm14, %v1733_v21 }
 0x317   :  { %v1756_v39 = vpop.f32.mrf.mxu3  ;;  %10394 = vmatmul.msk.f32.vlgmr.msrb.gmra.mxu0 %vm1647_vm15, %v1643_v3 }
 0x318   :  { %1825 = vmatpush.msrb.mxu2 %v1730_v16  ;;  %10382 = vmatpush.msk.msrb.mxu3 %vm1654_vm14, %v1756_v39 }
 0x319   :  { %10381 = vmatmul.msk.f32.vlgmr.msrb.gmra.mxu2 %vm1647_vm15, %v12185_v52  ;;  %10398 = vmatmul.msk.f32.vlgmr.msrb.gmra.mxu1 %vm1647_vm15, %v1645_v14 }
 0x31a   :  { %10388 = vmatpush.msk.msra.mxu2 %vm1654_vm14, %v1733_v21  ;;  %1848 = vmatpush.msrb.mxu3 %v1753_v12 }
 0x31b   :  { %10383 = vmatmul.msk.f32.vlgmr.msrb.gmra.mxu3 %vm1647_vm15, %v12185_v52 }
 0x31c   :  { %1910 = vmatpush.msra.mxu2 %v1730_v16  ;;  %10390 = vmatpush.msk.msra.mxu3 %vm1654_vm14, %v1756_v39 }
 0x31e   :  { %10400 = vmatpush.msk.msrb.mxu2 %vm1654_vm14, %v12514_v55  ;;  %1930 = vmatpush.msra.mxu3 %v1753_v12 }
 0x31f   :  { %10395 = vmatmul.msk.f32.gmra.mxu0 %vm1647_vm15, %v1644_v43 }
 0x320   :  { %10401 = vmatpush.msk.msrb.mxu2 %vm11809_vm8, %v15215_v15  ;;  %10404 = vmatpush.msk.msrb.mxu3 %vm1654_vm14, %v12514_v55 }
 0x321   :  { %10389 = vmatmul.msk.f32.vlgmr.msra.gmra.mxu2 %vm1647_vm15, %v12267_v4  ;;  %10399 = vmatmul.msk.f32.gmra.mxu1 %vm1647_vm15, %v1646_v9 }
 0x322   :  { %10405 = vmatpush.msk.msrb.mxu3 %vm11809_vm8, %v15215_v15 }
 0x323   :  { %10391 = vmatmul.msk.f32.vlgmr.msra.gmra.mxu3 %vm1647_vm15, %v12267_v4 }
 0x329   :  { %10402 = vmatmul.msk.f32.vlgmr.msrb.gmra.mxu2 %vm1647_vm15, %v1643_v3 }
 0x32b   :  { %10406 = vmatmul.msk.f32.vlgmr.msrb.gmra.mxu3 %vm1647_vm15, %v1645_v14 }
 0x331   :  { %10403 = vmatmul.msk.f32.gmra.mxu2 %vm1647_vm15, %v1644_v43  ;;  %v2320_v43 = vstv %s12696_s1  ;;  %s12810_s1 = sld [smem:[#allocation9 + $0x2]] }
 0x333   :  { %10407 = vmatmul.msk.f32.gmra.mxu3 %vm1647_vm15, %v1646_v9 }
 0x384   :  { %v1781_v7 = vpop.f32.mrf.mxu0 }
 0x385   :  { %v2213_v60 = vmul.f32 %v2212_v28, %v1781_v7  ;;  %v2303_v61 = vmul.f32 %v2302_v33, %v1781_v7  ;;  %v2393_v46 = vmul.f32 %v2392_v41, %v1781_v7  ;;  %v2483_v55 = vmul.f32 %v2482_v8, %v1781_v7 }
 0x386   :  { %v1804_v53 = vpop.f32.mrf.mxu1  ;;  %v2573_v35 = vmul.f32 %v2572_v27, %v1781_v7 }
 0x387   :  { %v2214_v0 = vmul.f32 %v2212_v28, %v1804_v53  ;;  %v2304_v54 = vmul.f32 %v2302_v33, %v1804_v53  ;;  %v2394_v20 = vmul.f32 %v2392_v41, %v1804_v53  ;;  %v2484_v45 = vmul.f32 %v2482_v8, %v1804_v53 }
 0x388   :  { %v2574_v34 = vmul.f32 %v2572_v27, %v1804_v53  ;;  %v2590_v8 = vstv %s12702_s26 }
 0x38c   :  { %v12622_v15 = vpop.f32.mrf.mxu0 }
 0x38d   :  { %v2405_v1 = vmul.f32 %v2404_v30, %v12622_v15  ;;  %v2585_v7 = vmul.f32 %v2584_v19, %v12622_v15 }
 0x38e   :  { %v12626_v2 = vpop.f32.mrf.mxu1 }
 0x38f   :  { %v2406_v28 = vmul.f32 %v2404_v30, %v12626_v2  ;;  %v2586_v41 = vmul.f32 %v2584_v19, %v12626_v2 }
 0x394   :  { %v1958_v40 = vpop.f32.mrf.mxu0 }
 0x396   :  { %v1987_v29 = vpop.f32.mrf.mxu1 }
 0x39c   :  { %v1827_v63 = vpop.f32.mrf.mxu2  ;;  %v1961_v47 = vpop.f32.mrf.mxu0 }
 0x39d   :  { %v2219_v6 = vmul.f32 %v2218_v49, %v1827_v63  ;;  %v2309_v56 = vmul.f32 %v2308_v51, %v1827_v63  ;;  %v2399_v18 = vmul.f32 %v2398_v62, %v1827_v63  ;;  %v2489_v57 = vmul.f32 %v2488_v22, %v1827_v63  ;;  %10408 = vmatpush.msk.msra.mxu0 %vm1654_vm14, %v1961_v47 }
 0x39e   :  { %v2579_v37 = vmul.f32 %v2578_v24, %v1827_v63  ;;  %v1850_v38 = vpop.f32.mrf.mxu3  ;;  %v1990_v23 = vpop.f32.mrf.mxu1  ;;  %v2506_v63 = vstv %s12708_s20  ;;  %s11358_s20 = smov [#allocation14]  }
 0x39f   :  { %v12649_v50 = vadd.f32 %v2219_v6, %v2213_v60  ;;  %v12651_v36 = vadd.f32 %v2309_v56, %v2303_v61  ;;  %v12653_v58 = vadd.f32 %v2399_v18, %v2393_v46  ;;  %v12655_v32 = vadd.f32 %v2489_v57, %v2483_v55  ;;  %2057 = vmatpush.msra.mxu0 %v1958_v40 }
 0x3a0   :  { %v12657_v42 = vadd.f32 %v2579_v37, %v2573_v35  ;;  %v2220_v44 = vmul.f32 %v2218_v49, %v1850_v38  ;;  %v2310_v10 = vmul.f32 %v2308_v51, %v1850_v38  ;;  %v2400_v5 = vmul.f32 %v2398_v62, %v1850_v38  ;;  %10410 = vmatpush.msk.msra.mxu1 %vm1654_vm14, %v1990_v23 }
 0x3a1   :  { %10409 = vmatmul.msk.f32.vlgmr.msra.gmra.mxu0 %vm1647_vm15, %v12185_v52  ;;  %v2490_v16 = vmul.f32 %v2488_v22, %v1850_v38  ;;  %v2580_v12 = vmul.f32 %v2578_v24, %v1850_v38  ;;  %v2407_v49 = vadd.f32 %v2405_v1, %v12653_v58  ;;  %v2326_v55 = vstv %s12704_s27 }
 0x3a2   :  { %v12662_v48 = vadd.f32 %v2220_v44, %v2214_v0  ;;  %v12664_v11 = vadd.f32 %v2310_v10, %v2304_v54  ;;  %v12666_v26 = vadd.f32 %v2400_v5, %v2394_v20  ;;  %10416 = vmatpush.msk.msrb.mxu0 %vm1654_vm14, %v1961_v47  ;;  %2080 = vmatpush.msra.mxu1 %v1987_v29  ;;  %v2416_v35 = vstv %s12706_s19 }
 0x3a3   :  { %10411 = vmatmul.msk.f32.vlgmr.msra.gmra.mxu1 %vm1647_vm15, %v12185_v52  ;;  %v12673_v13 = vadd.f32 %v2490_v16, %v2484_v45  ;;  %v12675_v31 = vadd.f32 %v2580_v12, %v2574_v34  ;;  %v2587_v24 = vadd.f32 %v2585_v7, %v12657_v42  ;;  %v2596_v18 = vstv %s12710_s28  ;;  %s10199_s28 = sshll.u32 %s11358_s20, 4  ;;  %s10200_s28 = int_to_ptr.vmem [resolvable:$true] %s10199_s28 }
 0x3a4   :  { %2146 = vmatpush.msrb.mxu0 %v1958_v40  ;;  %v12671_v17 = vpop.f32.mrf.mxu2  ;;  %10418 = vmatpush.msk.msrb.mxu1 %vm1654_vm14, %v1990_v23  ;;  %v2410_v40 = vstv %s12698_s24  ;;  %v2408_v47 = vadd.f32 %v2406_v28, %v12666_v26  ;;  %v2230_v1 = vstv %s10426_s29  ;;  %s12814_s24 = sld [smem:[#allocation9 + $0x3]]  ;;  %s10201_s29 = sshll.u32 %s15186_s9, 4  ;;  %s10202_s29 = int_to_ptr.hbm [resolvable:$true] %s10201_s29 }
 0x3a5   :  { %v2321_v51 = vmul.f32 %v2320_v43, %v12671_v17  ;;  %v2411_v62 = vmul.f32 %v2410_v40, %v12671_v17  ;;  %v2591_v46 = vmul.f32 %v2590_v8, %v12671_v17  ;;  %v2588_v42 = vadd.f32 %v2586_v41, %v12675_v31 }
 0x3a6   :  { %v12678_v59 = vpop.f32.mrf.mxu3  ;;  %2166 = vmatpush.msrb.mxu1 %v1987_v29  ;;  %v2500_v29 = vstv %s12700_s25  ;;  %v2231_v7 = vmul.f32 %v2230_v1, %v12671_v17  ;;  %v2332_v41 = vstv %s12762_s4  ;;  %s12823_s25 = sld [smem:[#allocation9 + $0x4]] }
 0x3a7   :  { %v2501_v61 = vmul.f32 %v2500_v29, %v12671_v17  ;;  %v2322_v6 = vmul.f32 %v2320_v43, %v12678_v59  ;;  %v2412_v56 = vmul.f32 %v2410_v40, %v12678_v59  ;;  %v2502_v57 = vmul.f32 %v2500_v29, %v12678_v59 }
 0x3a8   :  { %v2592_v0 = vmul.f32 %v2590_v8, %v12678_v59  ;;  %v2413_v37 = vadd.f32 %v2411_v62, %v2407_v49  ;;  %v2593_v44 = vadd.f32 %v2591_v46, %v2587_v24  ;;  %v2236_v40 = vstv %s10427_s30 }
 0x3a9   :  { %10417 = vmatmul.msk.f32.vlgmr.msrb.gmra.mxu0 %vm1647_vm15, %v12267_v4  ;;  %v2422_v49 = vstv %s12764_s11  ;;  %v2608_v62 = vstv %s12778_s15 }
 0x3ab   :  { %10419 = vmatmul.msk.f32.vlgmr.msrb.gmra.mxu1 %vm1647_vm15, %v12267_v4 }
 0x3ac   :  { %v2010_v3 = vpop.f32.mrf.mxu2 }
 0x3ae   :  { %v2033_v21 = vpop.f32.mrf.mxu3 }
 0x3b4   :  { %v2013_v14 = vpop.f32.mrf.mxu2 }
 0x3b5   :  { %10412 = vmatpush.msk.msra.mxu2 %vm1654_vm14, %v2013_v14 }
 0x3b6   :  { %v2036_v39 = vpop.f32.mrf.mxu3 }
 0x3b7   :  { %2103 = vmatpush.msra.mxu2 %v2010_v3  ;;  %10414 = vmatpush.msk.msra.mxu3 %vm1654_vm14, %v2036_v39 }
 0x3b8   :  { %10413 = vmatmul.msk.f32.vlgmr.msra.gmra.mxu2 %vm1647_vm15, %v12185_v52 }
 0x3b9   :  { %10420 = vmatpush.msk.msrb.mxu2 %vm1654_vm14, %v2013_v14  ;;  %2126 = vmatpush.msra.mxu3 %v2033_v21 }
 0x3ba   :  { %10415 = vmatmul.msk.f32.vlgmr.msra.gmra.mxu3 %vm1647_vm15, %v12185_v52  ;;  %v2314_v52 = vstv %s10433_s21  ;;  %s12790_s21 = sld [smem:[#allocation8 + $0x107]] }
 0x3bb   :  { %2186 = vmatpush.msrb.mxu2 %v2010_v3  ;;  %10422 = vmatpush.msk.msrb.mxu3 %vm1654_vm14, %v2036_v39  ;;  %v2315_v25 = vmul.f32 %v2314_v52, %v12622_v15  ;;  %v2316_v53 = vmul.f32 %v2314_v52, %v12626_v2  ;;  %v2414_v3 = vadd.f32 %v2412_v56, %v2408_v47 }
 0x3bc   :  { %v2594_v39 = vadd.f32 %v2592_v0, %v2588_v42 }
 0x3bd   :  { %2206 = vmatpush.msrb.mxu3 %v2033_v21  ;;  %v2317_v27 = vadd.f32 %v2315_v25, %v12651_v36  ;;  %v2318_v60 = vadd.f32 %v2316_v53, %v12664_v11  ;;  %v2224_v25 = vstv %s10425_s3  ;;  %v2232_v53 = vmul.f32 %v2230_v1, %v12678_v59 }
 0x3be   :  { %v2225_v43 = vmul.f32 %v2224_v25, %v12622_v15 }
 0x3bf   :  { %v2323_v20 = vadd.f32 %v2321_v51, %v2317_v27  ;;  %v2324_v26 = vadd.f32 %v2322_v6, %v2318_v60  ;;  %v2248_v27 = vstv %s12770_s13  ;;  %v2518_v51 = vstv %s12776_s14 }
 0x3c0   :  { %10421 = vmatmul.msk.f32.vlgmr.msrb.gmra.mxu2 %vm1647_vm15, %v12267_v4  ;;  %v2512_v60 = vstv %s12766_s0 }
 0x3c2   :  { %10423 = vmatmul.msk.f32.vlgmr.msrb.gmra.mxu3 %vm1647_vm15, %v12267_v4  ;;  %v2494_v4 = vstv %s10451_s22  ;;  %s12796_s22 = sld [smem:[#allocation8 + $0x207]] }
 0x3c3   :  { %v2495_v9 = vmul.f32 %v2494_v4, %v12622_v15  ;;  %v2496_v33 = vmul.f32 %v2494_v4, %v12626_v2  ;;  %v2227_v15 = vadd.f32 %v2225_v43, %v12649_v50  ;;  %v2338_v50 = vstv %s12772_s5 }
 0x3c4   :  { %v2350_v43 = vstv %s12806_s23 }
 0x3c5   :  { %v2497_v22 = vadd.f32 %v2495_v9, %v12655_v32  ;;  %v2498_v32 = vadd.f32 %v2496_v33, %v12673_v13  ;;  %v2226_v9 = vmul.f32 %v2224_v25, %v12626_v2  ;;  %v2233_v59 = vadd.f32 %v2231_v7, %v2227_v15 }
 0x3c6   :  { %v2242_v33 = vstv %s12760_s10  ;;  %v2530_v7 = vstv %s12814_s24 }
 0x3c7   :  { %v2503_v36 = vadd.f32 %v2501_v61, %v2497_v22  ;;  %v2504_v14 = vadd.f32 %v2502_v57, %v2498_v32  ;;  %v2228_v2 = vadd.f32 %v2226_v9, %v12662_v48  ;;  %v2428_v48 = vstv %s12774_s7 }
 0x3c8   :  { %v2602_v61 = vstv %s12768_s12  ;;  %v2344_v57 = vstv %s12784_s17  ;;  %v2524_v32 = vstv %s12794_s2  ;;  %v2614_v42 = vstv %s12796_s22 }
 0x3c9   :  { %v2234_v28 = vadd.f32 %v2232_v53, %v2228_v2  ;;  %v2440_v9 = vstv %s12810_s1 }
 0x41e   :  { %v2059_v54 = vpop.f32.mrf.mxu0 }
 0x41f   :  { %v2327_v38 = vmul.f32 %v2326_v55, %v2059_v54  ;;  %v2417_v23 = vmul.f32 %v2416_v35, %v2059_v54  ;;  %v2507_v58 = vmul.f32 %v2506_v63, %v2059_v54  ;;  %v2597_v10 = vmul.f32 %v2596_v18, %v2059_v54 }
 0x420   :  { %v2082_v11 = vpop.f32.mrf.mxu1  ;;  %v2237_v17 = vmul.f32 %v2236_v40, %v2059_v54 }
 0x421   :  { %v12744_v5 = vadd.f32 %v2327_v38, %v2323_v20  ;;  %v12746_v45 = vadd.f32 %v2417_v23, %v2413_v37  ;;  %v12748_v34 = vadd.f32 %v2507_v58, %v2503_v36  ;;  %v12750_v16 = vadd.f32 %v2597_v10, %v2593_v44 }
 0x422   :  { %v2328_v12 = vmul.f32 %v2326_v55, %v2082_v11  ;;  %v2418_v21 = vmul.f32 %v2416_v35, %v2082_v11  ;;  %v2508_v13 = vmul.f32 %v2506_v63, %v2082_v11  ;;  %v2598_v31 = vmul.f32 %v2596_v18, %v2082_v11 }
 0x423   :  { %v2238_v29 = vmul.f32 %v2236_v40, %v2082_v11  ;;  %v2239_v22 = vadd.f32 %v2237_v17, %v2233_v59  ;;  %v2254_v35 = vstv %s12782_s16  ;;  %v2260_v63 = vstv %s12788_s18 }
 0x424   :  { %v12752_v52 = vadd.f32 %v2328_v12, %v2324_v26  ;;  %v12754_v30 = vadd.f32 %v2418_v21, %v2414_v3  ;;  %v12756_v4 = vadd.f32 %v2508_v13, %v2504_v14  ;;  %v12758_v19 = vadd.f32 %v2598_v31, %v2594_v39 }
 0x425   :  { %v2240_v24 = vadd.f32 %v2238_v29, %v2234_v28  ;;  %v2434_v58 = vstv %s12790_s21  ;;  %v2620_v17 = vstv %s12823_s25 }
 0x426   :  { %v2148_v8 = vpop.f32.mrf.mxu0 }
 0x427   :  { %v2249_v46 = vmul.f32 %v2248_v27, %v2148_v8  ;;  %v2339_v55 = vmul.f32 %v2338_v50, %v2148_v8  ;;  %v2429_v6 = vmul.f32 %v2428_v48, %v2148_v8  ;;  %v2519_v56 = vmul.f32 %v2518_v51, %v2148_v8 }
 0x428   :  { %v2609_v18 = vmul.f32 %v2608_v62, %v2148_v8  ;;  %v12825_v36 = vpop.f32.mrf.mxu1 }
 0x429   :  { %v2250_v31 = vmul.f32 %v2248_v27, %v12825_v36  ;;  %v2340_v25 = vmul.f32 %v2338_v50, %v12825_v36 }
 0x43b   :  { %v2105_v47 = vpop.f32.mrf.mxu2 }
 0x43c   :  { %v2243_v0 = vmul.f32 %v2242_v33, %v2105_v47  ;;  %v2333_v54 = vmul.f32 %v2332_v41, %v2105_v47  ;;  %v2423_v20 = vmul.f32 %v2422_v49, %v2105_v47  ;;  %v2513_v37 = vmul.f32 %v2512_v60, %v2105_v47 }
 0x43d   :  { %v2603_v38 = vmul.f32 %v2602_v61, %v2105_v47  ;;  %v2128_v23 = vpop.f32.mrf.mxu3 }
 0x43e   :  { %v2245_v44 = vadd.f32 %v2243_v0, %v2239_v22  ;;  %v2335_v10 = vadd.f32 %v2333_v54, %v12744_v5  ;;  %v2425_v11 = vadd.f32 %v2423_v20, %v12746_v45  ;;  %v2515_v26 = vadd.f32 %v2513_v37, %v12748_v34 }
 0x43f   :  { %v2605_v12 = vadd.f32 %v2603_v38, %v12750_v16  ;;  %v2244_v3 = vmul.f32 %v2242_v33, %v2128_v23  ;;  %v2334_v21 = vmul.f32 %v2332_v41, %v2128_v23  ;;  %v2424_v14 = vmul.f32 %v2422_v49, %v2128_v23 }
 0x440   :  { %v2514_v13 = vmul.f32 %v2512_v60, %v2128_v23  ;;  %v2604_v39 = vmul.f32 %v2602_v61, %v2128_v23  ;;  %v2251_v53 = vadd.f32 %v2249_v46, %v2245_v44  ;;  %v2341_v40 = vadd.f32 %v2339_v55, %v2335_v10 }
 0x441   :  { %v2246_v1 = vadd.f32 %v2244_v3, %v2240_v24  ;;  %v2336_v5 = vadd.f32 %v2334_v21, %v12752_v52  ;;  %v2426_v45 = vadd.f32 %v2424_v14, %v12754_v30  ;;  %v2431_v15 = vadd.f32 %v2429_v6, %v2425_v11 }
 0x442   :  { %v12840_v34 = vadd.f32 %v2514_v13, %v12756_v4  ;;  %v12843_v16 = vadd.f32 %v2604_v39, %v12758_v19  ;;  %v2521_v29 = vadd.f32 %v2519_v56, %v2515_v26  ;;  %v2611_v52 = vadd.f32 %v2609_v18, %v2605_v12 }
 0x443   :  { %v2188_v2 = vpop.f32.mrf.mxu2  ;;  %v2252_v28 = vadd.f32 %v2250_v31, %v2246_v1  ;;  %v2342_v61 = vadd.f32 %v2340_v25, %v2336_v5  ;;  %v2430_v6 = vmul.f32 %v2428_v48, %v12825_v36  ;;  %v2520_v39 = vmul.f32 %v2518_v51, %v12825_v36 }
 0x444   :  { %v2255_v30 = vmul.f32 %v2254_v35, %v2188_v2  ;;  %v2345_v59 = vmul.f32 %v2344_v57, %v2188_v2  ;;  %v2435_v4 = vmul.f32 %v2434_v58, %v2188_v2  ;;  %v2525_v33 = vmul.f32 %v2524_v32, %v2188_v2 }
 0x445   :  { %v2615_v19 = vmul.f32 %v2614_v42, %v2188_v2  ;;  %v2208_v41 = vpop.f32.mrf.mxu3  ;;  %v2432_v12 = vadd.f32 %v2430_v6, %v2426_v45  ;;  %v2522_v45 = vadd.f32 %v2520_v39, %v12840_v34 }
 0x446   :  { %v2257_v8 = vadd.f32 %v2255_v30, %v2251_v53  ;;  %v2347_v27 = vadd.f32 %v2345_v59, %v2341_v40  ;;  %v2256_v50 = vmul.f32 %v2254_v35, %v2208_v41  ;;  %v2346_v49 = vmul.f32 %v2344_v57, %v2208_v41 }
 0x447   :  { %v2437_v22 = vadd.f32 %v2435_v4, %v2431_v15  ;;  %v2527_v24 = vadd.f32 %v2525_v33, %v2521_v29  ;;  %v2617_v60 = vadd.f32 %v2615_v19, %v2611_v52  ;;  %v2436_v44 = vmul.f32 %v2434_v58, %v2208_v41 }
 0x448   :  { %v2261_v46 = vadd.f32 %v2260_v63, %v2257_v8  ;;  %v2351_v55 = vadd.f32 %v2350_v43, %v2347_v27  ;;  %v2258_v47 = vadd.f32 %v2256_v50, %v2252_v28  ;;  %v2348_v57 = vadd.f32 %v2346_v49, %v2342_v61 }
 0x449   :  { %v2441_v56 = vadd.f32 %v2440_v9, %v2437_v22  ;;  %v2531_v18 = vadd.f32 %v2530_v7, %v2527_v24  ;;  %v2621_v0 = vadd.f32 %v2620_v17, %v2617_v60  ;;  %v2526_v25 = vmul.f32 %v2524_v32, %v2208_v41 }
 0x44a   :  { %v2263_v54 = vsub.f32 0.0, %v2261_v46  ;;  %v2353_v20 = vsub.f32 0.0, %v2351_v55  ;;  %v2262_v35 = vadd.f32 %v2260_v63, %v2258_v47  ;;  %v2352_v14 = vadd.f32 %v2350_v43, %v2348_v57 }
 0x44b   :  { %v2443_v37 = vsub.f32 0.0, %v2441_v56  ;;  %v2533_v38 = vsub.f32 0.0, %v2531_v18  ;;  %v2623_v23 = vsub.f32 0.0, %v2621_v0  ;;  %v2438_v63 = vadd.f32 %v2436_v44, %v2432_v12 }
 0x44c   :  { %v2265_v10 = vmul.f32 1.442695, %v2263_v54  ;;  %v2355_v11 = vmul.f32 1.442695, %v2353_v20  ;;  %v2264_v26 = vsub.f32 0.0, %v2262_v35  ;;  %v2354_v58 = vsub.f32 0.0, %v2352_v14 }
 0x44d   :  { %v2445_v48 = vmul.f32 1.442695, %v2443_v37  ;;  %v2535_v3 = vmul.f32 1.442695, %v2533_v38  ;;  %v2625_v21 = vmul.f32 1.442695, %v2623_v23  ;;  %v2442_v31 = vadd.f32 %v2440_v9, %v2438_v63 }
 0x44e   :  { %11123 = vpow2.f32 %v2265_v10  ;;  %v2267_v13 = vmul.f32 1.442695, %v2264_v26  ;;  %v2610_v43 = vmul.f32 %v2608_v62, %v12825_v36  ;;  %v2357_v51 = vmul.f32 1.442695, %v2354_v58 }
 0x44f   :  { %11125 = vpow2.f32 %v2355_v11  ;;  %v2444_v9 = vsub.f32 0.0, %v2442_v31  ;;  %v2528_v29 = vadd.f32 %v2526_v25, %v2522_v45  ;;  %v2616_v32 = vmul.f32 %v2614_v42, %v2208_v41 }
 0x450   :  { %11127 = vpow2.f32 %v2445_v48  ;;  %v2612_v62 = vadd.f32 %v2610_v43, %v12843_v16  ;;  %v2670_v43 = vld [vmem:[#allocation11 + $0x30] sm:$0xff] }
 0x451   :  { %11129 = vpow2.f32 %v2535_v3  ;;  %v2447_v28 = vmul.f32 1.442695, %v2444_v9  ;;  %v2532_v4 = vadd.f32 %v2530_v7, %v2528_v29 }
 0x452   :  { %11131 = vpow2.f32 %v2625_v21  ;;  %v2618_v42 = vadd.f32 %v2616_v32, %v2612_v62  ;;  %v2688_v62 = vunpack.c.l.b16 %v2670_v43 }
 0x453   :  { %11133 = vpow2.f32 %v2267_v13  ;;  %v2534_v27 = vsub.f32 0.0, %v2532_v4 }
 0x454   :  { %v11124_v1 = vpop.eup %11123  ;;  %v12904_v7 = vadd.f32 %v2620_v17, %v2618_v42 }
 0x455   :  { %v11126_v5 = vpop.eup %11125  ;;  %v12872_v53 = vadd.f32 1.0, %v11124_v1  ;;  %v2537_v54 = vmul.f32 1.442695, %v2534_v27 }
 0x456   :  { %v11128_v40 = vpop.eup %11127  ;;  %v12874_v15 = vadd.f32 1.0, %v11126_v5  ;;  %v2624_v20 = vsub.f32 0.0, %v12904_v7 }
 0x457   :  { %v11130_v2 = vpop.eup %11129  ;;  %11135 = vrcp.f32 %v12872_v53  ;;  %v12881_v36 = vadd.f32 1.0, %v11128_v40  ;;  %v2280_v22 = vand.u32 2147483647, %v12872_v53  ;;  %v2282_v24 = vand.u32 2147483648, %v12872_v53 }
 0x458   :  { %v11132_v52 = vpop.eup %11131  ;;  %11137 = vrcp.f32 %v12874_v15  ;;  %v12883_v30 = vadd.f32 1.0, %v11130_v2  ;;  %v2370_v46 = vand.u32 2147483647, %v12874_v15  ;;  %v2372_v55 = vand.u32 2147483648, %v12874_v15 }
 0x459   :  { %v11134_v34 = vpop.eup %11133  ;;  %v12885_v59 = vadd.f32 1.0, %v11132_v52  ;;  %11139 = vpow2.f32 %v2357_v51  ;;  %vm2276_vm0 = vweird.f32 %v12872_v53  ;;  %vm12925_vm1 = vcmp.eq.f32.partialorder %v2280_v22, 8.507059e+37 }
 0x45a   :  { %11141 = vrcp.f32 %v12881_v36  ;;  %v12891_v33 = vadd.f32 1.0, %v11134_v34  ;;  %v2283_v57 = vor.u32 1.1754944e-38, %v2282_v24  ;;  %vm2366_vm2 = vweird.f32 %v12874_v15 }
 0x45b   :  { %11143 = vrcp.f32 %v12883_v30  ;;  %vm12931_vm4 = vcmp.eq.f32.partialorder %v2370_v46, 8.507059e+37  ;;  %v2373_v23 = vor.u32 1.1754944e-38, %v2372_v55  ;;  %v2460_v44 = vand.u32 2147483647, %v12881_v36 }
 0x45c   :  { %11145 = vrcp.f32 %v12885_v59  ;;  %vm2456_vm6 = vweird.f32 %v12881_v36  ;;  %v2462_v13 = vand.u32 2147483648, %v12881_v36  ;;  %v2550_v63 = vand.u32 2147483647, %v12883_v30 }
 0x45d   :  { %v12893_v19 = vpop.eup %11135  ;;  %11147 = vpow2.f32 %v2447_v28  ;;  %v2552_v39 = vand.u32 2147483648, %v12883_v30  ;;  %vm2546_vm8 = vweird.f32 %v12883_v30  ;;  %v2295_v25 = vand.u32 2147483647, %v12891_v33 }
 0x45e   :  { %v12896_v16 = vpop.eup %11137  ;;  %v2272_v41 = vmul.f32 %v12893_v19, %v12872_v53  ;;  %11149 = vrcp.f32 %v12891_v33  ;;  %vm2277_vm3 = vweird.f32 %v12893_v19  ;;  %v2297_v1 = vand.u32 2147483648, %v12891_v33 }
 0x45f   :  { %v2362_v8 = vmul.f32 %v12896_v16, %v12874_v15  ;;  %v11140_v50 = vpop.eup %11139  ;;  %vm2367_vm5 = vweird.f32 %v12896_v16  ;;  %11151 = vpow2.f32 %v2537_v54  ;;  %vm12952_vm7 = vmor %vm2276_vm0, %vm2277_vm3  ;;  %vm12978_vm11 = vcmp.eq.f32.partialorder %v2460_v44, 8.507059e+37 }
 0x460   :  { %v2273_v49 = vsub.f32 1.0, %v2272_v41  ;;  %v12909_v60 = vpop.eup %11141  ;;  %v12939_v48 = vadd.f32 1.0, %v11140_v50  ;;  %vm12968_vm9 = vmor %vm2366_vm2, %vm2367_vm5  ;;  %v2463_v15 = vor.u32 1.1754944e-38, %v2462_v13  ;;  %vm2636_vm12 = vweird.f32 %v12885_v59 }
 0x461   :  { %v2363_v61 = vsub.f32 1.0, %v2362_v8  ;;  %v12913_v47 = vpop.eup %11143  ;;  %v2452_v6 = vmul.f32 %v12909_v60, %v12881_v36  ;;  %vm2291_vm13 = vweird.f32 %v12891_v33  ;;  %vm2457_vm14 = vweird.f32 %v12909_v60  ;;  %v2668_v8 = vld [vmem:[#allocation11 + $0x20] sm:$0xff] }
 0x462   :  { %v2274_v17 = vmul.f32 %v12893_v19, %v2273_v49  ;;  %v12918_v56 = vpop.eup %11145  ;;  %v2542_v0 = vmul.f32 %v12913_v47, %v12883_v30  ;;  %11153 = vrcp.f32 %v12939_v48  ;;  %vm12987_vm15 = vcmp.eq.f32.partialorder %v2550_v63, 8.507059e+37  ;;  %vm13012_vm3 = vmor %vm2456_vm6, %vm2457_vm14 }
 0x463   :  { %v2364_v18 = vmul.f32 %v12896_v16, %v2363_v61  ;;  %v11148_v37 = vpop.eup %11147  ;;  %v2453_v26 = vsub.f32 1.0, %v2452_v6  ;;  %v2632_v12 = vmul.f32 %v12918_v56, %v12885_v59  ;;  %vm12991_vm0 = vcmp.eq.f32.partialorder %v2295_v25, 8.507059e+37 }
 0x464   :  { %v11150_v10 = vpop.eup %11149  ;;  %v2275_v11 = vadd.f32 %v12893_v19, %v2274_v17  ;;  %v2543_v21 = vsub.f32 1.0, %v2542_v0  ;;  %v12959_v5 = vadd.f32 1.0, %v11148_v37  ;;  %vm2547_vm2 = vweird.f32 %v12913_v47 }
 0x465   :  { %v2365_v3 = vadd.f32 %v12896_v16, %v2364_v18  ;;  %v2287_v14 = vmul.f32 %v11150_v10, %v12891_v33  ;;  %v2454_v53 = vmul.f32 %v12909_v60, %v2453_v26  ;;  %v2633_v40 = vsub.f32 1.0, %v2632_v12  ;;  %v11152_v28 = vpop.eup %11151  ;;  %vm13028_vm5 = vmor %vm2546_vm8, %vm2547_vm2 }
 0x466   :  { %v2279_v45 = vsel %vm12952_vm7, %v12893_v19, %v2275_v11  ;;  %v2544_v2 = vmul.f32 %v12913_v47, %v2543_v21  ;;  %vm2292_vm10 = vweird.f32 %v11150_v10  ;;  %v2298_v19 = vor.u32 1.1754944e-38, %v2297_v1 }
 0x467   :  { %v2288_v31 = vsub.f32 1.0, %v2287_v14  ;;  %v2369_v51 = vsel %vm12968_vm9, %v12896_v16, %v2365_v3  ;;  %v2284_v32 = vsel %vm12925_vm1, %v2283_v57, %v2279_v45  ;;  %v2455_v42 = vadd.f32 %v12909_v60, %v2454_v53  ;;  %vm2293_vm1 = vmor %vm2291_vm13, %vm2292_vm10 }
 0x468   :  { %v2374_v4 = vsel %vm12931_vm4, %v2373_v23, %v2369_v51  ;;  %v2634_v33 = vmul.f32 %v12918_v56, %v2633_v40  ;;  %v2545_v16 = vadd.f32 %v12913_v47, %v2544_v2  ;;  %11155 = vrcp.f32 %v12959_v5  ;;  %v13002_v27 = vpop.eup %11153  ;;  %v2669_v23 = vld [vmem:[#allocation11 + $0x28] sm:$0xff] }
 0x469   :  { %v2289_v9 = vmul.f32 %v11150_v10, %v2288_v31  ;;  %v2640_v50 = vand.u32 2147483647, %v12885_v59  ;;  %v2642_v49 = vand.u32 2147483648, %v12885_v59  ;;  %v2661_v22 = vpack.c.bf16 %v2284_v32, %v2284_v32 }
 0x46a   :  { %vm2637_vm4 = vweird.f32 %v12918_v56  ;;  %v3995_v46 = vpack.c.bf16 %v2374_v4, %v2374_v4  ;;  %v2377_v55 = vmul.f32 %v13002_v27, %v12939_v48  ;;  %v13019_v17 = vadd.f32 1.0, %v11152_v28 }
 0x46b   :  { %v2290_v34 = vadd.f32 %v11150_v10, %v2289_v9  ;;  %v2459_v6 = vsel %vm13012_vm3, %v12909_v60, %v2455_v42  ;;  %v2635_v18 = vadd.f32 %v12918_v56, %v2634_v33  ;;  %v2627_v0 = vmul.f32 1.442695, %v2624_v20  ;;  %vm13055_vm7 = vmor %vm2636_vm12, %vm2637_vm4 }
 0x46c   :  { %v2684_v54 = vunpack.c.l.b16 %v2668_v8  ;;  %v2549_v35 = vsel %vm13028_vm5, %v12913_v47, %v2545_v16  ;;  %v2378_v57 = vsub.f32 1.0, %v2377_v55  ;;  %11157 = vrcp.f32 %v13019_v17 }
 0x46d   :  { %v2294_v41 = vsel %vm2293_vm1, %v11150_v10, %v2290_v34  ;;  %v2553_v37 = vor.u32 1.1754944e-38, %v2552_v39  ;;  %vm13039_vm6 = vcmp.eq.f32.partialorder %v2640_v50, 8.507059e+37  ;;  %v13043_v38 = vunpack.c.l.b16 %v2661_v22  ;;  %v2663_v50 = vld [vmem:[#allocation11] sm:$0xff] }
 0x46e   :  { %v2299_v24 = vsel %vm12991_vm0, %v2298_v19, %v2294_v41  ;;  %11159 = vpow2.f32 %v2627_v0  ;;  %v13045_v7 = vpop.eup %11155  ;;  %v13049_v20 = vsel %vm12978_vm11, %v2463_v15, %v2459_v6  ;;  %v2643_v44 = vor.u32 1.1754944e-38, %v2642_v49 }
 0x46f   :  { %v2662_v60 = vpack.c.bf16 %v2299_v24, %v2299_v24  ;;  %v13059_v10 = vunpack.c.l.b16 %v3995_v46  ;;  %v2692_v11 = vpack.c.b16 %v2684_v54, %v2684_v54  ;;  %v13063_v26 = vsel %vm12987_vm15, %v2553_v37, %v2549_v35 }
 0x470   :  { %v2639_v12 = vsel %vm13055_vm7, %v12918_v56, %v2635_v18  ;;  %vm2704_vm8 = vcmask 1043456   ;;  %v2685_v3 = vunpack.c.h.b16 %v2668_v8  ;;  %v2379_v59 = vmul.f32 %v13002_v27, %v2378_v57  ;;  %v2671_v8 = vld [vmem:[#allocation11 + $0x38] sm:$0xff]  ;;  %v2664_v18 = vld [vmem:[#allocation11 + $0x8] sm:$0xff] }
 0x471   :  { %v13069_v21 = vunpack.c.l.b16 %v2662_v60  ;;  %v2706_v14 = vsel %vm2704_vm8, %v2692_v11, 0  ;;  %v2686_v13 = vunpack.c.l.b16 %v2669_v23  ;;  %v2467_v63 = vmul.f32 %v13045_v7, %v12959_v5 }
 0x472   :  { %2736 = vmatpush.bf16.msra.mxu0 %v2706_v14  ;;  %v2693_v39 = vpack.c.b16 %v2685_v3, %v2685_v3  ;;  %v2687_v58 = vunpack.c.h.b16 %v2669_v23  ;;  %v2676_v31 = vrot.slane %v13043_v38, 1  ;;  %v13075_v25 = vpop.eup %11157  ;;  %v5343_v56 = vpack.c.bf16 %v13049_v20, %v13049_v20 }
 0x473   :  { %v2385_v1 = vand.u32 2147483647, %v12939_v48  ;;  %v2694_v45 = vpack.c.b16 %v2686_v13, %v2686_v13  ;;  %vm2677_vm9 = vcmask 1041409   ;;  %v2387_v40 = vand.u32 2147483648, %v12939_v48 }
 0x474   :  { %v11160_v53 = vpop.eup %11159  ;;  %v2477_v51 = vand.u32 2147483648, %v12959_v5  ;;  %v2557_v2 = vmul.f32 %v13075_v25, %v13019_v17  ;;  %v2709_v9 = vsel %vm2704_vm8, %v2693_v39, 0  ;;  %v2380_v29 = vadd.f32 %v13002_v27, %v2379_v59  ;;  %v2665_v59 = vld [vmem:[#allocation11 + $0x10] sm:$0xff] }
 0x475   :  { %vm2381_vm10 = vweird.f32 %v12939_v48  ;;  %vm2382_vm11 = vweird.f32 %v13002_v27  ;;  %2749 = vmatpush.bf16.msra.mxu1 %v2709_v9  ;;  %v2712_v15 = vsel %vm2704_vm8, %v2694_v45, 0  ;;  %v2468_v32 = vsub.f32 1.0, %v2467_v63 }
 0x476   :  { %2762 = vmatpush.bf16.msra.mxu2 %v2712_v15  ;;  %v2695_v52 = vpack.c.b16 %v2687_v58, %v2687_v58  ;;  %v2678_v34 = vsel %vm2677_vm9, %v13069_v21, %v2676_v31  ;;  %v13093_v28 = vsel %vm13039_vm6, %v2643_v44, %v2639_v12  ;;  %vm13095_vm12 = vcmp.eq.f32.partialorder %v2385_v1, 8.507059e+37  ;;  %vm13109_vm15 = vmor %vm2381_vm10, %vm2382_vm11 }
 0x477   :  { %v2475_v42 = vand.u32 2147483647, %v12959_v5  ;;  %v13100_v33 = vadd.f32 1.0, %v11160_v53  ;;  %v2388_v19 = vor.u32 1.1754944e-38, %v2387_v40  ;;  %vm2471_vm13 = vweird.f32 %v12959_v5 }
 0x478   :  { %v13103_v16 = vor.u32 1.1754944e-38, %v2477_v51  ;;  %v2558_v41 = vsub.f32 1.0, %v2557_v2  ;;  %vm2700_vm14 = vcmask 64512   ;;  %v2565_v22 = vand.u32 2147483647, %v13019_v17 }
 0x479   :  { %v2567_v24 = vand.u32 2147483648, %v13019_v17  ;;  %v2715_v61 = vsel %vm2704_vm8, %v2695_v52, 0  ;;  %v13116_v46 = vpack.c.b16 %v2678_v34, %v2678_v34  ;;  %v2384_v55 = vsel %vm13109_vm15, %v13002_v27, %v2380_v29 }
 0x47a   :  { %v2469_v6 = vmul.f32 %v13045_v7, %v2468_v32  ;;  %vm2561_vm0 = vweird.f32 %v13019_v17  ;;  %2775 = vmatpush.bf16.msra.mxu3 %v2715_v61  ;;  %v2696_v48 = vpack.c.b16 %v2688_v62, %v2688_v62  ;;  %v2689_v36 = vunpack.c.h.b16 %v2670_v43  ;;  %v2666_v43 = vld [vmem:[#allocation11 + $0x18] sm:$0xff] }
 0x47b   :  { %11161 = vrcp.f32 %v13100_v33  ;;  %10467 = vmatmul.msk.bf16.vlgmr.msra.gmra.mxu0 %vm2700_vm14, %v13116_v46  ;;  %10468 = vmatmul.msk.bf16.vlgmr.msra.gmra.mxu1 %vm2700_vm14, %v13116_v46  ;;  %v2690_v0 = vunpack.c.l.b16 %v2671_v8  ;;  %v2691_v54 = vunpack.c.h.b16 %v2671_v8  ;;  %v2840_v35 = vunpack.c.l.b16 %v2663_v50 }
 0x47c   :  { %vm13128_vm1 = vcmp.eq.f32.partialorder %v2475_v42, 8.507059e+37  ;;  %v2559_v57 = vmul.f32 %v13075_v25, %v2558_v41  ;;  %10469 = vmatmul.msk.bf16.vlgmr.msra.gmra.mxu2 %vm2700_vm14, %v13116_v46  ;;  %v2718_v60 = vsel %vm2704_vm8, %v2696_v48, 0  ;;  %v2697_v37 = vpack.c.b16 %v2689_v36, %v2689_v36 }
 0x47d   :  { %v2841_v30 = vunpack.c.h.b16 %v2663_v50  ;;  %v2389_v23 = vsel %vm13095_vm12, %v2388_v19, %v2384_v55  ;;  %10470 = vmatmul.msk.bf16.vlgmr.msra.gmra.mxu3 %vm2700_vm14, %v13116_v46  ;;  %2788 = vmatpush.bf16.msrb.mxu0 %v2718_v60  ;;  %v2698_v47 = vpack.c.b16 %v2690_v0, %v2690_v0  ;;  %v2699_v44 = vpack.c.b16 %v2691_v54, %v2691_v54 }
 0x47e   :  { %v2842_v11 = vunpack.c.l.b16 %v2664_v18  ;;  %v2470_v12 = vadd.f32 %v13045_v7, %v2469_v6  ;;  %vm2472_vm2 = vweird.f32 %v13045_v7  ;;  %vm2562_vm3 = vweird.f32 %v13075_v25 }
 0x47f   :  { %v2721_v3 = vsel %vm2704_vm8, %v2697_v37, 0  ;;  %v2724_v14 = vsel %vm2704_vm8, %v2698_v47, 0  ;;  %v2727_v13 = vsel %vm2704_vm8, %v2699_v44, 0  ;;  %v2848_v63 = vpack.c.b16 %v2840_v35, %v2840_v35  ;;  %vm13153_vm4 = vmor %vm2471_vm13, %vm2472_vm2 }
 0x480   :  { %2801 = vmatpush.bf16.msrb.mxu1 %v2721_v3  ;;  %v2849_v39 = vpack.c.b16 %v2841_v30, %v2841_v30  ;;  %v2560_v58 = vadd.f32 %v13075_v25, %v2559_v57  ;;  %v3996_v31 = vpack.c.bf16 %v2389_v23, %v2389_v23  ;;  %2814 = vmatpush.bf16.msrb.mxu2 %v2724_v14  ;;  %v2843_v45 = vunpack.c.h.b16 %v2664_v18  ;;  %vm13168_vm5 = vmor %vm2561_vm0, %vm2562_vm3 }
 0x481   :  { %2827 = vmatpush.bf16.msrb.mxu3 %v2727_v13  ;;  %v2850_v1 = vpack.c.b16 %v2842_v11, %v2842_v11  ;;  %v13147_v53 = vpop.eup %11161  ;;  %v2860_v51 = vsel %vm2704_vm8, %v2848_v63, 0  ;;  %v2833_v9 = vrot.slane %v13069_v21, 7  ;;  %v2844_v29 = vunpack.c.l.b16 %v2665_v59 }
 0x482   :  { %v2863_v2 = vsel %vm2704_vm8, %v2849_v39, 0  ;;  %v2474_v15 = vsel %vm13153_vm4, %v13045_v7, %v2470_v12  ;;  %2890 = vmatpush.bf16.msra.mxu0 %v2860_v51  ;;  %v2851_v5 = vpack.c.b16 %v2843_v45, %v2843_v45  ;;  %v2845_v52 = vunpack.c.h.b16 %v2665_v59 }
 0x483   :  { %v2866_v32 = vsel %vm2704_vm8, %v2850_v1, 0  ;;  %vm13172_vm6 = vcmp.eq.f32.partialorder %v2565_v22, 8.507059e+37  ;;  %v13178_v7 = vsel %vm2677_vm9, %v2833_v9, %v13043_v38  ;;  %v2846_v4 = vunpack.c.l.b16 %v2666_v43  ;;  %v2988_v1 = vld [vmem:[#allocation11 + $0x40] sm:$0xff] }
 0x484   :  { %2903 = vmatpush.bf16.msra.mxu1 %v2863_v2  ;;  %2916 = vmatpush.bf16.msra.mxu2 %v2866_v32  ;;  %v2847_v42 = vunpack.c.h.b16 %v2666_v43  ;;  %v2564_v19 = vsel %vm13168_vm5, %v13075_v25, %v2560_v58  ;;  %v2568_v41 = vor.u32 1.1754944e-38, %v2567_v24  ;;  %v2647_v8 = vmul.f32 %v13147_v53, %v13100_v33 }
 0x485   :  { %v2869_v50 = vsel %vm2704_vm8, %v2851_v5, 0  ;;  %v2479_v49 = vsel %vm13128_vm1, %v13103_v16, %v2474_v15  ;;  %v2657_v22 = vand.u32 2147483648, %v13100_v33  ;;  %v13192_v61 = vunpack.c.l.b16 %v3996_v31 }
 0x486   :  { %2929 = vmatpush.bf16.msra.mxu3 %v2869_v50  ;;  %v2852_v55 = vpack.c.b16 %v2844_v29, %v2844_v29  ;;  %v2853_v6 = vpack.c.b16 %v2845_v52, %v2845_v52  ;;  %v2854_v25 = vpack.c.b16 %v2846_v4, %v2846_v4  ;;  %v2992_v17 = vrot.slane %v13043_v38, 2  ;;  %v2989_v29 = vld [vmem:[#allocation11 + $0x48] sm:$0xff] }
 0x487   :  { %v2993_v24 = vrot.slane %v13069_v21, 1  ;;  %v2569_v48 = vsel %vm13172_vm6, %v2568_v41, %v2564_v19  ;;  %v2855_v36 = vpack.c.b16 %v2847_v42, %v2847_v42  ;;  %v3160_v18 = vrot.slane %v13043_v38, 3 }
 0x488   :  { %v3161_v16 = vrot.slane %v13069_v21, 2  ;;  %v2648_v0 = vsub.f32 1.0, %v2647_v8  ;;  %v3328_v35 = vrot.slane %v13043_v38, 4  ;;  %v3329_v27 = vrot.slane %v13069_v21, 3 }
 0x489   :  { %v13201_v54 = vsel %vm2677_vm9, %v2993_v24, %v2992_v17  ;;  %v2872_v57 = vsel %vm2704_vm8, %v2852_v55, 0  ;;  %v3496_v37 = vrot.slane %v13043_v38, 5  ;;  %v3497_v30 = vrot.slane %v13069_v21, 4 }
 0x48a   :  { %v13207_v60 = vsel %vm2677_vm9, %v3161_v16, %v3160_v18  ;;  %v5344_v23 = vpack.c.bf16 %v2479_v49, %v2479_v49  ;;  %v2875_v47 = vsel %vm2704_vm8, %v2853_v6, 0  ;;  %v2878_v44 = vsel %vm2704_vm8, %v2854_v25, 0 }
 0x48b   :  { %v13214_v11 = vsel %vm2677_vm9, %v3329_v27, %v3328_v35  ;;  %10471 = vmatmul.msk.bf16.vlgmr.msrb.gmra.mxu0 %vm2700_vm14, %v13116_v46  ;;  %10472 = vmatmul.msk.bf16.vlgmr.msrb.gmra.mxu1 %vm2700_vm14, %v13116_v46  ;;  %v2881_v12 = vsel %vm2704_vm8, %v2855_v36, 0  ;;  %v13222_v3 = vsel %vm2677_vm9, %v3497_v30, %v3496_v37  ;;  %v3664_v59 = vrot.slane %v13043_v38, 6 }
 0x48c   :  { %v3665_v14 = vrot.slane %v13069_v21, 5  ;;  %v6692_v13 = vpack.c.bf16 %v2569_v48, %v2569_v48  ;;  %10473 = vmatmul.msk.bf16.vlgmr.msrb.gmra.mxu2 %vm2700_vm14, %v13116_v46  ;;  %2942 = vmatpush.bf16.msrb.mxu0 %v2872_v57  ;;  %v3833_v63 = vrot.slane %v13069_v21, 6  ;;  %v4006_v39 = vrot.slane %v13192_v61, 7 }
 0x48d   :  { %v4173_v58 = vrot.slane %v13059_v10, 1  ;;  %v2649_v31 = vmul.f32 %v13147_v53, %v2648_v0  ;;  %10474 = vmatmul.msk.bf16.vlgmr.msrb.gmra.mxu3 %vm2700_vm14, %v13116_v46  ;;  %2955 = vmatpush.bf16.msrb.mxu1 %v2875_v47  ;;  %v3832_v43 = vrot.slane %v13043_v38, 7  ;;  %v4341_v40 = vrot.slane %v13192_v61, 1 }
 0x48e   :  { %v13235_v45 = vsel %vm2677_vm9, %v3665_v14, %v3664_v59  ;;  %v6691_v21 = vpack.c.bf16 %v13063_v26, %v13063_v26  ;;  %v2655_v51 = vand.u32 2147483647, %v13100_v33  ;;  %2968 = vmatpush.bf16.msrb.mxu2 %v2878_v44  ;;  %2981 = vmatpush.bf16.msrb.mxu3 %v2881_v12  ;;  %v3000_v2 = vunpack.c.l.b16 %v2988_v1 }
 0x48f   :  { %v4340_v9 = vrot.slane %v13059_v10, 2  ;;  %v3001_v46 = vunpack.c.h.b16 %v2988_v1  ;;  %v13244_v15 = vsel %vm2677_vm9, %v3833_v63, %v3832_v43  ;;  %v13248_v38 = vsel %vm2677_vm9, %v4006_v39, %v13059_v10 }
 0x490   :  { %v13252_v32 = vsel %vm2677_vm9, %v13192_v61, %v4173_v58  ;;  %v13257_v5 = vunpack.c.l.b16 %v5343_v56  ;;  %vm2651_vm7 = vweird.f32 %v13100_v33  ;;  %v2658_v52 = vor.u32 1.1754944e-38, %v2657_v22 }
 0x491   :  { %v13260_v34 = vunpack.c.l.b16 %v5344_v23  ;;  %v2650_v62 = vadd.f32 %v13147_v53, %v2649_v31  ;;  %vm2652_vm10 = vweird.f32 %v13147_v53  ;;  %v13264_v4 = vunpack.c.l.b16 %v6692_v13 }
 0x492   :  { %v13267_v42 = vsel %vm2677_vm9, %v4341_v40, %v4340_v9  ;;  %vm13269_vm11 = vcmp.eq.f32.partialorder %v2655_v51, 8.507059e+37  ;;  %v3008_v20 = vpack.c.b16 %v3000_v2, %v3000_v2  ;;  %v3002_v56 = vunpack.c.l.b16 %v2989_v29  ;;  %vm13285_vm12 = vmor %vm2651_vm7, %vm2652_vm10 }
 0x493   :  { %v3003_v41 = vunpack.c.h.b16 %v2989_v29  ;;  %v4508_v8 = vrot.slane %v13059_v10, 3  ;;  %v3009_v50 = vpack.c.b16 %v3001_v46, %v3001_v46  ;;  %v4509_v49 = vrot.slane %v13192_v61, 2  ;;  %v2990_v29 = vld [vmem:[#allocation11 + $0x50] sm:$0xff] }
 0x494   :  { %v4676_v22 = vrot.slane %v13059_v10, 4  ;;  %v4677_v55 = vrot.slane %v13192_v61, 3  ;;  %v4844_v6 = vrot.slane %v13059_v10, 5  ;;  %v4845_v25 = vrot.slane %v13192_v61, 4 }
 0x495   :  { %v5012_v17 = vrot.slane %v13059_v10, 6  ;;  %v5013_v24 = vrot.slane %v13192_v61, 5  ;;  %v13290_v36 = vsel %vm2677_vm9, %v4509_v49, %v4508_v8  ;;  %v5180_v16 = vrot.slane %v13059_v10, 7 }
 0x496   :  { %v13293_v18 = vsel %vm2677_vm9, %v4677_v55, %v4676_v22  ;;  %v5181_v0 = vrot.slane %v13192_v61, 6  ;;  %v2654_v35 = vsel %vm13285_vm12, %v13147_v53, %v2650_v62  ;;  %v13302_v33 = vpack.c.b16 %v13178_v7, %v13178_v7 }
 0x497   :  { %v13305_v27 = vsel %vm2677_vm9, %v4845_v25, %v4844_v6  ;;  %v13308_v57 = vsel %vm2677_vm9, %v5013_v24, %v5012_v17  ;;  %v3010_v37 = vpack.c.b16 %v3002_v56, %v3002_v56  ;;  %v3011_v30 = vpack.c.b16 %v3003_v41, %v3003_v41 }
 0x498   :  { %v13311_v10 = vsel %vm2677_vm9, %v5181_v0, %v5180_v16  ;;  %v5354_v61 = vrot.slane %v13260_v34, 7  ;;  %v3020_v23 = vsel %vm2704_vm8, %v3008_v20, 0  ;;  %v5521_v53 = vrot.slane %v13257_v5, 1 }
 0x499   :  { %v5688_v7 = vrot.slane %v13257_v5, 2  ;;  %v5689_v47 = vrot.slane %v13260_v34, 1  ;;  %v3023_v44 = vsel %vm2704_vm8, %v3009_v50, 0  ;;  %v5856_v59 = vrot.slane %v13257_v5, 3  ;;  %v2991_v50 = vld [vmem:[#allocation11 + $0x58] sm:$0xff] }
 0x49a   :  { %v13321_v12 = vsel %vm2677_vm9, %v5354_v61, %v13257_v5  ;;  %v5857_v14 = vrot.slane %v13260_v34, 2  ;;  %v13327_v13 = vsel %vm2677_vm9, %v13260_v34, %v5521_v53  ;;  %v6024_v39 = vrot.slane %v13257_v5, 4 }
 0x49b   :  { %v13330_v63 = vsel %vm2677_vm9, %v5689_v47, %v5688_v7  ;;  %v6025_v58 = vrot.slane %v13260_v34, 3  ;;  %v2659_v31 = vsel %vm13269_vm11, %v2658_v52, %v2654_v35  ;;  %10475 = vmatmul.msk.bf16.vlgmr.msra.gmra.mxu0 %vm2700_vm14, %v13302_v33  ;;  %10476 = vmatmul.msk.bf16.vlgmr.msra.gmra.mxu1 %vm2700_vm14, %v13302_v33  ;;  %v3026_v1 = vsel %vm2704_vm8, %v3010_v37, 0 }
 0x49c   :  { %v3029_v43 = vsel %vm2704_vm8, %v3011_v30, 0  ;;  %v13343_v40 = vsel %vm2677_vm9, %v5857_v14, %v5856_v59  ;;  %v8039_v51 = vpack.c.bf16 %v13093_v28, %v13093_v28  ;;  %10477 = vmatmul.msk.bf16.vlgmr.msra.gmra.mxu2 %vm2700_vm14, %v13302_v33  ;;  %3050 = vmatpush.bf16.msra.mxu0 %v3020_v23  ;;  %v6192_v9 = vrot.slane %v13257_v5, 5 }
 0x49d   :  { %v13350_v2 = vsel %vm2677_vm9, %v6025_v58, %v6024_v39  ;;  %v6193_v46 = vrot.slane %v13260_v34, 4  ;;  %10478 = vmatmul.msk.bf16.vlgmr.msra.gmra.mxu3 %vm2700_vm14, %v13302_v33  ;;  %3063 = vmatpush.bf16.msra.mxu1 %v3023_v44  ;;  %v6360_v52 = vrot.slane %v13257_v5, 6  ;;  %v6361_v28 = vrot.slane %v13260_v34, 5 }
 0x49e   :  { %v6528_v62 = vrot.slane %v13257_v5, 7  ;;  %v6529_v19 = vrot.slane %v13260_v34, 6  ;;  %v6700_v20 = vunpack.c.l.b16 %v6691_v21  ;;  %v8040_v56 = vpack.c.bf16 %v2659_v31, %v2659_v31  ;;  %3076 = vmatpush.bf16.msra.mxu2 %v3026_v1  ;;  %3089 = vmatpush.bf16.msra.mxu3 %v3029_v43 }
 0x49f   :  { %v3004_v41 = vunpack.c.l.b16 %v2990_v29  ;;  %v3005_v8 = vunpack.c.h.b16 %v2990_v29  ;;  %v13364_v49 = vsel %vm2677_vm9, %v6193_v46, %v6192_v9  ;;  %v13367_v22 = vsel %vm2677_vm9, %v6361_v28, %v6360_v52 }
 0x4a0   :  { %v13370_v5 = vsel %vm2677_vm9, %v6529_v19, %v6528_v62  ;;  %v6702_v34 = vrot.slane %v13264_v4, 7  ;;  %v13373_v55 = vunpack.c.l.b16 %v8039_v51  ;;  %v13378_v21 = vunpack.c.l.b16 %v8040_v56 }
 0x4a1   :  { %v3012_v6 = vpack.c.b16 %v3004_v41, %v3004_v41  ;;  %v3006_v25 = vunpack.c.l.b16 %v2991_v50  ;;  %v3007_v17 = vunpack.c.h.b16 %v2991_v50  ;;  %v3013_v24 = vpack.c.b16 %v3005_v8, %v3005_v8 }
 0x4a2   :  { %v13376_v26 = vsel %vm2677_vm9, %v6702_v34, %v6700_v20  ;;  %v6869_v48 = vrot.slane %v6700_v20, 1  ;;  %v7036_v16 = vrot.slane %v6700_v20, 2  ;;  %v7037_v0 = vrot.slane %v13264_v4, 1 }
 0x4a3   :  { %v7204_v35 = vrot.slane %v6700_v20, 3  ;;  %v7205_v37 = vrot.slane %v13264_v4, 2  ;;  %v7372_v30 = vrot.slane %v6700_v20, 4  ;;  %v7373_v61 = vrot.slane %v13264_v4, 3 }
 0x4a4   :  { %v13385_v23 = vsel %vm2677_vm9, %v13264_v4, %v6869_v48  ;;  %v13388_v53 = vsel %vm2677_vm9, %v7037_v0, %v7036_v16  ;;  %v7540_v7 = vrot.slane %v6700_v20, 5  ;;  %v7541_v47 = vrot.slane %v13264_v4, 4  ;;  %v3156_v48 = vld [vmem:[#allocation11 + $0x60] sm:$0xff]  ;;  %v3157_v16 = vld [vmem:[#allocation11 + $0x68] sm:$0xff] }
 0x4a5   :  { %v13392_v44 = vsel %vm2677_vm9, %v7205_v37, %v7204_v35  ;;  %v13395_v59 = vsel %vm2677_vm9, %v7373_v61, %v7372_v30  ;;  %v3032_v14 = vsel %vm2704_vm8, %v3012_v6, 0  ;;  %v3014_v39 = vpack.c.b16 %v3006_v25, %v3006_v25 }
 0x4a6   :  { %v3015_v58 = vpack.c.b16 %v3007_v17, %v3007_v17  ;;  %v13399_v31 = vsel %vm2677_vm9, %v7541_v47, %v7540_v7  ;;  %v7708_v1 = vrot.slane %v6700_v20, 6  ;;  %v7709_v43 = vrot.slane %v13264_v4, 5 }
 0x4a7   :  { %v7876_v51 = vrot.slane %v6700_v20, 7  ;;  %v7877_v9 = vrot.slane %v13264_v4, 6  ;;  %v3035_v46 = vsel %vm2704_vm8, %v3013_v24, 0  ;;  %v8050_v29 = vrot.slane %v13378_v21, 7 }
 0x4a8   :  { %v8217_v52 = vrot.slane %v13373_v55, 1  ;;  %v8385_v28 = vrot.slane %v13378_v21, 1  ;;  %v13408_v62 = vsel %vm2677_vm9, %v7709_v43, %v7708_v1  ;;  %v8384_v56 = vrot.slane %v13373_v55, 2 }
 0x4a9   :  { %v13411_v19 = vsel %vm2677_vm9, %v7877_v9, %v7876_v51  ;;  %v8553_v20 = vrot.slane %v13378_v21, 2  ;;  %v3038_v4 = vsel %vm2704_vm8, %v3014_v39, 0  ;;  %v3041_v41 = vsel %vm2704_vm8, %v3015_v58, 0 }
 0x4aa   :  { %v13423_v8 = vsel %vm2677_vm9, %v8050_v29, %v13373_v55  ;;  %v8552_v50 = vrot.slane %v13373_v55, 3  ;;  %v13430_v34 = vsel %vm2677_vm9, %v13378_v21, %v8217_v52  ;;  %v13433_v6 = vsel %vm2677_vm9, %v8385_v28, %v8384_v56 }
 0x4ab   :  { %10479 = vmatmul.msk.bf16.vlgmr.msrb.gmra.mxu0 %vm2700_vm14, %v13302_v33  ;;  %10480 = vmatmul.msk.bf16.vlgmr.msrb.gmra.mxu1 %vm2700_vm14, %v13302_v33  ;;  %v8721_v25 = vrot.slane %v13378_v21, 3  ;;  %v8720_v24 = vrot.slane %v13373_v55, 4  ;;  %v8888_v35 = vrot.slane %v13373_v55, 5  ;;  %v8889_v37 = vrot.slane %v13378_v21, 4 }
 0x4ac   :  { %10481 = vmatmul.msk.bf16.vlgmr.msrb.gmra.mxu2 %vm2700_vm14, %v13302_v33  ;;  %3102 = vmatpush.bf16.msrb.mxu0 %v3032_v14  ;;  %v13439_v17 = vsel %vm2677_vm9, %v8553_v20, %v8552_v50  ;;  %v3168_v30 = vunpack.c.l.b16 %v3156_v48  ;;  %v9056_v61 = vrot.slane %v13373_v55, 6  ;;  %v9057_v7 = vrot.slane %v13378_v21, 5 }
 0x4ad   :  { %10482 = vmatmul.msk.bf16.vlgmr.msrb.gmra.mxu3 %vm2700_vm14, %v13302_v33  ;;  %3115 = vmatpush.bf16.msrb.mxu1 %v3035_v46  ;;  %v13443_v0 = vsel %vm2677_vm9, %v8721_v25, %v8720_v24  ;;  %v13448_v33 = vsel %vm2677_vm9, %v8889_v37, %v8888_v35  ;;  %v3169_v47 = vunpack.c.h.b16 %v3156_v48  ;;  %v3170_v14 = vunpack.c.l.b16 %v3157_v16 }
 0x4ae   :  { %3128 = vmatpush.bf16.msrb.mxu2 %v3038_v4  ;;  %3141 = vmatpush.bf16.msrb.mxu3 %v3041_v41  ;;  %v3171_v39 = vunpack.c.h.b16 %v3157_v16  ;;  %v13453_v58 = vsel %vm2677_vm9, %v9057_v7, %v9056_v61  ;;  %v9224_v1 = vrot.slane %v13373_v55, 7  ;;  %v9225_v43 = vrot.slane %v13378_v21, 6  ;;  %v3159_v4 = vld [vmem:[#allocation11 + $0x78] sm:$0xff] }
 0x4af   :  { %v3176_v51 = vpack.c.b16 %v3168_v30, %v3168_v30  ;;  %v3177_v46 = vpack.c.b16 %v3169_v47, %v3169_v47  ;;  %v3178_v29 = vpack.c.b16 %v3170_v14, %v3170_v14  ;;  %v2995_v28 = vpack.c.b16 %v13201_v54, %v13201_v54  ;;  %v3158_v54 = vld [vmem:[#allocation11 + $0x70] sm:$0xff] }
 0x4b0   :  { %v13458_v9 = vsel %vm2677_vm9, %v9225_v43, %v9224_v1  ;;  %v3179_v52 = vpack.c.b16 %v3171_v39, %v3171_v39  ;;  %v3172_v41 = vunpack.c.l.b16 %v3158_v54  ;;  %v3173_v50 = vunpack.c.h.b16 %v3158_v54  ;;  %v3324_v39 = vld [vmem:[#allocation11 + $0x80] sm:$0xff]  ;;  %v3325_v1 = vld [vmem:[#allocation11 + $0x88] sm:$0xff] }
 0x4b1   :  { %v3188_v56 = vsel %vm2704_vm8, %v3176_v51, 0  ;;  %v3191_v20 = vsel %vm2704_vm8, %v3177_v46, 0  ;;  %v3194_v55 = vsel %vm2704_vm8, %v3178_v29, 0  ;;  %v3174_v25 = vunpack.c.l.b16 %v3159_v4 }
 0x4b2   :  { %v3197_v21 = vsel %vm2704_vm8, %v3179_v52, 0  ;;  %v3175_v24 = vunpack.c.h.b16 %v3159_v4  ;;  %v3180_v48 = vpack.c.b16 %v3172_v41, %v3172_v41  ;;  %v3181_v16 = vpack.c.b16 %v3173_v50, %v3173_v50  ;;  %v3326_v4 = vld [vmem:[#allocation11 + $0x90] sm:$0xff]  ;;  %v3327_v41 = vld [vmem:[#allocation11 + $0x98] sm:$0xff] }
 0x4b3   :  { %v3182_v35 = vpack.c.b16 %v3174_v25, %v3174_v25  ;;  %v3163_v14 = vpack.c.b16 %v13207_v60, %v13207_v60  ;;  %v3336_v43 = vunpack.c.l.b16 %v3324_v39  ;;  %v3337_v51 = vunpack.c.h.b16 %v3324_v39 }
 0x4b4   :  { %v3183_v37 = vpack.c.b16 %v3175_v24, %v3175_v24  ;;  %v3200_v30 = vsel %vm2704_vm8, %v3180_v48, 0  ;;  %v3203_v61 = vsel %vm2704_vm8, %v3181_v16, 0  ;;  %v3338_v46 = vunpack.c.l.b16 %v3325_v1 }
 0x4b5   :  { %v3206_v7 = vsel %vm2704_vm8, %v3182_v35, 0  ;;  %v3339_v29 = vunpack.c.h.b16 %v3325_v1  ;;  %v3344_v52 = vpack.c.b16 %v3336_v43, %v3336_v43  ;;  %v3340_v50 = vunpack.c.l.b16 %v3326_v4 }
 0x4b6   :  { %v3209_v47 = vsel %vm2704_vm8, %v3183_v37, 0  ;;  %v3341_v25 = vunpack.c.h.b16 %v3326_v4  ;;  %v3342_v24 = vunpack.c.l.b16 %v3327_v41  ;;  %v3343_v48 = vunpack.c.h.b16 %v3327_v41 }
 0x4b7   :  { %v3356_v60 = vsel %vm2704_vm8, %v3344_v52, 0  ;;  %v3348_v16 = vpack.c.b16 %v3340_v50, %v3340_v50 }
 0x4b8   :  { %v3349_v35 = vpack.c.b16 %v3341_v25, %v3341_v25  ;;  %v3350_v37 = vpack.c.b16 %v3342_v24, %v3342_v24 }
 0x4bb   :  { %10483 = vmatmul.msk.bf16.vlgmr.msra.gmra.mxu0 %vm2700_vm14, %v2995_v28  ;;  %10484 = vmatmul.msk.bf16.vlgmr.msra.gmra.mxu1 %vm2700_vm14, %v2995_v28 }
 0x4bc   :  { %10485 = vmatmul.msk.bf16.vlgmr.msra.gmra.mxu2 %vm2700_vm14, %v2995_v28  ;;  %3218 = vmatpush.bf16.msra.mxu0 %v3188_v56  ;;  %v3345_v56 = vpack.c.b16 %v3337_v51, %v3337_v51  ;;  %v3331_v51 = vpack.c.b16 %v13214_v11, %v13214_v11 }
 0x4bd   :  { %10486 = vmatmul.msk.bf16.vlgmr.msra.gmra.mxu3 %vm2700_vm14, %v2995_v28  ;;  %3231 = vmatpush.bf16.msra.mxu1 %v3191_v20  ;;  %v3346_v20 = vpack.c.b16 %v3338_v46, %v3338_v46  ;;  %v3492_v46 = vld [vmem:[#allocation11 + $0xa0] sm:$0xff] }
 0x4be   :  { %3244 = vmatpush.bf16.msra.mxu2 %v3194_v55  ;;  %3257 = vmatpush.bf16.msra.mxu3 %v3197_v21  ;;  %v3359_v55 = vsel %vm2704_vm8, %v3345_v56, 0  ;;  %v3505_v52 = vunpack.c.h.b16 %v3492_v46 }
 0x4bf   :  { %v3362_v21 = vsel %vm2704_vm8, %v3346_v20, 0 }
 0x4cb   :  { %10487 = vmatmul.msk.bf16.vlgmr.msrb.gmra.mxu0 %vm2700_vm14, %v2995_v28  ;;  %10488 = vmatmul.msk.bf16.vlgmr.msrb.gmra.mxu1 %vm2700_vm14, %v2995_v28 }
 0x4cc   :  { %10489 = vmatmul.msk.bf16.vlgmr.msrb.gmra.mxu2 %vm2700_vm14, %v2995_v28  ;;  %3270 = vmatpush.bf16.msrb.mxu0 %v3200_v30  ;;  %v3351_v30 = vpack.c.b16 %v3343_v48, %v3343_v48 }
 0x4cd   :  { %10490 = vmatmul.msk.bf16.vlgmr.msrb.gmra.mxu3 %vm2700_vm14, %v2995_v28  ;;  %3283 = vmatpush.bf16.msrb.mxu1 %v3203_v61  ;;  %v3347_v28 = vpack.c.b16 %v3339_v29, %v3339_v29  ;;  %v3368_v61 = vsel %vm2704_vm8, %v3348_v16, 0  ;;  %v3504_v29 = vunpack.c.l.b16 %v3492_v46 }
 0x4ce   :  { %3296 = vmatpush.bf16.msrb.mxu2 %v3206_v7  ;;  %3309 = vmatpush.bf16.msrb.mxu3 %v3209_v47  ;;  %v3371_v7 = vsel %vm2704_vm8, %v3349_v35, 0  ;;  %v3374_v47 = vsel %vm2704_vm8, %v3350_v37, 0  ;;  %v3377_v39 = vsel %vm2704_vm8, %v3351_v30, 0 }
 0x4cf   :  { %v3365_v54 = vsel %vm2704_vm8, %v3347_v28, 0  ;;  %v3512_v28 = vpack.c.b16 %v3504_v29, %v3504_v29 }
 0x4d1   :  { %v3524_v11 = vsel %vm2704_vm8, %v3512_v28, 0 }
 0x4db   :  { %10491 = vmatmul.msk.bf16.vlgmr.msra.gmra.mxu0 %vm2700_vm14, %v3163_v14  ;;  %10492 = vmatmul.msk.bf16.vlgmr.msra.gmra.mxu1 %vm2700_vm14, %v3163_v14 }
 0x4dc   :  { %10493 = vmatmul.msk.bf16.vlgmr.msra.gmra.mxu2 %vm2700_vm14, %v3163_v14  ;;  %3386 = vmatpush.bf16.msra.mxu0 %v3356_v60  ;;  %v3513_v60 = vpack.c.b16 %v3505_v52, %v3505_v52 }
 0x4dd   :  { %10494 = vmatmul.msk.bf16.vlgmr.msra.gmra.mxu3 %vm2700_vm14, %v3163_v14  ;;  %3399 = vmatpush.bf16.msra.mxu1 %v3359_v55 }
 0x4de   :  { %3412 = vmatpush.bf16.msra.mxu2 %v3362_v21  ;;  %3425 = vmatpush.bf16.msra.mxu3 %v3365_v54  ;;  %v3527_v4 = vsel %vm2704_vm8, %v3513_v60, 0 }
 0x4eb   :  { %10495 = vmatmul.msk.bf16.vlgmr.msrb.gmra.mxu0 %vm2700_vm14, %v3163_v14  ;;  %10496 = vmatmul.msk.bf16.vlgmr.msrb.gmra.mxu1 %vm2700_vm14, %v3163_v14 }
 0x4ec   :  { %10497 = vmatmul.msk.bf16.vlgmr.msrb.gmra.mxu2 %vm2700_vm14, %v3163_v14  ;;  %3438 = vmatpush.bf16.msrb.mxu0 %v3368_v61  ;;  %v3494_v61 = vld [vmem:[#allocation11 + $0xb0] sm:$0xff] }
 0x4ed   :  { %10498 = vmatmul.msk.bf16.vlgmr.msrb.gmra.mxu3 %vm2700_vm14, %v3163_v14  ;;  %3451 = vmatpush.bf16.msrb.mxu1 %v3371_v7  ;;  %v3493_v14 = vld [vmem:[#allocation11 + $0xa8] sm:$0xff]  ;;  %v3495_v7 = vld [vmem:[#allocation11 + $0xb8] sm:$0xff] }
 0x4ee   :  { %3464 = vmatpush.bf16.msrb.mxu2 %v3374_v47  ;;  %3477 = vmatpush.bf16.msrb.mxu3 %v3377_v39  ;;  %v3506_v56 = vunpack.c.l.b16 %v3493_v14  ;;  %v3507_v20 = vunpack.c.h.b16 %v3493_v14  ;;  %v3508_v47 = vunpack.c.l.b16 %v3494_v61  ;;  %v3509_v39 = vunpack.c.h.b16 %v3494_v61 }
 0x4ef   :  { %v3510_v46 = vunpack.c.l.b16 %v3495_v7  ;;  %v3511_v14 = vunpack.c.h.b16 %v3495_v7  ;;  %v3499_v61 = vpack.c.b16 %v13222_v3, %v13222_v3 }
 0x4f0   :  { %v3514_v55 = vpack.c.b16 %v3506_v56, %v3506_v56  ;;  %v3515_v21 = vpack.c.b16 %v3507_v20, %v3507_v20  ;;  %v3516_v29 = vpack.c.b16 %v3508_v47, %v3508_v47  ;;  %v3517_v52 = vpack.c.b16 %v3509_v39, %v3509_v39  ;;  %v3660_v47 = vld [vmem:[#allocation11 + $0xc0] sm:$0xff]  ;;  %v3661_v39 = vld [vmem:[#allocation11 + $0xc8] sm:$0xff] }
 0x4f1   :  { %v3518_v56 = vpack.c.b16 %v3510_v46, %v3510_v46  ;;  %v3519_v20 = vpack.c.b16 %v3511_v14, %v3511_v14  ;;  %v3672_v46 = vunpack.c.l.b16 %v3660_v47  ;;  %v3673_v14 = vunpack.c.h.b16 %v3660_v47 }
 0x4f2   :  { %v3530_v41 = vsel %vm2704_vm8, %v3514_v55, 0  ;;  %v3533_v50 = vsel %vm2704_vm8, %v3515_v21, 0  ;;  %v3536_v60 = vsel %vm2704_vm8, %v3516_v29, 0  ;;  %v3539_v55 = vsel %vm2704_vm8, %v3517_v52, 0 }
 0x4f3   :  { %v3542_v21 = vsel %vm2704_vm8, %v3518_v56, 0  ;;  %v3674_v29 = vunpack.c.l.b16 %v3661_v39  ;;  %v3675_v52 = vunpack.c.h.b16 %v3661_v39  ;;  %v3681_v56 = vpack.c.b16 %v3673_v14, %v3673_v14 }
 0x4f5   :  { %v3682_v3 = vpack.c.b16 %v3674_v29, %v3674_v29  ;;  %v3662_v29 = vld [vmem:[#allocation11 + $0xd0] sm:$0xff] }
 0x4f8   :  { %v2738_v1 = vpop.f32.mrf.mxu0  ;;  %v13496_v43 = vpop.f32.mrf.mxu1 }
 0x4fb   :  { %10499 = vmatmul.msk.bf16.vlgmr.msra.gmra.mxu0 %vm2700_vm14, %v3331_v51  ;;  %10500 = vmatmul.msk.bf16.vlgmr.msra.gmra.mxu1 %vm2700_vm14, %v3331_v51 }
 0x4fc   :  { %10501 = vmatmul.msk.bf16.vlgmr.msra.gmra.mxu2 %vm2700_vm14, %v3331_v51  ;;  %3554 = vmatpush.bf16.msra.mxu0 %v3524_v11  ;;  %v3545_v11 = vsel %vm2704_vm8, %v3519_v20, 0  ;;  %v3683_v20 = vpack.c.b16 %v3675_v52, %v3675_v52  ;;  %v3663_v52 = vld [vmem:[#allocation11 + $0xd8] sm:$0xff] }
 0x4fd   :  { %10502 = vmatmul.msk.bf16.vlgmr.msra.gmra.mxu3 %vm2700_vm14, %v3331_v51  ;;  %3567 = vmatpush.bf16.msra.mxu1 %v3527_v4 }
 0x4fe   :  { %3580 = vmatpush.bf16.msra.mxu2 %v3530_v41  ;;  %3593 = vmatpush.bf16.msra.mxu3 %v3533_v50 }
 0x4ff   :  { %v13504_v54 = vpop.f32.mrf.mxu2 }
 0x500   :  { %v13510_v25 = vpop.f32.mrf.mxu3  ;;  %v2740_v24 = vpop.f32.mrf.mxu0 }
 0x501   :  { %v2753_v48 = vpop.f32.mrf.mxu1 }
 0x507   :  { %v2766_v16 = vpop.f32.mrf.mxu2 }
 0x508   :  { %v2779_v35 = vpop.f32.mrf.mxu3  ;;  %v13512_v37 = vpop.f32.mrf.mxu0 }
 0x509   :  { %v13514_v30 = vpop.f32.mrf.mxu1 }
 0x50b   :  { %10503 = vmatmul.msk.bf16.vlgmr.msrb.gmra.mxu0 %vm2700_vm14, %v3331_v51  ;;  %10504 = vmatmul.msk.bf16.vlgmr.msrb.gmra.mxu1 %vm2700_vm14, %v3331_v51 }
 0x50c   :  { %10505 = vmatmul.msk.bf16.vlgmr.msrb.gmra.mxu2 %vm2700_vm14, %v3331_v51  ;;  %3606 = vmatpush.bf16.msrb.mxu0 %v3536_v60 }
 0x50d   :  { %10506 = vmatmul.msk.bf16.vlgmr.msrb.gmra.mxu3 %vm2700_vm14, %v3331_v51  ;;  %3619 = vmatpush.bf16.msrb.mxu1 %v3539_v55  ;;  %v3695_v55 = vsel %vm2704_vm8, %v3681_v56, 0  ;;  %v3678_v56 = vunpack.c.l.b16 %v3663_v52 }
 0x50e   :  { %3632 = vmatpush.bf16.msrb.mxu2 %v3542_v21  ;;  %3645 = vmatpush.bf16.msrb.mxu3 %v3545_v11  ;;  %v3698_v21 = vsel %vm2704_vm8, %v3682_v3, 0  ;;  %v3701_v11 = vsel %vm2704_vm8, %v3683_v20, 0  ;;  %v3679_v3 = vunpack.c.h.b16 %v3663_v52 }
 0x50f   :  { %v13520_v28 = vpop.f32.mrf.mxu2 }
 0x510   :  { %v13526_v4 = vpop.f32.mrf.mxu3  ;;  %v2792_v41 = vpop.f32.mrf.mxu0 }
 0x511   :  { %v2805_v51 = vpop.f32.mrf.mxu1 }
 0x517   :  { %v2818_v50 = vpop.f32.mrf.mxu2 }
 0x518   :  { %v2831_v24 = vpop.f32.mrf.mxu3  ;;  %v2892_v48 = vpop.f32.mrf.mxu0 }
 0x519   :  { %v13528_v16 = vadd.f32 %v2892_v48, %v2738_v1  ;;  %v2905_v35 = vpop.f32.mrf.mxu1  ;;  %v3680_v1 = vpack.c.b16 %v3672_v46, %v3672_v46 }
 0x51a   :  { %v13533_v7 = vadd.f32 %v2905_v35, %v13496_v43 }
 0x51b   :  { %10507 = vmatmul.msk.bf16.vlgmr.msra.gmra.mxu0 %vm2700_vm14, %v3499_v61  ;;  %10508 = vmatmul.msk.bf16.vlgmr.msra.gmra.mxu1 %vm2700_vm14, %v3499_v61  ;;  %v3692_v60 = vsel %vm2704_vm8, %v3680_v1, 0  ;;  %v3677_v1 = vunpack.c.h.b16 %v3662_v29 }
 0x51c   :  { %10509 = vmatmul.msk.bf16.vlgmr.msra.gmra.mxu2 %vm2700_vm14, %v3499_v61  ;;  %3722 = vmatpush.bf16.msra.mxu0 %v3692_v60  ;;  %v3687_v60 = vpack.c.b16 %v3679_v3, %v3679_v3  ;;  %v3829_v3 = vld [vmem:[#allocation11 + $0xe8] sm:$0xff] }
 0x51d   :  { %10510 = vmatmul.msk.bf16.vlgmr.msra.gmra.mxu3 %vm2700_vm14, %v3499_v61  ;;  %3735 = vmatpush.bf16.msra.mxu1 %v3695_v55  ;;  %v3685_v20 = vpack.c.b16 %v3677_v1, %v3677_v1 }
 0x51e   :  { %3748 = vmatpush.bf16.msra.mxu2 %v3698_v21  ;;  %3761 = vmatpush.bf16.msra.mxu3 %v3701_v11 }
 0x51f   :  { %v2918_v43 = vpop.f32.mrf.mxu2  ;;  %v3707_v21 = vsel %vm2704_vm8, %v3685_v20, 0  ;;  %v3842_v20 = vunpack.c.l.b16 %v3829_v3 }
 0x520   :  { %v13544_v41 = vadd.f32 %v2918_v43, %v13504_v54  ;;  %v2931_v51 = vpop.f32.mrf.mxu3  ;;  %v2894_v50 = vpop.f32.mrf.mxu0  ;;  %v3686_v43 = vpack.c.b16 %v3678_v56, %v3678_v56  ;;  %v3828_v56 = vld [vmem:[#allocation11 + $0xe0] sm:$0xff] }
 0x521   :  { %v13547_v24 = vadd.f32 %v2931_v51, %v13510_v25  ;;  %v2907_v48 = vpop.f32.mrf.mxu1  ;;  %v3676_v25 = vunpack.c.l.b16 %v3662_v29  ;;  %v3713_v51 = vsel %vm2704_vm8, %v3687_v60, 0 }
 0x522   :  { %v3710_v11 = vsel %vm2704_vm8, %v3686_v43, 0  ;;  %v3843_v43 = vunpack.c.h.b16 %v3829_v3 }
 0x527   :  { %v2920_v35 = vpop.f32.mrf.mxu2 }
 0x528   :  { %v2933_v47 = vpop.f32.mrf.mxu3  ;;  %v2944_v39 = vpop.f32.mrf.mxu0 }
 0x529   :  { %v13550_v46 = vadd.f32 %v2944_v39, %v13512_v37  ;;  %v2957_v14 = vpop.f32.mrf.mxu1  ;;  %v3684_v37 = vpack.c.b16 %v3676_v25, %v3676_v25 }
 0x52a   :  { %v13553_v54 = vadd.f32 %v2957_v14, %v13514_v30 }
 0x52b   :  { %10511 = vmatmul.msk.bf16.vlgmr.msrb.gmra.mxu0 %vm2700_vm14, %v3499_v61  ;;  %10512 = vmatmul.msk.bf16.vlgmr.msrb.gmra.mxu1 %vm2700_vm14, %v3499_v61  ;;  %v3704_v55 = vsel %vm2704_vm8, %v3684_v37, 0  ;;  %v3841_v37 = vunpack.c.h.b16 %v3828_v56 }
 0x52c   :  { %10513 = vmatmul.msk.bf16.vlgmr.msrb.gmra.mxu2 %vm2700_vm14, %v3499_v61  ;;  %3774 = vmatpush.bf16.msrb.mxu0 %v3704_v55 }
 0x52d   :  { %10514 = vmatmul.msk.bf16.vlgmr.msrb.gmra.mxu3 %vm2700_vm14, %v3499_v61  ;;  %3787 = vmatpush.bf16.msrb.mxu1 %v3707_v21  ;;  %v3849_v60 = vpack.c.b16 %v3841_v37, %v3841_v37  ;;  %v3830_v37 = vld [vmem:[#allocation11 + $0xf0] sm:$0xff] }
 0x52e   :  { %3800 = vmatpush.bf16.msrb.mxu2 %v3710_v11  ;;  %3813 = vmatpush.bf16.msrb.mxu3 %v3713_v51 }
 0x52f   :  { %v2970_v30 = vpop.f32.mrf.mxu2  ;;  %v3863_v21 = vsel %vm2704_vm8, %v3849_v60, 0 }
 0x530   :  { %v13564_v50 = vadd.f32 %v2970_v30, %v13520_v28  ;;  %v2983_v48 = vpop.f32.mrf.mxu3  ;;  %v2946_v35 = vpop.f32.mrf.mxu0  ;;  %v3667_v28 = vpack.c.b16 %v13235_v45, %v13235_v45  ;;  %v3850_v45 = vpack.c.b16 %v3842_v20, %v3842_v20  ;;  %v3851_v30 = vpack.c.b16 %v3843_v43, %v3843_v43  ;;  %v3831_v20 = vld [vmem:[#allocation11 + $0xf8] sm:$0xff] }
 0x531   :  { %v13567_v61 = vadd.f32 %v2983_v48, %v13526_v4  ;;  %v2959_v47 = vpop.f32.mrf.mxu1  ;;  %v3840_v4 = vunpack.c.l.b16 %v3828_v56  ;;  %v3845_v43 = vunpack.c.h.b16 %v3830_v37  ;;  %v3847_v60 = vunpack.c.h.b16 %v3831_v20 }
 0x532   :  { %v3866_v11 = vsel %vm2704_vm8, %v3850_v45, 0  ;;  %v3869_v51 = vsel %vm2704_vm8, %v3851_v30, 0 }
 0x533   :  { %v3853_v45 = vpack.c.b16 %v3845_v43, %v3845_v43  ;;  %v3998_v43 = vld [vmem:[#allocation11 + $0x100] sm:$0xff] }
 0x537   :  { %v2972_v39 = vpop.f32.mrf.mxu2 }
 0x538   :  { %v2985_v14 = vpop.f32.mrf.mxu3  ;;  %v3052_v29 = vpop.f32.mrf.mxu0 }
 0x539   :  { %v13570_v52 = vadd.f32 %v3052_v29, %v13528_v16  ;;  %v3065_v25 = vpop.f32.mrf.mxu1  ;;  %v3848_v16 = vpack.c.b16 %v3840_v4, %v3840_v4 }
 0x53a   :  { %v13575_v1 = vadd.f32 %v3065_v25, %v13533_v7 }
 0x53b   :  { %10515 = vmatmul.msk.bf16.vlgmr.msra.gmra.mxu0 %vm2700_vm14, %v3667_v28  ;;  %10516 = vmatmul.msk.bf16.vlgmr.msra.gmra.mxu1 %vm2700_vm14, %v3667_v28  ;;  %v3860_v55 = vsel %vm2704_vm8, %v3848_v16, 0  ;;  %v3846_v16 = vunpack.c.l.b16 %v3831_v20 }
 0x53c   :  { %10517 = vmatmul.msk.bf16.vlgmr.msra.gmra.mxu2 %vm2700_vm14, %v3667_v28  ;;  %3890 = vmatpush.bf16.msra.mxu0 %v3860_v55 }
 0x53d   :  { %10518 = vmatmul.msk.bf16.vlgmr.msra.gmra.mxu3 %vm2700_vm14, %v3667_v28  ;;  %3903 = vmatpush.bf16.msra.mxu1 %v3863_v21  ;;  %v3854_v30 = vpack.c.b16 %v3846_v16, %v3846_v16  ;;  %v3875_v21 = vsel %vm2704_vm8, %v3853_v45, 0  ;;  %v3999_v16 = vld [vmem:[#allocation11 + $0x108] sm:$0xff] }
 0x53e   :  { %3916 = vmatpush.bf16.msra.mxu2 %v3866_v11  ;;  %3929 = vmatpush.bf16.msra.mxu3 %v3869_v51  ;;  %v4016_v45 = vunpack.c.h.b16 %v3999_v16 }
 0x53f   :  { %v3078_v7 = vpop.f32.mrf.mxu2  ;;  %v3878_v11 = vsel %vm2704_vm8, %v3854_v30, 0 }
 0x540   :  { %v13586_v48 = vadd.f32 %v3078_v7, %v13544_v41  ;;  %v3091_v35 = vpop.f32.mrf.mxu3  ;;  %v3054_v47 = vpop.f32.mrf.mxu0  ;;  %v3855_v7 = vpack.c.b16 %v3847_v60, %v3847_v60  ;;  %v4014_v60 = vunpack.c.h.b16 %v3998_v43 }
 0x541   :  { %v13589_v39 = vadd.f32 %v3091_v35, %v13547_v24  ;;  %v3067_v14 = vpop.f32.mrf.mxu1  ;;  %v3844_v24 = vunpack.c.l.b16 %v3830_v37 }
 0x542   :  { %v3881_v51 = vsel %vm2704_vm8, %v3855_v7, 0  ;;  %v4022_v30 = vpack.c.b16 %v4014_v60, %v4014_v60  ;;  %v4024_v7 = vpack.c.b16 %v4016_v45, %v4016_v45  ;;  %v4001_v60 = vld [vmem:[#allocation11 + $0x118] sm:$0xff] }
 0x543   :  { %v4019_v45 = vunpack.c.l.b16 %v4001_v60 }
 0x547   :  { %v3080_v29 = vpop.f32.mrf.mxu2 }
 0x548   :  { %v3093_v25 = vpop.f32.mrf.mxu3  ;;  %v3104_v56 = vpop.f32.mrf.mxu0 }
 0x549   :  { %v13592_v3 = vadd.f32 %v3104_v56, %v13550_v46  ;;  %v3117_v4 = vpop.f32.mrf.mxu1  ;;  %v3852_v46 = vpack.c.b16 %v3844_v24, %v3844_v24 }
 0x54a   :  { %v13595_v41 = vadd.f32 %v3117_v4, %v13553_v54 }
 0x54b   :  { %10519 = vmatmul.msk.bf16.vlgmr.msrb.gmra.mxu0 %vm2700_vm14, %v3667_v28  ;;  %10520 = vmatmul.msk.bf16.vlgmr.msrb.gmra.mxu1 %vm2700_vm14, %v3667_v28  ;;  %v3872_v55 = vsel %vm2704_vm8, %v3852_v46, 0  ;;  %v4015_v46 = vunpack.c.l.b16 %v3999_v16 }
 0x54c   :  { %10521 = vmatmul.msk.bf16.vlgmr.msrb.gmra.mxu2 %vm2700_vm14, %v3667_v28  ;;  %3942 = vmatpush.bf16.msrb.mxu0 %v3872_v55  ;;  %v4036_v55 = vsel %vm2704_vm8, %v4022_v30, 0 }
 0x54d   :  { %10522 = vmatmul.msk.bf16.vlgmr.msrb.gmra.mxu3 %vm2700_vm14, %v3667_v28  ;;  %3955 = vmatpush.bf16.msrb.mxu1 %v3875_v21 }
 0x54e   :  { %3968 = vmatpush.bf16.msrb.mxu2 %v3878_v11  ;;  %3981 = vmatpush.bf16.msrb.mxu3 %v3881_v51  ;;  %v4042_v11 = vsel %vm2704_vm8, %v4024_v7, 0 }
 0x54f   :  { %v3130_v54 = vpop.f32.mrf.mxu2 }
 0x550   :  { %v13606_v35 = vadd.f32 %v3130_v54, %v13564_v50  ;;  %v3143_v47 = vpop.f32.mrf.mxu3  ;;  %v3106_v14 = vpop.f32.mrf.mxu0  ;;  %v3835_v50 = vpack.c.b16 %v13244_v15, %v13244_v15  ;;  %v4023_v15 = vpack.c.b16 %v4015_v46, %v4015_v46 }
 0x551   :  { %v13609_v28 = vadd.f32 %v3143_v47, %v13567_v61  ;;  %v3119_v29 = vpop.f32.mrf.mxu1  ;;  %v4013_v61 = vunpack.c.l.b16 %v3998_v43 }
 0x552   :  { %v4039_v21 = vsel %vm2704_vm8, %v4023_v15, 0  ;;  %v4027_v15 = vpack.c.b16 %v4019_v45, %v4019_v45 }
 0x557   :  { %v3132_v25 = vpop.f32.mrf.mxu2 }
 0x558   :  { %v3145_v56 = vpop.f32.mrf.mxu3  ;;  %v3220_v4 = vpop.f32.mrf.mxu0 }
 0x559   :  { %v13612_v37 = vadd.f32 %v3220_v4, %v13570_v52  ;;  %v3233_v20 = vpop.f32.mrf.mxu1  ;;  %v4021_v52 = vpack.c.b16 %v4013_v61, %v4013_v61  ;;  %v4000_v61 = vld [vmem:[#allocation11 + $0x110] sm:$0xff] }
 0x55a   :  { %v13617_v24 = vadd.f32 %v3233_v20, %v13575_v1  ;;  %v4018_v46 = vunpack.c.h.b16 %v4000_v61 }
 0x55b   :  { %10523 = vmatmul.msk.bf16.vlgmr.msra.gmra.mxu0 %vm2700_vm14, %v3835_v50  ;;  %10524 = vmatmul.msk.bf16.vlgmr.msra.gmra.mxu1 %vm2700_vm14, %v3835_v50  ;;  %v4033_v54 = vsel %vm2704_vm8, %v4021_v52, 0  ;;  %v4020_v52 = vunpack.c.h.b16 %v4001_v60 }
 0x55c   :  { %10525 = vmatmul.msk.bf16.vlgmr.msra.gmra.mxu2 %vm2700_vm14, %v3835_v50  ;;  %4063 = vmatpush.bf16.msra.mxu0 %v4033_v54  ;;  %v4026_v30 = vpack.c.b16 %v4018_v46, %v4018_v46  ;;  %v4170_v46 = vld [vmem:[#allocation11 + $0x128] sm:$0xff] }
 0x55d   :  { %10526 = vmatmul.msk.bf16.vlgmr.msra.gmra.mxu3 %vm2700_vm14, %v3835_v50  ;;  %4076 = vmatpush.bf16.msra.mxu1 %v4036_v55  ;;  %v4028_v7 = vpack.c.b16 %v4020_v52, %v4020_v52  ;;  %v4051_v55 = vsel %vm2704_vm8, %v4027_v15, 0  ;;  %v4182_v52 = vunpack.c.l.b16 %v4170_v46 }
 0x55e   :  { %4089 = vmatpush.bf16.msra.mxu2 %v4039_v21  ;;  %4102 = vmatpush.bf16.msra.mxu3 %v4042_v11  ;;  %v4048_v54 = vsel %vm2704_vm8, %v4026_v30, 0 }
 0x55f   :  { %v3246_v1 = vpop.f32.mrf.mxu2  ;;  %v4054_v21 = vsel %vm2704_vm8, %v4028_v7, 0 }
 0x560   :  { %v13628_v51 = vadd.f32 %v3246_v1, %v13586_v48  ;;  %v3259_v47 = vpop.f32.mrf.mxu3  ;;  %v3222_v14 = vpop.f32.mrf.mxu0 }
 0x561   :  { %v13631_v29 = vadd.f32 %v3259_v47, %v13589_v39  ;;  %v3235_v25 = vpop.f32.mrf.mxu1  ;;  %v4017_v39 = vunpack.c.l.b16 %v4000_v61 }
 0x567   :  { %v3248_v56 = vpop.f32.mrf.mxu2 }
 0x568   :  { %v3261_v4 = vpop.f32.mrf.mxu3  ;;  %v3272_v20 = vpop.f32.mrf.mxu0 }
 0x569   :  { %v13634_v43 = vadd.f32 %v3272_v20, %v13592_v3  ;;  %v3285_v16 = vpop.f32.mrf.mxu1  ;;  %v4025_v3 = vpack.c.b16 %v4017_v39, %v4017_v39  ;;  %v4169_v39 = vld [vmem:[#allocation11 + $0x120] sm:$0xff] }
 0x56a   :  { %v13637_v48 = vadd.f32 %v3285_v16, %v13595_v41  ;;  %v4181_v45 = vunpack.c.h.b16 %v4169_v39 }
 0x56b   :  { %10527 = vmatmul.msk.bf16.vlgmr.msrb.gmra.mxu0 %vm2700_vm14, %v3835_v50  ;;  %10528 = vmatmul.msk.bf16.vlgmr.msrb.gmra.mxu1 %vm2700_vm14, %v3835_v50  ;;  %v4045_v1 = vsel %vm2704_vm8, %v4025_v3, 0  ;;  %v4183_v3 = vunpack.c.h.b16 %v4170_v46  ;;  %v4171_v46 = vld [vmem:[#allocation11 + $0x130] sm:$0xff] }
 0x56c   :  { %10529 = vmatmul.msk.bf16.vlgmr.msrb.gmra.mxu2 %vm2700_vm14, %v3835_v50  ;;  %4115 = vmatpush.bf16.msrb.mxu0 %v4045_v1  ;;  %v4189_v30 = vpack.c.b16 %v4181_v45, %v4181_v45  ;;  %v4185_v45 = vunpack.c.h.b16 %v4171_v46 }
 0x56d   :  { %10530 = vmatmul.msk.bf16.vlgmr.msrb.gmra.mxu3 %vm2700_vm14, %v3835_v50  ;;  %4128 = vmatpush.bf16.msrb.mxu1 %v4048_v54  ;;  %v4191_v15 = vpack.c.b16 %v4183_v3, %v4183_v3 }
 0x56e   :  { %4141 = vmatpush.bf16.msrb.mxu2 %v4051_v55  ;;  %4154 = vmatpush.bf16.msrb.mxu3 %v4054_v21 }
 0x56f   :  { %v3298_v41 = vpop.f32.mrf.mxu2  ;;  %v4209_v54 = vsel %vm2704_vm8, %v4191_v15, 0 }
 0x570   :  { %v13648_v11 = vadd.f32 %v3298_v41, %v13606_v35  ;;  %v3311_v47 = vpop.f32.mrf.mxu3  ;;  %v3274_v14 = vpop.f32.mrf.mxu0  ;;  %v4008_v35 = vpack.c.b16 %v13248_v38, %v13248_v38  ;;  %v4190_v38 = vpack.c.b16 %v4182_v52, %v4182_v52  ;;  %v4203_v41 = vsel %vm2704_vm8, %v4189_v30, 0 }
 0x571   :  { %v13651_v50 = vadd.f32 %v3311_v47, %v13609_v28  ;;  %v3287_v25 = vpop.f32.mrf.mxu1  ;;  %v4180_v28 = vunpack.c.l.b16 %v4169_v39 }
 0x572   :  { %v4206_v1 = vsel %vm2704_vm8, %v4190_v38, 0 }
 0x577   :  { %v3300_v56 = vpop.f32.mrf.mxu2 }
 0x578   :  { %v3313_v4 = vpop.f32.mrf.mxu3  ;;  %v3388_v20 = vpop.f32.mrf.mxu0 }
 0x579   :  { %v13654_v16 = vadd.f32 %v3388_v20, %v13612_v37  ;;  %v3401_v61 = vpop.f32.mrf.mxu1  ;;  %v4188_v37 = vpack.c.b16 %v4180_v28, %v4180_v28  ;;  %v4172_v28 = vld [vmem:[#allocation11 + $0x138] sm:$0xff] }
 0x57a   :  { %v13659_v60 = vadd.f32 %v3401_v61, %v13617_v24  ;;  %v4186_v52 = vunpack.c.l.b16 %v4172_v28  ;;  %v4187_v3 = vunpack.c.h.b16 %v4172_v28  ;;  %v4336_v28 = vld [vmem:[#allocation11 + $0x140] sm:$0xff] }
 0x57b   :  { %10531 = vmatmul.msk.bf16.vlgmr.msra.gmra.mxu0 %vm2700_vm14, %v4008_v35  ;;  %10532 = vmatmul.msk.bf16.vlgmr.msra.gmra.mxu1 %vm2700_vm14, %v4008_v35  ;;  %v4200_v7 = vsel %vm2704_vm8, %v4188_v37, 0  ;;  %v4193_v37 = vpack.c.b16 %v4185_v45, %v4185_v45  ;;  %v4349_v45 = vunpack.c.h.b16 %v4336_v28 }
 0x57c   :  { %10533 = vmatmul.msk.bf16.vlgmr.msra.gmra.mxu2 %vm2700_vm14, %v4008_v35  ;;  %4230 = vmatpush.bf16.msra.mxu0 %v4200_v7  ;;  %v4194_v30 = vpack.c.b16 %v4186_v52, %v4186_v52  ;;  %v4195_v38 = vpack.c.b16 %v4187_v3, %v4187_v3 }
 0x57d   :  { %10534 = vmatmul.msk.bf16.vlgmr.msra.gmra.mxu3 %vm2700_vm14, %v4008_v35  ;;  %4243 = vmatpush.bf16.msra.mxu1 %v4203_v41 }
 0x57e   :  { %4256 = vmatpush.bf16.msra.mxu2 %v4206_v1  ;;  %4269 = vmatpush.bf16.msra.mxu3 %v4209_v54  ;;  %v4218_v7 = vsel %vm2704_vm8, %v4194_v30, 0  ;;  %v4221_v41 = vsel %vm2704_vm8, %v4195_v38, 0 }
 0x57f   :  { %v3414_v24 = vpop.f32.mrf.mxu2 }
 0x580   :  { %v13670_v55 = vadd.f32 %v3414_v24, %v13628_v51  ;;  %v3427_v21 = vpop.f32.mrf.mxu3  ;;  %v3390_v47 = vpop.f32.mrf.mxu0  ;;  %v4215_v24 = vsel %vm2704_vm8, %v4193_v37, 0 }
 0x581   :  { %v13673_v14 = vadd.f32 %v3427_v21, %v13631_v29  ;;  %v3403_v25 = vpop.f32.mrf.mxu1  ;;  %v4184_v29 = vunpack.c.l.b16 %v4171_v46 }
 0x587   :  { %v3416_v56 = vpop.f32.mrf.mxu2 }
 0x588   :  { %v3429_v4 = vpop.f32.mrf.mxu3  ;;  %v3440_v20 = vpop.f32.mrf.mxu0 }
 0x589   :  { %v13676_v61 = vadd.f32 %v3440_v20, %v13634_v43  ;;  %v3453_v39 = vpop.f32.mrf.mxu1  ;;  %v4192_v43 = vpack.c.b16 %v4184_v29, %v4184_v29  ;;  %v4337_v29 = vld [vmem:[#allocation11 + $0x148] sm:$0xff] }
 0x58a   :  { %v13679_v51 = vadd.f32 %v3453_v39, %v13637_v48  ;;  %v4350_v52 = vunpack.c.l.b16 %v4337_v29  ;;  %v4351_v3 = vunpack.c.h.b16 %v4337_v29  ;;  %v4339_v29 = vld [vmem:[#allocation11 + $0x158] sm:$0xff] }
 0x58b   :  { %10535 = vmatmul.msk.bf16.vlgmr.msrb.gmra.mxu0 %vm2700_vm14, %v4008_v35  ;;  %10536 = vmatmul.msk.bf16.vlgmr.msrb.gmra.mxu1 %vm2700_vm14, %v4008_v35  ;;  %v4212_v15 = vsel %vm2704_vm8, %v4192_v43, 0  ;;  %v4357_v43 = vpack.c.b16 %v4349_v45, %v4349_v45  ;;  %v4354_v45 = vunpack.c.l.b16 %v4339_v29 }
 0x58c   :  { %10537 = vmatmul.msk.bf16.vlgmr.msrb.gmra.mxu2 %vm2700_vm14, %v4008_v35  ;;  %4282 = vmatpush.bf16.msrb.mxu0 %v4212_v15  ;;  %v4359_v37 = vpack.c.b16 %v4351_v3, %v4351_v3 }
 0x58d   :  { %10538 = vmatmul.msk.bf16.vlgmr.msrb.gmra.mxu3 %vm2700_vm14, %v4008_v35  ;;  %4295 = vmatpush.bf16.msrb.mxu1 %v4215_v24  ;;  %v4371_v38 = vsel %vm2704_vm8, %v4357_v43, 0 }
 0x58e   :  { %4308 = vmatpush.bf16.msrb.mxu2 %v4218_v7  ;;  %4321 = vmatpush.bf16.msrb.mxu3 %v4221_v41  ;;  %v4377_v15 = vsel %vm2704_vm8, %v4359_v37, 0 }
 0x58f   :  { %v3466_v48 = vpop.f32.mrf.mxu2 }
 0x590   :  { %v13690_v1 = vadd.f32 %v3466_v48, %v13648_v11  ;;  %v3479_v54 = vpop.f32.mrf.mxu3  ;;  %v3442_v21 = vpop.f32.mrf.mxu0  ;;  %v4175_v11 = vpack.c.b16 %v13252_v32, %v13252_v32  ;;  %v4358_v32 = vpack.c.b16 %v4350_v52, %v4350_v52  ;;  %v4355_v52 = vunpack.c.h.b16 %v4339_v29  ;;  %v4505_v29 = vld [vmem:[#allocation11 + $0x168] sm:$0xff] }
 0x591   :  { %v13693_v35 = vadd.f32 %v3479_v54, %v13651_v50  ;;  %v3455_v47 = vpop.f32.mrf.mxu1  ;;  %v4348_v50 = vunpack.c.l.b16 %v4336_v28  ;;  %v4338_v28 = vld [vmem:[#allocation11 + $0x150] sm:$0xff] }
 0x592   :  { %v4374_v48 = vsel %vm2704_vm8, %v4358_v32, 0  ;;  %v4363_v43 = vpack.c.b16 %v4355_v52, %v4355_v52 }
 0x597   :  { %v3468_v25 = vpop.f32.mrf.mxu2 }
 0x598   :  { %v3481_v56 = vpop.f32.mrf.mxu3  ;;  %v3556_v4 = vpop.f32.mrf.mxu0 }
 0x599   :  { %v13696_v20 = vadd.f32 %v3556_v4, %v13654_v16  ;;  %v3569_v39 = vpop.f32.mrf.mxu1  ;;  %v4356_v16 = vpack.c.b16 %v4348_v50, %v4348_v50  ;;  %v4353_v50 = vunpack.c.h.b16 %v4338_v28 }
 0x59a   :  { %v13701_v46 = vadd.f32 %v3569_v39, %v13659_v60 }
 0x59b   :  { %10539 = vmatmul.msk.bf16.vlgmr.msra.gmra.mxu0 %vm2700_vm14, %v4175_v11  ;;  %10540 = vmatmul.msk.bf16.vlgmr.msra.gmra.mxu1 %vm2700_vm14, %v4175_v11  ;;  %v4368_v30 = vsel %vm2704_vm8, %v4356_v16, 0  ;;  %v4361_v3 = vpack.c.b16 %v4353_v50, %v4353_v50  ;;  %v4362_v16 = vpack.c.b16 %v4354_v45, %v4354_v45  ;;  %v4518_v50 = vunpack.c.l.b16 %v4505_v29 }
 0x59c   :  { %10541 = vmatmul.msk.bf16.vlgmr.msra.gmra.mxu2 %vm2700_vm14, %v4175_v11  ;;  %4398 = vmatpush.bf16.msra.mxu0 %v4368_v30  ;;  %v4389_v30 = vsel %vm2704_vm8, %v4363_v43, 0  ;;  %v4519_v45 = vunpack.c.h.b16 %v4505_v29 }
 0x59d   :  { %10542 = vmatmul.msk.bf16.vlgmr.msra.gmra.mxu3 %vm2700_vm14, %v4175_v11  ;;  %4411 = vmatpush.bf16.msra.mxu1 %v4371_v38  ;;  %v4383_v37 = vsel %vm2704_vm8, %v4361_v3, 0 }
 0x59e   :  { %4424 = vmatpush.bf16.msra.mxu2 %v4374_v48  ;;  %4437 = vmatpush.bf16.msra.mxu3 %v4377_v15 }
 0x59f   :  { %v3582_v60 = vpop.f32.mrf.mxu2 }
 0x5a0   :  { %v13712_v24 = vadd.f32 %v3582_v60, %v13670_v55  ;;  %v3595_v7 = vpop.f32.mrf.mxu3  ;;  %v3558_v41 = vpop.f32.mrf.mxu0  ;;  %v4386_v60 = vsel %vm2704_vm8, %v4362_v16, 0 }
 0x5a1   :  { %v13715_v54 = vadd.f32 %v3595_v7, %v13673_v14  ;;  %v3571_v21 = vpop.f32.mrf.mxu1  ;;  %v4352_v14 = vunpack.c.l.b16 %v4338_v28  ;;  %v4504_v28 = vld [vmem:[#allocation11 + $0x160] sm:$0xff] }
 0x5a7   :  { %v3584_v47 = vpop.f32.mrf.mxu2 }
 0x5a8   :  { %v3597_v25 = vpop.f32.mrf.mxu3  ;;  %v3608_v56 = vpop.f32.mrf.mxu0 }
 0x5a9   :  { %v13718_v4 = vadd.f32 %v3608_v56, %v13676_v61  ;;  %v3621_v39 = vpop.f32.mrf.mxu1  ;;  %v4360_v61 = vpack.c.b16 %v4352_v14, %v4352_v14  ;;  %v4517_v14 = vunpack.c.h.b16 %v4504_v28 }
 0x5aa   :  { %v13721_v55 = vadd.f32 %v3621_v39, %v13679_v51 }
 0x5ab   :  { %10543 = vmatmul.msk.bf16.vlgmr.msrb.gmra.mxu0 %vm2700_vm14, %v4175_v11  ;;  %10544 = vmatmul.msk.bf16.vlgmr.msrb.gmra.mxu1 %vm2700_vm14, %v4175_v11  ;;  %v4380_v32 = vsel %vm2704_vm8, %v4360_v61, 0  ;;  %v4525_v52 = vpack.c.b16 %v4517_v14, %v4517_v14  ;;  %v4527_v61 = vpack.c.b16 %v4519_v45, %v4519_v45 }
 0x5ac   :  { %10545 = vmatmul.msk.bf16.vlgmr.msrb.gmra.mxu2 %vm2700_vm14, %v4175_v11  ;;  %4450 = vmatpush.bf16.msrb.mxu0 %v4380_v32 }
 0x5ad   :  { %10546 = vmatmul.msk.bf16.vlgmr.msrb.gmra.mxu3 %vm2700_vm14, %v4175_v11  ;;  %4463 = vmatpush.bf16.msrb.mxu1 %v4383_v37  ;;  %v4539_v16 = vsel %vm2704_vm8, %v4525_v52, 0 }
 0x5ae   :  { %4476 = vmatpush.bf16.msrb.mxu2 %v4386_v60  ;;  %4489 = vmatpush.bf16.msrb.mxu3 %v4389_v30 }
 0x5af   :  { %v3634_v51 = vpop.f32.mrf.mxu2 }
 0x5b0   :  { %v13732_v38 = vadd.f32 %v3634_v51, %v13690_v1  ;;  %v3647_v48 = vpop.f32.mrf.mxu3  ;;  %v3610_v15 = vpop.f32.mrf.mxu0  ;;  %v4343_v1 = vpack.c.b16 %v13267_v42, %v13267_v42  ;;  %v4526_v42 = vpack.c.b16 %v4518_v50, %v4518_v50  ;;  %v4545_v51 = vsel %vm2704_vm8, %v4527_v61, 0 }
 0x5b1   :  { %v13735_v11 = vadd.f32 %v3647_v48, %v13693_v35  ;;  %v3623_v7 = vpop.f32.mrf.mxu1  ;;  %v4516_v35 = vunpack.c.l.b16 %v4504_v28  ;;  %v4507_v28 = vld [vmem:[#allocation11 + $0x178] sm:$0xff] }
 0x5b2   :  { %v4542_v43 = vsel %vm2704_vm8, %v4526_v42, 0  ;;  %v4523_v14 = vunpack.c.h.b16 %v4507_v28 }
 0x5b7   :  { %v3636_v41 = vpop.f32.mrf.mxu2 }
 0x5b8   :  { %v3649_v21 = vpop.f32.mrf.mxu3  ;;  %v3724_v47 = vpop.f32.mrf.mxu0 }
 0x5b9   :  { %v13738_v25 = vadd.f32 %v3724_v47, %v13696_v20  ;;  %v3737_v56 = vpop.f32.mrf.mxu1  ;;  %v4524_v20 = vpack.c.b16 %v4516_v35, %v4516_v35  ;;  %v4522_v35 = vunpack.c.l.b16 %v4507_v28 }
 0x5ba   :  { %v13743_v39 = vadd.f32 %v3737_v56, %v13701_v46  ;;  %v4506_v56 = vld [vmem:[#allocation11 + $0x170] sm:$0xff] }
 0x5bb   :  { %10547 = vmatmul.msk.bf16.vlgmr.msra.gmra.mxu0 %vm2700_vm14, %v4343_v1  ;;  %10548 = vmatmul.msk.bf16.vlgmr.msra.gmra.mxu1 %vm2700_vm14, %v4343_v1  ;;  %v4536_v3 = vsel %vm2704_vm8, %v4524_v20, 0  ;;  %v4521_v29 = vunpack.c.h.b16 %v4506_v56  ;;  %v4530_v45 = vpack.c.b16 %v4522_v35, %v4522_v35  ;;  %v4531_v20 = vpack.c.b16 %v4523_v14, %v4523_v14 }
 0x5bc   :  { %10549 = vmatmul.msk.bf16.vlgmr.msra.gmra.mxu2 %vm2700_vm14, %v4343_v1  ;;  %4566 = vmatpush.bf16.msra.mxu0 %v4536_v3 }
 0x5bd   :  { %10550 = vmatmul.msk.bf16.vlgmr.msra.gmra.mxu3 %vm2700_vm14, %v4343_v1  ;;  %4579 = vmatpush.bf16.msra.mxu1 %v4539_v16  ;;  %v4529_v50 = vpack.c.b16 %v4521_v29, %v4521_v29  ;;  %v4554_v61 = vsel %vm2704_vm8, %v4530_v45, 0 }
 0x5be   :  { %4592 = vmatpush.bf16.msra.mxu2 %v4542_v43  ;;  %4605 = vmatpush.bf16.msra.mxu3 %v4545_v51 }
 0x5bf   :  { %v3750_v46 = vpop.f32.mrf.mxu2  ;;  %v4551_v42 = vsel %vm2704_vm8, %v4529_v50, 0 }
 0x5c0   :  { %v13754_v32 = vadd.f32 %v3750_v46, %v13712_v24  ;;  %v3763_v37 = vpop.f32.mrf.mxu3  ;;  %v3726_v60 = vpop.f32.mrf.mxu0  ;;  %v4557_v46 = vsel %vm2704_vm8, %v4531_v20, 0 }
 0x5c1   :  { %v13757_v30 = vadd.f32 %v3763_v37, %v13715_v54  ;;  %v3739_v48 = vpop.f32.mrf.mxu1  ;;  %v4520_v54 = vunpack.c.l.b16 %v4506_v56  ;;  %v4673_v56 = vld [vmem:[#allocation11 + $0x188] sm:$0xff] }
 0x5c2   :  { %v4687_v29 = vunpack.c.h.b16 %v4673_v56 }
 0x5c4   :  { %v4695_v14 = vpack.c.b16 %v4687_v29, %v4687_v29 }
 0x5c6   :  { %v4713_v20 = vsel %vm2704_vm8, %v4695_v14, 0 }
 0x5c7   :  { %v3752_v15 = vpop.f32.mrf.mxu2 }
 0x5c8   :  { %v3765_v7 = vpop.f32.mrf.mxu3  ;;  %v3776_v41 = vpop.f32.mrf.mxu0 }
 0x5c9   :  { %v13760_v21 = vadd.f32 %v3776_v41, %v13718_v4  ;;  %v3789_v47 = vpop.f32.mrf.mxu1  ;;  %v4528_v4 = vpack.c.b16 %v4520_v54, %v4520_v54  ;;  %v4686_v54 = vunpack.c.l.b16 %v4673_v56 }
 0x5ca   :  { %v13763_v24 = vadd.f32 %v3789_v47, %v13721_v55  ;;  %v4672_v47 = vld [vmem:[#allocation11 + $0x180] sm:$0xff] }
 0x5cb   :  { %10551 = vmatmul.msk.bf16.vlgmr.msrb.gmra.mxu0 %vm2700_vm14, %v4343_v1  ;;  %10552 = vmatmul.msk.bf16.vlgmr.msrb.gmra.mxu1 %vm2700_vm14, %v4343_v1  ;;  %v4548_v52 = vsel %vm2704_vm8, %v4528_v4, 0  ;;  %v4685_v28 = vunpack.c.h.b16 %v4672_v47 }
 0x5cc   :  { %10553 = vmatmul.msk.bf16.vlgmr.msrb.gmra.mxu2 %vm2700_vm14, %v4343_v1  ;;  %4618 = vmatpush.bf16.msrb.mxu0 %v4548_v52 }
 0x5cd   :  { %10554 = vmatmul.msk.bf16.vlgmr.msrb.gmra.mxu3 %vm2700_vm14, %v4343_v1  ;;  %4631 = vmatpush.bf16.msrb.mxu1 %v4551_v42  ;;  %v4693_v35 = vpack.c.b16 %v4685_v28, %v4685_v28 }
 0x5ce   :  { %4644 = vmatpush.bf16.msrb.mxu2 %v4554_v61  ;;  %4657 = vmatpush.bf16.msrb.mxu3 %v4557_v46 }
 0x5cf   :  { %v3802_v55 = vpop.f32.mrf.mxu2  ;;  %v4707_v50 = vsel %vm2704_vm8, %v4693_v35, 0 }
 0x5d0   :  { %v13774_v3 = vadd.f32 %v3802_v55, %v13732_v38  ;;  %v3815_v16 = vpop.f32.mrf.mxu3  ;;  %v3778_v43 = vpop.f32.mrf.mxu0  ;;  %v4511_v38 = vpack.c.b16 %v13290_v36, %v13290_v36  ;;  %v4694_v36 = vpack.c.b16 %v4686_v54, %v4686_v54 }
 0x5d1   :  { %v13777_v1 = vadd.f32 %v3815_v16, %v13735_v11  ;;  %v3791_v51 = vpop.f32.mrf.mxu1  ;;  %v4684_v11 = vunpack.c.l.b16 %v4672_v47 }
 0x5d2   :  { %v4710_v45 = vsel %vm2704_vm8, %v4694_v36, 0 }
 0x5d7   :  { %v3804_v37 = vpop.f32.mrf.mxu2 }
 0x5d8   :  { %v3817_v60 = vpop.f32.mrf.mxu3  ;;  %v3892_v48 = vpop.f32.mrf.mxu0 }
 0x5d9   :  { %v13780_v15 = vadd.f32 %v3892_v48, %v13738_v25  ;;  %v3905_v7 = vpop.f32.mrf.mxu1  ;;  %v4692_v25 = vpack.c.b16 %v4684_v11, %v4684_v11  ;;  %v4674_v48 = vld [vmem:[#allocation11 + $0x190] sm:$0xff] }
 0x5da   :  { %v13785_v41 = vadd.f32 %v3905_v7, %v13743_v39  ;;  %v4675_v7 = vld [vmem:[#allocation11 + $0x198] sm:$0xff]  ;;  %v4689_v47 = vunpack.c.h.b16 %v4674_v48 }
 0x5db   :  { %10555 = vmatmul.msk.bf16.vlgmr.msra.gmra.mxu0 %vm2700_vm14, %v4511_v38  ;;  %10556 = vmatmul.msk.bf16.vlgmr.msra.gmra.mxu1 %vm2700_vm14, %v4511_v38  ;;  %v4704_v4 = vsel %vm2704_vm8, %v4692_v25, 0  ;;  %v4690_v56 = vunpack.c.l.b16 %v4675_v7  ;;  %v4691_v11 = vunpack.c.h.b16 %v4675_v7 }
 0x5dc   :  { %10557 = vmatmul.msk.bf16.vlgmr.msra.gmra.mxu2 %vm2700_vm14, %v4511_v38  ;;  %4734 = vmatpush.bf16.msra.mxu0 %v4704_v4  ;;  %v4697_v28 = vpack.c.b16 %v4689_v47, %v4689_v47 }
 0x5dd   :  { %10558 = vmatmul.msk.bf16.vlgmr.msra.gmra.mxu3 %vm2700_vm14, %v4511_v38  ;;  %4747 = vmatpush.bf16.msra.mxu1 %v4707_v50  ;;  %v4698_v54 = vpack.c.b16 %v4690_v56, %v4690_v56  ;;  %v4699_v29 = vpack.c.b16 %v4691_v11, %v4691_v11 }
 0x5de   :  { %4760 = vmatpush.bf16.msra.mxu2 %v4710_v45  ;;  %4773 = vmatpush.bf16.msra.mxu3 %v4713_v20  ;;  %v4719_v35 = vsel %vm2704_vm8, %v4697_v28, 0 }
 0x5df   :  { %v3918_v39 = vpop.f32.mrf.mxu2  ;;  %v4722_v36 = vsel %vm2704_vm8, %v4698_v54, 0  ;;  %v4725_v14 = vsel %vm2704_vm8, %v4699_v29, 0 }
 0x5e0   :  { %v13796_v55 = vadd.f32 %v3918_v39, %v13754_v32  ;;  %v3931_v52 = vpop.f32.mrf.mxu3  ;;  %v3894_v42 = vpop.f32.mrf.mxu0 }
 0x5e1   :  { %v13799_v61 = vadd.f32 %v3931_v52, %v13757_v30  ;;  %v3907_v46 = vpop.f32.mrf.mxu1  ;;  %v4688_v30 = vunpack.c.l.b16 %v4674_v48 }
 0x5e7   :  { %v3920_v16 = vpop.f32.mrf.mxu2 }
 0x5e8   :  { %v3933_v43 = vpop.f32.mrf.mxu3  ;;  %v3944_v51 = vpop.f32.mrf.mxu0 }
 0x5e9   :  { %v13802_v37 = vadd.f32 %v3944_v51, %v13760_v21  ;;  %v3957_v60 = vpop.f32.mrf.mxu1  ;;  %v4696_v21 = vpack.c.b16 %v4688_v30, %v4688_v30  ;;  %v4840_v51 = vld [vmem:[#allocation11 + $0x1a0] sm:$0xff] }
 0x5ea   :  { %v13805_v32 = vadd.f32 %v3957_v60, %v13763_v24  ;;  %v4841_v60 = vld [vmem:[#allocation11 + $0x1a8] sm:$0xff]  ;;  %v4853_v48 = vunpack.c.h.b16 %v4840_v51 }
 0x5eb   :  { %10559 = vmatmul.msk.bf16.vlgmr.msrb.gmra.mxu0 %vm2700_vm14, %v4511_v38  ;;  %10560 = vmatmul.msk.bf16.vlgmr.msrb.gmra.mxu1 %vm2700_vm14, %v4511_v38  ;;  %v4716_v25 = vsel %vm2704_vm8, %v4696_v21, 0  ;;  %v4854_v7 = vunpack.c.l.b16 %v4841_v60  ;;  %v4855_v30 = vunpack.c.h.b16 %v4841_v60 }
 0x5ec   :  { %10561 = vmatmul.msk.bf16.vlgmr.msrb.gmra.mxu2 %vm2700_vm14, %v4511_v38  ;;  %4786 = vmatpush.bf16.msrb.mxu0 %v4716_v25  ;;  %v4861_v47 = vpack.c.b16 %v4853_v48, %v4853_v48 }
 0x5ed   :  { %10562 = vmatmul.msk.bf16.vlgmr.msrb.gmra.mxu3 %vm2700_vm14, %v4511_v38  ;;  %4799 = vmatpush.bf16.msrb.mxu1 %v4719_v35  ;;  %v4863_v56 = vpack.c.b16 %v4855_v30, %v4855_v30 }
 0x5ee   :  { %4812 = vmatpush.bf16.msrb.mxu2 %v4722_v36  ;;  %4825 = vmatpush.bf16.msrb.mxu3 %v4725_v14  ;;  %v4875_v21 = vsel %vm2704_vm8, %v4861_v47, 0 }
 0x5ef   :  { %v3970_v24 = vpop.f32.mrf.mxu2  ;;  %v4881_v54 = vsel %vm2704_vm8, %v4863_v56, 0 }
 0x5f0   :  { %v13816_v39 = vadd.f32 %v3970_v24, %v13774_v3  ;;  %v3983_v4 = vpop.f32.mrf.mxu3  ;;  %v3946_v50 = vpop.f32.mrf.mxu0  ;;  %v4679_v3 = vpack.c.b16 %v13293_v18, %v13293_v18  ;;  %v4862_v18 = vpack.c.b16 %v4854_v7, %v4854_v7 }
 0x5f1   :  { %v13819_v38 = vadd.f32 %v3983_v4, %v13777_v1  ;;  %v3959_v45 = vpop.f32.mrf.mxu1  ;;  %v4852_v1 = vunpack.c.l.b16 %v4840_v51 }
 0x5f2   :  { %v4878_v28 = vsel %vm2704_vm8, %v4862_v18, 0 }
 0x5f7   :  { %v3972_v20 = vpop.f32.mrf.mxu2 }
 0x5f8   :  { %v3985_v52 = vpop.f32.mrf.mxu3  ;;  %v4065_v42 = vpop.f32.mrf.mxu0 }
 0x5f9   :  { %v13822_v46 = vadd.f32 %v4065_v42, %v13780_v15  ;;  %v4078_v16 = vpop.f32.mrf.mxu1  ;;  %v4860_v15 = vpack.c.b16 %v4852_v1, %v4852_v1  ;;  %v4842_v52 = vld [vmem:[#allocation11 + $0x1b0] sm:$0xff]  ;;  %v4843_v42 = vld [vmem:[#allocation11 + $0x1b8] sm:$0xff] }
 0x5fa   :  { %v13827_v43 = vadd.f32 %v4078_v16, %v13785_v41  ;;  %v4857_v16 = vunpack.c.h.b16 %v4842_v52  ;;  %v4858_v51 = vunpack.c.l.b16 %v4843_v42  ;;  %v4859_v60 = vunpack.c.h.b16 %v4843_v42 }
 0x5fb   :  { %10563 = vmatmul.msk.bf16.vlgmr.msra.gmra.mxu0 %vm2700_vm14, %v4679_v3  ;;  %10564 = vmatmul.msk.bf16.vlgmr.msra.gmra.mxu1 %vm2700_vm14, %v4679_v3  ;;  %v4872_v11 = vsel %vm2704_vm8, %v4860_v15, 0 }
 0x5fc   :  { %10565 = vmatmul.msk.bf16.vlgmr.msra.gmra.mxu2 %vm2700_vm14, %v4679_v3  ;;  %4902 = vmatpush.bf16.msra.mxu0 %v4872_v11  ;;  %v4865_v1 = vpack.c.b16 %v4857_v16, %v4857_v16  ;;  %v4866_v48 = vpack.c.b16 %v4858_v51, %v4858_v51  ;;  %v4867_v7 = vpack.c.b16 %v4859_v60, %v4859_v60 }
 0x5fd   :  { %10566 = vmatmul.msk.bf16.vlgmr.msra.gmra.mxu3 %vm2700_vm14, %v4679_v3  ;;  %4915 = vmatpush.bf16.msra.mxu1 %v4875_v21 }
 0x5fe   :  { %4928 = vmatpush.bf16.msra.mxu2 %v4878_v28  ;;  %4941 = vmatpush.bf16.msra.mxu3 %v4881_v54  ;;  %v4887_v15 = vsel %vm2704_vm8, %v4865_v1, 0  ;;  %v4890_v47 = vsel %vm2704_vm8, %v4866_v48, 0  ;;  %v4893_v18 = vsel %vm2704_vm8, %v4867_v7, 0 }
 0x5ff   :  { %v4091_v41 = vpop.f32.mrf.mxu2 }
 0x600   :  { %v13838_v29 = vadd.f32 %v4091_v41, %v13796_v55  ;;  %v4104_v24 = vpop.f32.mrf.mxu3  ;;  %v4067_v25 = vpop.f32.mrf.mxu0 }
 0x601   :  { %v13841_v35 = vadd.f32 %v4104_v24, %v13799_v61  ;;  %v4080_v36 = vpop.f32.mrf.mxu1  ;;  %v4856_v61 = vunpack.c.l.b16 %v4842_v52 }
 0x607   :  { %v4093_v14 = vpop.f32.mrf.mxu2 }
 0x608   :  { %v4106_v4 = vpop.f32.mrf.mxu3  ;;  %v4117_v50 = vpop.f32.mrf.mxu0 }
 0x609   :  { %v13844_v45 = vadd.f32 %v4117_v50, %v13802_v37  ;;  %v4130_v20 = vpop.f32.mrf.mxu1  ;;  %v4864_v37 = vpack.c.b16 %v4856_v61, %v4856_v61  ;;  %v5008_v4 = vld [vmem:[#allocation11 + $0x1c0] sm:$0xff]  ;;  %v5009_v50 = vld [vmem:[#allocation11 + $0x1c8] sm:$0xff] }
 0x60a   :  { %v13847_v55 = vadd.f32 %v4130_v20, %v13805_v32  ;;  %v5021_v20 = vunpack.c.h.b16 %v5008_v4  ;;  %v5022_v52 = vunpack.c.l.b16 %v5009_v50  ;;  %v5023_v42 = vunpack.c.h.b16 %v5009_v50 }
 0x60b   :  { %10567 = vmatmul.msk.bf16.vlgmr.msrb.gmra.mxu0 %vm2700_vm14, %v4679_v3  ;;  %10568 = vmatmul.msk.bf16.vlgmr.msrb.gmra.mxu1 %vm2700_vm14, %v4679_v3  ;;  %v4884_v30 = vsel %vm2704_vm8, %v4864_v37, 0 }
 0x60c   :  { %10569 = vmatmul.msk.bf16.vlgmr.msrb.gmra.mxu2 %vm2700_vm14, %v4679_v3  ;;  %4954 = vmatpush.bf16.msrb.mxu0 %v4884_v30  ;;  %v5029_v61 = vpack.c.b16 %v5021_v20, %v5021_v20  ;;  %v5031_v16 = vpack.c.b16 %v5023_v42, %v5023_v42 }
 0x60d   :  { %10570 = vmatmul.msk.bf16.vlgmr.msrb.gmra.mxu3 %vm2700_vm14, %v4679_v3  ;;  %4967 = vmatpush.bf16.msrb.mxu1 %v4887_v15 }
 0x60e   :  { %4980 = vmatpush.bf16.msrb.mxu2 %v4890_v47  ;;  %4993 = vmatpush.bf16.msrb.mxu3 %v4893_v18  ;;  %v5043_v60 = vsel %vm2704_vm8, %v5029_v61, 0  ;;  %v5049_v1 = vsel %vm2704_vm8, %v5031_v16, 0 }
 0x60f   :  { %v4143_v32 = vpop.f32.mrf.mxu2 }
 0x610   :  { %v13858_v56 = vadd.f32 %v4143_v32, %v13816_v39  ;;  %v4156_v41 = vpop.f32.mrf.mxu3  ;;  %v4119_v11 = vpop.f32.mrf.mxu0  ;;  %v4847_v39 = vpack.c.b16 %v13305_v27, %v13305_v27  ;;  %v5030_v27 = vpack.c.b16 %v5022_v52, %v5022_v52 }
 0x611   :  { %v13861_v3 = vadd.f32 %v4156_v41, %v13819_v38  ;;  %v4132_v21 = vpop.f32.mrf.mxu1  ;;  %v5020_v38 = vunpack.c.l.b16 %v5008_v4 }
 0x612   :  { %v5046_v37 = vsel %vm2704_vm8, %v5030_v27, 0 }
 0x617   :  { %v4145_v28 = vpop.f32.mrf.mxu2 }
 0x618   :  { %v4158_v54 = vpop.f32.mrf.mxu3  ;;  %v4232_v24 = vpop.f32.mrf.mxu0  ;;  %v5010_v28 = vld [vmem:[#allocation11 + $0x1d0] sm:$0xff] }
 0x619   :  { %v13864_v25 = vadd.f32 %v4232_v24, %v13822_v46  ;;  %v4245_v36 = vpop.f32.mrf.mxu1  ;;  %v5028_v46 = vpack.c.b16 %v5020_v38, %v5020_v38  ;;  %v5011_v54 = vld [vmem:[#allocation11 + $0x1d8] sm:$0xff]  ;;  %v5025_v24 = vunpack.c.h.b16 %v5010_v28 }
 0x61a   :  { %v13869_v14 = vadd.f32 %v4245_v36, %v13827_v43  ;;  %v5026_v36 = vunpack.c.l.b16 %v5011_v54  ;;  %v5027_v4 = vunpack.c.h.b16 %v5011_v54 }
 0x61b   :  { %10571 = vmatmul.msk.bf16.vlgmr.msra.gmra.mxu0 %vm2700_vm14, %v4847_v39  ;;  %10572 = vmatmul.msk.bf16.vlgmr.msra.gmra.mxu1 %vm2700_vm14, %v4847_v39  ;;  %v5040_v51 = vsel %vm2704_vm8, %v5028_v46, 0  ;;  %v5033_v50 = vpack.c.b16 %v5025_v24, %v5025_v24 }
 0x61c   :  { %10573 = vmatmul.msk.bf16.vlgmr.msra.gmra.mxu2 %vm2700_vm14, %v4847_v39  ;;  %5070 = vmatpush.bf16.msra.mxu0 %v5040_v51  ;;  %v5034_v38 = vpack.c.b16 %v5026_v36, %v5026_v36  ;;  %v5035_v20 = vpack.c.b16 %v5027_v4, %v5027_v4 }
 0x61d   :  { %10574 = vmatmul.msk.bf16.vlgmr.msra.gmra.mxu3 %vm2700_vm14, %v4847_v39  ;;  %5083 = vmatpush.bf16.msra.mxu1 %v5043_v60  ;;  %v5055_v42 = vsel %vm2704_vm8, %v5033_v50, 0 }
 0x61e   :  { %5096 = vmatpush.bf16.msra.mxu2 %v5046_v37  ;;  %5109 = vmatpush.bf16.msra.mxu3 %v5049_v1  ;;  %v5058_v46 = vsel %vm2704_vm8, %v5034_v38, 0  ;;  %v5061_v61 = vsel %vm2704_vm8, %v5035_v20, 0 }
 0x61f   :  { %v4258_v43 = vpop.f32.mrf.mxu2 }
 0x620   :  { %v13880_v48 = vadd.f32 %v4258_v43, %v13838_v29  ;;  %v4271_v7 = vpop.f32.mrf.mxu3  ;;  %v4234_v32 = vpop.f32.mrf.mxu0 }
 0x621   :  { %v13883_v30 = vadd.f32 %v4271_v7, %v13841_v35  ;;  %v4247_v15 = vpop.f32.mrf.mxu1  ;;  %v5024_v35 = vunpack.c.l.b16 %v5010_v28 }
 0x627   :  { %v4260_v47 = vpop.f32.mrf.mxu2 }
 0x628   :  { %v4273_v18 = vpop.f32.mrf.mxu3  ;;  %v4284_v41 = vpop.f32.mrf.mxu0  ;;  %v5176_v47 = vld [vmem:[#allocation11 + $0x1e0] sm:$0xff] }
 0x629   :  { %v13886_v11 = vadd.f32 %v4284_v41, %v13844_v45  ;;  %v4297_v21 = vpop.f32.mrf.mxu1  ;;  %v5032_v45 = vpack.c.b16 %v5024_v35, %v5024_v35  ;;  %v5177_v18 = vld [vmem:[#allocation11 + $0x1e8] sm:$0xff]  ;;  %v5189_v41 = vunpack.c.h.b16 %v5176_v47 }
 0x62a   :  { %v13889_v29 = vadd.f32 %v4297_v21, %v13847_v55  ;;  %v5190_v21 = vunpack.c.l.b16 %v5177_v18  ;;  %v5191_v28 = vunpack.c.h.b16 %v5177_v18 }
 0x62b   :  { %10575 = vmatmul.msk.bf16.vlgmr.msrb.gmra.mxu0 %vm2700_vm14, %v4847_v39  ;;  %10576 = vmatmul.msk.bf16.vlgmr.msrb.gmra.mxu1 %vm2700_vm14, %v4847_v39  ;;  %v5052_v52 = vsel %vm2704_vm8, %v5032_v45, 0  ;;  %v5197_v54 = vpack.c.b16 %v5189_v41, %v5189_v41 }
 0x62c   :  { %10577 = vmatmul.msk.bf16.vlgmr.msrb.gmra.mxu2 %vm2700_vm14, %v4847_v39  ;;  %5122 = vmatpush.bf16.msrb.mxu0 %v5052_v52  ;;  %v5199_v35 = vpack.c.b16 %v5191_v28, %v5191_v28 }
 0x62d   :  { %10578 = vmatmul.msk.bf16.vlgmr.msrb.gmra.mxu3 %vm2700_vm14, %v4847_v39  ;;  %5135 = vmatpush.bf16.msrb.mxu1 %v5055_v42  ;;  %v5211_v36 = vsel %vm2704_vm8, %v5197_v54, 0 }
 0x62e   :  { %5148 = vmatpush.bf16.msrb.mxu2 %v5058_v46  ;;  %5161 = vmatpush.bf16.msrb.mxu3 %v5061_v61  ;;  %v5217_v45 = vsel %vm2704_vm8, %v5199_v35, 0 }
 0x62f   :  { %v4310_v55 = vpop.f32.mrf.mxu2 }
 0x630   :  { %v13900_v27 = vadd.f32 %v4310_v55, %v13858_v56  ;;  %v4323_v16 = vpop.f32.mrf.mxu3  ;;  %v4286_v43 = vpop.f32.mrf.mxu0  ;;  %v5015_v56 = vpack.c.b16 %v13308_v57, %v13308_v57  ;;  %v5198_v57 = vpack.c.b16 %v5190_v21, %v5190_v21 }
 0x631   :  { %v13903_v39 = vadd.f32 %v4323_v16, %v13861_v3  ;;  %v4299_v51 = vpop.f32.mrf.mxu1  ;;  %v5188_v3 = vunpack.c.l.b16 %v5176_v47 }
 0x632   :  { %v5214_v4 = vsel %vm2704_vm8, %v5198_v57, 0  ;;  %v5178_v51 = vld [vmem:[#allocation11 + $0x1f0] sm:$0xff] }
 0x637   :  { %v4312_v60 = vpop.f32.mrf.mxu2 }
 0x638   :  { %v4325_v37 = vpop.f32.mrf.mxu3  ;;  %v4400_v1 = vpop.f32.mrf.mxu0  ;;  %v5179_v60 = vld [vmem:[#allocation11 + $0x1f8] sm:$0xff] }
 0x639   :  { %v13906_v7 = vadd.f32 %v4400_v1, %v13864_v25  ;;  %v4413_v32 = vpop.f32.mrf.mxu1  ;;  %v5196_v25 = vpack.c.b16 %v5188_v3, %v5188_v3  ;;  %v5193_v37 = vunpack.c.h.b16 %v5178_v51  ;;  %v5194_v1 = vunpack.c.l.b16 %v5179_v60 }
 0x63a   :  { %v13911_v15 = vadd.f32 %v4413_v32, %v13869_v14  ;;  %v5195_v32 = vunpack.c.h.b16 %v5179_v60 }
 0x63b   :  { %10579 = vmatmul.msk.bf16.vlgmr.msra.gmra.mxu0 %vm2700_vm14, %v5015_v56  ;;  %10580 = vmatmul.msk.bf16.vlgmr.msra.gmra.mxu1 %vm2700_vm14, %v5015_v56  ;;  %v5208_v24 = vsel %vm2704_vm8, %v5196_v25, 0  ;;  %v5201_v47 = vpack.c.b16 %v5193_v37, %v5193_v37  ;;  %v5202_v18 = vpack.c.b16 %v5194_v1, %v5194_v1 }
 0x63c   :  { %10581 = vmatmul.msk.bf16.vlgmr.msra.gmra.mxu2 %vm2700_vm14, %v5015_v56  ;;  %5238 = vmatpush.bf16.msra.mxu0 %v5208_v24  ;;  %v5203_v3 = vpack.c.b16 %v5195_v32, %v5195_v32 }
 0x63d   :  { %10582 = vmatmul.msk.bf16.vlgmr.msra.gmra.mxu3 %vm2700_vm14, %v5015_v56  ;;  %5251 = vmatpush.bf16.msra.mxu1 %v5211_v36  ;;  %v5223_v21 = vsel %vm2704_vm8, %v5201_v47, 0  ;;  %v5226_v28 = vsel %vm2704_vm8, %v5202_v18, 0 }
 0x63e   :  { %5264 = vmatpush.bf16.msra.mxu2 %v5214_v4  ;;  %5277 = vmatpush.bf16.msra.mxu3 %v5217_v45  ;;  %v5229_v25 = vsel %vm2704_vm8, %v5203_v3, 0 }
 0x63f   :  { %v4426_v14 = vpop.f32.mrf.mxu2 }
 0x640   :  { %v13922_v50 = vadd.f32 %v4426_v14, %v13880_v48  ;;  %v4439_v38 = vpop.f32.mrf.mxu3  ;;  %v4402_v20 = vpop.f32.mrf.mxu0 }
 0x641   :  { %v13925_v55 = vadd.f32 %v4439_v38, %v13883_v30  ;;  %v4415_v52 = vpop.f32.mrf.mxu1  ;;  %v5192_v30 = vunpack.c.l.b16 %v5178_v51 }
 0x642   :  { %v5346_v52 = vld [vmem:[#allocation11 + $0x200] sm:$0xff] }
 0x647   :  { %v4428_v42 = vpop.f32.mrf.mxu2 }
 0x648   :  { %v4441_v46 = vpop.f32.mrf.mxu3  ;;  %v4452_v61 = vpop.f32.mrf.mxu0  ;;  %v5347_v42 = vld [vmem:[#allocation11 + $0x208] sm:$0xff] }
 0x649   :  { %v13928_v16 = vadd.f32 %v4452_v61, %v13886_v11  ;;  %v4465_v43 = vpop.f32.mrf.mxu1  ;;  %v5200_v11 = vpack.c.b16 %v5192_v30, %v5192_v30  ;;  %v5362_v46 = vunpack.c.h.b16 %v5346_v52  ;;  %v5363_v61 = vunpack.c.l.b16 %v5347_v42 }
 0x64a   :  { %v13931_v48 = vadd.f32 %v4465_v43, %v13889_v29  ;;  %v5364_v43 = vunpack.c.h.b16 %v5347_v42 }
 0x64b   :  { %10583 = vmatmul.msk.bf16.vlgmr.msrb.gmra.mxu0 %vm2700_vm14, %v5015_v56  ;;  %10584 = vmatmul.msk.bf16.vlgmr.msrb.gmra.mxu1 %vm2700_vm14, %v5015_v56  ;;  %v5220_v41 = vsel %vm2704_vm8, %v5200_v11, 0  ;;  %v5370_v51 = vpack.c.b16 %v5362_v46, %v5362_v46 }
 0x64c   :  { %10585 = vmatmul.msk.bf16.vlgmr.msrb.gmra.mxu2 %vm2700_vm14, %v5015_v56  ;;  %5290 = vmatpush.bf16.msrb.mxu0 %v5220_v41  ;;  %v5372_v60 = vpack.c.b16 %v5364_v43, %v5364_v43 }
 0x64d   :  { %10586 = vmatmul.msk.bf16.vlgmr.msrb.gmra.mxu3 %vm2700_vm14, %v5015_v56  ;;  %5303 = vmatpush.bf16.msrb.mxu1 %v5223_v21  ;;  %v5384_v37 = vsel %vm2704_vm8, %v5370_v51, 0 }
 0x64e   :  { %5316 = vmatpush.bf16.msrb.mxu2 %v5226_v28  ;;  %5329 = vmatpush.bf16.msrb.mxu3 %v5229_v25  ;;  %v5390_v32 = vsel %vm2704_vm8, %v5372_v60, 0 }
 0x64f   :  { %v4478_v29 = vpop.f32.mrf.mxu2 }
 0x650   :  { %v13942_v54 = vadd.f32 %v4478_v29, %v13900_v27  ;;  %v4491_v57 = vpop.f32.mrf.mxu3  ;;  %v4454_v35 = vpop.f32.mrf.mxu0  ;;  %v5183_v27 = vpack.c.b16 %v13311_v10, %v13311_v10  ;;  %v5371_v10 = vpack.c.b16 %v5363_v61, %v5363_v61 }
 0x651   :  { %v13945_v56 = vadd.f32 %v4491_v57, %v13903_v39  ;;  %v4467_v14 = vpop.f32.mrf.mxu1  ;;  %v5361_v39 = vunpack.c.l.b16 %v5346_v52  ;;  %v5348_v35 = vld [vmem:[#allocation11 + $0x210] sm:$0xff] }
 0x652   :  { %v5387_v1 = vsel %vm2704_vm8, %v5371_v10, 0  ;;  %v5349_v14 = vld [vmem:[#allocation11 + $0x218] sm:$0xff] }
 0x657   :  { %v4480_v24 = vpop.f32.mrf.mxu2 }
 0x658   :  { %v4493_v36 = vpop.f32.mrf.mxu3  ;;  %v4568_v4 = vpop.f32.mrf.mxu0  ;;  %v5366_v24 = vunpack.c.h.b16 %v5348_v35 }
 0x659   :  { %v13948_v45 = vadd.f32 %v4568_v4, %v13906_v7  ;;  %v4581_v38 = vpop.f32.mrf.mxu1  ;;  %v5369_v7 = vpack.c.b16 %v5361_v39, %v5361_v39  ;;  %v5367_v36 = vunpack.c.l.b16 %v5349_v14  ;;  %v5368_v4 = vunpack.c.h.b16 %v5349_v14 }
 0x65a   :  { %v13953_v20 = vadd.f32 %v4581_v38, %v13911_v15  ;;  %v5374_v38 = vpack.c.b16 %v5366_v24, %v5366_v24 }
 0x65b   :  { %10587 = vmatmul.msk.bf16.vlgmr.msra.gmra.mxu0 %vm2700_vm14, %v5183_v27  ;;  %10588 = vmatmul.msk.bf16.vlgmr.msra.gmra.mxu1 %vm2700_vm14, %v5183_v27  ;;  %v5381_v30 = vsel %vm2704_vm8, %v5369_v7, 0  ;;  %v5375_v52 = vpack.c.b16 %v5367_v36, %v5367_v36  ;;  %v5376_v42 = vpack.c.b16 %v5368_v4, %v5368_v4 }
 0x65c   :  { %10589 = vmatmul.msk.bf16.vlgmr.msra.gmra.mxu2 %vm2700_vm14, %v5183_v27  ;;  %5411 = vmatpush.bf16.msra.mxu0 %v5381_v30  ;;  %v5396_v46 = vsel %vm2704_vm8, %v5374_v38, 0 }
 0x65d   :  { %10590 = vmatmul.msk.bf16.vlgmr.msra.gmra.mxu3 %vm2700_vm14, %v5183_v27  ;;  %5424 = vmatpush.bf16.msra.mxu1 %v5384_v37  ;;  %v5399_v61 = vsel %vm2704_vm8, %v5375_v52, 0  ;;  %v5402_v43 = vsel %vm2704_vm8, %v5376_v42, 0 }
 0x65e   :  { %5437 = vmatpush.bf16.msra.mxu2 %v5387_v1  ;;  %5450 = vmatpush.bf16.msra.mxu3 %v5390_v32 }
 0x65f   :  { %v4594_v15 = vpop.f32.mrf.mxu2 }
 0x660   :  { %v13964_v11 = vadd.f32 %v4594_v15, %v13922_v50  ;;  %v4607_v47 = vpop.f32.mrf.mxu3  ;;  %v4570_v18 = vpop.f32.mrf.mxu0 }
 0x661   :  { %v13967_v3 = vadd.f32 %v4607_v47, %v13925_v55  ;;  %v4583_v29 = vpop.f32.mrf.mxu1  ;;  %v5365_v55 = vunpack.c.l.b16 %v5348_v35  ;;  %v5517_v18 = vld [vmem:[#allocation11 + $0x220] sm:$0xff] }
 0x662   :  { %v5518_v29 = vld [vmem:[#allocation11 + $0x228] sm:$0xff] }
 0x667   :  { %v4596_v41 = vpop.f32.mrf.mxu2 }
 0x668   :  { %v4609_v21 = vpop.f32.mrf.mxu3  ;;  %v4620_v28 = vpop.f32.mrf.mxu0  ;;  %v5529_v41 = vunpack.c.h.b16 %v5517_v18 }
 0x669   :  { %v13970_v25 = vadd.f32 %v4620_v28, %v13928_v16  ;;  %v4633_v57 = vpop.f32.mrf.mxu1  ;;  %v5373_v16 = vpack.c.b16 %v5365_v55, %v5365_v55  ;;  %v5530_v21 = vunpack.c.l.b16 %v5518_v29  ;;  %v5531_v28 = vunpack.c.h.b16 %v5518_v29 }
 0x66a   :  { %v13973_v50 = vadd.f32 %v4633_v57, %v13931_v48  ;;  %v5537_v57 = vpack.c.b16 %v5529_v41, %v5529_v41 }
 0x66b   :  { %10591 = vmatmul.msk.bf16.vlgmr.msrb.gmra.mxu0 %vm2700_vm14, %v5183_v27  ;;  %10592 = vmatmul.msk.bf16.vlgmr.msrb.gmra.mxu1 %vm2700_vm14, %v5183_v27  ;;  %v5393_v39 = vsel %vm2704_vm8, %v5373_v16, 0  ;;  %v5539_v35 = vpack.c.b16 %v5531_v28, %v5531_v28 }
 0x66c   :  { %10593 = vmatmul.msk.bf16.vlgmr.msrb.gmra.mxu2 %vm2700_vm14, %v5183_v27  ;;  %5463 = vmatpush.bf16.msrb.mxu0 %v5393_v39  ;;  %v5551_v55 = vsel %vm2704_vm8, %v5537_v57, 0 }
 0x66d   :  { %10594 = vmatmul.msk.bf16.vlgmr.msrb.gmra.mxu3 %vm2700_vm14, %v5183_v27  ;;  %5476 = vmatpush.bf16.msrb.mxu1 %v5396_v46  ;;  %v5557_v36 = vsel %vm2704_vm8, %v5539_v35, 0 }
 0x66e   :  { %5489 = vmatpush.bf16.msrb.mxu2 %v5399_v61  ;;  %5502 = vmatpush.bf16.msrb.mxu3 %v5402_v43 }
 0x66f   :  { %v4646_v48 = vpop.f32.mrf.mxu2 }
 0x670   :  { %v13984_v7 = vadd.f32 %v4646_v48, %v13942_v54  ;;  %v4659_v51 = vpop.f32.mrf.mxu3  ;;  %v4622_v10 = vpop.f32.mrf.mxu0  ;;  %v5356_v54 = vpack.c.b16 %v13321_v12, %v13321_v12  ;;  %v5538_v12 = vpack.c.b16 %v5530_v21, %v5530_v21 }
 0x671   :  { %v13987_v27 = vadd.f32 %v4659_v51, %v13945_v56  ;;  %v4635_v60 = vpop.f32.mrf.mxu1  ;;  %v5528_v56 = vunpack.c.l.b16 %v5517_v18  ;;  %v5519_v51 = vld [vmem:[#allocation11 + $0x230] sm:$0xff]  ;;  %v5520_v10 = vld [vmem:[#allocation11 + $0x238] sm:$0xff] }
 0x672   :  { %v5554_v24 = vsel %vm2704_vm8, %v5538_v12, 0  ;;  %v5533_v60 = vunpack.c.h.b16 %v5519_v51 }
 0x677   :  { %v4648_v15 = vpop.f32.mrf.mxu2 }
 0x678   :  { %v4661_v30 = vpop.f32.mrf.mxu3  ;;  %v4736_v37 = vpop.f32.mrf.mxu0  ;;  %v5534_v15 = vunpack.c.l.b16 %v5520_v10 }
 0x679   :  { %v13990_v1 = vadd.f32 %v4736_v37, %v13948_v45  ;;  %v4749_v32 = vpop.f32.mrf.mxu1  ;;  %v5536_v45 = vpack.c.b16 %v5528_v56, %v5528_v56  ;;  %v5535_v30 = vunpack.c.h.b16 %v5520_v10  ;;  %v5541_v37 = vpack.c.b16 %v5533_v60, %v5533_v60 }
 0x67a   :  { %v13995_v47 = vadd.f32 %v4749_v32, %v13953_v20  ;;  %v5542_v32 = vpack.c.b16 %v5534_v15, %v5534_v15 }
 0x67b   :  { %10595 = vmatmul.msk.bf16.vlgmr.msra.gmra.mxu0 %vm2700_vm14, %v5356_v54  ;;  %10596 = vmatmul.msk.bf16.vlgmr.msra.gmra.mxu1 %vm2700_vm14, %v5356_v54  ;;  %v5548_v14 = vsel %vm2704_vm8, %v5536_v45, 0  ;;  %v5543_v18 = vpack.c.b16 %v5535_v30, %v5535_v30  ;;  %v5563_v56 = vsel %vm2704_vm8, %v5541_v37, 0 }
 0x67c   :  { %10597 = vmatmul.msk.bf16.vlgmr.msra.gmra.mxu2 %vm2700_vm14, %v5356_v54  ;;  %5578 = vmatpush.bf16.msra.mxu0 %v5548_v14  ;;  %v5566_v41 = vsel %vm2704_vm8, %v5542_v32, 0 }
 0x67d   :  { %10598 = vmatmul.msk.bf16.vlgmr.msra.gmra.mxu3 %vm2700_vm14, %v5356_v54  ;;  %5591 = vmatpush.bf16.msra.mxu1 %v5551_v55  ;;  %v5569_v21 = vsel %vm2704_vm8, %v5543_v18, 0 }
 0x67e   :  { %5604 = vmatpush.bf16.msra.mxu2 %v5554_v24  ;;  %5617 = vmatpush.bf16.msra.mxu3 %v5557_v36 }
 0x67f   :  { %v4762_v20 = vpop.f32.mrf.mxu2 }
 0x680   :  { %v14006_v4 = vadd.f32 %v4762_v20, %v13964_v11  ;;  %v4775_v16 = vpop.f32.mrf.mxu3  ;;  %v4738_v38 = vpop.f32.mrf.mxu0 }
 0x681   :  { %v14009_v52 = vadd.f32 %v4775_v16, %v13967_v3  ;;  %v4751_v42 = vpop.f32.mrf.mxu1  ;;  %v5532_v3 = vunpack.c.l.b16 %v5519_v51  ;;  %v5684_v16 = vld [vmem:[#allocation11 + $0x240] sm:$0xff]  ;;  %v5685_v38 = vld [vmem:[#allocation11 + $0x248] sm:$0xff] }
 0x682   :  { %v5697_v42 = vunpack.c.h.b16 %v5684_v16 }
 0x687   :  { %v4764_v48 = vpop.f32.mrf.mxu2 }
 0x688   :  { %v4777_v39 = vpop.f32.mrf.mxu3  ;;  %v4788_v46 = vpop.f32.mrf.mxu0  ;;  %v5698_v48 = vunpack.c.l.b16 %v5685_v38 }
 0x689   :  { %v14012_v61 = vadd.f32 %v4788_v46, %v13970_v25  ;;  %v4801_v43 = vpop.f32.mrf.mxu1  ;;  %v5540_v25 = vpack.c.b16 %v5532_v3, %v5532_v3  ;;  %v5699_v39 = vunpack.c.h.b16 %v5685_v38  ;;  %v5705_v46 = vpack.c.b16 %v5697_v42, %v5697_v42 }
 0x68a   :  { %v14015_v11 = vadd.f32 %v4801_v43, %v13973_v50 }
 0x68b   :  { %10599 = vmatmul.msk.bf16.vlgmr.msrb.gmra.mxu0 %vm2700_vm14, %v5356_v54  ;;  %10600 = vmatmul.msk.bf16.vlgmr.msrb.gmra.mxu1 %vm2700_vm14, %v5356_v54  ;;  %v5560_v29 = vsel %vm2704_vm8, %v5540_v25, 0  ;;  %v5707_v43 = vpack.c.b16 %v5699_v39, %v5699_v39  ;;  %v5719_v10 = vsel %vm2704_vm8, %v5705_v46, 0 }
 0x68c   :  { %10601 = vmatmul.msk.bf16.vlgmr.msrb.gmra.mxu2 %vm2700_vm14, %v5356_v54  ;;  %5630 = vmatpush.bf16.msrb.mxu0 %v5560_v29 }
 0x68d   :  { %10602 = vmatmul.msk.bf16.vlgmr.msrb.gmra.mxu3 %vm2700_vm14, %v5356_v54  ;;  %5643 = vmatpush.bf16.msrb.mxu1 %v5563_v56  ;;  %v5725_v60 = vsel %vm2704_vm8, %v5707_v43, 0 }
 0x68e   :  { %5656 = vmatpush.bf16.msrb.mxu2 %v5566_v41  ;;  %5669 = vmatpush.bf16.msrb.mxu3 %v5569_v21  ;;  %v5686_v21 = vld [vmem:[#allocation11 + $0x250] sm:$0xff] }
 0x68f   :  { %v4814_v50 = vpop.f32.mrf.mxu2 }
 0x690   :  { %v14026_v28 = vadd.f32 %v4814_v50, %v13984_v7  ;;  %v4827_v45 = vpop.f32.mrf.mxu3  ;;  %v4790_v57 = vpop.f32.mrf.mxu0  ;;  %v5523_v7 = vpack.c.b16 %v13327_v13, %v13327_v13  ;;  %v5706_v13 = vpack.c.b16 %v5698_v48, %v5698_v48 }
 0x691   :  { %v14029_v54 = vadd.f32 %v4827_v45, %v13987_v27  ;;  %v4803_v12 = vpop.f32.mrf.mxu1  ;;  %v5696_v27 = vunpack.c.l.b16 %v5684_v16  ;;  %v5687_v45 = vld [vmem:[#allocation11 + $0x258] sm:$0xff]  ;;  %v5701_v57 = vunpack.c.h.b16 %v5686_v21 }
 0x692   :  { %v5722_v3 = vsel %vm2704_vm8, %v5706_v13, 0  ;;  %v5702_v12 = vunpack.c.l.b16 %v5687_v45 }
 0x697   :  { %v4816_v35 = vpop.f32.mrf.mxu2 }
 0x698   :  { %v4829_v20 = vpop.f32.mrf.mxu3  ;;  %v4904_v14 = vpop.f32.mrf.mxu0  ;;  %v5703_v35 = vunpack.c.h.b16 %v5687_v45 }
 0x699   :  { %v14032_v55 = vadd.f32 %v4904_v14, %v13990_v1  ;;  %v4917_v24 = vpop.f32.mrf.mxu1  ;;  %v5704_v1 = vpack.c.b16 %v5696_v27, %v5696_v27  ;;  %v5709_v20 = vpack.c.b16 %v5701_v57, %v5701_v57  ;;  %v5710_v14 = vpack.c.b16 %v5702_v12, %v5702_v12 }
 0x69a   :  { %v14037_v36 = vadd.f32 %v4917_v24, %v13995_v47  ;;  %v5711_v24 = vpack.c.b16 %v5703_v35, %v5703_v35 }
 0x69b   :  { %10603 = vmatmul.msk.bf16.vlgmr.msra.gmra.mxu0 %vm2700_vm14, %v5523_v7  ;;  %10604 = vmatmul.msk.bf16.vlgmr.msra.gmra.mxu1 %vm2700_vm14, %v5523_v7  ;;  %v5716_v51 = vsel %vm2704_vm8, %v5704_v1, 0  ;;  %v5731_v38 = vsel %vm2704_vm8, %v5709_v20, 0  ;;  %v5734_v27 = vsel %vm2704_vm8, %v5710_v14, 0 }
 0x69c   :  { %10605 = vmatmul.msk.bf16.vlgmr.msra.gmra.mxu2 %vm2700_vm14, %v5523_v7  ;;  %5746 = vmatpush.bf16.msra.mxu0 %v5716_v51  ;;  %v5737_v42 = vsel %vm2704_vm8, %v5711_v24, 0 }
 0x69d   :  { %10606 = vmatmul.msk.bf16.vlgmr.msra.gmra.mxu3 %vm2700_vm14, %v5523_v7  ;;  %5759 = vmatpush.bf16.msra.mxu1 %v5719_v10 }
 0x69e   :  { %5772 = vmatpush.bf16.msra.mxu2 %v5722_v3  ;;  %5785 = vmatpush.bf16.msra.mxu3 %v5725_v60  ;;  %v5852_v60 = vld [vmem:[#allocation11 + $0x260] sm:$0xff] }
 0x69f   :  { %v4930_v47 = vpop.f32.mrf.mxu2 }
 0x6a0   :  { %v14048_v15 = vadd.f32 %v4930_v47, %v14006_v4  ;;  %v4943_v30 = vpop.f32.mrf.mxu3  ;;  %v4906_v25 = vpop.f32.mrf.mxu0 }
 0x6a1   :  { %v14051_v37 = vadd.f32 %v4943_v30, %v14009_v52  ;;  %v4919_v32 = vpop.f32.mrf.mxu1  ;;  %v5700_v52 = vunpack.c.l.b16 %v5686_v21  ;;  %v5853_v30 = vld [vmem:[#allocation11 + $0x268] sm:$0xff]  ;;  %v5865_v25 = vunpack.c.h.b16 %v5852_v60 }
 0x6a2   :  { %v5866_v32 = vunpack.c.l.b16 %v5853_v30 }
 0x6a7   :  { %v4932_v18 = vpop.f32.mrf.mxu2 }
 0x6a8   :  { %v4945_v50 = vpop.f32.mrf.mxu3  ;;  %v4956_v29 = vpop.f32.mrf.mxu0  ;;  %v5867_v18 = vunpack.c.h.b16 %v5853_v30 }
 0x6a9   :  { %v14054_v56 = vadd.f32 %v4956_v29, %v14012_v61  ;;  %v4969_v41 = vpop.f32.mrf.mxu1  ;;  %v5708_v61 = vpack.c.b16 %v5700_v52, %v5700_v52  ;;  %v5873_v50 = vpack.c.b16 %v5865_v25, %v5865_v25 }
 0x6aa   :  { %v14057_v4 = vadd.f32 %v4969_v41, %v14015_v11  ;;  %v5875_v29 = vpack.c.b16 %v5867_v18, %v5867_v18 }
 0x6ab   :  { %10607 = vmatmul.msk.bf16.vlgmr.msrb.gmra.mxu0 %vm2700_vm14, %v5523_v7  ;;  %10608 = vmatmul.msk.bf16.vlgmr.msrb.gmra.mxu1 %vm2700_vm14, %v5523_v7  ;;  %v5728_v16 = vsel %vm2704_vm8, %v5708_v61, 0  ;;  %v5887_v21 = vsel %vm2704_vm8, %v5873_v50, 0 }
 0x6ac   :  { %10609 = vmatmul.msk.bf16.vlgmr.msrb.gmra.mxu2 %vm2700_vm14, %v5523_v7  ;;  %5798 = vmatpush.bf16.msrb.mxu0 %v5728_v16  ;;  %v5893_v52 = vsel %vm2704_vm8, %v5875_v29, 0 }
 0x6ad   :  { %10610 = vmatmul.msk.bf16.vlgmr.msrb.gmra.mxu3 %vm2700_vm14, %v5523_v7  ;;  %5811 = vmatpush.bf16.msrb.mxu1 %v5731_v38 }
 0x6ae   :  { %5824 = vmatpush.bf16.msrb.mxu2 %v5734_v27  ;;  %5837 = vmatpush.bf16.msrb.mxu3 %v5737_v42  ;;  %v5854_v27 = vld [vmem:[#allocation11 + $0x270] sm:$0xff]  ;;  %v5855_v42 = vld [vmem:[#allocation11 + $0x278] sm:$0xff] }
 0x6af   :  { %v4982_v11 = vpop.f32.mrf.mxu2 }
 0x6b0   :  { %v14068_v48 = vadd.f32 %v4982_v11, %v14026_v28  ;;  %v4995_v39 = vpop.f32.mrf.mxu3  ;;  %v4958_v1 = vpop.f32.mrf.mxu0  ;;  %v5691_v28 = vpack.c.b16 %v13330_v63, %v13330_v63  ;;  %v5874_v63 = vpack.c.b16 %v5866_v32, %v5866_v32 }
 0x6b1   :  { %v14071_v7 = vadd.f32 %v4995_v39, %v14029_v54  ;;  %v4971_v46 = vpop.f32.mrf.mxu1  ;;  %v5864_v54 = vunpack.c.l.b16 %v5852_v60  ;;  %v5869_v39 = vunpack.c.h.b16 %v5854_v27  ;;  %v5870_v1 = vunpack.c.l.b16 %v5855_v42 }
 0x6b2   :  { %v5890_v45 = vsel %vm2704_vm8, %v5874_v63, 0  ;;  %v5871_v46 = vunpack.c.h.b16 %v5855_v42 }
 0x6b7   :  { %v4984_v13 = vpop.f32.mrf.mxu2 }
 0x6b8   :  { %v4997_v43 = vpop.f32.mrf.mxu3  ;;  %v5072_v47 = vpop.f32.mrf.mxu0  ;;  %v5877_v13 = vpack.c.b16 %v5869_v39, %v5869_v39 }
 0x6b9   :  { %v14074_v51 = vadd.f32 %v5072_v47, %v14032_v55  ;;  %v5085_v10 = vpop.f32.mrf.mxu1  ;;  %v5872_v55 = vpack.c.b16 %v5864_v54, %v5864_v54  ;;  %v5878_v43 = vpack.c.b16 %v5870_v1, %v5870_v1  ;;  %v5879_v47 = vpack.c.b16 %v5871_v46, %v5871_v46 }
 0x6ba   :  { %v14079_v3 = vadd.f32 %v5085_v10, %v14037_v36  ;;  %v5899_v60 = vsel %vm2704_vm8, %v5877_v13, 0 }
 0x6bb   :  { %10611 = vmatmul.msk.bf16.vlgmr.msra.gmra.mxu0 %vm2700_vm14, %v5691_v28  ;;  %10612 = vmatmul.msk.bf16.vlgmr.msra.gmra.mxu1 %vm2700_vm14, %v5691_v28  ;;  %v5884_v41 = vsel %vm2704_vm8, %v5872_v55, 0  ;;  %v5902_v30 = vsel %vm2704_vm8, %v5878_v43, 0  ;;  %v5905_v54 = vsel %vm2704_vm8, %v5879_v47, 0 }
 0x6bc   :  { %10613 = vmatmul.msk.bf16.vlgmr.msra.gmra.mxu2 %vm2700_vm14, %v5691_v28  ;;  %5914 = vmatpush.bf16.msra.mxu0 %v5884_v41 }
 0x6bd   :  { %10614 = vmatmul.msk.bf16.vlgmr.msra.gmra.mxu3 %vm2700_vm14, %v5691_v28  ;;  %5927 = vmatpush.bf16.msra.mxu1 %v5887_v21 }
 0x6be   :  { %5940 = vmatpush.bf16.msra.mxu2 %v5890_v45  ;;  %5953 = vmatpush.bf16.msra.mxu3 %v5893_v52  ;;  %v6020_v45 = vld [vmem:[#allocation11 + $0x280] sm:$0xff]  ;;  %v6021_v52 = vld [vmem:[#allocation11 + $0x288] sm:$0xff] }
 0x6bf   :  { %v5098_v36 = vpop.f32.mrf.mxu2 }
 0x6c0   :  { %v14090_v57 = vadd.f32 %v5098_v36, %v14048_v15  ;;  %v5111_v12 = vpop.f32.mrf.mxu3  ;;  %v5074_v35 = vpop.f32.mrf.mxu0 }
 0x6c1   :  { %v14093_v61 = vadd.f32 %v5111_v12, %v14051_v37  ;;  %v5087_v20 = vpop.f32.mrf.mxu1  ;;  %v5868_v37 = vunpack.c.l.b16 %v5854_v27  ;;  %v6033_v12 = vunpack.c.h.b16 %v6020_v45  ;;  %v6034_v35 = vunpack.c.l.b16 %v6021_v52 }
 0x6c2   :  { %v6035_v20 = vunpack.c.h.b16 %v6021_v52 }
 0x6c7   :  { %v5100_v14 = vpop.f32.mrf.mxu2 }
 0x6c8   :  { %v5113_v24 = vpop.f32.mrf.mxu3  ;;  %v5124_v11 = vpop.f32.mrf.mxu0  ;;  %v6041_v14 = vpack.c.b16 %v6033_v12, %v6033_v12 }
 0x6c9   :  { %v14096_v16 = vadd.f32 %v5124_v11, %v14054_v56  ;;  %v5137_v38 = vpop.f32.mrf.mxu1  ;;  %v5876_v56 = vpack.c.b16 %v5868_v37, %v5868_v37  ;;  %v6043_v24 = vpack.c.b16 %v6035_v20, %v6035_v20 }
 0x6ca   :  { %v14099_v15 = vadd.f32 %v5137_v38, %v14057_v4  ;;  %v6055_v38 = vsel %vm2704_vm8, %v6041_v14, 0 }
 0x6cb   :  { %10615 = vmatmul.msk.bf16.vlgmr.msrb.gmra.mxu0 %vm2700_vm14, %v5691_v28  ;;  %10616 = vmatmul.msk.bf16.vlgmr.msrb.gmra.mxu1 %vm2700_vm14, %v5691_v28  ;;  %v5896_v10 = vsel %vm2704_vm8, %v5876_v56, 0  ;;  %v6061_v42 = vsel %vm2704_vm8, %v6043_v24, 0 }
 0x6cc   :  { %10617 = vmatmul.msk.bf16.vlgmr.msrb.gmra.mxu2 %vm2700_vm14, %v5691_v28  ;;  %5966 = vmatpush.bf16.msrb.mxu0 %v5896_v10 }
 0x6cd   :  { %10618 = vmatmul.msk.bf16.vlgmr.msrb.gmra.mxu3 %vm2700_vm14, %v5691_v28  ;;  %5979 = vmatpush.bf16.msrb.mxu1 %v5899_v60  ;;  %v6022_v60 = vld [vmem:[#allocation11 + $0x290] sm:$0xff] }
 0x6ce   :  { %5992 = vmatpush.bf16.msrb.mxu2 %v5902_v30  ;;  %6005 = vmatpush.bf16.msrb.mxu3 %v5905_v54  ;;  %v6023_v30 = vld [vmem:[#allocation11 + $0x298] sm:$0xff]  ;;  %v6037_v54 = vunpack.c.h.b16 %v6022_v60 }
 0x6cf   :  { %v5150_v4 = vpop.f32.mrf.mxu2 }
 0x6d0   :  { %v14110_v25 = vadd.f32 %v5150_v4, %v14068_v48  ;;  %v5163_v32 = vpop.f32.mrf.mxu3  ;;  %v5126_v18 = vpop.f32.mrf.mxu0  ;;  %v5859_v48 = vpack.c.b16 %v13343_v40, %v13343_v40  ;;  %v6042_v40 = vpack.c.b16 %v6034_v35, %v6034_v35 }
 0x6d1   :  { %v14113_v28 = vadd.f32 %v5163_v32, %v14071_v7  ;;  %v5139_v55 = vpop.f32.mrf.mxu1  ;;  %v6032_v7 = vunpack.c.l.b16 %v6020_v45  ;;  %v6038_v32 = vunpack.c.l.b16 %v6023_v30  ;;  %v6039_v18 = vunpack.c.h.b16 %v6023_v30 }
 0x6d2   :  { %v6058_v27 = vsel %vm2704_vm8, %v6042_v40, 0  ;;  %v6045_v55 = vpack.c.b16 %v6037_v54, %v6037_v54 }
 0x6d7   :  { %v5152_v50 = vpop.f32.mrf.mxu2 }
 0x6d8   :  { %v5165_v63 = vpop.f32.mrf.mxu3  ;;  %v5240_v29 = vpop.f32.mrf.mxu0  ;;  %v6046_v50 = vpack.c.b16 %v6038_v32, %v6038_v32 }
 0x6d9   :  { %v14116_v36 = vadd.f32 %v5240_v29, %v14074_v51  ;;  %v5253_v41 = vpop.f32.mrf.mxu1  ;;  %v6040_v51 = vpack.c.b16 %v6032_v7, %v6032_v7  ;;  %v6047_v63 = vpack.c.b16 %v6039_v18, %v6039_v18 }
 0x6da   :  { %v14121_v21 = vadd.f32 %v5253_v41, %v14079_v3  ;;  %v6067_v41 = vsel %vm2704_vm8, %v6045_v55, 0  ;;  %v6070_v45 = vsel %vm2704_vm8, %v6046_v50, 0 }
 0x6db   :  { %10619 = vmatmul.msk.bf16.vlgmr.msra.gmra.mxu0 %vm2700_vm14, %v5859_v48  ;;  %10620 = vmatmul.msk.bf16.vlgmr.msra.gmra.mxu1 %vm2700_vm14, %v5859_v48  ;;  %v6052_v11 = vsel %vm2704_vm8, %v6040_v51, 0  ;;  %v6073_v52 = vsel %vm2704_vm8, %v6047_v63, 0 }
 0x6dc   :  { %10621 = vmatmul.msk.bf16.vlgmr.msra.gmra.mxu2 %vm2700_vm14, %v5859_v48  ;;  %6082 = vmatpush.bf16.msra.mxu0 %v6052_v11 }
 0x6dd   :  { %10622 = vmatmul.msk.bf16.vlgmr.msra.gmra.mxu3 %vm2700_vm14, %v5859_v48  ;;  %6095 = vmatpush.bf16.msra.mxu1 %v6055_v38  ;;  %v6188_v38 = vld [vmem:[#allocation11 + $0x2a0] sm:$0xff] }
 0x6de   :  { %6108 = vmatpush.bf16.msra.mxu2 %v6058_v27  ;;  %6121 = vmatpush.bf16.msra.mxu3 %v6061_v42  ;;  %v6189_v27 = vld [vmem:[#allocation11 + $0x2a8] sm:$0xff]  ;;  %v6201_v42 = vunpack.c.h.b16 %v6188_v38 }
 0x6df   :  { %v5266_v3 = vpop.f32.mrf.mxu2 }
 0x6e0   :  { %v14132_v37 = vadd.f32 %v5266_v3, %v14090_v57  ;;  %v5279_v39 = vpop.f32.mrf.mxu3  ;;  %v5242_v1 = vpop.f32.mrf.mxu0 }
 0x6e1   :  { %v14135_v46 = vadd.f32 %v5279_v39, %v14093_v61  ;;  %v5255_v56 = vpop.f32.mrf.mxu1  ;;  %v6036_v61 = vunpack.c.l.b16 %v6022_v60  ;;  %v6202_v39 = vunpack.c.l.b16 %v6189_v27  ;;  %v6203_v1 = vunpack.c.h.b16 %v6189_v27 }
 0x6e2   :  { %v6209_v56 = vpack.c.b16 %v6201_v42, %v6201_v42 }
 0x6e7   :  { %v5268_v13 = vpop.f32.mrf.mxu2 }
 0x6e8   :  { %v5281_v43 = vpop.f32.mrf.mxu3  ;;  %v5292_v47 = vpop.f32.mrf.mxu0  ;;  %v6211_v13 = vpack.c.b16 %v6203_v1, %v6203_v1 }
 0x6e9   :  { %v14138_v4 = vadd.f32 %v5292_v47, %v14096_v16  ;;  %v5305_v10 = vpop.f32.mrf.mxu1  ;;  %v6044_v16 = vpack.c.b16 %v6036_v61, %v6036_v61  ;;  %v6223_v47 = vsel %vm2704_vm8, %v6209_v56, 0 }
 0x6ea   :  { %v14141_v57 = vadd.f32 %v5305_v10, %v14099_v15  ;;  %v6229_v60 = vsel %vm2704_vm8, %v6211_v13, 0 }
 0x6eb   :  { %10623 = vmatmul.msk.bf16.vlgmr.msrb.gmra.mxu0 %vm2700_vm14, %v5859_v48  ;;  %10624 = vmatmul.msk.bf16.vlgmr.msrb.gmra.mxu1 %vm2700_vm14, %v5859_v48  ;;  %v6064_v29 = vsel %vm2704_vm8, %v6044_v16, 0 }
 0x6ec   :  { %10625 = vmatmul.msk.bf16.vlgmr.msrb.gmra.mxu2 %vm2700_vm14, %v5859_v48  ;;  %6134 = vmatpush.bf16.msrb.mxu0 %v6064_v29  ;;  %v6190_v29 = vld [vmem:[#allocation11 + $0x2b0] sm:$0xff] }
 0x6ed   :  { %10626 = vmatmul.msk.bf16.vlgmr.msrb.gmra.mxu3 %vm2700_vm14, %v5859_v48  ;;  %6147 = vmatpush.bf16.msrb.mxu1 %v6067_v41  ;;  %v6191_v41 = vld [vmem:[#allocation11 + $0x2b8] sm:$0xff] }
 0x6ee   :  { %6160 = vmatpush.bf16.msrb.mxu2 %v6070_v45  ;;  %6173 = vmatpush.bf16.msrb.mxu3 %v6073_v52  ;;  %v6205_v45 = vunpack.c.h.b16 %v6190_v29  ;;  %v6206_v52 = vunpack.c.l.b16 %v6191_v41 }
 0x6ef   :  { %v5318_v15 = vpop.f32.mrf.mxu2 }
 0x6f0   :  { %v14152_v7 = vadd.f32 %v5318_v15, %v14110_v25  ;;  %v5331_v12 = vpop.f32.mrf.mxu3  ;;  %v5294_v35 = vpop.f32.mrf.mxu0  ;;  %v6027_v25 = vpack.c.b16 %v13350_v2, %v13350_v2  ;;  %v6210_v2 = vpack.c.b16 %v6202_v39, %v6202_v39 }
 0x6f1   :  { %v14155_v48 = vadd.f32 %v5331_v12, %v14113_v28  ;;  %v5307_v20 = vpop.f32.mrf.mxu1  ;;  %v6200_v28 = vunpack.c.l.b16 %v6188_v38  ;;  %v6207_v12 = vunpack.c.h.b16 %v6191_v41  ;;  %v6213_v35 = vpack.c.b16 %v6205_v45, %v6205_v45 }
 0x6f2   :  { %v6226_v10 = vsel %vm2704_vm8, %v6210_v2, 0  ;;  %v6214_v20 = vpack.c.b16 %v6206_v52, %v6206_v52 }
 0x6f7   :  { %v5320_v51 = vpop.f32.mrf.mxu2 }
 0x6f8   :  { %v5333_v14 = vpop.f32.mrf.mxu3  ;;  %v5413_v40 = vpop.f32.mrf.mxu0  ;;  %v6215_v51 = vpack.c.b16 %v6207_v12, %v6207_v12 }
 0x6f9   :  { %v14158_v24 = vadd.f32 %v5413_v40, %v14116_v36  ;;  %v5426_v3 = vpop.f32.mrf.mxu1  ;;  %v6208_v36 = vpack.c.b16 %v6200_v28, %v6200_v28  ;;  %v6235_v40 = vsel %vm2704_vm8, %v6213_v35, 0 }
 0x6fa   :  { %v14163_v11 = vadd.f32 %v5426_v3, %v14121_v21  ;;  %v6238_v3 = vsel %vm2704_vm8, %v6214_v20, 0  ;;  %v6241_v38 = vsel %vm2704_vm8, %v6215_v51, 0 }
 0x6fb   :  { %10627 = vmatmul.msk.bf16.vlgmr.msra.gmra.mxu0 %vm2700_vm14, %v6027_v25  ;;  %10628 = vmatmul.msk.bf16.vlgmr.msra.gmra.mxu1 %vm2700_vm14, %v6027_v25  ;;  %v6220_v43 = vsel %vm2704_vm8, %v6208_v36, 0 }
 0x6fc   :  { %10629 = vmatmul.msk.bf16.vlgmr.msra.gmra.mxu2 %vm2700_vm14, %v6027_v25  ;;  %6250 = vmatpush.bf16.msra.mxu0 %v6220_v43  ;;  %v6356_v43 = vld [vmem:[#allocation11 + $0x2c0] sm:$0xff] }
 0x6fd   :  { %10630 = vmatmul.msk.bf16.vlgmr.msra.gmra.mxu3 %vm2700_vm14, %v6027_v25  ;;  %6263 = vmatpush.bf16.msra.mxu1 %v6223_v47  ;;  %v6357_v47 = vld [vmem:[#allocation11 + $0x2c8] sm:$0xff] }
 0x6fe   :  { %6276 = vmatpush.bf16.msra.mxu2 %v6226_v10  ;;  %6289 = vmatpush.bf16.msra.mxu3 %v6229_v60  ;;  %v6369_v10 = vunpack.c.h.b16 %v6356_v43  ;;  %v6370_v60 = vunpack.c.l.b16 %v6357_v47 }
 0x6ff   :  { %v5439_v21 = vpop.f32.mrf.mxu2 }
 0x700   :  { %v14174_v30 = vadd.f32 %v5439_v21, %v14132_v37  ;;  %v5452_v61 = vpop.f32.mrf.mxu3  ;;  %v5415_v54 = vpop.f32.mrf.mxu0 }
 0x701   :  { %v14177_v32 = vadd.f32 %v5452_v61, %v14135_v46  ;;  %v5428_v18 = vpop.f32.mrf.mxu1  ;;  %v6204_v46 = vunpack.c.l.b16 %v6190_v29  ;;  %v6371_v61 = vunpack.c.h.b16 %v6357_v47  ;;  %v6377_v54 = vpack.c.b16 %v6369_v10, %v6369_v10 }
 0x703   :  { %v6379_v18 = vpack.c.b16 %v6371_v61, %v6371_v61 }
 0x707   :  { %v5441_v16 = vpop.f32.mrf.mxu2 }
 0x708   :  { %v5454_v55 = vpop.f32.mrf.mxu3  ;;  %v5465_v50 = vpop.f32.mrf.mxu0 }
 0x709   :  { %v14180_v63 = vadd.f32 %v5465_v50, %v14138_v4  ;;  %v5478_v15 = vpop.f32.mrf.mxu1  ;;  %v6212_v4 = vpack.c.b16 %v6204_v46, %v6204_v46  ;;  %v6391_v55 = vsel %vm2704_vm8, %v6377_v54, 0 }
 0x70a   :  { %v14183_v37 = vadd.f32 %v5478_v15, %v14141_v57  ;;  %v6397_v15 = vsel %vm2704_vm8, %v6379_v18, 0 }
 0x70b   :  { %10631 = vmatmul.msk.bf16.vlgmr.msrb.gmra.mxu0 %vm2700_vm14, %v6027_v25  ;;  %10632 = vmatmul.msk.bf16.vlgmr.msrb.gmra.mxu1 %vm2700_vm14, %v6027_v25  ;;  %v6232_v14 = vsel %vm2704_vm8, %v6212_v4, 0 }
 0x70c   :  { %10633 = vmatmul.msk.bf16.vlgmr.msrb.gmra.mxu2 %vm2700_vm14, %v6027_v25  ;;  %6302 = vmatpush.bf16.msrb.mxu0 %v6232_v14  ;;  %v6359_v14 = vld [vmem:[#allocation11 + $0x2d8] sm:$0xff] }
 0x70d   :  { %10634 = vmatmul.msk.bf16.vlgmr.msrb.gmra.mxu3 %vm2700_vm14, %v6027_v25  ;;  %6315 = vmatpush.bf16.msrb.mxu1 %v6235_v40 }
 0x70e   :  { %6328 = vmatpush.bf16.msrb.mxu2 %v6238_v3  ;;  %6341 = vmatpush.bf16.msrb.mxu3 %v6241_v38  ;;  %v6374_v3 = vunpack.c.l.b16 %v6359_v14  ;;  %v6375_v38 = vunpack.c.h.b16 %v6359_v14 }
 0x70f   :  { %v5491_v57 = vpop.f32.mrf.mxu2 }
 0x710   :  { %v14194_v27 = vadd.f32 %v5491_v57, %v14152_v7  ;;  %v5504_v28 = vpop.f32.mrf.mxu3  ;;  %v5467_v42 = vpop.f32.mrf.mxu0  ;;  %v6195_v7 = vpack.c.b16 %v13364_v49, %v13364_v49  ;;  %v6378_v49 = vpack.c.b16 %v6370_v60, %v6370_v60  ;;  %v6358_v57 = vld [vmem:[#allocation11 + $0x2d0] sm:$0xff] }
 0x711   :  { %v14197_v25 = vadd.f32 %v5504_v28, %v14155_v48  ;;  %v5480_v39 = vpop.f32.mrf.mxu1  ;;  %v6368_v48 = vunpack.c.l.b16 %v6356_v43  ;;  %v6373_v40 = vunpack.c.h.b16 %v6358_v57  ;;  %v6382_v42 = vpack.c.b16 %v6374_v3, %v6374_v3 }
 0x712   :  { %v6394_v50 = vsel %vm2704_vm8, %v6378_v49, 0  ;;  %v6383_v39 = vpack.c.b16 %v6375_v38, %v6375_v38 }
 0x713   :  { %v6381_v28 = vpack.c.b16 %v6373_v40, %v6373_v40 }
 0x717   :  { %v5493_v1 = vpop.f32.mrf.mxu2 }
 0x718   :  { %v5506_v36 = vpop.f32.mrf.mxu3  ;;  %v5580_v56 = vpop.f32.mrf.mxu0 }
 0x719   :  { %v14200_v2 = vadd.f32 %v5580_v56, %v14158_v24  ;;  %v5593_v13 = vpop.f32.mrf.mxu1  ;;  %v6376_v24 = vpack.c.b16 %v6368_v48, %v6368_v48  ;;  %v6403_v36 = vsel %vm2704_vm8, %v6381_v28, 0  ;;  %v6406_v56 = vsel %vm2704_vm8, %v6382_v42, 0 }
 0x71a   :  { %v14205_v21 = vadd.f32 %v5593_v13, %v14163_v11  ;;  %v6409_v13 = vsel %vm2704_vm8, %v6383_v39, 0  ;;  %v6526_v39 = vld [vmem:[#allocation11 + $0x2f0] sm:$0xff] }
 0x71b   :  { %10635 = vmatmul.msk.bf16.vlgmr.msra.gmra.mxu0 %vm2700_vm14, %v6195_v7  ;;  %10636 = vmatmul.msk.bf16.vlgmr.msra.gmra.mxu1 %vm2700_vm14, %v6195_v7  ;;  %v6388_v16 = vsel %vm2704_vm8, %v6376_v24, 0 }
 0x71c   :  { %10637 = vmatmul.msk.bf16.vlgmr.msra.gmra.mxu2 %vm2700_vm14, %v6195_v7  ;;  %6418 = vmatpush.bf16.msra.mxu0 %v6388_v16  ;;  %v6525_v16 = vld [vmem:[#allocation11 + $0x2e8] sm:$0xff] }
 0x71d   :  { %10638 = vmatmul.msk.bf16.vlgmr.msra.gmra.mxu3 %vm2700_vm14, %v6195_v7  ;;  %6431 = vmatpush.bf16.msra.mxu1 %v6391_v55 }
 0x71e   :  { %6444 = vmatpush.bf16.msra.mxu2 %v6394_v50  ;;  %6457 = vmatpush.bf16.msra.mxu3 %v6397_v15  ;;  %v6538_v50 = vunpack.c.l.b16 %v6525_v16  ;;  %v6539_v15 = vunpack.c.h.b16 %v6525_v16 }
 0x71f   :  { %v5606_v11 = vpop.f32.mrf.mxu2 }
 0x720   :  { %v14216_v29 = vadd.f32 %v5606_v11, %v14174_v30  ;;  %v5619_v41 = vpop.f32.mrf.mxu3  ;;  %v5582_v46 = vpop.f32.mrf.mxu0  ;;  %v6524_v11 = vld [vmem:[#allocation11 + $0x2e0] sm:$0xff] }
 0x721   :  { %v14219_v45 = vadd.f32 %v5619_v41, %v14177_v32  ;;  %v5595_v52 = vpop.f32.mrf.mxu1  ;;  %v6372_v32 = vunpack.c.l.b16 %v6358_v57  ;;  %v6537_v55 = vunpack.c.h.b16 %v6524_v11  ;;  %v6547_v46 = vpack.c.b16 %v6539_v15, %v6539_v15 }
 0x723   :  { %v6545_v41 = vpack.c.b16 %v6537_v55, %v6537_v55 }
 0x727   :  { %v5608_v12 = vpop.f32.mrf.mxu2 }
 0x728   :  { %v5621_v4 = vpop.f32.mrf.mxu3  ;;  %v5632_v35 = vpop.f32.mrf.mxu0  ;;  %v6559_v12 = vsel %vm2704_vm8, %v6545_v41, 0 }
 0x729   :  { %v14222_v20 = vadd.f32 %v5632_v35, %v14180_v63  ;;  %v5645_v51 = vpop.f32.mrf.mxu1  ;;  %v6380_v63 = vpack.c.b16 %v6372_v32, %v6372_v32  ;;  %v6565_v35 = vsel %vm2704_vm8, %v6547_v46, 0  ;;  %v6694_v46 = vld [vmem:[#allocation11 + $0x300] sm:$0xff] }
 0x72a   :  { %v14225_v30 = vadd.f32 %v5645_v51, %v14183_v37 }
 0x72b   :  { %10639 = vmatmul.msk.bf16.vlgmr.msrb.gmra.mxu0 %vm2700_vm14, %v6195_v7  ;;  %10640 = vmatmul.msk.bf16.vlgmr.msrb.gmra.mxu1 %vm2700_vm14, %v6195_v7  ;;  %v6400_v1 = vsel %vm2704_vm8, %v6380_v63, 0 }
 0x72c   :  { %10641 = vmatmul.msk.bf16.vlgmr.msrb.gmra.mxu2 %vm2700_vm14, %v6195_v7  ;;  %6470 = vmatpush.bf16.msrb.mxu0 %v6400_v1  ;;  %v6541_v1 = vunpack.c.h.b16 %v6526_v39 }
 0x72d   :  { %10642 = vmatmul.msk.bf16.vlgmr.msrb.gmra.mxu3 %vm2700_vm14, %v6195_v7  ;;  %6483 = vmatpush.bf16.msrb.mxu1 %v6403_v36 }
 0x72e   :  { %6496 = vmatpush.bf16.msrb.mxu2 %v6406_v56  ;;  %6509 = vmatpush.bf16.msrb.mxu3 %v6409_v13  ;;  %v6549_v13 = vpack.c.b16 %v6541_v1, %v6541_v1 }
 0x72f   :  { %v5658_v37 = vpop.f32.mrf.mxu2 }
 0x730   :  { %v14236_v43 = vadd.f32 %v5658_v37, %v14194_v27  ;;  %v5671_v47 = vpop.f32.mrf.mxu3  ;;  %v5634_v48 = vpop.f32.mrf.mxu0  ;;  %v6363_v27 = vpack.c.b16 %v13367_v22, %v13367_v22  ;;  %v6546_v22 = vpack.c.b16 %v6538_v50, %v6538_v50  ;;  %v6527_v37 = vld [vmem:[#allocation11 + $0x2f8] sm:$0xff] }
 0x731   :  { %v14239_v7 = vadd.f32 %v5671_v47, %v14197_v25  ;;  %v5647_v10 = vpop.f32.mrf.mxu1  ;;  %v6536_v25 = vunpack.c.l.b16 %v6524_v11  ;;  %v6542_v36 = vunpack.c.l.b16 %v6527_v37  ;;  %v6543_v56 = vunpack.c.h.b16 %v6527_v37 }
 0x732   :  { %v6562_v4 = vsel %vm2704_vm8, %v6546_v22, 0 }
 0x733   :  { %v6550_v47 = vpack.c.b16 %v6542_v36, %v6542_v36  ;;  %v6551_v48 = vpack.c.b16 %v6543_v56, %v6543_v56 }
 0x737   :  { %v5660_v60 = vpop.f32.mrf.mxu2 }
 0x738   :  { %v5673_v61 = vpop.f32.mrf.mxu3  ;;  %v5748_v24 = vpop.f32.mrf.mxu0  ;;  %v6571_v60 = vsel %vm2704_vm8, %v6549_v13, 0 }
 0x739   :  { %v14242_v54 = vadd.f32 %v5748_v24, %v14200_v2  ;;  %v5761_v49 = vpop.f32.mrf.mxu1  ;;  %v6544_v2 = vpack.c.b16 %v6536_v25, %v6536_v25  ;;  %v6574_v61 = vsel %vm2704_vm8, %v6550_v47, 0  ;;  %v6577_v24 = vsel %vm2704_vm8, %v6551_v48, 0  ;;  %v6696_v47 = vld [vmem:[#allocation11 + $0x310] sm:$0xff]  ;;  %v6697_v48 = vld [vmem:[#allocation11 + $0x318] sm:$0xff] }
 0x73a   :  { %v14247_v18 = vadd.f32 %v5761_v49, %v14205_v21 }
 0x73b   :  { %10643 = vmatmul.msk.bf16.vlgmr.msra.gmra.mxu0 %vm2700_vm14, %v6363_v27  ;;  %10644 = vmatmul.msk.bf16.vlgmr.msra.gmra.mxu1 %vm2700_vm14, %v6363_v27  ;;  %v6556_v52 = vsel %vm2704_vm8, %v6544_v2, 0 }
 0x73c   :  { %10645 = vmatmul.msk.bf16.vlgmr.msra.gmra.mxu2 %vm2700_vm14, %v6363_v27  ;;  %6586 = vmatpush.bf16.msra.mxu0 %v6556_v52  ;;  %v6710_v52 = vunpack.c.h.b16 %v6694_v46 }
 0x73d   :  { %10646 = vmatmul.msk.bf16.vlgmr.msra.gmra.mxu3 %vm2700_vm14, %v6363_v27  ;;  %6599 = vmatpush.bf16.msra.mxu1 %v6559_v12 }
 0x73e   :  { %6612 = vmatpush.bf16.msra.mxu2 %v6562_v4  ;;  %6625 = vmatpush.bf16.msra.mxu3 %v6565_v35  ;;  %v6718_v35 = vpack.c.b16 %v6710_v52, %v6710_v52 }
 0x73f   :  { %v5774_v21 = vpop.f32.mrf.mxu2 }
 0x740   :  { %v14258_v51 = vadd.f32 %v5774_v21, %v14216_v29  ;;  %v5787_v57 = vpop.f32.mrf.mxu3  ;;  %v5750_v14 = vpop.f32.mrf.mxu0  ;;  %v6695_v21 = vld [vmem:[#allocation11 + $0x308] sm:$0xff] }
 0x741   :  { %v14261_v32 = vadd.f32 %v5787_v57, %v14219_v45  ;;  %v5763_v40 = vpop.f32.mrf.mxu1  ;;  %v6540_v45 = vunpack.c.l.b16 %v6526_v39  ;;  %v6711_v12 = vunpack.c.l.b16 %v6695_v21  ;;  %v6712_v4 = vunpack.c.h.b16 %v6695_v21 }
 0x742   :  { %v6732_v40 = vsel %vm2704_vm8, %v6718_v35, 0 }
 0x743   :  { %v6720_v57 = vpack.c.b16 %v6712_v4, %v6712_v4 }
 0x747   :  { %v5776_v3 = vpop.f32.mrf.mxu2 }
 0x748   :  { %v5789_v38 = vpop.f32.mrf.mxu3  ;;  %v5800_v63 = vpop.f32.mrf.mxu0 }
 0x749   :  { %v14264_v28 = vadd.f32 %v5800_v63, %v14222_v20  ;;  %v5813_v42 = vpop.f32.mrf.mxu1  ;;  %v6548_v20 = vpack.c.b16 %v6540_v45, %v6540_v45  ;;  %v6738_v38 = vsel %vm2704_vm8, %v6720_v57, 0  ;;  %v6866_v57 = vld [vmem:[#allocation11 + $0x328] sm:$0xff] }
 0x74a   :  { %v14267_v29 = vadd.f32 %v5813_v42, %v14225_v30 }
 0x74b   :  { %10647 = vmatmul.msk.bf16.vlgmr.msrb.gmra.mxu0 %vm2700_vm14, %v6363_v27  ;;  %10648 = vmatmul.msk.bf16.vlgmr.msrb.gmra.mxu1 %vm2700_vm14, %v6363_v27  ;;  %v6568_v10 = vsel %vm2704_vm8, %v6548_v20, 0 }
 0x74c   :  { %10649 = vmatmul.msk.bf16.vlgmr.msrb.gmra.mxu2 %vm2700_vm14, %v6363_v27  ;;  %6638 = vmatpush.bf16.msrb.mxu0 %v6568_v10  ;;  %v6715_v10 = vunpack.c.l.b16 %v6697_v48 }
 0x74d   :  { %10650 = vmatmul.msk.bf16.vlgmr.msrb.gmra.mxu3 %vm2700_vm14, %v6363_v27  ;;  %6651 = vmatpush.bf16.msrb.mxu1 %v6571_v60  ;;  %v6716_v60 = vunpack.c.h.b16 %v6697_v48 }
 0x74e   :  { %6664 = vmatpush.bf16.msrb.mxu2 %v6574_v61  ;;  %6677 = vmatpush.bf16.msrb.mxu3 %v6577_v24  ;;  %v6723_v24 = vpack.c.b16 %v6715_v10, %v6715_v10 }
 0x74f   :  { %v5826_v30 = vpop.f32.mrf.mxu2 }
 0x750   :  { %v14278_v49 = vadd.f32 %v5826_v30, %v14236_v43  ;;  %v5839_v11 = vpop.f32.mrf.mxu3  ;;  %v5802_v16 = vpop.f32.mrf.mxu0  ;;  %v6531_v43 = vpack.c.b16 %v13370_v5, %v13370_v5  ;;  %v6719_v5 = vpack.c.b16 %v6711_v12, %v6711_v12  ;;  %v6714_v30 = vunpack.c.h.b16 %v6696_v47 }
 0x751   :  { %v14281_v27 = vadd.f32 %v5839_v11, %v14239_v7  ;;  %v5815_v25 = vpop.f32.mrf.mxu1  ;;  %v6709_v7 = vunpack.c.l.b16 %v6694_v46  ;;  %v6724_v11 = vpack.c.b16 %v6716_v60, %v6716_v60 }
 0x752   :  { %v6735_v3 = vsel %vm2704_vm8, %v6719_v5, 0  ;;  %v6722_v61 = vpack.c.b16 %v6714_v30, %v6714_v30  ;;  %v6865_v5 = vld [vmem:[#allocation11 + $0x320] sm:$0xff] }
 0x754   :  { %v6744_v25 = vsel %vm2704_vm8, %v6722_v61, 0  ;;  %v6867_v61 = vld [vmem:[#allocation11 + $0x330] sm:$0xff] }
 0x757   :  { %v5828_v55 = vpop.f32.mrf.mxu2 }
 0x758   :  { %v5841_v50 = vpop.f32.mrf.mxu3  ;;  %v5916_v15 = vpop.f32.mrf.mxu0  ;;  %v6747_v55 = vsel %vm2704_vm8, %v6723_v24, 0  ;;  %v6868_v24 = vld [vmem:[#allocation11 + $0x338] sm:$0xff] }
 0x759   :  { %v14284_v2 = vadd.f32 %v5916_v15, %v14242_v54  ;;  %v5929_v41 = vpop.f32.mrf.mxu1  ;;  %v6717_v54 = vpack.c.b16 %v6709_v7, %v6709_v7  ;;  %v6750_v50 = vsel %vm2704_vm8, %v6724_v11, 0  ;;  %v6881_v11 = vunpack.c.h.b16 %v6867_v61 }
 0x75a   :  { %v14289_v22 = vadd.f32 %v5929_v41, %v14247_v18 }
 0x75b   :  { %10651 = vmatmul.msk.bf16.vlgmr.msra.gmra.mxu0 %vm2700_vm14, %v6531_v43  ;;  %10652 = vmatmul.msk.bf16.vlgmr.msra.gmra.mxu1 %vm2700_vm14, %v6531_v43  ;;  %v6729_v14 = vsel %vm2704_vm8, %v6717_v54, 0 }
 0x75c   :  { %10653 = vmatmul.msk.bf16.vlgmr.msra.gmra.mxu2 %vm2700_vm14, %v6531_v43  ;;  %6759 = vmatpush.bf16.msra.mxu0 %v6729_v14  ;;  %v6878_v14 = vunpack.c.l.b16 %v6866_v57 }
 0x75d   :  { %10654 = vmatmul.msk.bf16.vlgmr.msra.gmra.mxu3 %vm2700_vm14, %v6531_v43  ;;  %6772 = vmatpush.bf16.msra.mxu1 %v6732_v40  ;;  %v6879_v40 = vunpack.c.h.b16 %v6866_v57 }
 0x75e   :  { %6785 = vmatpush.bf16.msra.mxu2 %v6735_v3  ;;  %6798 = vmatpush.bf16.msra.mxu3 %v6738_v38 }
 0x75f   :  { %v5942_v18 = vpop.f32.mrf.mxu2  ;;  %v6887_v38 = vpack.c.b16 %v6879_v40, %v6879_v40 }
 0x760   :  { %v14300_v63 = vadd.f32 %v5942_v18, %v14258_v51  ;;  %v5955_v42 = vpop.f32.mrf.mxu3  ;;  %v5918_v39 = vpop.f32.mrf.mxu0  ;;  %v6877_v18 = vunpack.c.h.b16 %v6865_v5 }
 0x761   :  { %v14303_v37 = vadd.f32 %v5955_v42, %v14261_v32  ;;  %v5931_v45 = vpop.f32.mrf.mxu1  ;;  %v6713_v32 = vunpack.c.l.b16 %v6696_v47 }
 0x762   :  { %v6885_v3 = vpack.c.b16 %v6877_v18, %v6877_v18 }
 0x764   :  { %v6899_v39 = vsel %vm2704_vm8, %v6885_v3, 0  ;;  %v7032_v3 = vld [vmem:[#allocation11 + $0x340] sm:$0xff] }
 0x767   :  { %v5944_v1 = vpop.f32.mrf.mxu2 }
 0x768   :  { %v5957_v36 = vpop.f32.mrf.mxu3  ;;  %v5968_v56 = vpop.f32.mrf.mxu0  ;;  %v6905_v1 = vsel %vm2704_vm8, %v6887_v38, 0  ;;  %v7045_v38 = vunpack.c.h.b16 %v7032_v3 }
 0x769   :  { %v14306_v20 = vadd.f32 %v5968_v56, %v14264_v28  ;;  %v5981_v13 = vpop.f32.mrf.mxu1  ;;  %v6721_v28 = vpack.c.b16 %v6713_v32, %v6713_v32 }
 0x76a   :  { %v14309_v51 = vadd.f32 %v5981_v13, %v14267_v29 }
 0x76b   :  { %10655 = vmatmul.msk.bf16.vlgmr.msrb.gmra.mxu0 %vm2700_vm14, %v6531_v43  ;;  %10656 = vmatmul.msk.bf16.vlgmr.msrb.gmra.mxu1 %vm2700_vm14, %v6531_v43  ;;  %v6741_v16 = vsel %vm2704_vm8, %v6721_v28, 0 }
 0x76c   :  { %10657 = vmatmul.msk.bf16.vlgmr.msrb.gmra.mxu2 %vm2700_vm14, %v6531_v43  ;;  %6811 = vmatpush.bf16.msrb.mxu0 %v6741_v16  ;;  %v6883_v16 = vunpack.c.h.b16 %v6868_v24 }
 0x76d   :  { %10658 = vmatmul.msk.bf16.vlgmr.msrb.gmra.mxu3 %vm2700_vm14, %v6531_v43  ;;  %6824 = vmatpush.bf16.msrb.mxu1 %v6744_v25  ;;  %v6889_v25 = vpack.c.b16 %v6881_v11, %v6881_v11 }
 0x76e   :  { %6837 = vmatpush.bf16.msrb.mxu2 %v6747_v55  ;;  %6850 = vmatpush.bf16.msrb.mxu3 %v6750_v50  ;;  %v6891_v50 = vpack.c.b16 %v6883_v16, %v6883_v16 }
 0x76f   :  { %v5994_v29 = vpop.f32.mrf.mxu2 }
 0x770   :  { %v14320_v15 = vadd.f32 %v5994_v29, %v14278_v49  ;;  %v6007_v41 = vpop.f32.mrf.mxu3  ;;  %v5970_v46 = vpop.f32.mrf.mxu0  ;;  %v6704_v49 = vpack.c.b16 %v13376_v26, %v13376_v26  ;;  %v6886_v26 = vpack.c.b16 %v6878_v14, %v6878_v14  ;;  %v6882_v29 = vunpack.c.l.b16 %v6868_v24 }
 0x771   :  { %v14323_v43 = vadd.f32 %v6007_v41, %v14281_v27  ;;  %v5983_v21 = vpop.f32.mrf.mxu1  ;;  %v6876_v27 = vunpack.c.l.b16 %v6865_v5  ;;  %v6911_v46 = vsel %vm2704_vm8, %v6889_v25, 0  ;;  %v7035_v25 = vld [vmem:[#allocation11 + $0x358] sm:$0xff] }
 0x772   :  { %v6902_v45 = vsel %vm2704_vm8, %v6886_v26, 0  ;;  %v6890_v55 = vpack.c.b16 %v6882_v29, %v6882_v29  ;;  %v7033_v26 = vld [vmem:[#allocation11 + $0x348] sm:$0xff] }
 0x774   :  { %v6914_v21 = vsel %vm2704_vm8, %v6890_v55, 0 }
 0x777   :  { %v5996_v7 = vpop.f32.mrf.mxu2 }
 0x778   :  { %v6009_v52 = vpop.f32.mrf.mxu3  ;;  %v6084_v12 = vpop.f32.mrf.mxu0  ;;  %v6917_v7 = vsel %vm2704_vm8, %v6891_v50, 0  ;;  %v7050_v50 = vunpack.c.l.b16 %v7035_v25 }
 0x779   :  { %v14326_v4 = vadd.f32 %v6084_v12, %v14284_v2  ;;  %v6097_v54 = vpop.f32.mrf.mxu1  ;;  %v6884_v2 = vpack.c.b16 %v6876_v27, %v6876_v27 }
 0x77a   :  { %v14331_v35 = vadd.f32 %v6097_v54, %v14289_v22 }
 0x77b   :  { %10659 = vmatmul.msk.bf16.vlgmr.msra.gmra.mxu0 %vm2700_vm14, %v6704_v49  ;;  %10660 = vmatmul.msk.bf16.vlgmr.msra.gmra.mxu1 %vm2700_vm14, %v6704_v49  ;;  %v6896_v42 = vsel %vm2704_vm8, %v6884_v2, 0 }
 0x77c   :  { %10661 = vmatmul.msk.bf16.vlgmr.msra.gmra.mxu2 %vm2700_vm14, %v6704_v49  ;;  %6926 = vmatpush.bf16.msra.mxu0 %v6896_v42  ;;  %v7047_v42 = vunpack.c.h.b16 %v7033_v26 }
 0x77d   :  { %10662 = vmatmul.msk.bf16.vlgmr.msra.gmra.mxu3 %vm2700_vm14, %v6704_v49  ;;  %6939 = vmatpush.bf16.msra.mxu1 %v6899_v39  ;;  %v7053_v39 = vpack.c.b16 %v7045_v38, %v7045_v38 }
 0x77e   :  { %6952 = vmatpush.bf16.msra.mxu2 %v6902_v45  ;;  %6965 = vmatpush.bf16.msra.mxu3 %v6905_v1  ;;  %v7055_v45 = vpack.c.b16 %v7047_v42, %v7047_v42 }
 0x77f   :  { %v6110_v22 = vpop.f32.mrf.mxu2 }
 0x780   :  { %v14342_v36 = vadd.f32 %v6110_v22, %v14300_v63  ;;  %v6123_v56 = vpop.f32.mrf.mxu3  ;;  %v6086_v13 = vpop.f32.mrf.mxu0  ;;  %v7046_v22 = vunpack.c.l.b16 %v7033_v26 }
 0x781   :  { %v14345_v47 = vadd.f32 %v6123_v56, %v14303_v37  ;;  %v6099_v48 = vpop.f32.mrf.mxu1  ;;  %v6880_v37 = vunpack.c.l.b16 %v6867_v61  ;;  %v7067_v56 = vsel %vm2704_vm8, %v7053_v39, 0  ;;  %v7201_v39 = vld [vmem:[#allocation11 + $0x368] sm:$0xff] }
 0x782   :  { %v7073_v48 = vsel %vm2704_vm8, %v7055_v45, 0  ;;  %v7214_v45 = vunpack.c.l.b16 %v7201_v39 }
 0x787   :  { %v6112_v32 = vpop.f32.mrf.mxu2 }
 0x788   :  { %v6125_v30 = vpop.f32.mrf.mxu3  ;;  %v6136_v10 = vpop.f32.mrf.mxu0 }
 0x789   :  { %v14348_v60 = vadd.f32 %v6136_v10, %v14306_v20  ;;  %v6149_v28 = vpop.f32.mrf.mxu1  ;;  %v6888_v20 = vpack.c.b16 %v6880_v37, %v6880_v37 }
 0x78a   :  { %v14351_v63 = vadd.f32 %v6149_v28, %v14309_v51 }
 0x78b   :  { %10663 = vmatmul.msk.bf16.vlgmr.msrb.gmra.mxu0 %vm2700_vm14, %v6704_v49  ;;  %10664 = vmatmul.msk.bf16.vlgmr.msrb.gmra.mxu1 %vm2700_vm14, %v6704_v49  ;;  %v6908_v41 = vsel %vm2704_vm8, %v6888_v20, 0  ;;  %v7034_v20 = vld [vmem:[#allocation11 + $0x350] sm:$0xff] }
 0x78c   :  { %10665 = vmatmul.msk.bf16.vlgmr.msrb.gmra.mxu2 %vm2700_vm14, %v6704_v49  ;;  %6978 = vmatpush.bf16.msrb.mxu0 %v6908_v41  ;;  %v7049_v55 = vunpack.c.h.b16 %v7034_v20 }
 0x78d   :  { %10666 = vmatmul.msk.bf16.vlgmr.msrb.gmra.mxu3 %vm2700_vm14, %v6704_v49  ;;  %6991 = vmatpush.bf16.msrb.mxu1 %v6911_v46  ;;  %v7058_v46 = vpack.c.b16 %v7050_v50, %v7050_v50 }
 0x78e   :  { %7004 = vmatpush.bf16.msrb.mxu2 %v6914_v21  ;;  %7017 = vmatpush.bf16.msrb.mxu3 %v6917_v7  ;;  %v7057_v41 = vpack.c.b16 %v7049_v55, %v7049_v55 }
 0x78f   :  { %v6162_v51 = vpop.f32.mrf.mxu2 }
 0x790   :  { %v14362_v52 = vadd.f32 %v6162_v51, %v14320_v15  ;;  %v6175_v12 = vpop.f32.mrf.mxu3  ;;  %v6138_v54 = vpop.f32.mrf.mxu0  ;;  %v6871_v15 = vpack.c.b16 %v13385_v23, %v13385_v23  ;;  %v7054_v23 = vpack.c.b16 %v7046_v22, %v7046_v22  ;;  %v7051_v51 = vunpack.c.h.b16 %v7035_v25 }
 0x791   :  { %v14365_v49 = vadd.f32 %v6175_v12, %v14323_v43  ;;  %v6151_v5 = vpop.f32.mrf.mxu1  ;;  %v7044_v43 = vunpack.c.l.b16 %v7032_v3  ;;  %v7079_v12 = vsel %vm2704_vm8, %v7057_v41, 0  ;;  %v7082_v54 = vsel %vm2704_vm8, %v7058_v46, 0 }
 0x792   :  { %v7070_v13 = vsel %vm2704_vm8, %v7054_v23, 0  ;;  %v7059_v21 = vpack.c.b16 %v7051_v51, %v7051_v51  ;;  %v7202_v51 = vld [vmem:[#allocation11 + $0x370] sm:$0xff] }
 0x793   :  { %v7217_v41 = vunpack.c.h.b16 %v7202_v51 }
 0x794   :  { %v7085_v5 = vsel %vm2704_vm8, %v7059_v21, 0 }
 0x797   :  { %v6164_v57 = vpop.f32.mrf.mxu2 }
 0x798   :  { %v6177_v27 = vpop.f32.mrf.mxu3  ;;  %v6252_v18 = vpop.f32.mrf.mxu0 }
 0x799   :  { %v14368_v14 = vadd.f32 %v6252_v18, %v14326_v4  ;;  %v6265_v40 = vpop.f32.mrf.mxu1  ;;  %v7052_v4 = vpack.c.b16 %v7044_v43, %v7044_v43 }
 0x79a   :  { %v14373_v2 = vadd.f32 %v6265_v40, %v14331_v35 }
 0x79b   :  { %10667 = vmatmul.msk.bf16.vlgmr.msra.gmra.mxu0 %vm2700_vm14, %v6871_v15  ;;  %10668 = vmatmul.msk.bf16.vlgmr.msra.gmra.mxu1 %vm2700_vm14, %v6871_v15  ;;  %v7064_v1 = vsel %vm2704_vm8, %v7052_v4, 0  ;;  %v7200_v4 = vld [vmem:[#allocation11 + $0x360] sm:$0xff] }
 0x79c   :  { %10669 = vmatmul.msk.bf16.vlgmr.msra.gmra.mxu2 %vm2700_vm14, %v6871_v15  ;;  %7094 = vmatpush.bf16.msra.mxu0 %v7064_v1  ;;  %v7213_v23 = vunpack.c.h.b16 %v7200_v4 }
 0x79d   :  { %10670 = vmatmul.msk.bf16.vlgmr.msra.gmra.mxu3 %vm2700_vm14, %v6871_v15  ;;  %7107 = vmatpush.bf16.msra.mxu1 %v7067_v56 }
 0x79e   :  { %7120 = vmatpush.bf16.msra.mxu2 %v7070_v13  ;;  %7133 = vmatpush.bf16.msra.mxu3 %v7073_v48  ;;  %v7221_v1 = vpack.c.b16 %v7213_v23, %v7213_v23 }
 0x79f   :  { %v6278_v35 = vpop.f32.mrf.mxu2 }
 0x7a0   :  { %v14384_v32 = vadd.f32 %v6278_v35, %v14342_v36  ;;  %v6291_v30 = vpop.f32.mrf.mxu3  ;;  %v6254_v10 = vpop.f32.mrf.mxu0  ;;  %v7215_v35 = vunpack.c.h.b16 %v7201_v39  ;;  %v7235_v48 = vsel %vm2704_vm8, %v7221_v1, 0 }
 0x7a1   :  { %v14387_v28 = vadd.f32 %v6291_v30, %v14345_v47  ;;  %v6267_v61 = vpop.f32.mrf.mxu1  ;;  %v7048_v47 = vunpack.c.l.b16 %v7034_v20 }
 0x7a2   :  { %v7223_v56 = vpack.c.b16 %v7215_v35, %v7215_v35  ;;  %v7368_v35 = vld [vmem:[#allocation11 + $0x380] sm:$0xff] }
 0x7a3   :  { %v7381_v1 = vunpack.c.h.b16 %v7368_v35 }
 0x7a4   :  { %v7241_v10 = vsel %vm2704_vm8, %v7223_v56, 0 }
 0x7a7   :  { %v6280_v24 = vpop.f32.mrf.mxu2 }
 0x7a8   :  { %v6293_v37 = vpop.f32.mrf.mxu3  ;;  %v6304_v11 = vpop.f32.mrf.mxu0 }
 0x7a9   :  { %v14390_v29 = vadd.f32 %v6304_v11, %v14348_v60  ;;  %v6317_v16 = vpop.f32.mrf.mxu1  ;;  %v7056_v60 = vpack.c.b16 %v7048_v47, %v7048_v47 }
 0x7aa   :  { %v14393_v36 = vadd.f32 %v6317_v16, %v14351_v63 }
 0x7ab   :  { %10671 = vmatmul.msk.bf16.vlgmr.msrb.gmra.mxu0 %vm2700_vm14, %v6871_v15  ;;  %10672 = vmatmul.msk.bf16.vlgmr.msrb.gmra.mxu1 %vm2700_vm14, %v6871_v15  ;;  %v7076_v7 = vsel %vm2704_vm8, %v7056_v60, 0  ;;  %v7203_v60 = vld [vmem:[#allocation11 + $0x378] sm:$0xff] }
 0x7ac   :  { %10673 = vmatmul.msk.bf16.vlgmr.msrb.gmra.mxu2 %vm2700_vm14, %v6871_v15  ;;  %7146 = vmatpush.bf16.msrb.mxu0 %v7076_v7  ;;  %v7218_v46 = vunpack.c.l.b16 %v7203_v60  ;;  %v7219_v21 = vunpack.c.h.b16 %v7203_v60 }
 0x7ad   :  { %10674 = vmatmul.msk.bf16.vlgmr.msrb.gmra.mxu3 %vm2700_vm14, %v6871_v15  ;;  %7159 = vmatpush.bf16.msrb.mxu1 %v7079_v12 }
 0x7ae   :  { %7172 = vmatpush.bf16.msrb.mxu2 %v7082_v54  ;;  %7185 = vmatpush.bf16.msrb.mxu3 %v7085_v5  ;;  %v7226_v7 = vpack.c.b16 %v7218_v46, %v7218_v46  ;;  %v7227_v12 = vpack.c.b16 %v7219_v21, %v7219_v21  ;;  %v7370_v46 = vld [vmem:[#allocation11 + $0x390] sm:$0xff]  ;;  %v7371_v21 = vld [vmem:[#allocation11 + $0x398] sm:$0xff] }
 0x7af   :  { %v6330_v63 = vpop.f32.mrf.mxu2 }
 0x7b0   :  { %v14404_v57 = vadd.f32 %v6330_v63, %v14362_v52  ;;  %v6343_v27 = vpop.f32.mrf.mxu3  ;;  %v6306_v18 = vpop.f32.mrf.mxu0  ;;  %v7039_v52 = vpack.c.b16 %v13388_v53, %v13388_v53  ;;  %v7222_v53 = vpack.c.b16 %v7214_v45, %v7214_v45  ;;  %v7225_v63 = vpack.c.b16 %v7217_v41, %v7217_v41 }
 0x7b1   :  { %v14407_v40 = vadd.f32 %v6343_v27, %v14365_v49  ;;  %v6319_v15 = vpop.f32.mrf.mxu1  ;;  %v7212_v49 = vunpack.c.l.b16 %v7200_v4  ;;  %v7250_v27 = vsel %vm2704_vm8, %v7226_v7, 0  ;;  %v7253_v18 = vsel %vm2704_vm8, %v7227_v12, 0 }
 0x7b2   :  { %v7238_v30 = vsel %vm2704_vm8, %v7222_v53, 0  ;;  %v7247_v5 = vsel %vm2704_vm8, %v7225_v63, 0  ;;  %v7386_v63 = vunpack.c.l.b16 %v7371_v21  ;;  %v7387_v7 = vunpack.c.h.b16 %v7371_v21 }
 0x7b7   :  { %v6332_v3 = vpop.f32.mrf.mxu2 }
 0x7b8   :  { %v6345_v26 = vpop.f32.mrf.mxu3  ;;  %v6420_v43 = vpop.f32.mrf.mxu0 }
 0x7b9   :  { %v14410_v38 = vadd.f32 %v6420_v43, %v14368_v14  ;;  %v6433_v22 = vpop.f32.mrf.mxu1  ;;  %v7220_v14 = vpack.c.b16 %v7212_v49, %v7212_v49 }
 0x7ba   :  { %v14415_v42 = vadd.f32 %v6433_v22, %v14373_v2 }
 0x7bb   :  { %10675 = vmatmul.msk.bf16.vlgmr.msra.gmra.mxu0 %vm2700_vm14, %v7039_v52  ;;  %10676 = vmatmul.msk.bf16.vlgmr.msra.gmra.mxu1 %vm2700_vm14, %v7039_v52  ;;  %v7232_v13 = vsel %vm2704_vm8, %v7220_v14, 0  ;;  %v7369_v14 = vld [vmem:[#allocation11 + $0x388] sm:$0xff] }
 0x7bc   :  { %10677 = vmatmul.msk.bf16.vlgmr.msra.gmra.mxu2 %vm2700_vm14, %v7039_v52  ;;  %7262 = vmatpush.bf16.msra.mxu0 %v7232_v13  ;;  %v7382_v53 = vunpack.c.l.b16 %v7369_v14  ;;  %v7383_v56 = vunpack.c.h.b16 %v7369_v14 }
 0x7bd   :  { %10678 = vmatmul.msk.bf16.vlgmr.msra.gmra.mxu3 %vm2700_vm14, %v7039_v52  ;;  %7275 = vmatpush.bf16.msra.mxu1 %v7235_v48 }
 0x7be   :  { %7288 = vmatpush.bf16.msra.mxu2 %v7238_v30  ;;  %7301 = vmatpush.bf16.msra.mxu3 %v7241_v10  ;;  %v7391_v13 = vpack.c.b16 %v7383_v56, %v7383_v56  ;;  %v7537_v56 = vld [vmem:[#allocation11 + $0x3a8] sm:$0xff] }
 0x7bf   :  { %v6446_v2 = vpop.f32.mrf.mxu2 }
 0x7c0   :  { %v14426_v61 = vadd.f32 %v6446_v2, %v14384_v32  ;;  %v6459_v24 = vpop.f32.mrf.mxu3  ;;  %v6422_v37 = vpop.f32.mrf.mxu0  ;;  %v7389_v2 = vpack.c.b16 %v7381_v1, %v7381_v1 }
 0x7c1   :  { %v14429_v11 = vadd.f32 %v6459_v24, %v14387_v28  ;;  %v6435_v16 = vpop.f32.mrf.mxu1  ;;  %v7216_v28 = vunpack.c.l.b16 %v7202_v51  ;;  %v7409_v24 = vsel %vm2704_vm8, %v7391_v13, 0 }
 0x7c2   :  { %v7403_v30 = vsel %vm2704_vm8, %v7389_v2, 0  ;;  %v7550_v2 = vunpack.c.l.b16 %v7537_v56 }
 0x7c7   :  { %v6448_v20 = vpop.f32.mrf.mxu2 }
 0x7c8   :  { %v6461_v25 = vpop.f32.mrf.mxu3  ;;  %v6472_v47 = vpop.f32.mrf.mxu0 }
 0x7c9   :  { %v14432_v55 = vadd.f32 %v6472_v47, %v14390_v29  ;;  %v6485_v50 = vpop.f32.mrf.mxu1  ;;  %v7224_v29 = vpack.c.b16 %v7216_v28, %v7216_v28 }
 0x7ca   :  { %v14435_v32 = vadd.f32 %v6485_v50, %v14393_v36 }
 0x7cb   :  { %10679 = vmatmul.msk.bf16.vlgmr.msrb.gmra.mxu0 %vm2700_vm14, %v7039_v52  ;;  %10680 = vmatmul.msk.bf16.vlgmr.msrb.gmra.mxu1 %vm2700_vm14, %v7039_v52  ;;  %v7244_v54 = vsel %vm2704_vm8, %v7224_v29, 0  ;;  %v7385_v29 = vunpack.c.h.b16 %v7370_v46 }
 0x7cc   :  { %10681 = vmatmul.msk.bf16.vlgmr.msrb.gmra.mxu2 %vm2700_vm14, %v7039_v52  ;;  %7314 = vmatpush.bf16.msrb.mxu0 %v7244_v54  ;;  %v7395_v54 = vpack.c.b16 %v7387_v7, %v7387_v7 }
 0x7cd   :  { %10682 = vmatmul.msk.bf16.vlgmr.msrb.gmra.mxu3 %vm2700_vm14, %v7039_v52  ;;  %7327 = vmatpush.bf16.msrb.mxu1 %v7247_v5  ;;  %v7393_v12 = vpack.c.b16 %v7385_v29, %v7385_v29  ;;  %v7538_v29 = vld [vmem:[#allocation11 + $0x3b0] sm:$0xff] }
 0x7ce   :  { %7340 = vmatpush.bf16.msrb.mxu2 %v7250_v27  ;;  %7353 = vmatpush.bf16.msrb.mxu3 %v7253_v18  ;;  %v7553_v7 = vunpack.c.h.b16 %v7538_v29 }
 0x7cf   :  { %v6498_v36 = vpop.f32.mrf.mxu2  ;;  %v7415_v27 = vsel %vm2704_vm8, %v7393_v12, 0 }
 0x7d0   :  { %v14446_v15 = vadd.f32 %v6498_v36, %v14404_v57  ;;  %v6511_v3 = vpop.f32.mrf.mxu3  ;;  %v6474_v26 = vpop.f32.mrf.mxu0  ;;  %v7207_v57 = vpack.c.b16 %v13392_v44, %v13392_v44  ;;  %v7390_v44 = vpack.c.b16 %v7382_v53, %v7382_v53  ;;  %v7394_v36 = vpack.c.b16 %v7386_v63, %v7386_v63  ;;  %v7536_v53 = vld [vmem:[#allocation11 + $0x3a0] sm:$0xff]  ;;  %v7539_v63 = vld [vmem:[#allocation11 + $0x3b8] sm:$0xff] }
 0x7d1   :  { %v14449_v43 = vadd.f32 %v6511_v3, %v14407_v40  ;;  %v6487_v22 = vpop.f32.mrf.mxu1  ;;  %v7380_v40 = vunpack.c.l.b16 %v7368_v35  ;;  %v7421_v3 = vsel %vm2704_vm8, %v7395_v54, 0  ;;  %v7555_v12 = vunpack.c.h.b16 %v7539_v63 }
 0x7d2   :  { %v7406_v10 = vsel %vm2704_vm8, %v7390_v44, 0  ;;  %v7418_v18 = vsel %vm2704_vm8, %v7394_v36, 0  ;;  %v7551_v44 = vunpack.c.h.b16 %v7537_v56  ;;  %v7561_v36 = vpack.c.b16 %v7553_v7, %v7553_v7  ;;  %v7707_v7 = vld [vmem:[#allocation11 + $0x3d8] sm:$0xff] }
 0x7d7   :  { %v6500_v52 = vpop.f32.mrf.mxu2 }
 0x7d8   :  { %v6513_v4 = vpop.f32.mrf.mxu3  ;;  %v6588_v39 = vpop.f32.mrf.mxu0 }
 0x7d9   :  { %v14452_v49 = vadd.f32 %v6588_v39, %v14410_v38  ;;  %v6601_v23 = vpop.f32.mrf.mxu1  ;;  %v7388_v38 = vpack.c.b16 %v7380_v40, %v7380_v40 }
 0x7da   :  { %v14457_v45 = vadd.f32 %v6601_v23, %v14415_v42 }
 0x7db   :  { %10683 = vmatmul.msk.bf16.vlgmr.msra.gmra.mxu0 %vm2700_vm14, %v7207_v57  ;;  %10684 = vmatmul.msk.bf16.vlgmr.msra.gmra.mxu1 %vm2700_vm14, %v7207_v57  ;;  %v7400_v48 = vsel %vm2704_vm8, %v7388_v38, 0  ;;  %v7549_v38 = vunpack.c.h.b16 %v7536_v53 }
 0x7dc   :  { %10685 = vmatmul.msk.bf16.vlgmr.msra.gmra.mxu2 %vm2700_vm14, %v7207_v57  ;;  %7430 = vmatpush.bf16.msra.mxu0 %v7400_v48 }
 0x7dd   :  { %10686 = vmatmul.msk.bf16.vlgmr.msra.gmra.mxu3 %vm2700_vm14, %v7207_v57  ;;  %7443 = vmatpush.bf16.msra.mxu1 %v7403_v30  ;;  %v7557_v13 = vpack.c.b16 %v7549_v38, %v7549_v38  ;;  %v7704_v38 = vld [vmem:[#allocation11 + $0x3c0] sm:$0xff] }
 0x7de   :  { %7456 = vmatpush.bf16.msra.mxu2 %v7406_v10  ;;  %7469 = vmatpush.bf16.msra.mxu3 %v7409_v24 }
 0x7df   :  { %v6614_v42 = vpop.f32.mrf.mxu2  ;;  %v7571_v30 = vsel %vm2704_vm8, %v7557_v13, 0 }
 0x7e0   :  { %v14468_v37 = vadd.f32 %v6614_v42, %v14426_v61  ;;  %v6627_v16 = vpop.f32.mrf.mxu3  ;;  %v6590_v20 = vpop.f32.mrf.mxu0  ;;  %v7559_v42 = vpack.c.b16 %v7551_v44, %v7551_v44  ;;  %v7717_v44 = vunpack.c.h.b16 %v7704_v38 }
 0x7e1   :  { %v14471_v25 = vadd.f32 %v6627_v16, %v14429_v11  ;;  %v6603_v47 = vpop.f32.mrf.mxu1  ;;  %v7384_v11 = vunpack.c.l.b16 %v7370_v46 }
 0x7e2   :  { %v7577_v24 = vsel %vm2704_vm8, %v7559_v42, 0 }
 0x7e7   :  { %v6616_v50 = vpop.f32.mrf.mxu2 }
 0x7e8   :  { %v6629_v51 = vpop.f32.mrf.mxu3  ;;  %v6640_v60 = vpop.f32.mrf.mxu0 }
 0x7e9   :  { %v14474_v28 = vadd.f32 %v6640_v60, %v14432_v55  ;;  %v6653_v41 = vpop.f32.mrf.mxu1  ;;  %v7392_v55 = vpack.c.b16 %v7384_v11, %v7384_v11 }
 0x7ea   :  { %v14477_v61 = vadd.f32 %v6653_v41, %v14435_v32 }
 0x7eb   :  { %10687 = vmatmul.msk.bf16.vlgmr.msrb.gmra.mxu0 %vm2700_vm14, %v7207_v57  ;;  %10688 = vmatmul.msk.bf16.vlgmr.msrb.gmra.mxu1 %vm2700_vm14, %v7207_v57  ;;  %v7412_v5 = vsel %vm2704_vm8, %v7392_v55, 0  ;;  %v7554_v55 = vunpack.c.l.b16 %v7539_v63 }
 0x7ec   :  { %10689 = vmatmul.msk.bf16.vlgmr.msrb.gmra.mxu2 %vm2700_vm14, %v7207_v57  ;;  %7482 = vmatpush.bf16.msrb.mxu0 %v7412_v5 }
 0x7ed   :  { %10690 = vmatmul.msk.bf16.vlgmr.msrb.gmra.mxu3 %vm2700_vm14, %v7207_v57  ;;  %7495 = vmatpush.bf16.msrb.mxu1 %v7415_v27  ;;  %v7562_v54 = vpack.c.b16 %v7554_v55, %v7554_v55  ;;  %v7583_v27 = vsel %vm2704_vm8, %v7561_v36, 0 }
 0x7ee   :  { %7508 = vmatpush.bf16.msrb.mxu2 %v7418_v18  ;;  %7521 = vmatpush.bf16.msrb.mxu3 %v7421_v3 }
 0x7ef   :  { %v6666_v32 = vpop.f32.mrf.mxu2  ;;  %v7586_v18 = vsel %vm2704_vm8, %v7562_v54, 0 }
 0x7f0   :  { %v14488_v26 = vadd.f32 %v6666_v32, %v14446_v15  ;;  %v6679_v22 = vpop.f32.mrf.mxu3  ;;  %v6642_v52 = vpop.f32.mrf.mxu0  ;;  %v7375_v15 = vpack.c.b16 %v13395_v59, %v13395_v59  ;;  %v7558_v59 = vpack.c.b16 %v7550_v2, %v7550_v2  ;;  %v7563_v32 = vpack.c.b16 %v7555_v12, %v7555_v12  ;;  %v7705_v2 = vld [vmem:[#allocation11 + $0x3c8] sm:$0xff] }
 0x7f1   :  { %v14491_v4 = vadd.f32 %v6679_v22, %v14449_v43  ;;  %v6655_v39 = vpop.f32.mrf.mxu1  ;;  %v7548_v43 = vunpack.c.l.b16 %v7536_v53  ;;  %v7719_v13 = vunpack.c.h.b16 %v7705_v2  ;;  %v7722_v12 = vunpack.c.l.b16 %v7707_v7 }
 0x7f2   :  { %v7574_v10 = vsel %vm2704_vm8, %v7558_v59, 0  ;;  %v7589_v3 = vsel %vm2704_vm8, %v7563_v32, 0  ;;  %v7725_v59 = vpack.c.b16 %v7717_v44, %v7717_v44  ;;  %v7873_v44 = vld [vmem:[#allocation11 + $0x3e8] sm:$0xff] }
 0x7f3   :  { %v7727_v42 = vpack.c.b16 %v7719_v13, %v7719_v13  ;;  %v7730_v54 = vpack.c.b16 %v7722_v12, %v7722_v12  ;;  %v7886_v13 = vunpack.c.l.b16 %v7873_v44 }
 0x7f7   :  { %v6668_v23 = vpop.f32.mrf.mxu2 }
 0x7f8   :  { %v6681_v57 = vpop.f32.mrf.mxu3  ;;  %v6761_v35 = vpop.f32.mrf.mxu0 }
 0x7f9   :  { %v14494_v14 = vadd.f32 %v6761_v35, %v14452_v49  ;;  %v6774_v40 = vpop.f32.mrf.mxu1  ;;  %v7556_v49 = vpack.c.b16 %v7548_v43, %v7548_v43 }
 0x7fa   :  { %v14499_v1 = vadd.f32 %v6774_v40, %v14457_v45 }
 0x7fb   :  { %10691 = vmatmul.msk.bf16.vlgmr.msra.gmra.mxu0 %vm2700_vm14, %v7375_v15  ;;  %10692 = vmatmul.msk.bf16.vlgmr.msra.gmra.mxu1 %vm2700_vm14, %v7375_v15  ;;  %v7568_v48 = vsel %vm2704_vm8, %v7556_v49, 0  ;;  %v7718_v49 = vunpack.c.l.b16 %v7705_v2 }
 0x7fc   :  { %10693 = vmatmul.msk.bf16.vlgmr.msra.gmra.mxu2 %vm2700_vm14, %v7375_v15  ;;  %7598 = vmatpush.bf16.msra.mxu0 %v7568_v48  ;;  %v7739_v48 = vsel %vm2704_vm8, %v7725_v59, 0 }
 0x7fd   :  { %10694 = vmatmul.msk.bf16.vlgmr.msra.gmra.mxu3 %vm2700_vm14, %v7375_v15  ;;  %7611 = vmatpush.bf16.msra.mxu1 %v7571_v30 }
 0x7fe   :  { %7624 = vmatpush.bf16.msra.mxu2 %v7574_v10  ;;  %7637 = vmatpush.bf16.msra.mxu3 %v7577_v24  ;;  %v7745_v10 = vsel %vm2704_vm8, %v7727_v42, 0 }
 0x7ff   :  { %v6787_v45 = vpop.f32.mrf.mxu2 }
 0x800   :  { %v14510_v16 = vadd.f32 %v6787_v45, %v14468_v37  ;;  %v6800_v20 = vpop.f32.mrf.mxu3  ;;  %v6763_v47 = vpop.f32.mrf.mxu0 }
 0x801   :  { %v14513_v50 = vadd.f32 %v6800_v20, %v14471_v25  ;;  %v6776_v51 = vpop.f32.mrf.mxu1  ;;  %v7552_v25 = vunpack.c.l.b16 %v7538_v29 }
 0x807   :  { %v6789_v60 = vpop.f32.mrf.mxu2 }
 0x808   :  { %v6802_v41 = vpop.f32.mrf.mxu3  ;;  %v6813_v46 = vpop.f32.mrf.mxu0 }
 0x809   :  { %v14516_v21 = vadd.f32 %v6813_v46, %v14474_v28  ;;  %v6826_v11 = vpop.f32.mrf.mxu1  ;;  %v7560_v28 = vpack.c.b16 %v7552_v25, %v7552_v25  ;;  %v7706_v25 = vld [vmem:[#allocation11 + $0x3d0] sm:$0xff] }
 0x80a   :  { %v14519_v37 = vadd.f32 %v6826_v11, %v14477_v61  ;;  %v7721_v55 = vunpack.c.h.b16 %v7706_v25 }
 0x80b   :  { %10695 = vmatmul.msk.bf16.vlgmr.msrb.gmra.mxu0 %vm2700_vm14, %v7375_v15  ;;  %10696 = vmatmul.msk.bf16.vlgmr.msrb.gmra.mxu1 %vm2700_vm14, %v7375_v15  ;;  %v7580_v5 = vsel %vm2704_vm8, %v7560_v28, 0  ;;  %v7723_v28 = vunpack.c.h.b16 %v7707_v7  ;;  %v7874_v7 = vld [vmem:[#allocation11 + $0x3f0] sm:$0xff] }
 0x80c   :  { %10697 = vmatmul.msk.bf16.vlgmr.msrb.gmra.mxu2 %vm2700_vm14, %v7375_v15  ;;  %7650 = vmatpush.bf16.msrb.mxu0 %v7580_v5  ;;  %v7729_v36 = vpack.c.b16 %v7721_v55, %v7721_v55  ;;  %v7889_v55 = vunpack.c.h.b16 %v7874_v7 }
 0x80d   :  { %10698 = vmatmul.msk.bf16.vlgmr.msrb.gmra.mxu3 %vm2700_vm14, %v7375_v15  ;;  %7663 = vmatpush.bf16.msrb.mxu1 %v7583_v27  ;;  %v7731_v32 = vpack.c.b16 %v7723_v28, %v7723_v28  ;;  %v7754_v27 = vsel %vm2704_vm8, %v7730_v54, 0 }
 0x80e   :  { %7676 = vmatpush.bf16.msrb.mxu2 %v7586_v18  ;;  %7689 = vmatpush.bf16.msrb.mxu3 %v7589_v3  ;;  %v7751_v5 = vsel %vm2704_vm8, %v7729_v36, 0 }
 0x80f   :  { %v6839_v61 = vpop.f32.mrf.mxu2  ;;  %v7757_v18 = vsel %vm2704_vm8, %v7731_v32, 0 }
 0x810   :  { %v14530_v22 = vadd.f32 %v6839_v61, %v14488_v26  ;;  %v6852_v52 = vpop.f32.mrf.mxu3  ;;  %v6815_v39 = vpop.f32.mrf.mxu0  ;;  %v7543_v26 = vpack.c.b16 %v13399_v31, %v13399_v31  ;;  %v7726_v31 = vpack.c.b16 %v7718_v49, %v7718_v49 }
 0x811   :  { %v14533_v23 = vadd.f32 %v6852_v52, %v14491_v4  ;;  %v6828_v57 = vpop.f32.mrf.mxu1  ;;  %v7716_v4 = vunpack.c.l.b16 %v7704_v38 }
 0x812   :  { %v7742_v30 = vsel %vm2704_vm8, %v7726_v31, 0 }
 0x817   :  { %v6841_v35 = vpop.f32.mrf.mxu2 }
 0x818   :  { %v6854_v40 = vpop.f32.mrf.mxu3  ;;  %v6928_v15 = vpop.f32.mrf.mxu0 }
 0x819   :  { %v14536_v53 = vadd.f32 %v6928_v15, %v14494_v14  ;;  %v6941_v56 = vpop.f32.mrf.mxu1  ;;  %v7724_v14 = vpack.c.b16 %v7716_v4, %v7716_v4  ;;  %v7872_v4 = vld [vmem:[#allocation11 + $0x3e0] sm:$0xff] }
 0x81a   :  { %v14541_v43 = vadd.f32 %v6941_v56, %v14499_v1  ;;  %v7885_v49 = vunpack.c.h.b16 %v7872_v4 }
 0x81b   :  { %10699 = vmatmul.msk.bf16.vlgmr.msra.gmra.mxu0 %vm2700_vm14, %v7543_v26  ;;  %10700 = vmatmul.msk.bf16.vlgmr.msra.gmra.mxu1 %vm2700_vm14, %v7543_v26  ;;  %v7736_v45 = vsel %vm2704_vm8, %v7724_v14, 0  ;;  %v7887_v14 = vunpack.c.h.b16 %v7873_v44  ;;  %v8042_v44 = vld [vmem:[#allocation11 + $0x400] sm:$0xff] }
 0x81c   :  { %10701 = vmatmul.msk.bf16.vlgmr.msra.gmra.mxu2 %vm2700_vm14, %v7543_v26  ;;  %7766 = vmatpush.bf16.msra.mxu0 %v7736_v45  ;;  %v7893_v59 = vpack.c.b16 %v7885_v49, %v7885_v49  ;;  %v8058_v49 = vunpack.c.h.b16 %v8042_v44 }
 0x81d   :  { %10702 = vmatmul.msk.bf16.vlgmr.msra.gmra.mxu3 %vm2700_vm14, %v7543_v26  ;;  %7779 = vmatpush.bf16.msra.mxu1 %v7739_v48  ;;  %v7895_v31 = vpack.c.b16 %v7887_v14, %v7887_v14 }
 0x81e   :  { %7792 = vmatpush.bf16.msra.mxu2 %v7742_v30  ;;  %7805 = vmatpush.bf16.msra.mxu3 %v7745_v10 }
 0x81f   :  { %v6954_v1 = vpop.f32.mrf.mxu2  ;;  %v7913_v48 = vsel %vm2704_vm8, %v7895_v31, 0 }
 0x820   :  { %v14552_v24 = vadd.f32 %v6954_v1, %v14510_v16  ;;  %v6967_v20 = vpop.f32.mrf.mxu3  ;;  %v6930_v47 = vpop.f32.mrf.mxu0  ;;  %v7907_v1 = vsel %vm2704_vm8, %v7893_v59, 0 }
 0x821   :  { %v14555_v51 = vadd.f32 %v6967_v20, %v14513_v50  ;;  %v6943_v60 = vpop.f32.mrf.mxu1  ;;  %v7720_v50 = vunpack.c.l.b16 %v7706_v25 }
 0x827   :  { %v6956_v41 = vpop.f32.mrf.mxu2 }
 0x828   :  { %v6969_v46 = vpop.f32.mrf.mxu3  ;;  %v6980_v11 = vpop.f32.mrf.mxu0 }
 0x829   :  { %v14558_v29 = vadd.f32 %v6980_v11, %v14516_v21  ;;  %v6993_v63 = vpop.f32.mrf.mxu1  ;;  %v7728_v21 = vpack.c.b16 %v7720_v50, %v7720_v50  ;;  %v7875_v50 = vld [vmem:[#allocation11 + $0x3f8] sm:$0xff] }
 0x82a   :  { %v14561_v16 = vadd.f32 %v6993_v63, %v14519_v37  ;;  %v7890_v12 = vunpack.c.l.b16 %v7875_v50  ;;  %v7891_v28 = vunpack.c.h.b16 %v7875_v50  ;;  %v8045_v50 = vld [vmem:[#allocation11 + $0x418] sm:$0xff] }
 0x82b   :  { %10703 = vmatmul.msk.bf16.vlgmr.msrb.gmra.mxu0 %vm2700_vm14, %v7543_v26  ;;  %10704 = vmatmul.msk.bf16.vlgmr.msrb.gmra.mxu1 %vm2700_vm14, %v7543_v26  ;;  %v7748_v61 = vsel %vm2704_vm8, %v7728_v21, 0  ;;  %v7897_v21 = vpack.c.b16 %v7889_v55, %v7889_v55  ;;  %v8063_v55 = vunpack.c.l.b16 %v8045_v50 }
 0x82c   :  { %10705 = vmatmul.msk.bf16.vlgmr.msrb.gmra.mxu2 %vm2700_vm14, %v7543_v26  ;;  %7818 = vmatpush.bf16.msrb.mxu0 %v7748_v61  ;;  %v7898_v36 = vpack.c.b16 %v7890_v12, %v7890_v12  ;;  %v7899_v54 = vpack.c.b16 %v7891_v28, %v7891_v28  ;;  %v8064_v12 = vunpack.c.h.b16 %v8045_v50 }
 0x82d   :  { %10706 = vmatmul.msk.bf16.vlgmr.msrb.gmra.mxu3 %vm2700_vm14, %v7543_v26  ;;  %7831 = vmatpush.bf16.msrb.mxu1 %v7751_v5 }
 0x82e   :  { %7844 = vmatpush.bf16.msrb.mxu2 %v7754_v27  ;;  %7857 = vmatpush.bf16.msrb.mxu3 %v7757_v18  ;;  %v7922_v61 = vsel %vm2704_vm8, %v7898_v36, 0  ;;  %v7925_v5 = vsel %vm2704_vm8, %v7899_v54, 0 }
 0x82f   :  { %v7006_v37 = vpop.f32.mrf.mxu2 }
 0x830   :  { %v14572_v3 = vadd.f32 %v7006_v37, %v14530_v22  ;;  %v7019_v52 = vpop.f32.mrf.mxu3  ;;  %v6982_v39 = vpop.f32.mrf.mxu0  ;;  %v7711_v22 = vpack.c.b16 %v13408_v62, %v13408_v62  ;;  %v7894_v62 = vpack.c.b16 %v7886_v13, %v7886_v13  ;;  %v7919_v37 = vsel %vm2704_vm8, %v7897_v21, 0 }
 0x831   :  { %v14575_v57 = vadd.f32 %v7019_v52, %v14533_v23  ;;  %v6995_v35 = vpop.f32.mrf.mxu1  ;;  %v7884_v23 = vunpack.c.l.b16 %v7872_v4  ;;  %v8072_v21 = vpack.c.b16 %v8064_v12, %v8064_v12 }
 0x832   :  { %v7910_v45 = vsel %vm2704_vm8, %v7894_v62, 0 }
 0x837   :  { %v7008_v40 = vpop.f32.mrf.mxu2 }
 0x838   :  { %v7021_v15 = vpop.f32.mrf.mxu3  ;;  %v7096_v56 = vpop.f32.mrf.mxu0 }
 0x839   :  { %v14578_v26 = vadd.f32 %v7096_v56, %v14536_v53  ;;  %v7109_v38 = vpop.f32.mrf.mxu1  ;;  %v7892_v53 = vpack.c.b16 %v7884_v23, %v7884_v23  ;;  %v8043_v23 = vld [vmem:[#allocation11 + $0x408] sm:$0xff] }
 0x83a   :  { %v14583_v2 = vadd.f32 %v7109_v38, %v14541_v43  ;;  %v8059_v13 = vunpack.c.l.b16 %v8043_v23  ;;  %v8060_v14 = vunpack.c.h.b16 %v8043_v23  ;;  %v8214_v23 = vld [vmem:[#allocation11 + $0x428] sm:$0xff] }
 0x83b   :  { %10707 = vmatmul.msk.bf16.vlgmr.msra.gmra.mxu0 %vm2700_vm14, %v7711_v22  ;;  %10708 = vmatmul.msk.bf16.vlgmr.msra.gmra.mxu1 %vm2700_vm14, %v7711_v22  ;;  %v7904_v42 = vsel %vm2704_vm8, %v7892_v53, 0  ;;  %v8066_v53 = vpack.c.b16 %v8058_v49, %v8058_v49  ;;  %v8226_v49 = vunpack.c.l.b16 %v8214_v23 }
 0x83c   :  { %10709 = vmatmul.msk.bf16.vlgmr.msra.gmra.mxu2 %vm2700_vm14, %v7711_v22  ;;  %7934 = vmatpush.bf16.msra.mxu0 %v7904_v42  ;;  %v8068_v59 = vpack.c.b16 %v8060_v14, %v8060_v14 }
 0x83d   :  { %10710 = vmatmul.msk.bf16.vlgmr.msra.gmra.mxu3 %vm2700_vm14, %v7711_v22  ;;  %7947 = vmatpush.bf16.msra.mxu1 %v7907_v1  ;;  %v8080_v31 = vsel %vm2704_vm8, %v8066_v53, 0 }
 0x83e   :  { %7960 = vmatpush.bf16.msra.mxu2 %v7910_v45  ;;  %7973 = vmatpush.bf16.msra.mxu3 %v7913_v48  ;;  %v8086_v42 = vsel %vm2704_vm8, %v8068_v59, 0 }
 0x83f   :  { %v7122_v43 = vpop.f32.mrf.mxu2 }
 0x840   :  { %v14594_v30 = vadd.f32 %v7122_v43, %v14552_v24  ;;  %v7135_v10 = vpop.f32.mrf.mxu3  ;;  %v7098_v20 = vpop.f32.mrf.mxu0 }
 0x841   :  { %v14597_v47 = vadd.f32 %v7135_v10, %v14555_v51  ;;  %v7111_v60 = vpop.f32.mrf.mxu1  ;;  %v7888_v51 = vunpack.c.l.b16 %v7874_v7  ;;  %v8044_v7 = vld [vmem:[#allocation11 + $0x410] sm:$0xff] }
 0x847   :  { %v7124_v41 = vpop.f32.mrf.mxu2 }
 0x848   :  { %v7137_v46 = vpop.f32.mrf.mxu3  ;;  %v7148_v11 = vpop.f32.mrf.mxu0 }
 0x849   :  { %v14600_v63 = vadd.f32 %v7148_v11, %v14558_v29  ;;  %v7161_v25 = vpop.f32.mrf.mxu1  ;;  %v7896_v29 = vpack.c.b16 %v7888_v51, %v7888_v51  ;;  %v8062_v51 = vunpack.c.h.b16 %v8044_v7 }
 0x84a   :  { %v14603_v24 = vadd.f32 %v7161_v25, %v14561_v16 }
 0x84b   :  { %10711 = vmatmul.msk.bf16.vlgmr.msrb.gmra.mxu0 %vm2700_vm14, %v7711_v22  ;;  %10712 = vmatmul.msk.bf16.vlgmr.msrb.gmra.mxu1 %vm2700_vm14, %v7711_v22  ;;  %v7916_v32 = vsel %vm2704_vm8, %v7896_v29, 0  ;;  %v8070_v28 = vpack.c.b16 %v8062_v51, %v8062_v51  ;;  %v8071_v29 = vpack.c.b16 %v8063_v55, %v8063_v55 }
 0x84c   :  { %10713 = vmatmul.msk.bf16.vlgmr.msrb.gmra.mxu2 %vm2700_vm14, %v7711_v22  ;;  %7986 = vmatpush.bf16.msrb.mxu0 %v7916_v32  ;;  %v8098_v32 = vsel %vm2704_vm8, %v8072_v21, 0 }
 0x84d   :  { %10714 = vmatmul.msk.bf16.vlgmr.msrb.gmra.mxu3 %vm2700_vm14, %v7711_v22  ;;  %7999 = vmatpush.bf16.msrb.mxu1 %v7919_v37  ;;  %v8092_v54 = vsel %vm2704_vm8, %v8070_v28, 0 }
 0x84e   :  { %8012 = vmatpush.bf16.msrb.mxu2 %v7922_v61  ;;  %8025 = vmatpush.bf16.msrb.mxu3 %v7925_v5 }
 0x84f   :  { %v7174_v16 = vpop.f32.mrf.mxu2 }
 0x850   :  { %v14614_v27 = vadd.f32 %v7174_v16, %v14572_v3  ;;  %v7187_v18 = vpop.f32.mrf.mxu3  ;;  %v7150_v52 = vpop.f32.mrf.mxu0  ;;  %v7879_v3 = vpack.c.b16 %v13411_v19, %v13411_v19  ;;  %v8067_v19 = vpack.c.b16 %v8059_v13, %v8059_v13  ;;  %v8095_v16 = vsel %vm2704_vm8, %v8071_v29, 0 }
 0x851   :  { %v14617_v39 = vadd.f32 %v7187_v18, %v14575_v57  ;;  %v7163_v35 = vpop.f32.mrf.mxu1  ;;  %v8057_v57 = vunpack.c.l.b16 %v8042_v44  ;;  %v8213_v44 = vld [vmem:[#allocation11 + $0x420] sm:$0xff]  ;;  %v8227_v13 = vunpack.c.h.b16 %v8214_v23 }
 0x852   :  { %v8083_v43 = vsel %vm2704_vm8, %v8067_v19, 0 }
 0x857   :  { %v7176_v40 = vpop.f32.mrf.mxu2 }
 0x858   :  { %v7189_v15 = vpop.f32.mrf.mxu3  ;;  %v7264_v56 = vpop.f32.mrf.mxu0 }
 0x859   :  { %v14620_v38 = vadd.f32 %v7264_v56, %v14578_v26  ;;  %v7277_v22 = vpop.f32.mrf.mxu1  ;;  %v8065_v26 = vpack.c.b16 %v8057_v57, %v8057_v57  ;;  %v8225_v57 = vunpack.c.h.b16 %v8213_v44 }
 0x85a   :  { %v14625_v4 = vadd.f32 %v7277_v22, %v14583_v2 }
 0x85b   :  { %10715 = vmatmul.msk.bf16.vlgmr.msra.gmra.mxu0 %vm2700_vm14, %v7879_v3  ;;  %10716 = vmatmul.msk.bf16.vlgmr.msra.gmra.mxu1 %vm2700_vm14, %v7879_v3  ;;  %v8077_v62 = vsel %vm2704_vm8, %v8065_v26, 0  ;;  %v8233_v14 = vpack.c.b16 %v8225_v57, %v8225_v57  ;;  %v8235_v26 = vpack.c.b16 %v8227_v13, %v8227_v13 }
 0x85c   :  { %10717 = vmatmul.msk.bf16.vlgmr.msra.gmra.mxu2 %vm2700_vm14, %v7879_v3  ;;  %8107 = vmatpush.bf16.msra.mxu0 %v8077_v62 }
 0x85d   :  { %10718 = vmatmul.msk.bf16.vlgmr.msra.gmra.mxu3 %vm2700_vm14, %v7879_v3  ;;  %8120 = vmatpush.bf16.msra.mxu1 %v8080_v31  ;;  %v8247_v19 = vsel %vm2704_vm8, %v8233_v14, 0 }
 0x85e   :  { %8133 = vmatpush.bf16.msra.mxu2 %v8083_v43  ;;  %8146 = vmatpush.bf16.msra.mxu3 %v8086_v42 }
 0x85f   :  { %v7290_v2 = vpop.f32.mrf.mxu2 }
 0x860   :  { %v14636_v1 = vadd.f32 %v7290_v2, %v14594_v30  ;;  %v7303_v45 = vpop.f32.mrf.mxu3  ;;  %v7266_v48 = vpop.f32.mrf.mxu0  ;;  %v8253_v2 = vsel %vm2704_vm8, %v8235_v26, 0 }
 0x861   :  { %v14639_v10 = vadd.f32 %v7303_v45, %v14597_v47  ;;  %v7279_v20 = vpop.f32.mrf.mxu1  ;;  %v8061_v47 = vunpack.c.l.b16 %v8044_v7  ;;  %v8216_v7 = vld [vmem:[#allocation11 + $0x438] sm:$0xff] }
 0x862   :  { %v8231_v51 = vunpack.c.h.b16 %v8216_v7 }
 0x867   :  { %v7292_v60 = vpop.f32.mrf.mxu2 }
 0x868   :  { %v7305_v41 = vpop.f32.mrf.mxu3  ;;  %v7316_v46 = vpop.f32.mrf.mxu0 }
 0x869   :  { %v14642_v11 = vadd.f32 %v7316_v46, %v14600_v63  ;;  %v7329_v25 = vpop.f32.mrf.mxu1  ;;  %v8069_v63 = vpack.c.b16 %v8061_v47, %v8061_v47  ;;  %v8230_v47 = vunpack.c.l.b16 %v8216_v7 }
 0x86a   :  { %v14645_v30 = vadd.f32 %v7329_v25, %v14603_v24  ;;  %v8215_v25 = vld [vmem:[#allocation11 + $0x430] sm:$0xff] }
 0x86b   :  { %10719 = vmatmul.msk.bf16.vlgmr.msrb.gmra.mxu0 %vm2700_vm14, %v7879_v3  ;;  %10720 = vmatmul.msk.bf16.vlgmr.msrb.gmra.mxu1 %vm2700_vm14, %v7879_v3  ;;  %v8089_v36 = vsel %vm2704_vm8, %v8069_v63, 0  ;;  %v8229_v50 = vunpack.c.h.b16 %v8215_v25  ;;  %v8238_v12 = vpack.c.b16 %v8230_v47, %v8230_v47  ;;  %v8239_v63 = vpack.c.b16 %v8231_v51, %v8231_v51 }
 0x86c   :  { %10721 = vmatmul.msk.bf16.vlgmr.msrb.gmra.mxu2 %vm2700_vm14, %v7879_v3  ;;  %8159 = vmatpush.bf16.msrb.mxu0 %v8089_v36 }
 0x86d   :  { %10722 = vmatmul.msk.bf16.vlgmr.msrb.gmra.mxu3 %vm2700_vm14, %v7879_v3  ;;  %8172 = vmatpush.bf16.msrb.mxu1 %v8092_v54  ;;  %v8237_v55 = vpack.c.b16 %v8229_v50, %v8229_v50  ;;  %v8262_v21 = vsel %vm2704_vm8, %v8238_v12, 0 }
 0x86e   :  { %8185 = vmatpush.bf16.msrb.mxu2 %v8095_v16  ;;  %8198 = vmatpush.bf16.msrb.mxu3 %v8098_v32 }
 0x86f   :  { %v7342_v24 = vpop.f32.mrf.mxu2  ;;  %v8259_v29 = vsel %vm2704_vm8, %v8237_v55, 0 }
 0x870   :  { %v14656_v37 = vadd.f32 %v7342_v24, %v14614_v27  ;;  %v7355_v61 = vpop.f32.mrf.mxu3  ;;  %v7318_v5 = vpop.f32.mrf.mxu0  ;;  %v8052_v27 = vpack.c.b16 %v13423_v8, %v13423_v8  ;;  %v8234_v8 = vpack.c.b16 %v8226_v49, %v8226_v49  ;;  %v8265_v24 = vsel %vm2704_vm8, %v8239_v63, 0 }
 0x871   :  { %v14659_v18 = vadd.f32 %v7355_v61, %v14617_v39  ;;  %v7331_v52 = vpop.f32.mrf.mxu1  ;;  %v8224_v39 = vunpack.c.l.b16 %v8213_v44  ;;  %v8381_v44 = vld [vmem:[#allocation11 + $0x448] sm:$0xff] }
 0x872   :  { %v8250_v59 = vsel %vm2704_vm8, %v8234_v8, 0  ;;  %v8395_v57 = vunpack.c.h.b16 %v8381_v44 }
 0x874   :  { %v8403_v13 = vpack.c.b16 %v8395_v57, %v8395_v57 }
 0x876   :  { %v8421_v26 = vsel %vm2704_vm8, %v8403_v13, 0 }
 0x877   :  { %v7344_v35 = vpop.f32.mrf.mxu2 }
 0x878   :  { %v7357_v40 = vpop.f32.mrf.mxu3  ;;  %v7432_v15 = vpop.f32.mrf.mxu0 }
 0x879   :  { %v14662_v56 = vadd.f32 %v7432_v15, %v14620_v38  ;;  %v7445_v22 = vpop.f32.mrf.mxu1  ;;  %v8232_v38 = vpack.c.b16 %v8224_v39, %v8224_v39  ;;  %v8394_v39 = vunpack.c.l.b16 %v8381_v44 }
 0x87a   :  { %v14667_v3 = vadd.f32 %v7445_v22, %v14625_v4 }
 0x87b   :  { %10723 = vmatmul.msk.bf16.vlgmr.msra.gmra.mxu0 %vm2700_vm14, %v8052_v27  ;;  %10724 = vmatmul.msk.bf16.vlgmr.msra.gmra.mxu1 %vm2700_vm14, %v8052_v27  ;;  %v8244_v53 = vsel %vm2704_vm8, %v8232_v38, 0 }
 0x87c   :  { %10725 = vmatmul.msk.bf16.vlgmr.msra.gmra.mxu2 %vm2700_vm14, %v8052_v27  ;;  %8274 = vmatpush.bf16.msra.mxu0 %v8244_v53 }
 0x87d   :  { %10726 = vmatmul.msk.bf16.vlgmr.msra.gmra.mxu3 %vm2700_vm14, %v8052_v27  ;;  %8287 = vmatpush.bf16.msra.mxu1 %v8247_v19 }
 0x87e   :  { %8300 = vmatpush.bf16.msra.mxu2 %v8250_v59  ;;  %8313 = vmatpush.bf16.msra.mxu3 %v8253_v2 }
 0x87f   :  { %v7458_v4 = vpop.f32.mrf.mxu2 }
 0x880   :  { %v14678_v62 = vadd.f32 %v7458_v4, %v14636_v1  ;;  %v7471_v31 = vpop.f32.mrf.mxu3  ;;  %v7434_v43 = vpop.f32.mrf.mxu0 }
 0x881   :  { %v14681_v42 = vadd.f32 %v7471_v31, %v14639_v10  ;;  %v7447_v45 = vpop.f32.mrf.mxu1  ;;  %v8228_v10 = vunpack.c.l.b16 %v8215_v25 }
 0x887   :  { %v7460_v48 = vpop.f32.mrf.mxu2 }
 0x888   :  { %v7473_v20 = vpop.f32.mrf.mxu3  ;;  %v7484_v60 = vpop.f32.mrf.mxu0 }
 0x889   :  { %v14684_v41 = vadd.f32 %v7484_v60, %v14642_v11  ;;  %v7497_v46 = vpop.f32.mrf.mxu1  ;;  %v8236_v11 = vpack.c.b16 %v8228_v10, %v8228_v10  ;;  %v8382_v60 = vld [vmem:[#allocation11 + $0x450] sm:$0xff] }
 0x88a   :  { %v14687_v1 = vadd.f32 %v7497_v46, %v14645_v30  ;;  %v8383_v46 = vld [vmem:[#allocation11 + $0x458] sm:$0xff]  ;;  %v8397_v25 = vunpack.c.h.b16 %v8382_v60 }
 0x88b   :  { %10727 = vmatmul.msk.bf16.vlgmr.msrb.gmra.mxu0 %vm2700_vm14, %v8052_v27  ;;  %10728 = vmatmul.msk.bf16.vlgmr.msrb.gmra.mxu1 %vm2700_vm14, %v8052_v27  ;;  %v8256_v28 = vsel %vm2704_vm8, %v8236_v11, 0  ;;  %v8398_v7 = vunpack.c.l.b16 %v8383_v46  ;;  %v8399_v10 = vunpack.c.h.b16 %v8383_v46 }
 0x88c   :  { %10729 = vmatmul.msk.bf16.vlgmr.msrb.gmra.mxu2 %vm2700_vm14, %v8052_v27  ;;  %8326 = vmatpush.bf16.msrb.mxu0 %v8256_v28  ;;  %v8405_v50 = vpack.c.b16 %v8397_v25, %v8397_v25 }
 0x88d   :  { %10730 = vmatmul.msk.bf16.vlgmr.msrb.gmra.mxu3 %vm2700_vm14, %v8052_v27  ;;  %8339 = vmatpush.bf16.msrb.mxu1 %v8259_v29  ;;  %v8380_v27 = vld [vmem:[#allocation11 + $0x440] sm:$0xff]  ;;  %v8406_v47 = vpack.c.b16 %v8398_v7, %v8398_v7  ;;  %v8407_v51 = vpack.c.b16 %v8399_v10, %v8399_v10 }
 0x88e   :  { %8352 = vmatpush.bf16.msrb.mxu2 %v8262_v21  ;;  %8365 = vmatpush.bf16.msrb.mxu3 %v8265_v24  ;;  %v8393_v23 = vunpack.c.h.b16 %v8380_v27  ;;  %v8427_v55 = vsel %vm2704_vm8, %v8405_v50, 0 }
 0x88f   :  { %v7510_v30 = vpop.f32.mrf.mxu2  ;;  %v8430_v12 = vsel %vm2704_vm8, %v8406_v47, 0  ;;  %v8433_v63 = vsel %vm2704_vm8, %v8407_v51, 0 }
 0x890   :  { %v14698_v36 = vadd.f32 %v7510_v30, %v14656_v37  ;;  %v7523_v54 = vpop.f32.mrf.mxu3  ;;  %v7486_v16 = vpop.f32.mrf.mxu0  ;;  %v8219_v37 = vpack.c.b16 %v13430_v34, %v13430_v34  ;;  %v8401_v49 = vpack.c.b16 %v8393_v23, %v8393_v23  ;;  %v8402_v34 = vpack.c.b16 %v8394_v39, %v8394_v39 }
 0x891   :  { %v14701_v32 = vadd.f32 %v7523_v54, %v14659_v18  ;;  %v7499_v61 = vpop.f32.mrf.mxu1  ;;  %v8392_v18 = vunpack.c.l.b16 %v8380_v27 }
 0x892   :  { %v8415_v14 = vsel %vm2704_vm8, %v8401_v49, 0  ;;  %v8418_v8 = vsel %vm2704_vm8, %v8402_v34, 0 }
 0x897   :  { %v7512_v5 = vpop.f32.mrf.mxu2 }
 0x898   :  { %v7525_v52 = vpop.f32.mrf.mxu3  ;;  %v7600_v35 = vpop.f32.mrf.mxu0 }
 0x899   :  { %v14704_v40 = vadd.f32 %v7600_v35, %v14662_v56  ;;  %v7613_v15 = vpop.f32.mrf.mxu1  ;;  %v8400_v56 = vpack.c.b16 %v8392_v18, %v8392_v18 }
 0x89a   :  { %v14709_v22 = vadd.f32 %v7613_v15, %v14667_v3  ;;  %v8548_v15 = vld [vmem:[#allocation11 + $0x460] sm:$0xff] }
 0x89b   :  { %10731 = vmatmul.msk.bf16.vlgmr.msra.gmra.mxu0 %vm2700_vm14, %v8219_v37  ;;  %10732 = vmatmul.msk.bf16.vlgmr.msra.gmra.mxu1 %vm2700_vm14, %v8219_v37  ;;  %v8412_v38 = vsel %vm2704_vm8, %v8400_v56, 0  ;;  %v8561_v27 = vunpack.c.h.b16 %v8548_v15 }
 0x89c   :  { %10733 = vmatmul.msk.bf16.vlgmr.msra.gmra.mxu2 %vm2700_vm14, %v8219_v37  ;;  %8442 = vmatpush.bf16.msra.mxu0 %v8412_v38 }
 0x89d   :  { %10734 = vmatmul.msk.bf16.vlgmr.msra.gmra.mxu3 %vm2700_vm14, %v8219_v37  ;;  %8455 = vmatpush.bf16.msra.mxu1 %v8415_v14  ;;  %v8569_v23 = vpack.c.b16 %v8561_v27, %v8561_v27 }
 0x89e   :  { %8468 = vmatpush.bf16.msra.mxu2 %v8418_v8  ;;  %8481 = vmatpush.bf16.msra.mxu3 %v8421_v26 }
 0x89f   :  { %v7626_v3 = vpop.f32.mrf.mxu2  ;;  %v8583_v56 = vsel %vm2704_vm8, %v8569_v23, 0 }
 0x8a0   :  { %v14720_v4 = vadd.f32 %v7626_v3, %v14678_v62  ;;  %v7639_v53 = vpop.f32.mrf.mxu3  ;;  %v7602_v19 = vpop.f32.mrf.mxu0 }
 0x8a1   :  { %v14723_v59 = vadd.f32 %v7639_v53, %v14681_v42  ;;  %v7615_v2 = vpop.f32.mrf.mxu1  ;;  %v8396_v42 = vunpack.c.l.b16 %v8382_v60 }
 0x8a7   :  { %v7628_v31 = vpop.f32.mrf.mxu2 }
 0x8a8   :  { %v7641_v43 = vpop.f32.mrf.mxu3  ;;  %v7652_v45 = vpop.f32.mrf.mxu0 }
 0x8a9   :  { %v14726_v48 = vadd.f32 %v7652_v45, %v14684_v41  ;;  %v7665_v20 = vpop.f32.mrf.mxu1  ;;  %v8404_v41 = vpack.c.b16 %v8396_v42, %v8396_v42  ;;  %v8550_v43 = vld [vmem:[#allocation11 + $0x470] sm:$0xff]  ;;  %v8551_v45 = vld [vmem:[#allocation11 + $0x478] sm:$0xff] }
 0x8aa   :  { %v14729_v62 = vadd.f32 %v7665_v20, %v14687_v1  ;;  %v8565_v20 = vunpack.c.h.b16 %v8550_v43  ;;  %v8566_v60 = vunpack.c.l.b16 %v8551_v45  ;;  %v8567_v46 = vunpack.c.h.b16 %v8551_v45 }
 0x8ab   :  { %10735 = vmatmul.msk.bf16.vlgmr.msrb.gmra.mxu0 %vm2700_vm14, %v8219_v37  ;;  %10736 = vmatmul.msk.bf16.vlgmr.msrb.gmra.mxu1 %vm2700_vm14, %v8219_v37  ;;  %v8424_v11 = vsel %vm2704_vm8, %v8404_v41, 0 }
 0x8ac   :  { %10737 = vmatmul.msk.bf16.vlgmr.msrb.gmra.mxu2 %vm2700_vm14, %v8219_v37  ;;  %8494 = vmatpush.bf16.msrb.mxu0 %v8424_v11  ;;  %v8573_v42 = vpack.c.b16 %v8565_v20, %v8565_v20  ;;  %v8574_v25 = vpack.c.b16 %v8566_v60, %v8566_v60  ;;  %v8575_v7 = vpack.c.b16 %v8567_v46, %v8567_v46 }
 0x8ad   :  { %10738 = vmatmul.msk.bf16.vlgmr.msrb.gmra.mxu3 %vm2700_vm14, %v8219_v37  ;;  %8507 = vmatpush.bf16.msrb.mxu1 %v8427_v55  ;;  %v8549_v37 = vld [vmem:[#allocation11 + $0x468] sm:$0xff] }
 0x8ae   :  { %8520 = vmatpush.bf16.msrb.mxu2 %v8430_v12  ;;  %8533 = vmatpush.bf16.msrb.mxu3 %v8433_v63  ;;  %v8562_v44 = vunpack.c.l.b16 %v8549_v37  ;;  %v8563_v18 = vunpack.c.h.b16 %v8549_v37  ;;  %v8595_v41 = vsel %vm2704_vm8, %v8573_v42, 0  ;;  %v8598_v50 = vsel %vm2704_vm8, %v8574_v25, 0 }
 0x8af   :  { %v7678_v1 = vpop.f32.mrf.mxu2  ;;  %v8601_v47 = vsel %vm2704_vm8, %v8575_v7, 0 }
 0x8b0   :  { %v14740_v30 = vadd.f32 %v7678_v1, %v14698_v36  ;;  %v7691_v28 = vpop.f32.mrf.mxu3  ;;  %v7654_v29 = vpop.f32.mrf.mxu0  ;;  %v8387_v36 = vpack.c.b16 %v13433_v6, %v13433_v6  ;;  %v8570_v6 = vpack.c.b16 %v8562_v44, %v8562_v44  ;;  %v8571_v39 = vpack.c.b16 %v8563_v18, %v8563_v18 }
 0x8b1   :  { %v14743_v21 = vadd.f32 %v7691_v28, %v14701_v32  ;;  %v7667_v24 = vpop.f32.mrf.mxu1  ;;  %v8560_v32 = vunpack.c.l.b16 %v8548_v15 }
 0x8b2   :  { %v8586_v49 = vsel %vm2704_vm8, %v8570_v6, 0  ;;  %v8589_v34 = vsel %vm2704_vm8, %v8571_v39, 0 }
 0x8b7   :  { %v7680_v54 = vpop.f32.mrf.mxu2 }
 0x8b8   :  { %v7693_v16 = vpop.f32.mrf.mxu3  ;;  %v7768_v61 = vpop.f32.mrf.mxu0 }
 0x8b9   :  { %v14746_v5 = vadd.f32 %v7768_v61, %v14704_v40  ;;  %v7781_v52 = vpop.f32.mrf.mxu1  ;;  %v8568_v40 = vpack.c.b16 %v8560_v32, %v8560_v32  ;;  %v8716_v61 = vld [vmem:[#allocation11 + $0x480] sm:$0xff] }
 0x8ba   :  { %v14751_v35 = vadd.f32 %v7781_v52, %v14709_v22  ;;  %v8717_v52 = vld [vmem:[#allocation11 + $0x488] sm:$0xff] }
 0x8bb   :  { %10739 = vmatmul.msk.bf16.vlgmr.msra.gmra.mxu0 %vm2700_vm14, %v8387_v36  ;;  %10740 = vmatmul.msk.bf16.vlgmr.msra.gmra.mxu1 %vm2700_vm14, %v8387_v36  ;;  %v8580_v57 = vsel %vm2704_vm8, %v8568_v40, 0  ;;  %v8730_v15 = vunpack.c.l.b16 %v8717_v52  ;;  %v8731_v37 = vunpack.c.h.b16 %v8717_v52 }
 0x8bc   :  { %10741 = vmatmul.msk.bf16.vlgmr.msra.gmra.mxu2 %vm2700_vm14, %v8387_v36  ;;  %8610 = vmatpush.bf16.msra.mxu0 %v8580_v57 }
 0x8bd   :  { %10742 = vmatmul.msk.bf16.vlgmr.msra.gmra.mxu3 %vm2700_vm14, %v8387_v36  ;;  %8623 = vmatpush.bf16.msra.mxu1 %v8583_v56  ;;  %v8739_v27 = vpack.c.b16 %v8731_v37, %v8731_v37 }
 0x8be   :  { %8636 = vmatpush.bf16.msra.mxu2 %v8586_v49  ;;  %8649 = vmatpush.bf16.msra.mxu3 %v8589_v34 }
 0x8bf   :  { %v7794_v22 = vpop.f32.mrf.mxu2  ;;  %v8757_v23 = vsel %vm2704_vm8, %v8739_v27, 0 }
 0x8c0   :  { %v14762_v13 = vadd.f32 %v7794_v22, %v14720_v4  ;;  %v7807_v3 = vpop.f32.mrf.mxu3  ;;  %v7770_v38 = vpop.f32.mrf.mxu0 }
 0x8c1   :  { %v14765_v14 = vadd.f32 %v7807_v3, %v14723_v59  ;;  %v7783_v8 = vpop.f32.mrf.mxu1  ;;  %v8564_v59 = vunpack.c.l.b16 %v8550_v43 }
 0x8c7   :  { %v7796_v26 = vpop.f32.mrf.mxu2 }
 0x8c8   :  { %v7809_v53 = vpop.f32.mrf.mxu3  ;;  %v7820_v19 = vpop.f32.mrf.mxu0  ;;  %v8718_v26 = vld [vmem:[#allocation11 + $0x490] sm:$0xff] }
 0x8c9   :  { %v14768_v2 = vadd.f32 %v7820_v19, %v14726_v48  ;;  %v7833_v31 = vpop.f32.mrf.mxu1  ;;  %v8572_v48 = vpack.c.b16 %v8564_v59, %v8564_v59  ;;  %v8719_v53 = vld [vmem:[#allocation11 + $0x498] sm:$0xff]  ;;  %v8733_v19 = vunpack.c.h.b16 %v8718_v26 }
 0x8ca   :  { %v14771_v4 = vadd.f32 %v7833_v31, %v14729_v62  ;;  %v8734_v31 = vunpack.c.l.b16 %v8719_v53  ;;  %v8735_v43 = vunpack.c.h.b16 %v8719_v53 }
 0x8cb   :  { %10743 = vmatmul.msk.bf16.vlgmr.msrb.gmra.mxu0 %vm2700_vm14, %v8387_v36  ;;  %10744 = vmatmul.msk.bf16.vlgmr.msrb.gmra.mxu1 %vm2700_vm14, %v8387_v36  ;;  %v8592_v10 = vsel %vm2704_vm8, %v8572_v48, 0  ;;  %v8741_v45 = vpack.c.b16 %v8733_v19, %v8733_v19 }
 0x8cc   :  { %10745 = vmatmul.msk.bf16.vlgmr.msrb.gmra.mxu2 %vm2700_vm14, %v8387_v36  ;;  %8662 = vmatpush.bf16.msrb.mxu0 %v8592_v10  ;;  %v8742_v59 = vpack.c.b16 %v8734_v31, %v8734_v31  ;;  %v8743_v20 = vpack.c.b16 %v8735_v43, %v8735_v43 }
 0x8cd   :  { %10746 = vmatmul.msk.bf16.vlgmr.msrb.gmra.mxu3 %vm2700_vm14, %v8387_v36  ;;  %8675 = vmatpush.bf16.msrb.mxu1 %v8595_v41  ;;  %v8729_v36 = vunpack.c.h.b16 %v8716_v61  ;;  %v8763_v46 = vsel %vm2704_vm8, %v8741_v45, 0 }
 0x8ce   :  { %8688 = vmatpush.bf16.msrb.mxu2 %v8598_v50  ;;  %8701 = vmatpush.bf16.msrb.mxu3 %v8601_v47  ;;  %v8766_v48 = vsel %vm2704_vm8, %v8742_v59, 0  ;;  %v8769_v42 = vsel %vm2704_vm8, %v8743_v20, 0 }
 0x8cf   :  { %v7846_v62 = vpop.f32.mrf.mxu2  ;;  %v8737_v32 = vpack.c.b16 %v8729_v36, %v8729_v36 }
 0x8d0   :  { %v14782_v51 = vadd.f32 %v7846_v62, %v14740_v30  ;;  %v7859_v1 = vpop.f32.mrf.mxu3  ;;  %v7822_v11 = vpop.f32.mrf.mxu0  ;;  %v8555_v30 = vpack.c.b16 %v13439_v17, %v13439_v17  ;;  %v8738_v17 = vpack.c.b16 %v8730_v15, %v8730_v15 }
 0x8d1   :  { %v14785_v55 = vadd.f32 %v7859_v1, %v14743_v21  ;;  %v7835_v12 = vpop.f32.mrf.mxu1  ;;  %v8728_v21 = vunpack.c.l.b16 %v8716_v61  ;;  %v8751_v18 = vsel %vm2704_vm8, %v8737_v32, 0 }
 0x8d2   :  { %v8754_v40 = vsel %vm2704_vm8, %v8738_v17, 0 }
 0x8d7   :  { %v7848_v63 = vpop.f32.mrf.mxu2 }
 0x8d8   :  { %v7861_v28 = vpop.f32.mrf.mxu3  ;;  %v7936_v29 = vpop.f32.mrf.mxu0 }
 0x8d9   :  { %v14788_v24 = vadd.f32 %v7936_v29, %v14746_v5  ;;  %v7949_v54 = vpop.f32.mrf.mxu1  ;;  %v8736_v5 = vpack.c.b16 %v8728_v21, %v8728_v21  ;;  %v8884_v28 = vld [vmem:[#allocation11 + $0x4a0] sm:$0xff]  ;;  %v8885_v29 = vld [vmem:[#allocation11 + $0x4a8] sm:$0xff] }
 0x8da   :  { %v14793_v16 = vadd.f32 %v7949_v54, %v14751_v35  ;;  %v8897_v54 = vunpack.c.h.b16 %v8884_v28  ;;  %v8899_v61 = vunpack.c.h.b16 %v8885_v29 }
 0x8db   :  { %10747 = vmatmul.msk.bf16.vlgmr.msra.gmra.mxu0 %vm2700_vm14, %v8555_v30  ;;  %10748 = vmatmul.msk.bf16.vlgmr.msra.gmra.mxu1 %vm2700_vm14, %v8555_v30  ;;  %v8748_v44 = vsel %vm2704_vm8, %v8736_v5, 0 }
 0x8dc   :  { %10749 = vmatmul.msk.bf16.vlgmr.msra.gmra.mxu2 %vm2700_vm14, %v8555_v30  ;;  %8778 = vmatpush.bf16.msra.mxu0 %v8748_v44  ;;  %v8905_v52 = vpack.c.b16 %v8897_v54, %v8897_v54  ;;  %v8907_v21 = vpack.c.b16 %v8899_v61, %v8899_v61 }
 0x8dd   :  { %10750 = vmatmul.msk.bf16.vlgmr.msra.gmra.mxu3 %vm2700_vm14, %v8555_v30  ;;  %8791 = vmatpush.bf16.msra.mxu1 %v8751_v18 }
 0x8de   :  { %8804 = vmatpush.bf16.msra.mxu2 %v8754_v40  ;;  %8817 = vmatpush.bf16.msra.mxu3 %v8757_v23  ;;  %v8919_v15 = vsel %vm2704_vm8, %v8905_v52, 0  ;;  %v8925_v5 = vsel %vm2704_vm8, %v8907_v21, 0 }
 0x8df   :  { %v7962_v35 = vpop.f32.mrf.mxu2 }
 0x8e0   :  { %v14804_v6 = vadd.f32 %v7962_v35, %v14762_v13  ;;  %v7975_v39 = vpop.f32.mrf.mxu3  ;;  %v7938_v22 = vpop.f32.mrf.mxu0 }
 0x8e1   :  { %v14807_v57 = vadd.f32 %v7975_v39, %v14765_v14  ;;  %v7951_v56 = vpop.f32.mrf.mxu1  ;;  %v8732_v14 = vunpack.c.l.b16 %v8718_v26 }
 0x8e2   :  { %v8886_v56 = vld [vmem:[#allocation11 + $0x4b0] sm:$0xff] }
 0x8e7   :  { %v7964_v49 = vpop.f32.mrf.mxu2 }
 0x8e8   :  { %v7977_v34 = vpop.f32.mrf.mxu3  ;;  %v7988_v3 = vpop.f32.mrf.mxu0  ;;  %v8887_v49 = vld [vmem:[#allocation11 + $0x4b8] sm:$0xff] }
 0x8e9   :  { %v14810_v38 = vadd.f32 %v7988_v3, %v14768_v2  ;;  %v8001_v8 = vpop.f32.mrf.mxu1  ;;  %v8740_v2 = vpack.c.b16 %v8732_v14, %v8732_v14  ;;  %v8901_v34 = vunpack.c.h.b16 %v8886_v56  ;;  %v8902_v3 = vunpack.c.l.b16 %v8887_v49 }
 0x8ea   :  { %v14813_v13 = vadd.f32 %v8001_v8, %v14771_v4  ;;  %v8903_v8 = vunpack.c.h.b16 %v8887_v49 }
 0x8eb   :  { %10751 = vmatmul.msk.bf16.vlgmr.msrb.gmra.mxu0 %vm2700_vm14, %v8555_v30  ;;  %10752 = vmatmul.msk.bf16.vlgmr.msrb.gmra.mxu1 %vm2700_vm14, %v8555_v30  ;;  %v8760_v60 = vsel %vm2704_vm8, %v8740_v2, 0  ;;  %v8909_v26 = vpack.c.b16 %v8901_v34, %v8901_v34  ;;  %v8910_v53 = vpack.c.b16 %v8902_v3, %v8902_v3 }
 0x8ec   :  { %10753 = vmatmul.msk.bf16.vlgmr.msrb.gmra.mxu2 %vm2700_vm14, %v8555_v30  ;;  %8830 = vmatpush.bf16.msrb.mxu0 %v8760_v60  ;;  %v8911_v14 = vpack.c.b16 %v8903_v8, %v8903_v8 }
 0x8ed   :  { %10754 = vmatmul.msk.bf16.vlgmr.msrb.gmra.mxu3 %vm2700_vm14, %v8555_v30  ;;  %8843 = vmatpush.bf16.msrb.mxu1 %v8763_v46  ;;  %v8898_v30 = vunpack.c.l.b16 %v8885_v29  ;;  %v8931_v31 = vsel %vm2704_vm8, %v8909_v26, 0  ;;  %v8934_v43 = vsel %vm2704_vm8, %v8910_v53, 0 }
 0x8ee   :  { %8856 = vmatpush.bf16.msrb.mxu2 %v8766_v48  ;;  %8869 = vmatpush.bf16.msrb.mxu3 %v8769_v42  ;;  %v8937_v2 = vsel %vm2704_vm8, %v8911_v14, 0 }
 0x8ef   :  { %v8014_v4 = vpop.f32.mrf.mxu2 }
 0x8f0   :  { %v14824_v25 = vadd.f32 %v8014_v4, %v14782_v51  ;;  %v8027_v7 = vpop.f32.mrf.mxu3  ;;  %v7990_v62 = vpop.f32.mrf.mxu0  ;;  %v8723_v51 = vpack.c.b16 %v13443_v0, %v13443_v0  ;;  %v8906_v0 = vpack.c.b16 %v8898_v30, %v8898_v30 }
 0x8f1   :  { %v14827_v10 = vadd.f32 %v8027_v7, %v14785_v55  ;;  %v8003_v41 = vpop.f32.mrf.mxu1  ;;  %v8896_v55 = vunpack.c.l.b16 %v8884_v28 }
 0x8f2   :  { %v8922_v37 = vsel %vm2704_vm8, %v8906_v0, 0 }
 0x8f7   :  { %v8016_v50 = vpop.f32.mrf.mxu2 }
 0x8f8   :  { %v8029_v47 = vpop.f32.mrf.mxu3  ;;  %v8109_v1 = vpop.f32.mrf.mxu0  ;;  %v9052_v50 = vld [vmem:[#allocation11 + $0x4c0] sm:$0xff] }
 0x8f9   :  { %v14830_v11 = vadd.f32 %v8109_v1, %v14788_v24  ;;  %v8122_v12 = vpop.f32.mrf.mxu1  ;;  %v8904_v24 = vpack.c.b16 %v8896_v55, %v8896_v55  ;;  %v9053_v47 = vld [vmem:[#allocation11 + $0x4c8] sm:$0xff]  ;;  %v9065_v1 = vunpack.c.h.b16 %v9052_v50 }
 0x8fa   :  { %v14835_v63 = vadd.f32 %v8122_v12, %v14793_v16  ;;  %v9066_v12 = vunpack.c.l.b16 %v9053_v47 }
 0x8fb   :  { %10755 = vmatmul.msk.bf16.vlgmr.msra.gmra.mxu0 %vm2700_vm14, %v8723_v51  ;;  %10756 = vmatmul.msk.bf16.vlgmr.msra.gmra.mxu1 %vm2700_vm14, %v8723_v51  ;;  %v8916_v36 = vsel %vm2704_vm8, %v8904_v24, 0  ;;  %v9073_v28 = vpack.c.b16 %v9065_v1, %v9065_v1 }
 0x8fc   :  { %10757 = vmatmul.msk.bf16.vlgmr.msra.gmra.mxu2 %vm2700_vm14, %v8723_v51  ;;  %8946 = vmatpush.bf16.msra.mxu0 %v8916_v36 }
 0x8fd   :  { %10758 = vmatmul.msk.bf16.vlgmr.msra.gmra.mxu3 %vm2700_vm14, %v8723_v51  ;;  %8959 = vmatpush.bf16.msra.mxu1 %v8919_v15  ;;  %v9087_v54 = vsel %vm2704_vm8, %v9073_v28, 0 }
 0x8fe   :  { %8972 = vmatpush.bf16.msra.mxu2 %v8922_v37  ;;  %8985 = vmatpush.bf16.msra.mxu3 %v8925_v5 }
 0x8ff   :  { %v8135_v16 = vpop.f32.mrf.mxu2 }
 0x900   :  { %v14846_v32 = vadd.f32 %v8135_v16, %v14804_v6  ;;  %v8148_v17 = vpop.f32.mrf.mxu3  ;;  %v8111_v27 = vpop.f32.mrf.mxu0 }
 0x901   :  { %v14849_v35 = vadd.f32 %v8148_v17, %v14807_v57  ;;  %v8124_v44 = vpop.f32.mrf.mxu1  ;;  %v8900_v57 = vunpack.c.l.b16 %v8886_v56  ;;  %v9054_v27 = vld [vmem:[#allocation11 + $0x4d0] sm:$0xff] }
 0x902   :  { %v9055_v44 = vld [vmem:[#allocation11 + $0x4d8] sm:$0xff] }
 0x907   :  { %v8137_v18 = vpop.f32.mrf.mxu2 }
 0x908   :  { %v8150_v40 = vpop.f32.mrf.mxu3  ;;  %v8161_v23 = vpop.f32.mrf.mxu0  ;;  %v9069_v18 = vunpack.c.h.b16 %v9054_v27 }
 0x909   :  { %v14852_v39 = vadd.f32 %v8161_v23, %v14810_v38  ;;  %v8174_v22 = vpop.f32.mrf.mxu1  ;;  %v8908_v38 = vpack.c.b16 %v8900_v57, %v8900_v57  ;;  %v9070_v40 = vunpack.c.l.b16 %v9055_v44  ;;  %v9071_v23 = vunpack.c.h.b16 %v9055_v44 }
 0x90a   :  { %v14855_v6 = vadd.f32 %v8174_v22, %v14813_v13  ;;  %v9077_v22 = vpack.c.b16 %v9069_v18, %v9069_v18 }
 0x90b   :  { %10759 = vmatmul.msk.bf16.vlgmr.msrb.gmra.mxu0 %vm2700_vm14, %v8723_v51  ;;  %10760 = vmatmul.msk.bf16.vlgmr.msrb.gmra.mxu1 %vm2700_vm14, %v8723_v51  ;;  %v8928_v19 = vsel %vm2704_vm8, %v8908_v38, 0  ;;  %v9078_v56 = vpack.c.b16 %v9070_v40, %v9070_v40  ;;  %v9079_v49 = vpack.c.b16 %v9071_v23, %v9071_v23 }
 0x90c   :  { %10761 = vmatmul.msk.bf16.vlgmr.msrb.gmra.mxu2 %vm2700_vm14, %v8723_v51  ;;  %8998 = vmatpush.bf16.msrb.mxu0 %v8928_v19  ;;  %v9099_v34 = vsel %vm2704_vm8, %v9077_v22, 0 }
 0x90d   :  { %10762 = vmatmul.msk.bf16.vlgmr.msrb.gmra.mxu3 %vm2700_vm14, %v8723_v51  ;;  %9011 = vmatpush.bf16.msrb.mxu1 %v8931_v31  ;;  %v9067_v51 = vunpack.c.h.b16 %v9053_v47  ;;  %v9102_v3 = vsel %vm2704_vm8, %v9078_v56, 0  ;;  %v9105_v8 = vsel %vm2704_vm8, %v9079_v49, 0 }
 0x90e   :  { %9024 = vmatpush.bf16.msrb.mxu2 %v8934_v43  ;;  %9037 = vmatpush.bf16.msrb.mxu3 %v8937_v2 }
 0x90f   :  { %v8187_v13 = vpop.f32.mrf.mxu2  ;;  %v9075_v29 = vpack.c.b16 %v9067_v51, %v9067_v51 }
 0x910   :  { %v14866_v45 = vadd.f32 %v8187_v13, %v14824_v25  ;;  %v8200_v59 = vpop.f32.mrf.mxu3  ;;  %v8163_v20 = vpop.f32.mrf.mxu0  ;;  %v8891_v25 = vpack.c.b16 %v13448_v33, %v13448_v33  ;;  %v9074_v33 = vpack.c.b16 %v9066_v12, %v9066_v12 }
 0x911   :  { %v14869_v4 = vadd.f32 %v8200_v59, %v14827_v10  ;;  %v8176_v60 = vpop.f32.mrf.mxu1  ;;  %v9064_v10 = vunpack.c.l.b16 %v9052_v50  ;;  %v9093_v61 = vsel %vm2704_vm8, %v9075_v29, 0 }
 0x912   :  { %v9090_v30 = vsel %vm2704_vm8, %v9074_v33, 0  ;;  %v9220_v60 = vld [vmem:[#allocation11 + $0x4e0] sm:$0xff] }
 0x917   :  { %v8189_v46 = vpop.f32.mrf.mxu2 }
 0x918   :  { %v8202_v48 = vpop.f32.mrf.mxu3  ;;  %v8276_v42 = vpop.f32.mrf.mxu0  ;;  %v9221_v46 = vld [vmem:[#allocation11 + $0x4e8] sm:$0xff] }
 0x919   :  { %v14872_v7 = vadd.f32 %v8276_v42, %v14830_v11  ;;  %v8289_v62 = vpop.f32.mrf.mxu1  ;;  %v9072_v11 = vpack.c.b16 %v9064_v10, %v9064_v10  ;;  %v9233_v48 = vunpack.c.h.b16 %v9220_v60  ;;  %v9234_v42 = vunpack.c.l.b16 %v9221_v46 }
 0x91a   :  { %v14877_v41 = vadd.f32 %v8289_v62, %v14835_v63  ;;  %v9235_v62 = vunpack.c.h.b16 %v9221_v46 }
 0x91b   :  { %10763 = vmatmul.msk.bf16.vlgmr.msra.gmra.mxu0 %vm2700_vm14, %v8891_v25  ;;  %10764 = vmatmul.msk.bf16.vlgmr.msra.gmra.mxu1 %vm2700_vm14, %v8891_v25  ;;  %v9084_v55 = vsel %vm2704_vm8, %v9072_v11, 0 }
 0x91c   :  { %10765 = vmatmul.msk.bf16.vlgmr.msra.gmra.mxu2 %vm2700_vm14, %v8891_v25  ;;  %9114 = vmatpush.bf16.msra.mxu0 %v9084_v55  ;;  %v9243_v50 = vpack.c.b16 %v9235_v62, %v9235_v62 }
 0x91d   :  { %10766 = vmatmul.msk.bf16.vlgmr.msra.gmra.mxu3 %vm2700_vm14, %v8891_v25  ;;  %9127 = vmatpush.bf16.msra.mxu1 %v9087_v54 }
 0x91e   :  { %9140 = vmatpush.bf16.msra.mxu2 %v9090_v30  ;;  %9153 = vmatpush.bf16.msra.mxu3 %v9093_v61  ;;  %v9261_v12 = vsel %vm2704_vm8, %v9243_v50, 0 }
 0x91f   :  { %v8302_v63 = vpop.f32.mrf.mxu2 }
 0x920   :  { %v14888_v24 = vadd.f32 %v8302_v63, %v14846_v32  ;;  %v8315_v52 = vpop.f32.mrf.mxu3  ;;  %v8278_v0 = vpop.f32.mrf.mxu0 }
 0x921   :  { %v14891_v21 = vadd.f32 %v8315_v52, %v14849_v35  ;;  %v8291_v16 = vpop.f32.mrf.mxu1  ;;  %v9068_v35 = vunpack.c.l.b16 %v9054_v27  ;;  %v9222_v0 = vld [vmem:[#allocation11 + $0x4f0] sm:$0xff] }
 0x922   :  { %v9223_v16 = vld [vmem:[#allocation11 + $0x4f8] sm:$0xff] }
 0x927   :  { %v8304_v36 = vpop.f32.mrf.mxu2 }
 0x928   :  { %v8317_v15 = vpop.f32.mrf.mxu3  ;;  %v8328_v37 = vpop.f32.mrf.mxu0  ;;  %v9237_v36 = vunpack.c.h.b16 %v9222_v0 }
 0x929   :  { %v14894_v5 = vadd.f32 %v8328_v37, %v14852_v39  ;;  %v8341_v17 = vpop.f32.mrf.mxu1  ;;  %v9076_v39 = vpack.c.b16 %v9068_v35, %v9068_v35  ;;  %v9239_v15 = vunpack.c.h.b16 %v9223_v16 }
 0x92a   :  { %v14897_v32 = vadd.f32 %v8341_v17, %v14855_v6  ;;  %v9245_v17 = vpack.c.b16 %v9237_v36, %v9237_v36 }
 0x92b   :  { %10767 = vmatmul.msk.bf16.vlgmr.msrb.gmra.mxu0 %vm2700_vm14, %v8891_v25  ;;  %10768 = vmatmul.msk.bf16.vlgmr.msrb.gmra.mxu1 %vm2700_vm14, %v8891_v25  ;;  %v9096_v57 = vsel %vm2704_vm8, %v9076_v39, 0  ;;  %v9247_v27 = vpack.c.b16 %v9239_v15, %v9239_v15 }
 0x92c   :  { %10769 = vmatmul.msk.bf16.vlgmr.msrb.gmra.mxu2 %vm2700_vm14, %v8891_v25  ;;  %9166 = vmatpush.bf16.msrb.mxu0 %v9096_v57  ;;  %v9267_v35 = vsel %vm2704_vm8, %v9245_v17, 0 }
 0x92d   :  { %10770 = vmatmul.msk.bf16.vlgmr.msrb.gmra.mxu3 %vm2700_vm14, %v8891_v25  ;;  %9179 = vmatpush.bf16.msrb.mxu1 %v9099_v34  ;;  %v9241_v25 = vpack.c.b16 %v9233_v48, %v9233_v48  ;;  %v9273_v40 = vsel %vm2704_vm8, %v9247_v27, 0 }
 0x92e   :  { %9192 = vmatpush.bf16.msrb.mxu2 %v9102_v3  ;;  %9205 = vmatpush.bf16.msrb.mxu3 %v9105_v8 }
 0x92f   :  { %v8354_v6 = vpop.f32.mrf.mxu2  ;;  %v9255_v10 = vsel %vm2704_vm8, %v9241_v25, 0 }
 0x930   :  { %v14908_v38 = vadd.f32 %v8354_v6, %v14866_v45  ;;  %v8367_v26 = vpop.f32.mrf.mxu3  ;;  %v8330_v53 = vpop.f32.mrf.mxu0  ;;  %v9059_v45 = vpack.c.b16 %v13453_v58, %v13453_v58  ;;  %v9242_v58 = vpack.c.b16 %v9234_v42, %v9234_v42 }
 0x931   :  { %v14911_v14 = vadd.f32 %v8367_v26, %v14869_v4  ;;  %v8343_v13 = vpop.f32.mrf.mxu1  ;;  %v9232_v4 = vunpack.c.l.b16 %v9220_v60  ;;  %v9227_v26 = vpack.c.b16 %v13458_v9, %v13458_v9 }
 0x932   :  { %v9258_v1 = vsel %vm2704_vm8, %v9242_v58, 0 }
 0x937   :  { %v8356_v19 = vpop.f32.mrf.mxu2 }
 0x938   :  { %v8369_v31 = vpop.f32.mrf.mxu3  ;;  %v8444_v43 = vpop.f32.mrf.mxu0 }
 0x939   :  { %v14914_v2 = vadd.f32 %v8444_v43, %v14872_v7  ;;  %v8457_v59 = vpop.f32.mrf.mxu1  ;;  %v9240_v7 = vpack.c.b16 %v9232_v4, %v9232_v4 }
 0x93a   :  { %v14919_v20 = vadd.f32 %v8457_v59, %v14877_v41 }
 0x93b   :  { %10771 = vmatmul.msk.bf16.vlgmr.msra.gmra.mxu0 %vm2700_vm14, %v9059_v45  ;;  %10772 = vmatmul.msk.bf16.vlgmr.msra.gmra.mxu1 %vm2700_vm14, %v9059_v45  ;;  %v9252_v47 = vsel %vm2704_vm8, %v9240_v7, 0 }
 0x93c   :  { %10773 = vmatmul.msk.bf16.vlgmr.msra.gmra.mxu2 %vm2700_vm14, %v9059_v45  ;;  %9282 = vmatpush.bf16.msra.mxu0 %v9252_v47 }
 0x93d   :  { %10774 = vmatmul.msk.bf16.vlgmr.msra.gmra.mxu3 %vm2700_vm14, %v9059_v45  ;;  %9295 = vmatpush.bf16.msra.mxu1 %v9255_v10 }
 0x93e   :  { %9308 = vmatpush.bf16.msra.mxu2 %v9258_v1  ;;  %9321 = vmatpush.bf16.msra.mxu3 %v9261_v12 }
 0x93f   :  { %v8470_v41 = vpop.f32.mrf.mxu2 }
 0x940   :  { %v8541_v51 = vadd.f32 %v8470_v41, %v14888_v24  ;;  %v8483_v11 = vpop.f32.mrf.mxu3  ;;  %v8446_v28 = vpop.f32.mrf.mxu0  ;;  %v9236_v24 = vunpack.c.l.b16 %v9222_v0 }
 0x941   :  { %v8542_v33 = vadd.f32 %v8483_v11, %v14891_v21  ;;  %v8459_v29 = vpop.f32.mrf.mxu1  ;;  %v9238_v21 = vunpack.c.l.b16 %v9223_v16 }
 0x942   :  { %v9244_v37 = vpack.c.b16 %v9236_v24, %v9236_v24 }
 0x947   :  { %v8472_v63 = vpop.f32.mrf.mxu2 }
 0x948   :  { %v8485_v55 = vpop.f32.mrf.mxu3  ;;  %v8496_v54 = vpop.f32.mrf.mxu0 }
 0x949   :  { %v8543_v30 = vadd.f32 %v8496_v54, %v14894_v5  ;;  %v8509_v61 = vpop.f32.mrf.mxu1  ;;  %v9246_v5 = vpack.c.b16 %v9238_v21, %v9238_v21 }
 0x94a   :  { %v8544_v52 = vadd.f32 %v8509_v61, %v14897_v32  ;;  %v9264_v32 = vsel %vm2704_vm8, %v9244_v37, 0 }
 0x94b   :  { %10775 = vmatmul.msk.bf16.vlgmr.msrb.gmra.mxu0 %vm2700_vm14, %v9059_v45  ;;  %10776 = vmatmul.msk.bf16.vlgmr.msrb.gmra.mxu1 %vm2700_vm14, %v9059_v45  ;;  %v9270_v18 = vsel %vm2704_vm8, %v9246_v5, 0 }
 0x94c   :  { %10777 = vmatmul.msk.bf16.vlgmr.msrb.gmra.mxu2 %vm2700_vm14, %v9059_v45  ;;  %9334 = vmatpush.bf16.msrb.mxu0 %v9264_v32 }
 0x94d   :  { %10778 = vmatmul.msk.bf16.vlgmr.msrb.gmra.mxu3 %vm2700_vm14, %v9059_v45  ;;  %9347 = vmatpush.bf16.msrb.mxu1 %v9267_v35 }
 0x94e   :  { %9360 = vmatpush.bf16.msrb.mxu2 %v9270_v18  ;;  %9373 = vmatpush.bf16.msrb.mxu3 %v9273_v40 }
 0x94f   :  { %v8522_v44 = vpop.f32.mrf.mxu2 }
 0x950   :  { %v8545_v23 = vadd.f32 %v8522_v44, %v14908_v38  ;;  %v8535_v39 = vpop.f32.mrf.mxu3  ;;  %v8498_v22 = vpop.f32.mrf.mxu0 }
 0x951   :  { %v8546_v56 = vadd.f32 %v8535_v39, %v14911_v14  ;;  %v8511_v49 = vpop.f32.mrf.mxu1 }
 0x957   :  { %v8524_v6 = vpop.f32.mrf.mxu2 }
 0x958   :  { %v8537_v57 = vpop.f32.mrf.mxu3  ;;  %v8612_v34 = vpop.f32.mrf.mxu0 }
 0x959   :  { %v8707_v3 = vadd.f32 %v8612_v34, %v14914_v2  ;;  %v8625_v8 = vpop.f32.mrf.mxu1  ;;  %v11050_v57 = vld [vmem:[#allocation12 + $0x38] sm:$0xff] }
 0x95a   :  { %v8708_v38 = vadd.f32 %v8625_v8, %v14919_v20  ;;  %v11058_v34 = vld [vmem:[#allocation12 + $0x78] sm:$0xff]  ;;  %v11057_v8 = vld [vmem:[#allocation12 + $0x70] sm:$0xff] }
 0x95b   :  { %10779 = vmatmul.msk.bf16.vlgmr.msra.gmra.mxu0 %vm2700_vm14, %v9227_v26  ;;  %10780 = vmatmul.msk.bf16.vlgmr.msra.gmra.mxu1 %vm2700_vm14, %v9227_v26 }
 0x95c   :  { %10781 = vmatmul.msk.bf16.vlgmr.msra.gmra.mxu2 %vm2700_vm14, %v9227_v26  ;;  %10089 = vmatpush.bf16.msra.mxu0 %v11050_v57  ;;  %v11054_v57 = vld [vmem:[#allocation12 + $0x58] sm:$0xff] }
 0x95d   :  { %10782 = vmatmul.msk.bf16.vlgmr.msra.gmra.mxu3 %vm2700_vm14, %v9227_v26  ;;  %10102 = vmatpush.bf16.msra.mxu1 %v11058_v34 }
 0x95f   :  { %v8638_v53 = vpop.f32.mrf.mxu2 }
 0x960   :  { %v8709_v14 = vadd.f32 %v8638_v53, %v8541_v51  ;;  %v8651_v13 = vpop.f32.mrf.mxu3  ;;  %v8614_v19 = vpop.f32.mrf.mxu0 }
 0x961   :  { %v8710_v31 = vadd.f32 %v8651_v13, %v8542_v33  ;;  %v8627_v43 = vpop.f32.mrf.mxu1  ;;  %10103 = vmatpush.bf16.msra.mxu1 %v11057_v8  ;;  %v11074_v13 = vld [vmem:[#allocation12 + $0xf8] sm:$0xff] }
 0x962   :  { %10128 = vmatpush.bf16.msra.mxu3 %v11074_v13  ;;  %v11053_v13 = vld [vmem:[#allocation12 + $0x50] sm:$0xff] }
 0x967   :  { %v8640_v2 = vpop.f32.mrf.mxu2 }
 0x968   :  { %v8653_v59 = vpop.f32.mrf.mxu3  ;;  %v8664_v45 = vpop.f32.mrf.mxu0 }
 0x969   :  { %v8711_v9 = vadd.f32 %v8664_v45, %v8543_v30  ;;  %v8677_v60 = vpop.f32.mrf.mxu1 }
 0x96a   :  { %v8712_v20 = vadd.f32 %v8677_v60, %v8544_v52 }
 0x96b   :  { %10783 = vmatmul.msk.bf16.vlgmr.msrb.gmra.mxu0 %vm2700_vm14, %v9227_v26  ;;  %10784 = vmatmul.msk.bf16.vlgmr.msrb.gmra.mxu1 %vm2700_vm14, %v9227_v26 }
 0x96c   :  { %10785 = vmatmul.msk.bf16.vlgmr.msrb.gmra.mxu2 %vm2700_vm14, %v9227_v26 }
 0x96d   :  { %10786 = vmatmul.msk.bf16.vlgmr.msrb.gmra.mxu3 %vm2700_vm14, %v9227_v26 }
 0x96f   :  { %v8690_v46 = vpop.f32.mrf.mxu2 }
 0x970   :  { %v8713_v4 = vadd.f32 %v8690_v46, %v8545_v23  ;;  %v8703_v48 = vpop.f32.mrf.mxu3  ;;  %v8666_v42 = vpop.f32.mrf.mxu0 }
 0x971   :  { %v8714_v62 = vadd.f32 %v8703_v48, %v8546_v56  ;;  %v8679_v7 = vpop.f32.mrf.mxu1 }
 0x977   :  { %v8692_v25 = vpop.f32.mrf.mxu2 }
 0x978   :  { %v8705_v58 = vpop.f32.mrf.mxu3  ;;  %v8780_v50 = vpop.f32.mrf.mxu0 }
 0x979   :  { %v14955_v41 = vadd.f32 %v8780_v50, %v8707_v3  ;;  %v8793_v47 = vpop.f32.mrf.mxu1  ;;  %v11049_v3 = vld [vmem:[#allocation12 + $0x30] sm:$0xff]  ;;  %v11048_v58 = vld [vmem:[#allocation12 + $0x28] sm:$0xff] }
 0x97a   :  { %v14957_v10 = vadd.f32 %v8793_v47, %v8708_v38  ;;  %10090 = vmatpush.bf16.msra.mxu0 %v11049_v3  ;;  %v11056_v50 = vld [vmem:[#allocation12 + $0x68] sm:$0xff]  ;;  %v11065_v47 = vld [vmem:[#allocation12 + $0xb0] sm:$0xff] }
 0x97b   :  { %10104 = vmatpush.bf16.msra.mxu1 %v11056_v50 }
 0x97e   :  { %10091 = vmatpush.bf16.msra.mxu0 %v11048_v58 }
 0x97f   :  { %v8806_v1 = vpop.f32.mrf.mxu2 }
 0x980   :  { %v14959_v12 = vadd.f32 %v8806_v1, %v8709_v14  ;;  %v8819_v51 = vpop.f32.mrf.mxu3  ;;  %v8782_v11 = vpop.f32.mrf.mxu0  ;;  %v11066_v14 = vld [vmem:[#allocation12 + $0xb8] sm:$0xff] }
 0x981   :  { %v14961_v28 = vadd.f32 %v8819_v51, %v8710_v31  ;;  %v8795_v33 = vpop.f32.mrf.mxu1  ;;  %10115 = vmatpush.bf16.msra.mxu2 %v11066_v14  ;;  %v11045_v14 = vld [vmem:[#allocation12 + $0x10] sm:$0xff] }
 0x982   :  { %v11073_v33 = vld [vmem:[#allocation12 + $0xf0] sm:$0xff] }
 0x983   :  { %10129 = vmatpush.bf16.msra.mxu3 %v11073_v33 }
 0x985   :  { %10116 = vmatpush.bf16.msra.mxu2 %v11065_v47 }
 0x987   :  { %v8808_v29 = vpop.f32.mrf.mxu2 }
 0x988   :  { %v8821_v63 = vpop.f32.mrf.mxu3  ;;  %v8832_v55 = vpop.f32.mrf.mxu0 }
 0x989   :  { %v14963_v54 = vadd.f32 %v8832_v55, %v8711_v9  ;;  %v8845_v30 = vpop.f32.mrf.mxu1 }
 0x98a   :  { %v14965_v61 = vadd.f32 %v8845_v30, %v8712_v20 }
 0x98f   :  { %v8858_v52 = vpop.f32.mrf.mxu2 }
 0x990   :  { %v14967_v0 = vadd.f32 %v8858_v52, %v8713_v4  ;;  %v8871_v16 = vpop.f32.mrf.mxu3  ;;  %v8834_v24 = vpop.f32.mrf.mxu0  ;;  %v11047_v52 = vld [vmem:[#allocation12 + $0x20] sm:$0xff] }
 0x991   :  { %v14969_v36 = vadd.f32 %v8871_v16, %v8714_v62  ;;  %v8847_v21 = vpop.f32.mrf.mxu1  ;;  %v14994_v62 = vld [vmem:[%s15183_s6] sm:$0xff]  ;;  %10092 = vmatpush.bf16.msra.mxu0 %v11047_v52 }
 0x992   :  { %v9389_v11 = vperm.slane %v14994_v62, 0  ;;  %v9390_v30 = vperm.slane %v14994_v62, 1  ;;  %v11055_v16 = vld [vmem:[#allocation12 + $0x60] sm:$0xff] }
 0x993   :  { %10105 = vmatpush.bf16.msra.mxu1 %v11055_v16  ;;  %v11069_v16 = vld [vmem:[#allocation12 + $0xd0] sm:$0xff] }
 0x997   :  { %v8860_v15 = vpop.f32.mrf.mxu2  ;;  %10106 = vmatpush.bf16.msra.mxu1 %v11054_v57  ;;  %v11068_v57 = vld [vmem:[#allocation12 + $0xc8] sm:$0xff] }
 0x998   :  { %v8873_v37 = vpop.f32.mrf.mxu3  ;;  %v8948_v17 = vpop.f32.mrf.mxu0 }
 0x999   :  { %v8961_v5 = vpop.f32.mrf.mxu1  ;;  %v9043_v7 = vadd.f32 %v8948_v17, %v14955_v41 }
 0x99a   :  { %v9044_v25 = vadd.f32 %v8961_v5, %v14957_v10 }
 0x99b   :  { %10107 = vmatpush.bf16.msra.mxu1 %v11053_v13 }
 0x99f   :  { %v14971_v27 = vpop.f32.mrf.mxu2 }
 0x9a0   :  { %v14973_v44 = vpop.f32.mrf.mxu3  ;;  %v8950_v32 = vpop.f32.mrf.mxu0  ;;  %v9045_v15 = vadd.f32 %v14971_v27, %v14959_v12  ;;  %v9392_v12 = vperm.slane %v14994_v62, 3  ;;  %v11063_v27 = vld [vmem:[#allocation12 + $0xa0] sm:$0xff] }
 0x9a1   :  { %v8963_v35 = vpop.f32.mrf.mxu1  ;;  %v9046_v17 = vadd.f32 %v14973_v44, %v14961_v28  ;;  %v11064_v32 = vld [vmem:[#allocation12 + $0xa8] sm:$0xff] }
 0x9a2   :  { %v11072_v35 = vld [vmem:[#allocation12 + $0xe8] sm:$0xff]  ;;  %10117 = vmatpush.bf16.msra.mxu2 %v11064_v32  ;;  %v11090_v32 = vld [vmem:[#allocation12 + $0x178] sm:$0xff] }
 0x9a3   :  { %10130 = vmatpush.bf16.msra.mxu3 %v11072_v35  ;;  %v11060_v35 = vld [vmem:[#allocation12 + $0x88] sm:$0xff] }
 0x9a6   :  { %10118 = vmatpush.bf16.msra.mxu2 %v11063_v27 }
 0x9a7   :  { %v8976_v18 = vpop.f32.mrf.mxu2 }
 0x9a8   :  { %v8989_v40 = vpop.f32.mrf.mxu3  ;;  %v14975_v23 = vpop.f32.mrf.mxu0  ;;  %v11046_v18 = vld [vmem:[#allocation12 + $0x18] sm:$0xff] }
 0x9a9   :  { %v14977_v39 = vpop.f32.mrf.mxu1  ;;  %10093 = vmatpush.bf16.msra.mxu0 %v11046_v18 }
 0x9ad   :  { %10094 = vmatpush.bf16.msra.mxu0 %v11045_v14  ;;  %v11067_v14 = vld [vmem:[#allocation12 + $0xc0] sm:$0xff] }
 0x9af   :  { %v14979_v22 = vpop.f32.mrf.mxu2 }
 0x9b0   :  { %v14981_v56 = vpop.f32.mrf.mxu3  ;;  %v9002_v49 = vpop.f32.mrf.mxu0 }
 0x9b1   :  { %v9015_v6 = vpop.f32.mrf.mxu1 }
 0x9b2   :  { %v9391_v6 = vperm.slane %v14994_v62, 2 }
 0x9b7   :  { %v9028_v26 = vpop.f32.mrf.mxu2 }
 0x9b8   :  { %v9041_v38 = vpop.f32.mrf.mxu3  ;;  %v9116_v53 = vpop.f32.mrf.mxu0  ;;  %v11071_v26 = vld [vmem:[#allocation12 + $0xe0] sm:$0xff] }
 0x9b9   :  { %v9129_v19 = vpop.f32.mrf.mxu1  ;;  %v9211_v1 = vadd.f32 %v9116_v53, %v9043_v7  ;;  %10131 = vmatpush.bf16.msra.mxu3 %v11071_v26  ;;  %v9048_v7 = vadd.f32 %v14977_v39, %v14965_v61  ;;  %v9394_v61 = vperm.slane %v14994_v62, 5  ;;  %v11044_v39 = vld [vmem:[#allocation12 + $0x8] sm:$0xff] }
 0x9ba   :  { %v9212_v29 = vadd.f32 %v9129_v19, %v9044_v25  ;;  %10095 = vmatpush.bf16.msra.mxu0 %v11044_v39 }
 0x9bf   :  { %v9142_v31 = vpop.f32.mrf.mxu2 }
 0x9c0   :  { %v9155_v43 = vpop.f32.mrf.mxu3  ;;  %v9118_v2 = vpop.f32.mrf.mxu0  ;;  %v9213_v40 = vadd.f32 %v9142_v31, %v9045_v15 }
 0x9c1   :  { %v9131_v59 = vpop.f32.mrf.mxu1  ;;  %v9214_v34 = vadd.f32 %v9155_v43, %v9046_v17 }
 0x9c2   :  { %v11062_v59 = vld [vmem:[#allocation12 + $0x98] sm:$0xff] }
 0x9c3   :  { %10119 = vmatpush.bf16.msra.mxu2 %v11062_v59 }
 0x9c7   :  { %v9144_v45 = vpop.f32.mrf.mxu2 }
 0x9c8   :  { %v9157_v9 = vpop.f32.mrf.mxu3  ;;  %v14983_v60 = vpop.f32.mrf.mxu0  ;;  %v11070_v45 = vld [vmem:[#allocation12 + $0xd8] sm:$0xff] }
 0x9c9   :  { %v14985_v20 = vpop.f32.mrf.mxu1  ;;  %10132 = vmatpush.bf16.msra.mxu3 %v11070_v45 }
 0x9ca   :  { %v9216_v33 = vadd.f32 %v14985_v20, %v9048_v7  ;;  %v11043_v20 = vld [vmem:[#allocation12] sm:$0xff]  ;;  %v11080_v7 = vld [vmem:[#allocation12 + $0x128] sm:$0xff] }
 0x9cb   :  { %10096 = vmatpush.bf16.msra.mxu0 %v11043_v20 }
 0x9cd   :  { %10133 = vmatpush.bf16.msra.mxu3 %v11069_v16 }
 0x9cf   :  { %v14987_v46 = vpop.f32.mrf.mxu2 }
 0x9d0   :  { %v14989_v4 = vpop.f32.mrf.mxu3  ;;  %v9170_v48 = vpop.f32.mrf.mxu0 }
 0x9d1   :  { %v9183_v42 = vpop.f32.mrf.mxu1  ;;  %v9047_v48 = vadd.f32 %v14975_v23, %v14963_v54  ;;  %10134 = vmatpush.bf16.msra.mxu3 %v11068_v57 }
 0x9d3   :  { %v9215_v50 = vadd.f32 %v14983_v60, %v9047_v48 }
 0x9d5   :  { %10135 = vmatpush.bf16.msra.mxu3 %v11067_v14 }
 0x9d7   :  { %v9196_v51 = vpop.f32.mrf.mxu2 }
 0x9d8   :  { %v9209_v63 = vpop.f32.mrf.mxu3  ;;  %v9284_v55 = vpop.f32.mrf.mxu0  ;;  %v9393_v51 = vperm.slane %v14994_v62, 4 }
 0x9d9   :  { %v9379_v41 = vadd.f32 %v9284_v55, %v9211_v1  ;;  %v9297_v24 = vpop.f32.mrf.mxu1  ;;  %v11052_v63 = vld [vmem:[#allocation12 + $0x48] sm:$0xff]  ;;  %v11061_v55 = vld [vmem:[#allocation12 + $0x90] sm:$0xff] }
 0x9da   :  { %v9380_v10 = vadd.f32 %v9297_v24, %v9212_v29  ;;  %10108 = vmatpush.bf16.msra.mxu1 %v11052_v63  ;;  %v11051_v24 = vld [vmem:[#allocation12 + $0x40] sm:$0xff]  ;;  %10120 = vmatpush.bf16.msra.mxu2 %v11061_v55 }
 0x9db   :  { %v9405_v21 = vadd.f32 %v9389_v11, %v9379_v41  ;;  %v11079_v63 = vld [vmem:[#allocation12 + $0x120] sm:$0xff] }
 0x9dc   :  { %v9406_v37 = vadd.f32 %v9390_v30, %v9380_v10 }
 0x9dd   :  { %v9413_v5 = vsub.f32 0.0, %v9405_v21  ;;  %v9049_v21 = vadd.f32 %v14979_v22, %v14967_v0 }
 0x9de   :  { %v9414_v49 = vsub.f32 0.0, %v9406_v37  ;;  %v9050_v37 = vadd.f32 %v14981_v56, %v14969_v36  ;;  %10109 = vmatpush.bf16.msra.mxu1 %v11051_v24  ;;  %10121 = vmatpush.bf16.msra.mxu2 %v11060_v35 }
 0x9df   :  { %v9421_v3 = vmul.f32 1.442695, %v9413_v5  ;;  %v9310_v8 = vpop.f32.mrf.mxu2  ;;  %v11082_v5 = vld [vmem:[#allocation12 + $0x138] sm:$0xff] }
 0x9e0   :  { %v9423_v38 = vmul.f32 1.442695, %v9414_v49  ;;  %v9381_v28 = vadd.f32 %v9310_v8, %v9213_v40  ;;  %v9323_v44 = vpop.f32.mrf.mxu3  ;;  %v9286_v53 = vpop.f32.mrf.mxu0  ;;  %v9217_v40 = vadd.f32 %v14987_v46, %v9049_v21  ;;  %v9218_v22 = vadd.f32 %v14989_v4, %v9050_v37  ;;  %10141 = vmatpush.bf16.msrb.mxu0 %v11082_v5  ;;  %v11081_v46 = vld [vmem:[#allocation12 + $0x130] sm:$0xff] }
 0x9e1   :  { %11163 = vpow2.f32 %v9421_v3  ;;  %v9382_v19 = vadd.f32 %v9323_v44, %v9214_v34  ;;  %v9299_v31 = vpop.f32.mrf.mxu1  ;;  %v9396_v8 = vperm.slane %v14994_v62, 7  ;;  %v11059_v53 = vld [vmem:[#allocation12 + $0x80] sm:$0xff] }
 0x9e2   :  { %11165 = vpow2.f32 %v9423_v38  ;;  %v9407_v43 = vadd.f32 %v9391_v6, %v9381_v28  ;;  %v9395_v6 = vperm.slane %v14994_v62, 6  ;;  %10154 = vmatpush.bf16.msrb.mxu1 %v11090_v32  ;;  %10122 = vmatpush.bf16.msra.mxu2 %v11059_v53  ;;  %v11103_v53 = vld [vmem:[#allocation12 + $0x1e0] sm:$0xff] }
 0x9e3   :  { %v9408_v2 = vadd.f32 %v9392_v12, %v9382_v19  ;;  %v11089_v12 = vld [vmem:[#allocation12 + $0x170] sm:$0xff] }
 0x9e4   :  { %v9415_v9 = vsub.f32 0.0, %v9407_v43  ;;  %v11098_v43 = vld [vmem:[#allocation12 + $0x1b8] sm:$0xff]  ;;  %10142 = vmatpush.bf16.msrb.mxu0 %v11081_v46 }
 0x9e5   :  { %v9416_v42 = vsub.f32 0.0, %v9408_v2  ;;  %v11106_v2 = vld [vmem:[#allocation12 + $0x1f8] sm:$0xff] }
 0x9e6   :  { %v9425_v25 = vmul.f32 1.442695, %v9415_v9  ;;  %10155 = vmatpush.bf16.msrb.mxu1 %v11089_v12  ;;  %10167 = vmatpush.bf16.msrb.mxu2 %v11098_v43  ;;  %v11078_v12 = vld [vmem:[#allocation12 + $0x118] sm:$0xff] }
 0x9e7   :  { %v11164_v58 = vpop.eup %11163  ;;  %v9427_v47 = vmul.f32 1.442695, %v9416_v42  ;;  %v9312_v1 = vpop.f32.mrf.mxu2  ;;  %10180 = vmatpush.bf16.msrb.mxu3 %v11106_v2  ;;  %v11077_v2 = vld [vmem:[#allocation12 + $0x110] sm:$0xff] }
 0x9e8   :  { %v11166_v11 = vpop.eup %11165  ;;  %v15013_v29 = vadd.f32 1.0, %v11164_v58  ;;  %11167 = vpow2.f32 %v9425_v25  ;;  %v9325_v54 = vpop.f32.mrf.mxu3  ;;  %v11088_v25 = vld [vmem:[#allocation12 + $0x168] sm:$0xff]  ;;  %10143 = vmatpush.bf16.msrb.mxu0 %v11080_v7 }
 0x9e9   :  { %v9336_v23 = vpop.f32.mrf.mxu0  ;;  %v15016_v60 = vadd.f32 1.0, %v11166_v11  ;;  %11169 = vpow2.f32 %v9427_v47  ;;  %v9349_v52 = vpop.f32.mrf.mxu1  ;;  %v11097_v11 = vld [vmem:[#allocation12 + $0x1b0] sm:$0xff]  ;;  %v11076_v54 = vld [vmem:[#allocation12 + $0x108] sm:$0xff] }
 0x9ea   :  { %v9383_v30 = vadd.f32 %v9336_v23, %v9215_v50  ;;  %11171 = vrcp.f32 %v15013_v29  ;;  %v9384_v41 = vadd.f32 %v9349_v52, %v9216_v33  ;;  %v9454_v34 = vand.u32 2147483647, %v15013_v29  ;;  %v11105_v33 = vld [vmem:[#allocation12 + $0x1f0] sm:$0xff]  ;;  %10156 = vmatpush.bf16.msrb.mxu1 %v11088_v25  ;;  %10168 = vmatpush.bf16.msrb.mxu2 %v11097_v11 }
 0x9eb   :  { %11173 = vrcp.f32 %v15016_v60  ;;  %vm9450_vm8 = vweird.f32 %v15013_v29  ;;  %vm9465_vm9 = vweird.f32 %v15016_v60  ;;  %v9456_v9 = vand.u32 2147483648, %v15013_v29  ;;  %10181 = vmatpush.bf16.msrb.mxu3 %v11105_v33 }
 0x9ec   :  { %v9409_v10 = vadd.f32 %v9393_v51, %v9383_v30  ;;  %v9410_v15 = vadd.f32 %v9394_v61, %v9384_v41  ;;  %v9471_v58 = vand.u32 2147483648, %v15016_v60  ;;  %vm15049_vm14 = vcmp.eq.f32.partialorder %v9454_v34, 8.507059e+37  ;;  %v11087_v41 = vld [vmem:[#allocation12 + $0x160] sm:$0xff]  ;;  %10144 = vmatpush.bf16.msrb.mxu0 %v11079_v63 }
 0x9ed   :  { %v9469_v23 = vand.u32 2147483647, %v15016_v60  ;;  %v9457_v55 = vor.u32 1.1754944e-38, %v9456_v9 }
 0x9ee   :  { %v9417_v17 = vsub.f32 0.0, %v9409_v10  ;;  %v11168_v18 = vpop.eup %11167  ;;  %v9418_v49 = vsub.f32 0.0, %v9410_v15  ;;  %v9472_v24 = vor.u32 1.1754944e-38, %v9471_v58  ;;  %10157 = vmatpush.bf16.msrb.mxu1 %v11087_v41  ;;  %v11094_v58 = vld [vmem:[#allocation12 + $0x198] sm:$0xff] }
 0x9ef   :  { %v11170_v0 = vpop.eup %11169  ;;  %v15028_v3 = vadd.f32 1.0, %v11168_v18  ;;  %v9362_v56 = vpop.f32.mrf.mxu2  ;;  %vm15073_vm1 = vcmp.eq.f32.partialorder %v9469_v23, 8.507059e+37  ;;  %v11084_v23 = vld [vmem:[#allocation12 + $0x148] sm:$0xff] }
 0x9f0   :  { %v9429_v36 = vmul.f32 1.442695, %v9417_v17  ;;  %v15031_v27 = vpop.eup %11171  ;;  %v15033_v26 = vadd.f32 1.0, %v11170_v0  ;;  %v9431_v38 = vmul.f32 1.442695, %v9418_v49  ;;  %v9385_v28 = vadd.f32 %v9362_v56, %v9217_v40  ;;  %v9375_v44 = vpop.f32.mrf.mxu3  ;;  %v11096_v40 = vld [vmem:[#allocation12 + $0x1a8] sm:$0xff]  ;;  %10145 = vmatpush.bf16.msrb.mxu0 %v11078_v12 }
 0x9f1   :  { %v9338_v4 = vpop.f32.mrf.mxu0  ;;  %v15036_v13 = vpop.eup %11173  ;;  %v9446_v62 = vmul.f32 %v15031_v27, %v15013_v29  ;;  %11175 = vrcp.f32 %v15028_v3  ;;  %v9386_v19 = vadd.f32 %v9375_v44, %v9218_v22  ;;  %vm9451_vm13 = vweird.f32 %v15031_v27  ;;  %v11104_v49 = vld [vmem:[#allocation12 + $0x1e8] sm:$0xff]  ;;  %10169 = vmatpush.bf16.msrb.mxu2 %v11096_v40 }
 0x9f2   :  { %v9351_v31 = vpop.f32.mrf.mxu1  ;;  %v9461_v59 = vmul.f32 %v15036_v13, %v15016_v60  ;;  %11177 = vrcp.f32 %v15033_v26  ;;  %v9411_v45 = vadd.f32 %v9395_v6, %v9385_v28  ;;  %vm9466_vm15 = vweird.f32 %v15036_v13  ;;  %vm15068_vm0 = vmor %vm9450_vm8, %vm9451_vm13  ;;  %10182 = vmatpush.bf16.msrb.mxu3 %v11104_v49  ;;  %v11095_v4 = vld [vmem:[#allocation12 + $0x1a0] sm:$0xff]  ;;  %v11092_v40 = vld [vmem:[#allocation12 + $0x188] sm:$0xff] }
 0x9f3   :  { %v9447_v48 = vsub.f32 1.0, %v9446_v62  ;;  %11179 = vpow2.f32 %v9429_v36  ;;  %v9412_v42 = vadd.f32 %v9396_v8, %v9386_v19  ;;  %v9484_v10 = vand.u32 2147483647, %v15028_v3  ;;  %vm9467_vm2 = vmor %vm9465_vm9, %vm9466_vm15 }
 0x9f4   :  { %v9462_v50 = vsub.f32 1.0, %v9461_v59  ;;  %11181 = vpow2.f32 %v9431_v38  ;;  %v9419_v47 = vsub.f32 0.0, %v9411_v45  ;;  %v9486_v6 = vand.u32 2147483648, %v15028_v3  ;;  %v11085_v59 = vld [vmem:[#allocation12 + $0x150] sm:$0xff]  ;;  %10146 = vmatpush.bf16.msrb.mxu0 %v11077_v2 }
 0x9f5   :  { %v9448_v1 = vmul.f32 %v15031_v27, %v9447_v48  ;;  %v9420_v51 = vsub.f32 0.0, %v9412_v42  ;;  %vm9480_vm5 = vweird.f32 %v15028_v3  ;;  %v9499_v62 = vand.u32 2147483647, %v15033_v26  ;;  %10170 = vmatpush.bf16.msrb.mxu2 %v11095_v4 }
 0x9f6   :  { %v9463_v61 = vmul.f32 %v15036_v13, %v9462_v50  ;;  %v9433_v39 = vmul.f32 1.442695, %v9419_v47  ;;  %v9501_v19 = vand.u32 2147483648, %v15033_v26  ;;  %v9487_v45 = vor.u32 1.1754944e-38, %v9486_v6  ;;  %10183 = vmatpush.bf16.msrb.mxu3 %v11103_v53 }
 0x9f7   :  { %v15056_v30 = vpop.eup %11175  ;;  %v9435_v52 = vmul.f32 1.442695, %v9420_v51  ;;  %v9364_v16 = vpop.f32.mrf.mxu2  ;;  %v9449_v20 = vadd.f32 %v15031_v27, %v9448_v1  ;;  %vm9495_vm7 = vweird.f32 %v15033_v26  ;;  %vm9485_vm10 = vcmp.eq.f32.partialorder %v9484_v10, 8.507059e+37  ;;  %v11102_v1 = vld [vmem:[#allocation12 + $0x1d8] sm:$0xff] }
 0x9f8   :  { %v15060_v21 = vpop.eup %11177  ;;  %v9476_v15 = vmul.f32 %v15056_v30, %v15028_v3  ;;  %11183 = vpow2.f32 %v9433_v39  ;;  %v9377_v37 = vpop.f32.mrf.mxu3  ;;  %v9464_v5 = vadd.f32 %v15036_v13, %v9463_v61  ;;  %vm9481_vm3 = vweird.f32 %v15056_v30  ;;  %v11101_v16 = vld [vmem:[#allocation12 + $0x1d0] sm:$0xff]  ;;  %10147 = vmatpush.bf16.msrb.mxu0 %v11076_v54 }
 0x9f9   :  { %v11180_v35 = vpop.eup %11179  ;;  %v9491_v18 = vmul.f32 %v15060_v21, %v15033_v26  ;;  %11185 = vpow2.f32 %v9435_v52  ;;  %v9453_v29 = vsel %vm15068_vm0, %v15031_v27, %v9449_v20  ;;  %v11086_v27 = vld [vmem:[#allocation12 + $0x158] sm:$0xff]  ;;  %vm9496_vm4 = vweird.f32 %v15060_v21  ;;  %vm9482_vm6 = vmor %vm9480_vm5, %vm9481_vm3  ;;  %10171 = vmatpush.bf16.msrb.mxu2 %v11094_v58 }
 0x9fa   :  { %v11182_v57 = vpop.eup %11181  ;;  %v9477_v34 = vsub.f32 1.0, %v9476_v15  ;;  %v15087_v0 = vadd.f32 1.0, %v11180_v35  ;;  %v9458_v22 = vsel %vm15049_vm14, %v9457_v55, %v9453_v29  ;;  %v9468_v36 = vsel %vm9467_vm2, %v15036_v13, %v9464_v5  ;;  %10158 = vmatpush.bf16.msrb.mxu1 %v11086_v27  ;;  %vm9497_vm11 = vmor %vm9495_vm7, %vm9496_vm4  ;;  %10184 = vmatpush.bf16.msrb.mxu3 %v11102_v1  ;;  %v11083_v15 = vld [vmem:[#allocation12 + $0x140] sm:$0xff] }
 0x9fb   :  { %v9492_v56 = vsub.f32 1.0, %v9491_v18  ;;  %v15092_v8 = vadd.f32 1.0, %v11182_v57  ;;  %v9565_v46 = vpack.c.bf16 %v9458_v22, %v9458_v22  ;;  %v9473_v60 = vsel %vm15073_vm1, %v9472_v24, %v9468_v36 }
 0x9fc   :  { %v9478_v38 = vmul.f32 %v15056_v30, %v9477_v34  ;;  %11187 = vrcp.f32 %v15087_v0  ;;  %v9566_v28 = vpack.c.bf16 %v9473_v60, %v9473_v60  ;;  %v9502_v42 = vor.u32 1.1754944e-38, %v9501_v19  ;;  %v11100_v34 = vld [vmem:[#allocation12 + $0x1c8] sm:$0xff] }
 0x9fd   :  { %v9493_v44 = vmul.f32 %v15060_v21, %v9492_v56  ;;  %11189 = vrcp.f32 %v15092_v8  ;;  %10097 = vmatmul.bf16.vlgmr.msra.gmra.mxu0 %v9565_v46  ;;  %vm9500_vm12 = vcmp.eq.f32.partialorder %v9499_v62, 8.507059e+37  ;;  %v9514_v61 = vand.u32 2147483647, %v15087_v0 }
 0x9fe   :  { %v11184_v14 = vpop.eup %11183  ;;  %10110 = vmatmul.bf16.vlgmr.msra.gmra.mxu1 %v9566_v28  ;;  %v9479_v13 = vadd.f32 %v15056_v30, %v9478_v38  ;;  %v9516_v39 = vand.u32 2147483648, %v15087_v0  ;;  %vm9510_vm8 = vweird.f32 %v15087_v0  ;;  %v9529_v41 = vand.u32 2147483647, %v15092_v8  ;;  %10185 = vmatpush.bf16.msrb.mxu3 %v11101_v16 }
 0x9ff   :  { %v11186_v31 = vpop.eup %11185  ;;  %v15106_v43 = vadd.f32 1.0, %v11184_v14  ;;  %v9494_v9 = vadd.f32 %v15060_v21, %v9493_v44  ;;  %10159 = vmatpush.bf16.msrb.mxu1 %v11085_v59  ;;  %v9531_v20 = vand.u32 2147483648, %v15092_v8  ;;  %vm15135_vm13 = vcmp.eq.f32.partialorder %v9514_v61, 8.507059e+37  ;;  %v11091_v14 = vld [vmem:[#allocation12 + $0x180] sm:$0xff] }
 0xa00   :  { %v15112_v3 = vadd.f32 1.0, %v11186_v31  ;;  %v9483_v48 = vsel %vm9482_vm6, %v15056_v30, %v9479_v13  ;;  %v11093_v30 = vld [vmem:[#allocation12 + $0x190] sm:$0xff]  ;;  %v9517_v17 = vor.u32 1.1754944e-38, %v9516_v39  ;;  %vm9525_vm14 = vweird.f32 %v15092_v8  ;;  %v11099_v13 = vld [vmem:[#allocation12 + $0x1c0] sm:$0xff] }
 0xa01   :  { %11191 = vrcp.f32 %v15106_v43  ;;  %v9488_v7 = vsel %vm9485_vm10, %v9487_v45, %v9483_v48  ;;  %v9498_v25 = vsel %vm9497_vm11, %v15060_v21, %v9494_v9  ;;  %v11075_v21 = vld [vmem:[#allocation12 + $0x100] sm:$0xff]  ;;  %10172 = vmatpush.bf16.msrb.mxu2 %v11093_v30  ;;  %v9544_v29 = vand.u32 2147483647, %v15106_v43 }
 0xa02   :  { %v15119_v50 = vpop.eup %11187  ;;  %11193 = vrcp.f32 %v15112_v3  ;;  %v9567_v26 = vpack.c.bf16 %v9488_v7, %v9488_v7  ;;  %v9503_v47 = vsel %vm9500_vm12, %v9502_v42, %v9498_v25  ;;  %v9546_v6 = vand.u32 2147483648, %v15106_v43  ;;  %10148 = vmatpush.bf16.msrb.mxu0 %v11075_v21  ;;  %10186 = vmatpush.bf16.msrb.mxu3 %v11100_v34 }
 0xa03   :  { %v15122_v51 = vpop.eup %11189  ;;  %v9506_v11 = vmul.f32 %v15119_v50, %v15087_v0  ;;  %v9568_v33 = vpack.c.bf16 %v9503_v47, %v9503_v47  ;;  %10160 = vmatpush.bf16.msrb.mxu1 %v11084_v23  ;;  %vm9511_vm9 = vweird.f32 %v15119_v50  ;;  %vm15152_vm1 = vcmp.eq.f32.partialorder %v9529_v41, 8.507059e+37 }
 0xa04   :  { %v9521_v63 = vmul.f32 %v15122_v51, %v15092_v8  ;;  %10123 = vmatmul.bf16.vlgmr.msra.gmra.mxu2 %v9567_v26  ;;  %vm9526_vm15 = vweird.f32 %v15122_v51  ;;  %vm9512_vm0 = vmor %vm9510_vm8, %vm9511_vm9  ;;  %v9532_v56 = vor.u32 1.1754944e-38, %v9531_v20  ;;  %v9559_v0 = vand.u32 2147483647, %v15112_v3 }
 0xa05   :  { %v9507_v55 = vsub.f32 1.0, %v9506_v11  ;;  %10136 = vmatmul.bf16.vlgmr.msra.gmra.mxu3 %v9568_v33  ;;  %vm9527_vm2 = vmor %vm9525_vm14, %vm9526_vm15  ;;  %v9561_v28 = vand.u32 2147483648, %v15112_v3  ;;  %10173 = vmatpush.bf16.msrb.mxu2 %v11092_v40  ;;  %vm9540_vm5 = vweird.f32 %v15106_v43  ;;  %v9547_v19 = vor.u32 1.1754944e-38, %v9546_v6 }
 0xa06   :  { %v9522_v52 = vsub.f32 1.0, %v9521_v63  ;;  %vm9555_vm7 = vweird.f32 %v15112_v3  ;;  %vm9545_vm10 = vcmp.eq.f32.partialorder %v9544_v29, 8.507059e+37  ;;  %vm9560_vm12 = vcmp.eq.f32.partialorder %v9559_v0, 8.507059e+37  ;;  %10187 = vmatpush.bf16.msrb.mxu3 %v11099_v13 }
 0xa07   :  { %v11192_v24 = vpop.eup %11191  ;;  %v9508_v10 = vmul.f32 %v15119_v50, %v9507_v55  ;;  %10161 = vmatpush.bf16.msrb.mxu1 %v11083_v15  ;;  %v9562_v59 = vor.u32 1.1754944e-38, %v9561_v28 }
 0xa08   :  { %v11194_v5 = vpop.eup %11193  ;;  %v9523_v32 = vmul.f32 %v15122_v51, %v9522_v52  ;;  %v9536_v35 = vmul.f32 %v11192_v24, %v15106_v43  ;;  %vm9541_vm3 = vweird.f32 %v11192_v24 }
 0xa09   :  { %v9551_v18 = vmul.f32 %v11194_v5, %v15112_v3  ;;  %v9509_v49 = vadd.f32 %v15119_v50, %v9508_v10  ;;  %vm9556_vm4 = vweird.f32 %v11194_v5  ;;  %vm9542_vm6 = vmor %vm9540_vm5, %vm9541_vm3  ;;  %10174 = vmatpush.bf16.msrb.mxu2 %v11091_v14  ;;  %v11122_v3 = vld [vmem:[%s15185_s8] ss:$0 sm:$0xff] }
 0xa0a   :  { %v9537_v57 = vsub.f32 1.0, %v9536_v35  ;;  %v9524_v22 = vadd.f32 %v15122_v51, %v9523_v32  ;;  %vm9557_vm11 = vmor %vm9555_vm7, %vm9556_vm4 }
 0xa0b   :  { %v9552_v46 = vsub.f32 1.0, %v9551_v18  ;;  %v9513_v60 = vsel %vm9512_vm0, %v15119_v50, %v9509_v49 }
 0xa0c   :  { %v9538_v12 = vmul.f32 %v11192_v24, %v9537_v57  ;;  %v9518_v27 = vsel %vm15135_vm13, %v9517_v17, %v9513_v60  ;;  %v9528_v38 = vsel %vm9527_vm2, %v15122_v51, %v9524_v22 }
 0xa0d   :  { %v9553_v44 = vmul.f32 %v11194_v5, %v9552_v46  ;;  %v9569_v4 = vpack.c.bf16 %v9518_v27, %v9518_v27  ;;  %v9533_v53 = vsel %vm15152_vm1, %v9532_v56, %v9528_v38 }
 0xa0e   :  { %v9570_v8 = vpack.c.bf16 %v9533_v53, %v9533_v53  ;;  %v9539_v62 = vadd.f32 %v11192_v24, %v9538_v12 }
 0xa0f   :  { %10149 = vmatmul.bf16.vlgmr.msrb.gmra.mxu0 %v9569_v4  ;;  %v9554_v31 = vadd.f32 %v11194_v5, %v9553_v44 }
 0xa10   :  { %10162 = vmatmul.bf16.vlgmr.msrb.gmra.mxu1 %v9570_v8  ;;  %v9543_v2 = vsel %vm9542_vm6, %v11192_v24, %v9539_v62 }
 0xa11   :  { %v9548_v45 = vsel %vm9545_vm10, %v9547_v19, %v9543_v2  ;;  %v9558_v9 = vsel %vm9557_vm11, %v11194_v5, %v9554_v31 }
 0xa12   :  { %v9571_v48 = vpack.c.bf16 %v9548_v45, %v9548_v45  ;;  %v9563_v42 = vsel %vm9560_vm12, %v9562_v59, %v9558_v9 }
 0xa13   :  { %v9572_v43 = vpack.c.bf16 %v9563_v42, %v9563_v42 }
 0xa14   :  { %10175 = vmatmul.bf16.vlgmr.msrb.gmra.mxu2 %v9571_v48 }
 0xa15   :  { %10188 = vmatmul.bf16.vlgmr.msrb.gmra.mxu3 %v9572_v43 }
 0xa7a   :  { %v10098_v7 = vpop.f32.mrf.mxu0 }
 0xa7b   :  { %v10111_v25 = vpop.f32.mrf.mxu1  ;;  %v10099_v26 = vadd.f32 %v11122_v3, %v10098_v7 }
 0xa7d   :  { %v10112_v1 = vadd.f32 %v10111_v25, %v10099_v26 }
 0xa82   :  { %v10100_v58 = vpop.f32.mrf.mxu0 }
 0xa83   :  { %v10113_v50 = vpop.f32.mrf.mxu1 }
 0xa87   :  { %v10124_v47 = vpop.f32.mrf.mxu2 }
 0xa88   :  { %v10137_v51 = vpop.f32.mrf.mxu3  ;;  %v10125_v11 = vadd.f32 %v10124_v47, %v10112_v1 }
 0xa8a   :  { %v10138_v23 = vadd.f32 %v10137_v51, %v10125_v11 }
 0xa8c   :  { %v10150_v33 = vpop.f32.mrf.mxu0 }
 0xa8d   :  { %v10163_v54 = vpop.f32.mrf.mxu1  ;;  %v10151_v63 = vadd.f32 %v10150_v33, %v10138_v23 }
 0xa8f   :  { %v10126_v61 = vpop.f32.mrf.mxu2  ;;  %v10164_v52 = vadd.f32 %v10163_v54, %v10151_v63 }
 0xa90   :  { %v10139_v39 = vpop.f32.mrf.mxu3 }
 0xa94   :  { %v10152_v55 = vpop.f32.mrf.mxu0 }
 0xa95   :  { %v10165_v30 = vpop.f32.mrf.mxu1 }
 0xa97   :  { %v10176_v16 = vpop.f32.mrf.mxu2 }
 0xa98   :  { %v10177_v41 = vadd.f32 %v10176_v16, %v10164_v52  ;;  %v10189_v20 = vpop.f32.mrf.mxu3 }
 0xa9a   :  { %v10190_v24 = vadd.f32 %v10189_v20, %v10177_v41 }
 0xa9c   :  { %10193 = vst [vmem:[#allocation14] sm:$0x3] %v10190_v24 }
 0xa9d   :  { %10204 = dma.vmem_to_hbm [thread:$0]  %s10200_s28, 32, %s10202_s29, [#allocation4]  }
 0xa9f   :  { %v10178_v10 = vpop.f32.mrf.mxu2 }
 0xaa0   :  { %v10191_v21 = vpop.f32.mrf.mxu3 }
 0xaa1   :  { %11342 = dma.done.wait [#allocation4], 32  }
 0xaa2   :  { %11343 = vsyncadd [#allocation4], 4294967264 }
 0xaa3   :  { %10209 = vsyncpa [#allocation3], 1 }
 0xaa4   :  { %10210 = vsyncpa [#allocation13], 1 }
 0xaa5   :  { %10211 = vsyncpa [#allocation4], 1 }
 0xaa6   :  { %10212 = vsyncpa [#allocation5], 1 }
 0xaa7   :  { %10213 = vsyncpa [#allocation7], 1 }
 0xaa8   :  { %10214 = vsyncpa [#allocation10], 1 }

</bundles_post_ra>
